<compile_context>
chip_gen: v7x
topology: tpu7x:2x2x1
jax: 0.10.0
libtpu: 0.0.40
codegen_flags: <defaults>
</compile_context>

<pallas_src>
import functools

import jax
import jax.numpy as jnp
from jax.experimental import pallas as pl
from jax.experimental.pallas import tpu as pltpu


# --------------------------------------------------------------------------------------
# Fused implicit-GEMM convolution kernel (shared by Conv2d and ConvTranspose2d paths)
# --------------------------------------------------------------------------------------
def _stable_sigmoid(x):
    return 0.5 * (jnp.tanh(0.5 * x) + 1.0)


def _conv_kernel(x_ref, w_ref, b_ref, o_ref, *, plan, activation):
    """Implicit-GEMM conv over pre-flattened spatial windows (one batch element per grid step).

    x_ref : (n_in_phase, 1, Lin, Cin)    bf16  flattened (row-major) input phases
    w_ref : (n_taps, Cin, Cout)          bf16  per-tap weight matrices
    b_ref : (1, Cout)                    f32
    o_ref : (n_out_phase, 1, Lout, Cout)       flattened output phases (extra cols sliced off outside)
    plan  : static; per output phase, tuple of (in_phase, flat_shift, tap_idx)
    """
    lout = o_ref.shape[2]
    cout = o_ref.shape[3]
    # Hoist the bias broadcast once (f32 accumulator init = bias; one add per output element total).
    bias_b = jnp.broadcast_to(b_ref[...].astype(jnp.float32), (lout, cout))
    for op_idx, taps in enumerate(plan):
        acc = bias_b
        for (ip, shift, t) in taps:
            win = x_ref[ip, 0, shift:shift + lout, :]          # contiguous (Lout, Cin) slice
            acc = acc + jnp.dot(win, w_ref[t], preferred_element_type=jnp.float32)
        if activation == "relu":
            acc = jnp.maximum(acc, 0.0)
        elif activation == "sigmoid":
            acc = _stable_sigmoid(acc)
        o_ref[op_idx, 0] = acc.astype(o_ref.dtype)


def _phased_conv(x_flat, w_taps, b2, plan, lout, activation, out_dtype):
    p_in, B, lin, cin = x_flat.shape
    n_taps, _, cout = w_taps.shape
    n_out = len(plan)
    kernel = functools.partial(_conv_kernel, plan=plan, activation=activation)
    return pl.pallas_call(
        kernel,
        out_shape=jax.ShapeDtypeStruct((n_out, B, lout, cout), out_dtype),
        grid=(B,),
        in_specs=[
            pl.BlockSpec((p_in, 1, lin, cin), lambda bb: (0, bb, 0, 0)),
            pl.BlockSpec((n_taps, cin, cout), lambda bb: (0, 0, 0)),
            pl.BlockSpec((1, cout), lambda bb: (0, 0)),
        ],
        out_specs=pl.BlockSpec((n_out, 1, lout, cout), lambda bb: (0, bb, 0, 0)),
        compiler_params=pltpu.CompilerParams(dimension_semantics=("parallel",)),
    )(x_flat, w_taps, b2)


# --------------------------------------------------------------------------------------
# Conv2d (NHWC, torch semantics) -- stride handled by input-phase (space-to-depth) split
# --------------------------------------------------------------------------------------
def conv2d_nhwc(x, w, b, *, stride, pad, activation, out_dtype=jnp.bfloat16):
    """x: (B,H,W,Cin) NHWC;  w: (Cout,Cin,kh,kw) torch Conv2d layout;  b: (Cout,)."""
    B, H, W, cin = x.shape
    cout, _, kh, kw = w.shape
    s = stride
    xp = jnp.pad(x, ((0, 0), (pad, pad), (pad, pad), (0, 0)))
    Hp, Wp = H + 2 * pad, W + 2 * pad
    Ho = (Hp - kh) // s + 1
    Wo = (Wp - kw) // s + 1
    Hm = (kh - 1) // s + Ho
    Wm = (kw - 1) // s + Wo

    phases = []
    for pi in range(s):
        for pj in range(s):
            ph = xp[:, pi::s, pj::s, :][:, :Hm, :Wm, :]
            ph = jnp.pad(ph, ((0, 0), (0, Hm - ph.shape[1]), (0, Wm - ph.shape[2]), (0, 0)))
            phases.append(ph)
    x_ph = jnp.stack(phases, axis=0).astype(jnp.bfloat16)          # (s*s, B, Hm, Wm, Cin)
    x_flat = x_ph.reshape(s * s, B, Hm * Wm, cin)
    lout = Ho * Wm

    taps = []
    for di in range(kh):
        for dj in range(kw):
            taps.append(((di % s) * s + (dj % s), (di // s) * Wm + (dj // s), di * kw + dj))
    plan = (tuple(taps),)
    max_shift = max(t[1] for t in taps)
    extra = max(0, lout + max_shift - Hm * Wm)
    if extra:
        x_flat = jnp.pad(x_flat, ((0, 0), (0, 0), (0, extra), (0, 0)))

    w_taps = w.transpose(2, 3, 1, 0).reshape(kh * kw, cin, cout).astype(jnp.bfloat16)
    b2 = b.reshape(1, cout).astype(jnp.float32)
    out = _phased_conv(x_flat, w_taps, b2, plan, lout, activation, out_dtype)  # (1,B,Ho*Wm,Cout)
    return out[0].reshape(B, Ho, Wm, cout)[:, :, :Wo, :]


# --------------------------------------------------------------------------------------
# ConvTranspose2d (NHWC) via sub-pixel / output-phase decomposition (no zero-stuffing)
# --------------------------------------------------------------------------------------
def _tconv_dim(size, k, s, p):
    out = (size - 1) * s - 2 * p + k
    per = []
    for r in range(s):
        q = r + p
        qm, qd = q % s, q // s
        T = -(-(k - qm) // s)                                     # ceil((k - qm)/s)
        per.append((qm, qd, T))
    lpad = max(T - 1 - qd for (qm, qd, T) in per)
    op = -(-out // s)                                             # per-phase output length
    rpad = max(0, max(op + qd for (qm, qd, T) in per) - size)
    taps = []
    for (qm, qd, T) in per:
        base = qd - (T - 1) + lpad
        taps.append(tuple((base + wi, s * (T - 1 - wi) + qm) for wi in range(T)))
    return out, op, lpad, rpad, taps


def conv_transpose2d_nhwc(x, w_t, b, *, stride, pad, activation, out_dtype=jnp.bfloat16):
    """x: (B,H,W,Cin);  w_t: (Cin,Cout,kh,kw) torch ConvTranspose2d layout (output_padding=0)."""
    B, H, W, cin = x.shape
    _, cout, kh, kw = w_t.shape
    s = stride
    Hout, Hop, lpad_h, rpad_h, taps_h = _tconv_dim(H, kh, s, pad)
    Wout, Wop, lpad_w, rpad_w, taps_w = _tconv_dim(W, kw, s, pad)

    xp = jnp.pad(x, ((0, 0), (lpad_h, rpad_h), (lpad_w, rpad_w), (0, 0))).astype(jnp.bfloat16)
    Hp, Wp = xp.shape[1], xp.shape[2]
    x_flat = xp.reshape(B, Hp * Wp, cin)[None]                    # (1, B, Hp*Wp, Cin)
    lout = Hop * Wp

    w_list, plan, tap_of = [], [], {}
    for r in range(s):
        for c in range(s):
            taps = []
            for (offh, uh) in taps_h[r]:
                for (offw, uw) in taps_w[c]:
                    if (uh, uw) not in tap_of:
                        tap_of[(uh, uw)] = len(w_list)
                        w_list.append(w_t[:, :, uh, uw])          # (Cin, Cout)
                    taps.append((0, offh * Wp + offw, tap_of[(uh, uw)]))
            plan.append(tuple(taps))
    plan = tuple(plan)
    w_taps = jnp.stack(w_list, axis=0).astype(jnp.bfloat16)
    max_shift = max(t[1] for ph in plan for t in ph)
    extra = max(0, lout + max_shift - Hp * Wp)
    if extra:
        x_flat = jnp.pad(x_flat, ((0, 0), (0, 0), (0, extra), (0, 0)))

    b2 = b.reshape(1, cout).astype(jnp.float32)
    out = _phased_conv(x_flat, w_taps, b2, plan, lout, activation, out_dtype)  # (s*s,B,Hop*Wp,Cout)
    out = out.reshape(s, s, B, Hop, Wp, cout)[:, :, :, :, :Wop, :]
    out = out.transpose(2, 3, 0, 4, 1, 5).reshape(B, s * Hop, s * Wop, cout)
    return out[:, :Hout, :Wout, :]


# --------------------------------------------------------------------------------------
# Fused latent head: fc_mu + fc_logvar + reparameterize, K-tiled with in-place accumulation
# --------------------------------------------------------------------------------------
def _latent_head_kernel(h_ref, wmu_ref, wlv_ref, bmu_ref, blv_ref, eps_ref,
                        mu_ref, lv_ref, z_ref):
    k = pl.program_id(0)

    @pl.when(k == 0)
    def _init():
        mu_ref[...] = jnp.broadcast_to(bmu_ref[...], mu_ref.shape)
        lv_ref[...] = jnp.broadcast_to(blv_ref[...], lv_ref.shape)

    h = h_ref[...]
    mu_ref[...] += jnp.dot(h, wmu_ref[...], preferred_element_type=jnp.float32)
    lv_ref[...] += jnp.dot(h, wlv_ref[...], preferred_element_type=jnp.float32)

    @pl.when(k == pl.num_programs(0) - 1)
    def _finalize():
        z_ref[...] = mu_ref[...] + eps_ref[...] * jnp.exp(0.5 * lv_ref[...])


def _pick_tile(dim, candidates=(512, 256, 128)):
    for t in candidates:
        if dim >= t and dim % t == 0:
            return t
    return dim


def latent_head(h_flat, w_mu, w_lv, b_mu, b_lv, eps):
    B, K = h_flat.shape
    L = w_mu.shape[1]
    tk = _pick_tile(K)
    nk = K // tk
    out_sds = jax.ShapeDtypeStruct((B, L), jnp.float32)
    mu, logvar, z = pl.pallas_call(
        _latent_head_kernel,
        out_shape=(out_sds, out_sds, out_sds),
        grid=(nk,),
        in_specs=[
            pl.BlockSpec((B, tk), lambda k: (0, k)),
            pl.BlockSpec((tk, L), lambda k: (k, 0)),
            pl.BlockSpec((tk, L), lambda k: (k, 0)),
            pl.BlockSpec((1, L), lambda k: (0, 0)),
            pl.BlockSpec((1, L), lambda k: (0, 0)),
            pl.BlockSpec((B, L), lambda k: (0, 0)),
        ],
        out_specs=(
            pl.BlockSpec((B, L), lambda k: (0, 0)),
            pl.BlockSpec((B, L), lambda k: (0, 0)),
            pl.BlockSpec((B, L), lambda k: (0, 0)),
        ),
        compiler_params=pltpu.CompilerParams(dimension_semantics=("arbitrary",)),
    )(h_flat.astype(jnp.bfloat16), w_mu.astype(jnp.bfloat16), w_lv.astype(jnp.bfloat16),
      b_mu.reshape(1, L).astype(jnp.float32), b_lv.reshape(1, L).astype(jnp.float32),
      eps.astype(jnp.float32))
    return mu, logvar, z


# --------------------------------------------------------------------------------------
# decoder_fc: N-tiled fused matmul + bias
# --------------------------------------------------------------------------------------
def _fc_kernel(x_ref, w_ref, b_ref, o_ref, *, activation):
    y = jnp.dot(x_ref[...], w_ref[...], preferred_element_type=jnp.float32) + b_ref[...]
    if activation == "relu":
        y = jnp.maximum(y, 0.0)
    o_ref[...] = y.astype(o_ref.dtype)


def linear_ntiled(x, w, b, activation="none", out_dtype=jnp.bfloat16):
    """x: (M, K);  w: (K, N);  b: (N,).  K is small (latent), N is tiled ('parallel')."""
    M, K = x.shape
    _, N = w.shape
    tn = _pick_tile(N)
    kernel = functools.partial(_fc_kernel, activation=activation)
    return pl.pallas_call(
        kernel,
        out_shape=jax.ShapeDtypeStruct((M, N), out_dtype),
        grid=(N // tn,),
        in_specs=[
            pl.BlockSpec((M, K), lambda n: (0, 0)),
            pl.BlockSpec((K, tn), lambda n: (0, n)),
            pl.BlockSpec((1, tn), lambda n: (0, n)),
        ],
        out_specs=pl.BlockSpec((M, tn), lambda n: (0, n)),
        compiler_params=pltpu.CompilerParams(dimension_semantics=("parallel",)),
    )(x.astype(jnp.bfloat16), w.astype(jnp.bfloat16), b.reshape(1, N).astype(jnp.float32))


# --------------------------------------------------------------------------------------
# Parameters (torch layouts) + one-time layout preparation
# --------------------------------------------------------------------------------------
def init_params(key, input_channels, image_size, latent_dim):
    conv_out = 128 * (image_size // 4) * (image_size // 4)
    shapes = {
        "enc1_w": (32, input_channels, 3, 3), "enc1_b": (32,),
        "enc2_w": (64, 32, 3, 3),             "enc2_b": (64,),
        "enc3_w": (128, 64, 3, 3),            "enc3_b": (128,),
        "mu_w":   (latent_dim, conv_out),     "mu_b":   (latent_dim,),
        "lv_w":   (latent_dim, conv_out),     "lv_b":   (latent_dim,),
        "dfc_w":  (conv_out, latent_dim),     "dfc_b":  (conv_out,),
        "dec1_w": (128, 64, 4, 4),            "dec1_b": (64,),
        "dec2_w": (64, 32, 4, 4),             "dec2_b": (32,),
        "dec3_w": (32, input_channels, 3, 3), "dec3_b": (input_channels,),
    }
    params = {}
    keys = jax.random.split(key, len(shapes))
    for k_, (name, shp) in zip(keys, shapes.items()):
        params[name] = 0.05 * jax.random.normal(k_, shp, dtype=jnp.float32)
    return params, conv_out


def prepare_params(params, image_size, latent_dim):
    """One-time permutation of the FC weights so NHWC activations can be flattened directly."""
    Hc = Wc = image_size // 4
    L = latent_dim

    def enc_fc(w):  # (L, conv_out) in NCHW order -> (conv_out NHWC order, L), bf16
        return (w.reshape(L, 128, Hc, Wc).transpose(0, 2, 3, 1)
                 .reshape(L, -1).T.astype(jnp.bfloat16))

    prep = dict(params)
    prep["mu_w"] = enc_fc(params["mu_w"])
    prep["lv_w"] = enc_fc(params["lv_w"])
    prep["dfc_w"] = (params["dfc_w"].reshape(128, Hc, Wc, L).transpose(1, 2, 0, 3)
                      .reshape(-1, L).T.astype(jnp.bfloat16))        # (L, conv_out NHWC order)
    prep["dfc_b"] = params["dfc_b"].reshape(128, Hc, Wc).transpose(1, 2, 0).reshape(-1)
    return prep


# --------------------------------------------------------------------------------------
# VAE forward (matches torch VAE.forward: returns x_recon, mu, logvar)
# --------------------------------------------------------------------------------------
def vae_forward(prep, x_nchw, eps, image_size):
    B = x_nchw.shape[0]
    x = x_nchw.transpose(0, 2, 3, 1)                                 # NCHW -> NHWC once

    # encoder (intermediates kept bf16 — they feed MXU matmuls as bf16 anyway)
    h = conv2d_nhwc(x, prep["enc1_w"], prep["enc1_b"], stride=1, pad=1, activation="relu")
    h = conv2d_nhwc(h, prep["enc2_w"], prep["enc2_b"], stride=2, pad=1, activation="relu")
    h = conv2d_nhwc(h, prep["enc3_w"], prep["enc3_b"], stride=2, pad=1, activation="relu")
    h_flat = h.reshape(B, -1)                                        # NHWC flatten (weights permuted)

    # fused fc_mu / fc_logvar / reparameterize (f32 outputs)
    mu, logvar, z = latent_head(h_flat, prep["mu_w"], prep["lv_w"],
                                prep["mu_b"], prep["lv_b"], eps)

    # decoder
    d = linear_ntiled(z, prep["dfc_w"], prep["dfc_b"])
    d = d.reshape(B, image_size // 4, image_size // 4, 128)          # NHWC
    d = conv_transpose2d_nhwc(d, prep["dec1_w"], prep["dec1_b"], stride=2, pad=1, activation="relu")
    d = conv_transpose2d_nhwc(d, prep["dec2_w"], prep["dec2_b"], stride=2, pad=1, activation="relu")
    x_recon = conv_transpose2d_nhwc(d, prep["dec3_w"], prep["dec3_b"], stride=1, pad=1,
                                    activation="sigmoid", out_dtype=jnp.float32)
    return x_recon.transpose(0, 3, 1, 2), mu, logvar                 # back to NCHW at the boundary


if __name__ == "__main__":
    B, C, IMG, LATENT = 2, 4, 16, 8
    key = jax.random.PRNGKey(0)
    k_params, k_x, k_eps = jax.random.split(key, 3)

    params, conv_out = init_params(k_params, C, IMG, LATENT)
    prep = prepare_params(params, IMG, LATENT)

    x = jax.random.normal(k_x, (B, C, IMG, IMG), dtype=jnp.float32)
    eps = jax.random.normal(k_eps, (B, LATENT), dtype=jnp.float32)   # torch.randn_like(std)

    fwd = jax.jit(functools.partial(vae_forward, image_size=IMG))
    x_recon, mu, logvar = fwd(prep, x, eps)
    jax.block_until_ready((x_recon, mu, logvar))

    assert x_recon.shape == (B, C, IMG, IMG)
    assert mu.shape == (B, LATENT) and logvar.shape == (B, LATENT)
    assert bool(jnp.all(jnp.isfinite(x_recon))) and bool(jnp.all(jnp.isfinite(mu)))
    assert bool(jnp.all((x_recon >= 0.0) & (x_recon <= 1.0)))
    print("KERNEL_OK")
</pallas_src>

<mosaic_0001>
module attributes {stable_mosaic.version = 11 : i64} {
  func.func @_conv_kernel(%arg0: i32, %arg1: memref<1x1x326x4xbf16, #tpu.memory_space<vmem>>, %arg2: memref<9x4x32xbf16, #tpu.memory_space<vmem>>, %arg3: memref<1x32xf32, #tpu.memory_space<vmem>>, %arg4: memref<1x1x288x32xbf16, #tpu.memory_space<vmem>>) attributes {dimension_semantics = [#tpu.dimension_semantics<parallel>], iteration_bounds = array<i64: 2>, scalar_prefetch = 0 : i64, scratch_operands = 0 : i64, tpu.core_type = #tpu.core_type<tc>, window_params = [{transform_indices = @transform_0, window_bounds = array<i64: 1, 1, 326, 4>}, {pipeline_mode = #tpu.pipeline_mode<synchronous>, transform_indices = @transform_1, window_bounds = array<i64: 9, 4, 32>}, {pipeline_mode = #tpu.pipeline_mode<synchronous>, transform_indices = @transform_2, window_bounds = array<i64: 1, 32>}, {transform_indices = @transform_3, window_bounds = array<i64: 1, 1, 288, 32>}]} {
    %c0 = arith.constant 0 : index
    %c0_0 = arith.constant 0 : index
    %0 = vector.load %arg3[%c0, %c0_0] : memref<1x32xf32, #tpu.memory_space<vmem>>, vector<1x32xf32>
    %1 = vector.shape_cast %0 : vector<1x32xf32> to vector<1x32xf32>
    %2 = vector.broadcast %1 : vector<1x32xf32> to vector<288x32xf32>
    %c0_1 = arith.constant 0 : index
    %c0_2 = arith.constant 0 : index
    %c0_3 = arith.constant 0 : index
    %c0_4 = arith.constant 0 : index
    %3 = vector.load %arg1[%c0_1, %c0_2, %c0_3, %c0_4] : memref<1x1x326x4xbf16, #tpu.memory_space<vmem>>, vector<1x1x288x4xbf16>
    %4 = vector.shape_cast %3 : vector<1x1x288x4xbf16> to vector<288x4xbf16>
    %c0_5 = arith.constant 0 : index
    %c0_6 = arith.constant 0 : index
    %c0_7 = arith.constant 0 : index
    %5 = vector.load %arg2[%c0_5, %c0_6, %c0_7] : memref<9x4x32xbf16, #tpu.memory_space<vmem>>, vector<1x4x32xbf16>
    %6 = vector.shape_cast %5 : vector<1x4x32xbf16> to vector<4x32xbf16>
    %cst = arith.constant dense<0.000000e+00> : vector<288x32xf32>
    %7 = tpu.matmul %4, %6, %cst {dimension_numbers = #tpu.dot_dimension_numbers<[1], [0], [0], [1], [0, 0, 1, 1], [], []>} : vector<288x4xbf16>, vector<4x32xbf16>, vector<288x32xf32> -> vector<288x32xf32>
    %8 = arith.addf %2, %7 : vector<288x32xf32>
    %c0_8 = arith.constant 0 : index
    %c0_9 = arith.constant 0 : index
    %c1 = arith.constant 1 : index
    %c0_10 = arith.constant 0 : index
    %9 = vector.load %arg1[%c0_8, %c0_9, %c1, %c0_10] : memref<1x1x326x4xbf16, #tpu.memory_space<vmem>>, vector<1x1x288x4xbf16>
    %10 = vector.shape_cast %9 : vector<1x1x288x4xbf16> to vector<288x4xbf16>
    %c1_11 = arith.constant 1 : index
    %c0_12 = arith.constant 0 : index
    %c0_13 = arith.constant 0 : index
    %11 = vector.load %arg2[%c1_11, %c0_12, %c0_13] : memref<9x4x32xbf16, #tpu.memory_space<vmem>>, vector<1x4x32xbf16>
    %12 = vector.shape_cast %11 : vector<1x4x32xbf16> to vector<4x32xbf16>
    %cst_14 = arith.constant dense<0.000000e+00> : vector<288x32xf32>
    %13 = tpu.matmul %10, %12, %cst_14 {dimension_numbers = #tpu.dot_dimension_numbers<[1], [0], [0], [1], [0, 0, 1, 1], [], []>} : vector<288x4xbf16>, vector<4x32xbf16>, vector<288x32xf32> -> vector<288x32xf32>
    %14 = arith.addf %8, %13 : vector<288x32xf32>
    %c0_15 = arith.constant 0 : index
    %c0_16 = arith.constant 0 : index
    %c2 = arith.constant 2 : index
    %c0_17 = arith.constant 0 : index
    %15 = vector.load %arg1[%c0_15, %c0_16, %c2, %c0_17] : memref<1x1x326x4xbf16, #tpu.memory_space<vmem>>, vector<1x1x288x4xbf16>
    %16 = vector.shape_cast %15 : vector<1x1x288x4xbf16> to vector<288x4xbf16>
    %c2_18 = arith.constant 2 : index
    %c0_19 = arith.constant 0 : index
    %c0_20 = arith.constant 0 : index
    %17 = vector.load %arg2[%c2_18, %c0_19, %c0_20] : memref<9x4x32xbf16, #tpu.memory_space<vmem>>, vector<1x4x32xbf16>
    %18 = vector.shape_cast %17 : vector<1x4x32xbf16> to vector<4x32xbf16>
    %cst_21 = arith.constant dense<0.000000e+00> : vector<288x32xf32>
    %19 = tpu.matmul %16, %18, %cst_21 {dimension_numbers = #tpu.dot_dimension_numbers<[1], [0], [0], [1], [0, 0, 1, 1], [], []>} : vector<288x4xbf16>, vector<4x32xbf16>, vector<288x32xf32> -> vector<288x32xf32>
    %20 = arith.addf %14, %19 : vector<288x32xf32>
    %c0_22 = arith.constant 0 : index
    %c0_23 = arith.constant 0 : index
    %c18 = arith.constant 18 : index
    %c0_24 = arith.constant 0 : index
    %21 = vector.load %arg1[%c0_22, %c0_23, %c18, %c0_24] : memref<1x1x326x4xbf16, #tpu.memory_space<vmem>>, vector<1x1x288x4xbf16>
    %22 = vector.shape_cast %21 : vector<1x1x288x4xbf16> to vector<288x4xbf16>
    %c3 = arith.constant 3 : index
    %c0_25 = arith.constant 0 : index
    %c0_26 = arith.constant 0 : index
    %23 = vector.load %arg2[%c3, %c0_25, %c0_26] : memref<9x4x32xbf16, #tpu.memory_space<vmem>>, vector<1x4x32xbf16>
    %24 = vector.shape_cast %23 : vector<1x4x32xbf16> to vector<4x32xbf16>
    %cst_27 = arith.constant dense<0.000000e+00> : vector<288x32xf32>
    %25 = tpu.matmul %22, %24, %cst_27 {dimension_numbers = #tpu.dot_dimension_numbers<[1], [0], [0], [1], [0, 0, 1, 1], [], []>} : vector<288x4xbf16>, vector<4x32xbf16>, vector<288x32xf32> -> vector<288x32xf32>
    %26 = arith.addf %20, %25 : vector<288x32xf32>
    %c0_28 = arith.constant 0 : index
    %c0_29 = arith.constant 0 : index
    %c19 = arith.constant 19 : index
    %c0_30 = arith.constant 0 : index
    %27 = vector.load %arg1[%c0_28, %c0_29, %c19, %c0_30] : memref<1x1x326x4xbf16, #tpu.memory_space<vmem>>, vector<1x1x288x4xbf16>
    %28 = vector.shape_cast %27 : vector<1x1x288x4xbf16> to vector<288x4xbf16>
    %c4 = arith.constant 4 : index
    %c0_31 = arith.constant 0 : index
    %c0_32 = arith.constant 0 : index
    %29 = vector.load %arg2[%c4, %c0_31, %c0_32] : memref<9x4x32xbf16, #tpu.memory_space<vmem>>, vector<1x4x32xbf16>
    %30 = vector.shape_cast %29 : vector<1x4x32xbf16> to vector<4x32xbf16>
    %cst_33 = arith.constant dense<0.000000e+00> : vector<288x32xf32>
    %31 = tpu.matmul %28, %30, %cst_33 {dimension_numbers = #tpu.dot_dimension_numbers<[1], [0], [0], [1], [0, 0, 1, 1], [], []>} : vector<288x4xbf16>, vector<4x32xbf16>, vector<288x32xf32> -> vector<288x32xf32>
    %32 = arith.addf %26, %31 : vector<288x32xf32>
    %c0_34 = arith.constant 0 : index
    %c0_35 = arith.constant 0 : index
    %c20 = arith.constant 20 : index
    %c0_36 = arith.constant 0 : index
    %33 = vector.load %arg1[%c0_34, %c0_35, %c20, %c0_36] : memref<1x1x326x4xbf16, #tpu.memory_space<vmem>>, vector<1x1x288x4xbf16>
    %34 = vector.shape_cast %33 : vector<1x1x288x4xbf16> to vector<288x4xbf16>
    %c5 = arith.constant 5 : index
    %c0_37 = arith.constant 0 : index
    %c0_38 = arith.constant 0 : index
    %35 = vector.load %arg2[%c5, %c0_37, %c0_38] : memref<9x4x32xbf16, #tpu.memory_space<vmem>>, vector<1x4x32xbf16>
    %36 = vector.shape_cast %35 : vector<1x4x32xbf16> to vector<4x32xbf16>
    %cst_39 = arith.constant dense<0.000000e+00> : vector<288x32xf32>
    %37 = tpu.matmul %34, %36, %cst_39 {dimension_numbers = #tpu.dot_dimension_numbers<[1], [0], [0], [1], [0, 0, 1, 1], [], []>} : vector<288x4xbf16>, vector<4x32xbf16>, vector<288x32xf32> -> vector<288x32xf32>
    %38 = arith.addf %32, %37 : vector<288x32xf32>
    %c0_40 = arith.constant 0 : index
    %c0_41 = arith.constant 0 : index
    %c36 = arith.constant 36 : index
    %c0_42 = arith.constant 0 : index
    %39 = vector.load %arg1[%c0_40, %c0_41, %c36, %c0_42] : memref<1x1x326x4xbf16, #tpu.memory_space<vmem>>, vector<1x1x288x4xbf16>
    %40 = vector.shape_cast %39 : vector<1x1x288x4xbf16> to vector<288x4xbf16>
    %c6 = arith.constant 6 : index
    %c0_43 = arith.constant 0 : index
    %c0_44 = arith.constant 0 : index
    %41 = vector.load %arg2[%c6, %c0_43, %c0_44] : memref<9x4x32xbf16, #tpu.memory_space<vmem>>, vector<1x4x32xbf16>
    %42 = vector.shape_cast %41 : vector<1x4x32xbf16> to vector<4x32xbf16>
    %cst_45 = arith.constant dense<0.000000e+00> : vector<288x32xf32>
    %43 = tpu.matmul %40, %42, %cst_45 {dimension_numbers = #tpu.dot_dimension_numbers<[1], [0], [0], [1], [0, 0, 1, 1], [], []>} : vector<288x4xbf16>, vector<4x32xbf16>, vector<288x32xf32> -> vector<288x32xf32>
    %44 = arith.addf %38, %43 : vector<288x32xf32>
    %c0_46 = arith.constant 0 : index
    %c0_47 = arith.constant 0 : index
    %c37 = arith.constant 37 : index
    %c0_48 = arith.constant 0 : index
    %45 = vector.load %arg1[%c0_46, %c0_47, %c37, %c0_48] : memref<1x1x326x4xbf16, #tpu.memory_space<vmem>>, vector<1x1x288x4xbf16>
    %46 = vector.shape_cast %45 : vector<1x1x288x4xbf16> to vector<288x4xbf16>
    %c7 = arith.constant 7 : index
    %c0_49 = arith.constant 0 : index
    %c0_50 = arith.constant 0 : index
    %47 = vector.load %arg2[%c7, %c0_49, %c0_50] : memref<9x4x32xbf16, #tpu.memory_space<vmem>>, vector<1x4x32xbf16>
    %48 = vector.shape_cast %47 : vector<1x4x32xbf16> to vector<4x32xbf16>
    %cst_51 = arith.constant dense<0.000000e+00> : vector<288x32xf32>
    %49 = tpu.matmul %46, %48, %cst_51 {dimension_numbers = #tpu.dot_dimension_numbers<[1], [0], [0], [1], [0, 0, 1, 1], [], []>} : vector<288x4xbf16>, vector<4x32xbf16>, vector<288x32xf32> -> vector<288x32xf32>
    %50 = arith.addf %44, %49 : vector<288x32xf32>
    %c0_52 = arith.constant 0 : index
    %c0_53 = arith.constant 0 : index
    %c38 = arith.constant 38 : index
    %c0_54 = arith.constant 0 : index
    %51 = vector.load %arg1[%c0_52, %c0_53, %c38, %c0_54] : memref<1x1x326x4xbf16, #tpu.memory_space<vmem>>, vector<1x1x288x4xbf16>
    %52 = vector.shape_cast %51 : vector<1x1x288x4xbf16> to vector<288x4xbf16>
    %c8 = arith.constant 8 : index
    %c0_55 = arith.constant 0 : index
    %c0_56 = arith.constant 0 : index
    %53 = vector.load %arg2[%c8, %c0_55, %c0_56] : memref<9x4x32xbf16, #tpu.memory_space<vmem>>, vector<1x4x32xbf16>
    %54 = vector.shape_cast %53 : vector<1x4x32xbf16> to vector<4x32xbf16>
    %cst_57 = arith.constant dense<0.000000e+00> : vector<288x32xf32>
    %55 = tpu.matmul %52, %54, %cst_57 {dimension_numbers = #tpu.dot_dimension_numbers<[1], [0], [0], [1], [0, 0, 1, 1], [], []>} : vector<288x4xbf16>, vector<4x32xbf16>, vector<288x32xf32> -> vector<288x32xf32>
    %56 = arith.addf %50, %55 : vector<288x32xf32>
    %cst_58 = arith.constant 0.000000e+00 : f32
    %57 = vector.broadcast %cst_58 : f32 to vector<288x32xf32>
    %58 = arith.maximumf %56, %57 : vector<288x32xf32>
    %59 = arith.truncf %58 : vector<288x32xf32> to vector<288x32xbf16>
    %c0_59 = arith.constant 0 : index
    %c0_60 = arith.constant 0 : index
    %c0_61 = arith.constant 0 : index
    %c0_62 = arith.constant 0 : index
    %60 = vector.load %arg4[%c0_59, %c0_60, %c0_61, %c0_62] : memref<1x1x288x32xbf16, #tpu.memory_space<vmem>>, vector<1x1x288x32xbf16>
    %61 = vector.shape_cast %60 : vector<1x1x288x32xbf16> to vector<288x32xbf16>
    %62 = vector.shape_cast %59 : vector<288x32xbf16> to vector<1x1x288x32xbf16>
    tpu.vector_store %arg4[%c0_59, %c0_60, %c0_61, %c0_62], %62 {strides = array<i32>} : memref<1x1x288x32xbf16, #tpu.memory_space<vmem>>, vector<1x1x288x32xbf16>,
    return
  }
  func.func @transform_0(%arg0: i32) -> (i32, i32, i32, i32) {
    %c0_i32 = arith.constant 0 : i32
    %c0_i32_0 = arith.constant 0 : i32
    %c0_i32_1 = arith.constant 0 : i32
    %c0_i32_2 = arith.constant 0 : i32
    return %c0_i32, %arg0, %c0_i32_0, %c0_i32_1 : i32, i32, i32, i32
  }
  func.func @transform_1(%arg0: i32) -> (i32, i32, i32) {
    %c0_i32 = arith.constant 0 : i32
    %c0_i32_0 = arith.constant 0 : i32
    %c0_i32_1 = arith.constant 0 : i32
    %c0_i32_2 = arith.constant 0 : i32
    return %c0_i32, %c0_i32_0, %c0_i32_1 : i32, i32, i32
  }
  func.func @transform_2(%arg0: i32) -> (i32, i32) {
    %c0_i32 = arith.constant 0 : i32
    %c0_i32_0 = arith.constant 0 : i32
    %c0_i32_1 = arith.constant 0 : i32
    return %c0_i32, %c0_i32_0 : i32, i32
  }
  func.func @transform_3(%arg0: i32) -> (i32, i32, i32, i32) {
    %c0_i32 = arith.constant 0 : i32
    %c0_i32_0 = arith.constant 0 : i32
    %c0_i32_1 = arith.constant 0 : i32
    %c0_i32_2 = arith.constant 0 : i32
    return %c0_i32, %arg0, %c0_i32_0, %c0_i32_1 : i32, i32, i32, i32
  }
}

module attributes {stable_mosaic.version = 11 : i64} {
  func.func @_conv_kernel(%arg0: i32, %arg1: memref<4x1x82x32xbf16, #tpu.memory_space<vmem>>, %arg2: memref<9x32x64xbf16, #tpu.memory_space<vmem>>, %arg3: memref<1x64xf32, #tpu.memory_space<vmem>>, %arg4: memref<1x1x72x64xbf16, #tpu.memory_space<vmem>>) attributes {dimension_semantics = [#tpu.dimension_semantics<parallel>], iteration_bounds = array<i64: 2>, scalar_prefetch = 0 : i64, scratch_operands = 0 : i64, tpu.core_type = #tpu.core_type<tc>, window_params = [{transform_indices = @transform_0, window_bounds = array<i64: 4, 1, 82, 32>}, {pipeline_mode = #tpu.pipeline_mode<synchronous>, transform_indices = @transform_1, window_bounds = array<i64: 9, 32, 64>}, {pipeline_mode = #tpu.pipeline_mode<synchronous>, transform_indices = @transform_2, window_bounds = array<i64: 1, 64>}, {transform_indices = @transform_3, window_bounds = array<i64: 1, 1, 72, 64>}]} {
    %c0 = arith.constant 0 : index
    %c0_0 = arith.constant 0 : index
    %0 = vector.load %arg3[%c0, %c0_0] : memref<1x64xf32, #tpu.memory_space<vmem>>, vector<1x64xf32>
    %1 = vector.shape_cast %0 : vector<1x64xf32> to vector<1x64xf32>
    %2 = vector.broadcast %1 : vector<1x64xf32> to vector<72x64xf32>
    %c0_1 = arith.constant 0 : index
    %c0_2 = arith.constant 0 : index
    %c0_3 = arith.constant 0 : index
    %c0_4 = arith.constant 0 : index
    %3 = vector.load %arg1[%c0_1, %c0_2, %c0_3, %c0_4] : memref<4x1x82x32xbf16, #tpu.memory_space<vmem>>, vector<1x1x72x32xbf16>
    %4 = vector.shape_cast %3 : vector<1x1x72x32xbf16> to vector<72x32xbf16>
    %c0_5 = arith.constant 0 : index
    %c0_6 = arith.constant 0 : index
    %c0_7 = arith.constant 0 : index
    %5 = vector.load %arg2[%c0_5, %c0_6, %c0_7] : memref<9x32x64xbf16, #tpu.memory_space<vmem>>, vector<1x32x64xbf16>
    %6 = vector.shape_cast %5 : vector<1x32x64xbf16> to vector<32x64xbf16>
    %cst = arith.constant dense<0.000000e+00> : vector<72x64xf32>
    %7 = tpu.matmul %4, %6, %cst {dimension_numbers = #tpu.dot_dimension_numbers<[1], [0], [0], [1], [0, 0, 1, 1], [], []>} : vector<72x32xbf16>, vector<32x64xbf16>, vector<72x64xf32> -> vector<72x64xf32>
    %8 = arith.addf %2, %7 : vector<72x64xf32>
    %c1 = arith.constant 1 : index
    %c0_8 = arith.constant 0 : index
    %c0_9 = arith.constant 0 : index
    %c0_10 = arith.constant 0 : index
    %9 = vector.load %arg1[%c1, %c0_8, %c0_9, %c0_10] : memref<4x1x82x32xbf16, #tpu.memory_space<vmem>>, vector<1x1x72x32xbf16>
    %10 = vector.shape_cast %9 : vector<1x1x72x32xbf16> to vector<72x32xbf16>
    %c1_11 = arith.constant 1 : index
    %c0_12 = arith.constant 0 : index
    %c0_13 = arith.constant 0 : index
    %11 = vector.load %arg2[%c1_11, %c0_12, %c0_13] : memref<9x32x64xbf16, #tpu.memory_space<vmem>>, vector<1x32x64xbf16>
    %12 = vector.shape_cast %11 : vector<1x32x64xbf16> to vector<32x64xbf16>
    %cst_14 = arith.constant dense<0.000000e+00> : vector<72x64xf32>
    %13 = tpu.matmul %10, %12, %cst_14 {dimension_numbers = #tpu.dot_dimension_numbers<[1], [0], [0], [1], [0, 0, 1, 1], [], []>} : vector<72x32xbf16>, vector<32x64xbf16>, vector<72x64xf32> -> vector<72x64xf32>
    %14 = arith.addf %8, %13 : vector<72x64xf32>
    %c0_15 = arith.constant 0 : index
    %c0_16 = arith.constant 0 : index
    %c1_17 = arith.constant 1 : index
    %c0_18 = arith.constant 0 : index
    %15 = vector.load %arg1[%c0_15, %c0_16, %c1_17, %c0_18] : memref<4x1x82x32xbf16, #tpu.memory_space<vmem>>, vector<1x1x72x32xbf16>
    %16 = vector.shape_cast %15 : vector<1x1x72x32xbf16> to vector<72x32xbf16>
    %c2 = arith.constant 2 : index
    %c0_19 = arith.constant 0 : index
    %c0_20 = arith.constant 0 : index
    %17 = vector.load %arg2[%c2, %c0_19, %c0_20] : memref<9x32x64xbf16, #tpu.memory_space<vmem>>, vector<1x32x64xbf16>
    %18 = vector.shape_cast %17 : vector<1x32x64xbf16> to vector<32x64xbf16>
    %cst_21 = arith.constant dense<0.000000e+00> : vector<72x64xf32>
    %19 = tpu.matmul %16, %18, %cst_21 {dimension_numbers = #tpu.dot_dimension_numbers<[1], [0], [0], [1], [0, 0, 1, 1], [], []>} : vector<72x32xbf16>, vector<32x64xbf16>, vector<72x64xf32> -> vector<72x64xf32>
    %20 = arith.addf %14, %19 : vector<72x64xf32>
    %c2_22 = arith.constant 2 : index
    %c0_23 = arith.constant 0 : index
    %c0_24 = arith.constant 0 : index
    %c0_25 = arith.constant 0 : index
    %21 = vector.load %arg1[%c2_22, %c0_23, %c0_24, %c0_25] : memref<4x1x82x32xbf16, #tpu.memory_space<vmem>>, vector<1x1x72x32xbf16>
    %22 = vector.shape_cast %21 : vector<1x1x72x32xbf16> to vector<72x32xbf16>
    %c3 = arith.constant 3 : index
    %c0_26 = arith.constant 0 : index
    %c0_27 = arith.constant 0 : index
    %23 = vector.load %arg2[%c3, %c0_26, %c0_27] : memref<9x32x64xbf16, #tpu.memory_space<vmem>>, vector<1x32x64xbf16>
    %24 = vector.shape_cast %23 : vector<1x32x64xbf16> to vector<32x64xbf16>
    %cst_28 = arith.constant dense<0.000000e+00> : vector<72x64xf32>
    %25 = tpu.matmul %22, %24, %cst_28 {dimension_numbers = #tpu.dot_dimension_numbers<[1], [0], [0], [1], [0, 0, 1, 1], [], []>} : vector<72x32xbf16>, vector<32x64xbf16>, vector<72x64xf32> -> vector<72x64xf32>
    %26 = arith.addf %20, %25 : vector<72x64xf32>
    %c3_29 = arith.constant 3 : index
    %c0_30 = arith.constant 0 : index
    %c0_31 = arith.constant 0 : index
    %c0_32 = arith.constant 0 : index
    %27 = vector.load %arg1[%c3_29, %c0_30, %c0_31, %c0_32] : memref<4x1x82x32xbf16, #tpu.memory_space<vmem>>, vector<1x1x72x32xbf16>
    %28 = vector.shape_cast %27 : vector<1x1x72x32xbf16> to vector<72x32xbf16>
    %c4 = arith.constant 4 : index
    %c0_33 = arith.constant 0 : index
    %c0_34 = arith.constant 0 : index
    %29 = vector.load %arg2[%c4, %c0_33, %c0_34] : memref<9x32x64xbf16, #tpu.memory_space<vmem>>, vector<1x32x64xbf16>
    %30 = vector.shape_cast %29 : vector<1x32x64xbf16> to vector<32x64xbf16>
    %cst_35 = arith.constant dense<0.000000e+00> : vector<72x64xf32>
    %31 = tpu.matmul %28, %30, %cst_35 {dimension_numbers = #tpu.dot_dimension_numbers<[1], [0], [0], [1], [0, 0, 1, 1], [], []>} : vector<72x32xbf16>, vector<32x64xbf16>, vector<72x64xf32> -> vector<72x64xf32>
    %32 = arith.addf %26, %31 : vector<72x64xf32>
    %c2_36 = arith.constant 2 : index
    %c0_37 = arith.constant 0 : index
    %c1_38 = arith.constant 1 : index
    %c0_39 = arith.constant 0 : index
    %33 = vector.load %arg1[%c2_36, %c0_37, %c1_38, %c0_39] : memref<4x1x82x32xbf16, #tpu.memory_space<vmem>>, vector<1x1x72x32xbf16>
    %34 = vector.shape_cast %33 : vector<1x1x72x32xbf16> to vector<72x32xbf16>
    %c5 = arith.constant 5 : index
    %c0_40 = arith.constant 0 : index
    %c0_41 = arith.constant 0 : index
    %35 = vector.load %arg2[%c5, %c0_40, %c0_41] : memref<9x32x64xbf16, #tpu.memory_space<vmem>>, vector<1x32x64xbf16>
    %36 = vector.shape_cast %35 : vector<1x32x64xbf16> to vector<32x64xbf16>
    %cst_42 = arith.constant dense<0.000000e+00> : vector<72x64xf32>
    %37 = tpu.matmul %34, %36, %cst_42 {dimension_numbers = #tpu.dot_dimension_numbers<[1], [0], [0], [1], [0, 0, 1, 1], [], []>} : vector<72x32xbf16>, vector<32x64xbf16>, vector<72x64xf32> -> vector<72x64xf32>
    %38 = arith.addf %32, %37 : vector<72x64xf32>
    %c0_43 = arith.constant 0 : index
    %c0_44 = arith.constant 0 : index
    %c9 = arith.constant 9 : index
    %c0_45 = arith.constant 0 : index
    %39 = vector.load %arg1[%c0_43, %c0_44, %c9, %c0_45] : memref<4x1x82x32xbf16, #tpu.memory_space<vmem>>, vector<1x1x72x32xbf16>
    %40 = vector.shape_cast %39 : vector<1x1x72x32xbf16> to vector<72x32xbf16>
    %c6 = arith.constant 6 : index
    %c0_46 = arith.constant 0 : index
    %c0_47 = arith.constant 0 : index
    %41 = vector.load %arg2[%c6, %c0_46, %c0_47] : memref<9x32x64xbf16, #tpu.memory_space<vmem>>, vector<1x32x64xbf16>
    %42 = vector.shape_cast %41 : vector<1x32x64xbf16> to vector<32x64xbf16>
    %cst_48 = arith.constant dense<0.000000e+00> : vector<72x64xf32>
    %43 = tpu.matmul %40, %42, %cst_48 {dimension_numbers = #tpu.dot_dimension_numbers<[1], [0], [0], [1], [0, 0, 1, 1], [], []>} : vector<72x32xbf16>, vector<32x64xbf16>, vector<72x64xf32> -> vector<72x64xf32>
    %44 = arith.addf %38, %43 : vector<72x64xf32>
    %c1_49 = arith.constant 1 : index
    %c0_50 = arith.constant 0 : index
    %c9_51 = arith.constant 9 : index
    %c0_52 = arith.constant 0 : index
    %45 = vector.load %arg1[%c1_49, %c0_50, %c9_51, %c0_52] : memref<4x1x82x32xbf16, #tpu.memory_space<vmem>>, vector<1x1x72x32xbf16>
    %46 = vector.shape_cast %45 : vector<1x1x72x32xbf16> to vector<72x32xbf16>
    %c7 = arith.constant 7 : index
    %c0_53 = arith.constant 0 : index
    %c0_54 = arith.constant 0 : index
    %47 = vector.load %arg2[%c7, %c0_53, %c0_54] : memref<9x32x64xbf16, #tpu.memory_space<vmem>>, vector<1x32x64xbf16>
    %48 = vector.shape_cast %47 : vector<1x32x64xbf16> to vector<32x64xbf16>
    %cst_55 = arith.constant dense<0.000000e+00> : vector<72x64xf32>
    %49 = tpu.matmul %46, %48, %cst_55 {dimension_numbers = #tpu.dot_dimension_numbers<[1], [0], [0], [1], [0, 0, 1, 1], [], []>} : vector<72x32xbf16>, vector<32x64xbf16>, vector<72x64xf32> -> vector<72x64xf32>
    %50 = arith.addf %44, %49 : vector<72x64xf32>
    %c0_56 = arith.constant 0 : index
    %c0_57 = arith.constant 0 : index
    %c10 = arith.constant 10 : index
    %c0_58 = arith.constant 0 : index
    %51 = vector.load %arg1[%c0_56, %c0_57, %c10, %c0_58] : memref<4x1x82x32xbf16, #tpu.memory_space<vmem>>, vector<1x1x72x32xbf16>
    %52 = vector.shape_cast %51 : vector<1x1x72x32xbf16> to vector<72x32xbf16>
    %c8 = arith.constant 8 : index
    %c0_59 = arith.constant 0 : index
    %c0_60 = arith.constant 0 : index
    %53 = vector.load %arg2[%c8, %c0_59, %c0_60] : memref<9x32x64xbf16, #tpu.memory_space<vmem>>, vector<1x32x64xbf16>
    %54 = vector.shape_cast %53 : vector<1x32x64xbf16> to vector<32x64xbf16>
    %cst_61 = arith.constant dense<0.000000e+00> : vector<72x64xf32>
    %55 = tpu.matmul %52, %54, %cst_61 {dimension_numbers = #tpu.dot_dimension_numbers<[1], [0], [0], [1], [0, 0, 1, 1], [], []>} : vector<72x32xbf16>, vector<32x64xbf16>, vector<72x64xf32> -> vector<72x64xf32>
    %56 = arith.addf %50, %55 : vector<72x64xf32>
    %cst_62 = arith.constant 0.000000e+00 : f32
    %57 = vector.broadcast %cst_62 : f32 to vector<72x64xf32>
    %58 = arith.maximumf %56, %57 : vector<72x64xf32>
    %59 = arith.truncf %58 : vector<72x64xf32> to vector<72x64xbf16>
    %c0_63 = arith.constant 0 : index
    %c0_64 = arith.constant 0 : index
    %c0_65 = arith.constant 0 : index
    %c0_66 = arith.constant 0 : index
    %60 = vector.load %arg4[%c0_63, %c0_64, %c0_65, %c0_66] : memref<1x1x72x64xbf16, #tpu.memory_space<vmem>>, vector<1x1x72x64xbf16>
    %61 = vector.shape_cast %60 : vector<1x1x72x64xbf16> to vector<72x64xbf16>
    %62 = vector.shape_cast %59 : vector<72x64xbf16> to vector<1x1x72x64xbf16>
    tpu.vector_store %arg4[%c0_63, %c0_64, %c0_65, %c0_66], %62 {strides = array<i32>} : memref<1x1x72x64xbf16, #tpu.memory_space<vmem>>, vector<1x1x72x64xbf16>,
    return
  }
  func.func @transform_0(%arg0: i32) -> (i32, i32, i32, i32) {
    %c0_i32 = arith.constant 0 : i32
    %c0_i32_0 = arith.constant 0 : i32
    %c0_i32_1 = arith.constant 0 : i32
    %c0_i32_2 = arith.constant 0 : i32
    return %c0_i32, %arg0, %c0_i32_0, %c0_i32_1 : i32, i32, i32, i32
  }
  func.func @transform_1(%arg0: i32) -> (i32, i32, i32) {
    %c0_i32 = arith.constant 0 : i32
    %c0_i32_0 = arith.constant 0 : i32
    %c0_i32_1 = arith.constant 0 : i32
    %c0_i32_2 = arith.constant 0 : i32
    return %c0_i32, %c0_i32_0, %c0_i32_1 : i32, i32, i32
  }
  func.func @transform_2(%arg0: i32) -> (i32, i32) {
    %c0_i32 = arith.constant 0 : i32
    %c0_i32_0 = arith.constant 0 : i32
    %c0_i32_1 = arith.constant 0 : i32
    return %c0_i32, %c0_i32_0 : i32, i32
  }
  func.func @transform_3(%arg0: i32) -> (i32, i32, i32, i32) {
    %c0_i32 = arith.constant 0 : i32
    %c0_i32_0 = arith.constant 0 : i32
    %c0_i32_1 = arith.constant 0 : i32
    %c0_i32_2 = arith.constant 0 : i32
    return %c0_i32, %arg0, %c0_i32_0, %c0_i32_1 : i32, i32, i32, i32
  }
}

module attributes {stable_mosaic.version = 11 : i64} {
  func.func @_conv_kernel(%arg0: i32, %arg1: memref<4x1x26x64xbf16, #tpu.memory_space<vmem>>, %arg2: memref<9x64x128xbf16, #tpu.memory_space<vmem>>, %arg3: memref<1x128xf32, #tpu.memory_space<vmem>>, %arg4: memref<1x1x20x128xbf16, #tpu.memory_space<vmem>>) attributes {dimension_semantics = [#tpu.dimension_semantics<parallel>], iteration_bounds = array<i64: 2>, scalar_prefetch = 0 : i64, scratch_operands = 0 : i64, tpu.core_type = #tpu.core_type<tc>, window_params = [{transform_indices = @transform_0, window_bounds = array<i64: 4, 1, 26, 64>}, {pipeline_mode = #tpu.pipeline_mode<synchronous>, transform_indices = @transform_1, window_bounds = array<i64: 9, 64, 128>}, {pipeline_mode = #tpu.pipeline_mode<synchronous>, transform_indices = @transform_2, window_bounds = array<i64: 1, 128>}, {transform_indices = @transform_3, window_bounds = array<i64: 1, 1, 20, 128>}]} {
    %c0 = arith.constant 0 : index
    %c0_0 = arith.constant 0 : index
    %0 = vector.load %arg3[%c0, %c0_0] : memref<1x128xf32, #tpu.memory_space<vmem>>, vector<1x128xf32>
    %1 = vector.shape_cast %0 : vector<1x128xf32> to vector<1x128xf32>
    %2 = vector.broadcast %1 : vector<1x128xf32> to vector<20x128xf32>
    %c0_1 = arith.constant 0 : index
    %c0_2 = arith.constant 0 : index
    %c0_3 = arith.constant 0 : index
    %c0_4 = arith.constant 0 : index
    %3 = vector.load %arg1[%c0_1, %c0_2, %c0_3, %c0_4] : memref<4x1x26x64xbf16, #tpu.memory_space<vmem>>, vector<1x1x20x64xbf16>
    %4 = vector.shape_cast %3 : vector<1x1x20x64xbf16> to vector<20x64xbf16>
    %c0_5 = arith.constant 0 : index
    %c0_6 = arith.constant 0 : index
    %c0_7 = arith.constant 0 : index
    %5 = vector.load %arg2[%c0_5, %c0_6, %c0_7] : memref<9x64x128xbf16, #tpu.memory_space<vmem>>, vector<1x64x128xbf16>
    %6 = vector.shape_cast %5 : vector<1x64x128xbf16> to vector<64x128xbf16>
    %cst = arith.constant dense<0.000000e+00> : vector<20x128xf32>
    %7 = tpu.matmul %4, %6, %cst {dimension_numbers = #tpu.dot_dimension_numbers<[1], [0], [0], [1], [0, 0, 1, 1], [], []>} : vector<20x64xbf16>, vector<64x128xbf16>, vector<20x128xf32> -> vector<20x128xf32>
    %8 = arith.addf %2, %7 : vector<20x128xf32>
    %c1 = arith.constant 1 : index
    %c0_8 = arith.constant 0 : index
    %c0_9 = arith.constant 0 : index
    %c0_10 = arith.constant 0 : index
    %9 = vector.load %arg1[%c1, %c0_8, %c0_9, %c0_10] : memref<4x1x26x64xbf16, #tpu.memory_space<vmem>>, vector<1x1x20x64xbf16>
    %10 = vector.shape_cast %9 : vector<1x1x20x64xbf16> to vector<20x64xbf16>
    %c1_11 = arith.constant 1 : index
    %c0_12 = arith.constant 0 : index
    %c0_13 = arith.constant 0 : index
    %11 = vector.load %arg2[%c1_11, %c0_12, %c0_13] : memref<9x64x128xbf16, #tpu.memory_space<vmem>>, vector<1x64x128xbf16>
    %12 = vector.shape_cast %11 : vector<1x64x128xbf16> to vector<64x128xbf16>
    %cst_14 = arith.constant dense<0.000000e+00> : vector<20x128xf32>
    %13 = tpu.matmul %10, %12, %cst_14 {dimension_numbers = #tpu.dot_dimension_numbers<[1], [0], [0], [1], [0, 0, 1, 1], [], []>} : vector<20x64xbf16>, vector<64x128xbf16>, vector<20x128xf32> -> vector<20x128xf32>
    %14 = arith.addf %8, %13 : vector<20x128xf32>
    %c0_15 = arith.constant 0 : index
    %c0_16 = arith.constant 0 : index
    %c1_17 = arith.constant 1 : index
    %c0_18 = arith.constant 0 : index
    %15 = vector.load %arg1[%c0_15, %c0_16, %c1_17, %c0_18] : memref<4x1x26x64xbf16, #tpu.memory_space<vmem>>, vector<1x1x20x64xbf16>
    %16 = vector.shape_cast %15 : vector<1x1x20x64xbf16> to vector<20x64xbf16>
    %c2 = arith.constant 2 : index
    %c0_19 = arith.constant 0 : index
    %c0_20 = arith.constant 0 : index
    %17 = vector.load %arg2[%c2, %c0_19, %c0_20] : memref<9x64x128xbf16, #tpu.memory_space<vmem>>, vector<1x64x128xbf16>
    %18 = vector.shape_cast %17 : vector<1x64x128xbf16> to vector<64x128xbf16>
    %cst_21 = arith.constant dense<0.000000e+00> : vector<20x128xf32>
    %19 = tpu.matmul %16, %18, %cst_21 {dimension_numbers = #tpu.dot_dimension_numbers<[1], [0], [0], [1], [0, 0, 1, 1], [], []>} : vector<20x64xbf16>, vector<64x128xbf16>, vector<20x128xf32> -> vector<20x128xf32>
    %20 = arith.addf %14, %19 : vector<20x128xf32>
    %c2_22 = arith.constant 2 : index
    %c0_23 = arith.constant 0 : index
    %c0_24 = arith.constant 0 : index
    %c0_25 = arith.constant 0 : index
    %21 = vector.load %arg1[%c2_22, %c0_23, %c0_24, %c0_25] : memref<4x1x26x64xbf16, #tpu.memory_space<vmem>>, vector<1x1x20x64xbf16>
    %22 = vector.shape_cast %21 : vector<1x1x20x64xbf16> to vector<20x64xbf16>
    %c3 = arith.constant 3 : index
    %c0_26 = arith.constant 0 : index
    %c0_27 = arith.constant 0 : index
    %23 = vector.load %arg2[%c3, %c0_26, %c0_27] : memref<9x64x128xbf16, #tpu.memory_space<vmem>>, vector<1x64x128xbf16>
    %24 = vector.shape_cast %23 : vector<1x64x128xbf16> to vector<64x128xbf16>
    %cst_28 = arith.constant dense<0.000000e+00> : vector<20x128xf32>
    %25 = tpu.matmul %22, %24, %cst_28 {dimension_numbers = #tpu.dot_dimension_numbers<[1], [0], [0], [1], [0, 0, 1, 1], [], []>} : vector<20x64xbf16>, vector<64x128xbf16>, vector<20x128xf32> -> vector<20x128xf32>
    %26 = arith.addf %20, %25 : vector<20x128xf32>
    %c3_29 = arith.constant 3 : index
    %c0_30 = arith.constant 0 : index
    %c0_31 = arith.constant 0 : index
    %c0_32 = arith.constant 0 : index
    %27 = vector.load %arg1[%c3_29, %c0_30, %c0_31, %c0_32] : memref<4x1x26x64xbf16, #tpu.memory_space<vmem>>, vector<1x1x20x64xbf16>
    %28 = vector.shape_cast %27 : vector<1x1x20x64xbf16> to vector<20x64xbf16>
    %c4 = arith.constant 4 : index
    %c0_33 = arith.constant 0 : index
    %c0_34 = arith.constant 0 : index
    %29 = vector.load %arg2[%c4, %c0_33, %c0_34] : memref<9x64x128xbf16, #tpu.memory_space<vmem>>, vector<1x64x128xbf16>
    %30 = vector.shape_cast %29 : vector<1x64x128xbf16> to vector<64x128xbf16>
    %cst_35 = arith.constant dense<0.000000e+00> : vector<20x128xf32>
    %31 = tpu.matmul %28, %30, %cst_35 {dimension_numbers = #tpu.dot_dimension_numbers<[1], [0], [0], [1], [0, 0, 1, 1], [], []>} : vector<20x64xbf16>, vector<64x128xbf16>, vector<20x128xf32> -> vector<20x128xf32>
    %32 = arith.addf %26, %31 : vector<20x128xf32>
    %c2_36 = arith.constant 2 : index
    %c0_37 = arith.constant 0 : index
    %c1_38 = arith.constant 1 : index
    %c0_39 = arith.constant 0 : index
    %33 = vector.load %arg1[%c2_36, %c0_37, %c1_38, %c0_39] : memref<4x1x26x64xbf16, #tpu.memory_space<vmem>>, vector<1x1x20x64xbf16>
    %34 = vector.shape_cast %33 : vector<1x1x20x64xbf16> to vector<20x64xbf16>
    %c5 = arith.constant 5 : index
    %c0_40 = arith.constant 0 : index
    %c0_41 = arith.constant 0 : index
    %35 = vector.load %arg2[%c5, %c0_40, %c0_41] : memref<9x64x128xbf16, #tpu.memory_space<vmem>>, vector<1x64x128xbf16>
    %36 = vector.shape_cast %35 : vector<1x64x128xbf16> to vector<64x128xbf16>
    %cst_42 = arith.constant dense<0.000000e+00> : vector<20x128xf32>
    %37 = tpu.matmul %34, %36, %cst_42 {dimension_numbers = #tpu.dot_dimension_numbers<[1], [0], [0], [1], [0, 0, 1, 1], [], []>} : vector<20x64xbf16>, vector<64x128xbf16>, vector<20x128xf32> -> vector<20x128xf32>
    %38 = arith.addf %32, %37 : vector<20x128xf32>
    %c0_43 = arith.constant 0 : index
    %c0_44 = arith.constant 0 : index
    %c5_45 = arith.constant 5 : index
    %c0_46 = arith.constant 0 : index
    %39 = vector.load %arg1[%c0_43, %c0_44, %c5_45, %c0_46] : memref<4x1x26x64xbf16, #tpu.memory_space<vmem>>, vector<1x1x20x64xbf16>
    %40 = vector.shape_cast %39 : vector<1x1x20x64xbf16> to vector<20x64xbf16>
    %c6 = arith.constant 6 : index
    %c0_47 = arith.constant 0 : index
    %c0_48 = arith.constant 0 : index
    %41 = vector.load %arg2[%c6, %c0_47, %c0_48] : memref<9x64x128xbf16, #tpu.memory_space<vmem>>, vector<1x64x128xbf16>
    %42 = vector.shape_cast %41 : vector<1x64x128xbf16> to vector<64x128xbf16>
    %cst_49 = arith.constant dense<0.000000e+00> : vector<20x128xf32>
    %43 = tpu.matmul %40, %42, %cst_49 {dimension_numbers = #tpu.dot_dimension_numbers<[1], [0], [0], [1], [0, 0, 1, 1], [], []>} : vector<20x64xbf16>, vector<64x128xbf16>, vector<20x128xf32> -> vector<20x128xf32>
    %44 = arith.addf %38, %43 : vector<20x128xf32>
    %c1_50 = arith.constant 1 : index
    %c0_51 = arith.constant 0 : index
    %c5_52 = arith.constant 5 : index
    %c0_53 = arith.constant 0 : index
    %45 = vector.load %arg1[%c1_50, %c0_51, %c5_52, %c0_53] : memref<4x1x26x64xbf16, #tpu.memory_space<vmem>>, vector<1x1x20x64xbf16>
    %46 = vector.shape_cast %45 : vector<1x1x20x64xbf16> to vector<20x64xbf16>
    %c7 = arith.constant 7 : index
    %c0_54 = arith.constant 0 : index
    %c0_55 = arith.constant 0 : index
    %47 = vector.load %arg2[%c7, %c0_54, %c0_55] : memref<9x64x128xbf16, #tpu.memory_space<vmem>>, vector<1x64x128xbf16>
    %48 = vector.shape_cast %47 : vector<1x64x128xbf16> to vector<64x128xbf16>
    %cst_56 = arith.constant dense<0.000000e+00> : vector<20x128xf32>
    %49 = tpu.matmul %46, %48, %cst_56 {dimension_numbers = #tpu.dot_dimension_numbers<[1], [0], [0], [1], [0, 0, 1, 1], [], []>} : vector<20x64xbf16>, vector<64x128xbf16>, vector<20x128xf32> -> vector<20x128xf32>
    %50 = arith.addf %44, %49 : vector<20x128xf32>
    %c0_57 = arith.constant 0 : index
    %c0_58 = arith.constant 0 : index
    %c6_59 = arith.constant 6 : index
    %c0_60 = arith.constant 0 : index
    %51 = vector.load %arg1[%c0_57, %c0_58, %c6_59, %c0_60] : memref<4x1x26x64xbf16, #tpu.memory_space<vmem>>, vector<1x1x20x64xbf16>
    %52 = vector.shape_cast %51 : vector<1x1x20x64xbf16> to vector<20x64xbf16>
    %c8 = arith.constant 8 : index
    %c0_61 = arith.constant 0 : index
    %c0_62 = arith.constant 0 : index
    %53 = vector.load %arg2[%c8, %c0_61, %c0_62] : memref<9x64x128xbf16, #tpu.memory_space<vmem>>, vector<1x64x128xbf16>
    %54 = vector.shape_cast %53 : vector<1x64x128xbf16> to vector<64x128xbf16>
    %cst_63 = arith.constant dense<0.000000e+00> : vector<20x128xf32>
    %55 = tpu.matmul %52, %54, %cst_63 {dimension_numbers = #tpu.dot_dimension_numbers<[1], [0], [0], [1], [0, 0, 1, 1], [], []>} : vector<20x64xbf16>, vector<64x128xbf16>, vector<20x128xf32> -> vector<20x128xf32>
    %56 = arith.addf %50, %55 : vector<20x128xf32>
    %cst_64 = arith.constant 0.000000e+00 : f32
    %57 = vector.broadcast %cst_64 : f32 to vector<20x128xf32>
    %58 = arith.maximumf %56, %57 : vector<20x128xf32>
    %59 = arith.truncf %58 : vector<20x128xf32> to vector<20x128xbf16>
    %c0_65 = arith.constant 0 : index
    %c0_66 = arith.constant 0 : index
    %c0_67 = arith.constant 0 : index
    %c0_68 = arith.constant 0 : index
    %60 = vector.load %arg4[%c0_65, %c0_66, %c0_67, %c0_68] : memref<1x1x20x128xbf16, #tpu.memory_space<vmem>>, vector<1x1x20x128xbf16>
    %61 = vector.shape_cast %60 : vector<1x1x20x128xbf16> to vector<20x128xbf16>
    %62 = vector.shape_cast %59 : vector<20x128xbf16> to vector<1x1x20x128xbf16>
    tpu.vector_store %arg4[%c0_65, %c0_66, %c0_67, %c0_68], %62 {strides = array<i32>} : memref<1x1x20x128xbf16, #tpu.memory_space<vmem>>, vector<1x1x20x128xbf16>,
    return
  }
  func.func @transform_0(%arg0: i32) -> (i32, i32, i32, i32) {
    %c0_i32 = arith.constant 0 : i32
    %c0_i32_0 = arith.constant 0 : i32
    %c0_i32_1 = arith.constant 0 : i32
    %c0_i32_2 = arith.constant 0 : i32
    return %c0_i32, %arg0, %c0_i32_0, %c0_i32_1 : i32, i32, i32, i32
  }
  func.func @transform_1(%arg0: i32) -> (i32, i32, i32) {
    %c0_i32 = arith.constant 0 : i32
    %c0_i32_0 = arith.constant 0 : i32
    %c0_i32_1 = arith.constant 0 : i32
    %c0_i32_2 = arith.constant 0 : i32
    return %c0_i32, %c0_i32_0, %c0_i32_1 : i32, i32, i32
  }
  func.func @transform_2(%arg0: i32) -> (i32, i32) {
    %c0_i32 = arith.constant 0 : i32
    %c0_i32_0 = arith.constant 0 : i32
    %c0_i32_1 = arith.constant 0 : i32
    return %c0_i32, %c0_i32_0 : i32, i32
  }
  func.func @transform_3(%arg0: i32) -> (i32, i32, i32, i32) {
    %c0_i32 = arith.constant 0 : i32
    %c0_i32_0 = arith.constant 0 : i32
    %c0_i32_1 = arith.constant 0 : i32
    %c0_i32_2 = arith.constant 0 : i32
    return %c0_i32, %arg0, %c0_i32_0, %c0_i32_1 : i32, i32, i32, i32
  }
}

module attributes {stable_mosaic.version = 11 : i64} {
  func.func @_latent_head_kernel(%arg0: i32, %arg1: memref<2x512xbf16, #tpu.memory_space<vmem>>, %arg2: memref<512x8xbf16, #tpu.memory_space<vmem>>, %arg3: memref<512x8xbf16, #tpu.memory_space<vmem>>, %arg4: memref<1x8xf32, #tpu.memory_space<vmem>>, %arg5: memref<1x8xf32, #tpu.memory_space<vmem>>, %arg6: memref<2x8xf32, #tpu.memory_space<vmem>>, %arg7: memref<2x8xf32, #tpu.memory_space<vmem>>, %arg8: memref<2x8xf32, #tpu.memory_space<vmem>>, %arg9: memref<2x8xf32, #tpu.memory_space<vmem>>) attributes {dimension_semantics = [#tpu.dimension_semantics<arbitrary>], iteration_bounds = array<i64: 4>, scalar_prefetch = 0 : i64, scratch_operands = 0 : i64, tpu.core_type = #tpu.core_type<tc>, window_params = [{transform_indices = @transform_0, window_bounds = array<i64: 2, 512>}, {transform_indices = @transform_1, window_bounds = array<i64: 512, 8>}, {transform_indices = @transform_2, window_bounds = array<i64: 512, 8>}, {pipeline_mode = #tpu.pipeline_mode<synchronous>, transform_indices = @transform_3, window_bounds = array<i64: 1, 8>}, {pipeline_mode = #tpu.pipeline_mode<synchronous>, transform_indices = @transform_4, window_bounds = array<i64: 1, 8>}, {pipeline_mode = #tpu.pipeline_mode<synchronous>, transform_indices = @transform_5, window_bounds = array<i64: 2, 8>}, {pipeline_mode = #tpu.pipeline_mode<synchronous>, transform_indices = @transform_6, window_bounds = array<i64: 2, 8>}, {pipeline_mode = #tpu.pipeline_mode<synchronous>, transform_indices = @transform_7, window_bounds = array<i64: 2, 8>}, {pipeline_mode = #tpu.pipeline_mode<synchronous>, transform_indices = @transform_8, window_bounds = array<i64: 2, 8>}]} {
    %c0_i32 = arith.constant 0 : i32
    %0 = arith.cmpi eq, %arg0, %c0_i32 : i32
    %1 = arith.extui %0 : i1 to i32
    %c0_i32_0 = arith.constant 0 : i32
    %2 = arith.cmpi ne, %1, %c0_i32_0 : i32
    scf.if %2 {
      %c0_16 = arith.constant 0 : index
      %c0_17 = arith.constant 0 : index
      %17 = vector.load %arg4[%c0_16, %c0_17] : memref<1x8xf32, #tpu.memory_space<vmem>>, vector<1x8xf32>
      %18 = vector.shape_cast %17 : vector<1x8xf32> to vector<1x8xf32>
      %19 = vector.broadcast %18 : vector<1x8xf32> to vector<2x8xf32>
      %c0_18 = arith.constant 0 : index
      %c0_19 = arith.constant 0 : index
      %20 = vector.load %arg7[%c0_18, %c0_19] : memref<2x8xf32, #tpu.memory_space<vmem>>, vector<2x8xf32>
      tpu.vector_store %arg7[%c0_18, %c0_19], %19 {strides = array<i32>} : memref<2x8xf32, #tpu.memory_space<vmem>>, vector<2x8xf32>,
      %c0_20 = arith.constant 0 : index
      %c0_21 = arith.constant 0 : index
      %21 = vector.load %arg5[%c0_20, %c0_21] : memref<1x8xf32, #tpu.memory_space<vmem>>, vector<1x8xf32>
      %22 = vector.shape_cast %21 : vector<1x8xf32> to vector<1x8xf32>
      %23 = vector.broadcast %22 : vector<1x8xf32> to vector<2x8xf32>
      %c0_22 = arith.constant 0 : index
      %c0_23 = arith.constant 0 : index
      %24 = vector.load %arg8[%c0_22, %c0_23] : memref<2x8xf32, #tpu.memory_space<vmem>>, vector<2x8xf32>
      tpu.vector_store %arg8[%c0_22, %c0_23], %23 {strides = array<i32>} : memref<2x8xf32, #tpu.memory_space<vmem>>, vector<2x8xf32>,
    } else {
    }
    %c0 = arith.constant 0 : index
    %c0_1 = arith.constant 0 : index
    %3 = vector.load %arg1[%c0, %c0_1] : memref<2x512xbf16, #tpu.memory_space<vmem>>, vector<2x512xbf16>
    %c0_2 = arith.constant 0 : index
    %c0_3 = arith.constant 0 : index
    %4 = vector.load %arg7[%c0_2, %c0_3] : memref<2x8xf32, #tpu.memory_space<vmem>>, vector<2x8xf32>
    %c0_4 = arith.constant 0 : index
    %c0_5 = arith.constant 0 : index
    %5 = vector.load %arg2[%c0_4, %c0_5] : memref<512x8xbf16, #tpu.memory_space<vmem>>, vector<512x8xbf16>
    %cst = arith.constant dense<0.000000e+00> : vector<2x8xf32>
    %6 = tpu.matmul %3, %5, %cst {dimension_numbers = #tpu.dot_dimension_numbers<[1], [0], [0], [1], [0, 0, 1, 1], [], []>} : vector<2x512xbf16>, vector<512x8xbf16>, vector<2x8xf32> -> vector<2x8xf32>
    %7 = arith.addf %4, %6 : vector<2x8xf32>
    %c0_6 = arith.constant 0 : index
    %c0_7 = arith.constant 0 : index
    %8 = vector.load %arg7[%c0_6, %c0_7] : memref<2x8xf32, #tpu.memory_space<vmem>>, vector<2x8xf32>
    tpu.vector_store %arg7[%c0_6, %c0_7], %7 {strides = array<i32>} : memref<2x8xf32, #tpu.memory_space<vmem>>, vector<2x8xf32>,
    %c0_8 = arith.constant 0 : index
    %c0_9 = arith.constant 0 : index
    %9 = vector.load %arg8[%c0_8, %c0_9] : memref<2x8xf32, #tpu.memory_space<vmem>>, vector<2x8xf32>
    %c0_10 = arith.constant 0 : index
    %c0_11 = arith.constant 0 : index
    %10 = vector.load %arg3[%c0_10, %c0_11] : memref<512x8xbf16, #tpu.memory_space<vmem>>, vector<512x8xbf16>
    %cst_12 = arith.constant dense<0.000000e+00> : vector<2x8xf32>
    %11 = tpu.matmul %3, %10, %cst_12 {dimension_numbers = #tpu.dot_dimension_numbers<[1], [0], [0], [1], [0, 0, 1, 1], [], []>} : vector<2x512xbf16>, vector<512x8xbf16>, vector<2x8xf32> -> vector<2x8xf32>
    %12 = arith.addf %9, %11 : vector<2x8xf32>
    %c0_13 = arith.constant 0 : index
    %c0_14 = arith.constant 0 : index
    %13 = vector.load %arg8[%c0_13, %c0_14] : memref<2x8xf32, #tpu.memory_space<vmem>>, vector<2x8xf32>
    tpu.vector_store %arg8[%c0_13, %c0_14], %12 {strides = array<i32>} : memref<2x8xf32, #tpu.memory_space<vmem>>, vector<2x8xf32>,
    %c3_i32 = arith.constant 3 : i32
    %14 = arith.cmpi eq, %arg0, %c3_i32 : i32
    %15 = arith.extui %14 : i1 to i32
    %c0_i32_15 = arith.constant 0 : i32
    %16 = arith.cmpi ne, %15, %c0_i32_15 : i32
    scf.if %16 {
      %c0_16 = arith.constant 0 : index
      %c0_17 = arith.constant 0 : index
      %17 = vector.load %arg7[%c0_16, %c0_17] : memref<2x8xf32, #tpu.memory_space<vmem>>, vector<2x8xf32>
      %c0_18 = arith.constant 0 : index
      %c0_19 = arith.constant 0 : index
      %18 = vector.load %arg6[%c0_18, %c0_19] : memref<2x8xf32, #tpu.memory_space<vmem>>, vector<2x8xf32>
      %c0_20 = arith.constant 0 : index
      %c0_21 = arith.constant 0 : index
      %19 = vector.load %arg8[%c0_20, %c0_21] : memref<2x8xf32, #tpu.memory_space<vmem>>, vector<2x8xf32>
      %cst_22 = arith.constant 5.000000e-01 : f32
      %20 = vector.broadcast %cst_22 : f32 to vector<2x8xf32>
      %21 = arith.mulf %20, %19 : vector<2x8xf32>
      %22 = math.exp %21 : vector<2x8xf32>
      %23 = arith.mulf %18, %22 : vector<2x8xf32>
      %24 = arith.addf %17, %23 : vector<2x8xf32>
      %c0_23 = arith.constant 0 : index
      %c0_24 = arith.constant 0 : index
      %25 = vector.load %arg9[%c0_23, %c0_24] : memref<2x8xf32, #tpu.memory_space<vmem>>, vector<2x8xf32>
      tpu.vector_store %arg9[%c0_23, %c0_24], %24 {strides = array<i32>} : memref<2x8xf32, #tpu.memory_space<vmem>>, vector<2x8xf32>,
    } else {
    }
    return
  }
  func.func @transform_0(%arg0: i32) -> (i32, i32) {
    %c0_i32 = arith.constant 0 : i32
    %c0_i32_0 = arith.constant 0 : i32
    return %c0_i32, %arg0 : i32, i32
  }
  func.func @transform_1(%arg0: i32) -> (i32, i32) {
    %c0_i32 = arith.constant 0 : i32
    %c0_i32_0 = arith.constant 0 : i32
    return %arg0, %c0_i32 : i32, i32
  }
  func.func @transform_2(%arg0: i32) -> (i32, i32) {
    %c0_i32 = arith.constant 0 : i32
    %c0_i32_0 = arith.constant 0 : i32
    return %arg0, %c0_i32 : i32, i32
  }
  func.func @transform_3(%arg0: i32) -> (i32, i32) {
    %c0_i32 = arith.constant 0 : i32
    %c0_i32_0 = arith.constant 0 : i32
    %c0_i32_1 = arith.constant 0 : i32
    return %c0_i32, %c0_i32_0 : i32, i32
  }
  func.func @transform_4(%arg0: i32) -> (i32, i32) {
    %c0_i32 = arith.constant 0 : i32
    %c0_i32_0 = arith.constant 0 : i32
    %c0_i32_1 = arith.constant 0 : i32
    return %c0_i32, %c0_i32_0 : i32, i32
  }
  func.func @transform_5(%arg0: i32) -> (i32, i32) {
    %c0_i32 = arith.constant 0 : i32
    %c0_i32_0 = arith.constant 0 : i32
    %c0_i32_1 = arith.constant 0 : i32
    return %c0_i32, %c0_i32_0 : i32, i32
  }
  func.func @transform_6(%arg0: i32) -> (i32, i32) {
    %c0_i32 = arith.constant 0 : i32
    %c0_i32_0 = arith.constant 0 : i32
    %c0_i32_1 = arith.constant 0 : i32
    return %c0_i32, %c0_i32_0 : i32, i32
  }
  func.func @transform_7(%arg0: i32) -> (i32, i32) {
    %c0_i32 = arith.constant 0 : i32
    %c0_i32_0 = arith.constant 0 : i32
    %c0_i32_1 = arith.constant 0 : i32
    return %c0_i32, %c0_i32_0 : i32, i32
  }
  func.func @transform_8(%arg0: i32) -> (i32, i32) {
    %c0_i32 = arith.constant 0 : i32
    %c0_i32_0 = arith.constant 0 : i32
    %c0_i32_1 = arith.constant 0 : i32
    return %c0_i32, %c0_i32_0 : i32, i32
  }
}

module attributes {stable_mosaic.version = 11 : i64} {
  func.func @_fc_kernel(%arg0: i32, %arg1: memref<2x8xbf16, #tpu.memory_space<vmem>>, %arg2: memref<8x512xbf16, #tpu.memory_space<vmem>>, %arg3: memref<1x512xf32, #tpu.memory_space<vmem>>, %arg4: memref<2x512xbf16, #tpu.memory_space<vmem>>) attributes {dimension_semantics = [#tpu.dimension_semantics<parallel>], iteration_bounds = array<i64: 4>, scalar_prefetch = 0 : i64, scratch_operands = 0 : i64, tpu.core_type = #tpu.core_type<tc>, window_params = [{pipeline_mode = #tpu.pipeline_mode<synchronous>, transform_indices = @transform_0, window_bounds = array<i64: 2, 8>}, {transform_indices = @transform_1, window_bounds = array<i64: 8, 512>}, {transform_indices = @transform_2, window_bounds = array<i64: 1, 512>}, {transform_indices = @transform_3, window_bounds = array<i64: 2, 512>}]} {
    %c0 = arith.constant 0 : index
    %c0_0 = arith.constant 0 : index
    %0 = vector.load %arg1[%c0, %c0_0] : memref<2x8xbf16, #tpu.memory_space<vmem>>, vector<2x8xbf16>
    %c0_1 = arith.constant 0 : index
    %c0_2 = arith.constant 0 : index
    %1 = vector.load %arg2[%c0_1, %c0_2] : memref<8x512xbf16, #tpu.memory_space<vmem>>, vector<8x512xbf16>
    %cst = arith.constant dense<0.000000e+00> : vector<2x512xf32>
    %2 = tpu.matmul %0, %1, %cst {dimension_numbers = #tpu.dot_dimension_numbers<[1], [0], [0], [1], [0, 0, 1, 1], [], []>} : vector<2x8xbf16>, vector<8x512xbf16>, vector<2x512xf32> -> vector<2x512xf32>
    %c0_3 = arith.constant 0 : index
    %c0_4 = arith.constant 0 : index
    %3 = vector.load %arg3[%c0_3, %c0_4] : memref<1x512xf32, #tpu.memory_space<vmem>>, vector<1x512xf32>
    %4 = vector.broadcast %3 : vector<1x512xf32> to vector<2x512xf32>
    %5 = arith.addf %2, %4 : vector<2x512xf32>
    %6 = arith.truncf %5 : vector<2x512xf32> to vector<2x512xbf16>
    %c0_5 = arith.constant 0 : index
    %c0_6 = arith.constant 0 : index
    %7 = vector.load %arg4[%c0_5, %c0_6] : memref<2x512xbf16, #tpu.memory_space<vmem>>, vector<2x512xbf16>
    tpu.vector_store %arg4[%c0_5, %c0_6], %6 {strides = array<i32>} : memref<2x512xbf16, #tpu.memory_space<vmem>>, vector<2x512xbf16>,
    return
  }
  func.func @transform_0(%arg0: i32) -> (i32, i32) {
    %c0_i32 = arith.constant 0 : i32
    %c0_i32_0 = arith.constant 0 : i32
    %c0_i32_1 = arith.constant 0 : i32
    return %c0_i32, %c0_i32_0 : i32, i32
  }
  func.func @transform_1(%arg0: i32) -> (i32, i32) {
    %c0_i32 = arith.constant 0 : i32
    %c0_i32_0 = arith.constant 0 : i32
    return %c0_i32, %arg0 : i32, i32
  }
  func.func @transform_2(%arg0: i32) -> (i32, i32) {
    %c0_i32 = arith.constant 0 : i32
    %c0_i32_0 = arith.constant 0 : i32
    return %c0_i32, %arg0 : i32, i32
  }
  func.func @transform_3(%arg0: i32) -> (i32, i32) {
    %c0_i32 = arith.constant 0 : i32
    %c0_i32_0 = arith.constant 0 : i32
    return %c0_i32, %arg0 : i32, i32
  }
}

module attributes {stable_mosaic.version = 11 : i64} {
  func.func @_conv_kernel(%arg0: i32, %arg1: memref<1x1x38x128xbf16, #tpu.memory_space<vmem>>, %arg2: memref<16x128x64xbf16, #tpu.memory_space<vmem>>, %arg3: memref<1x64xf32, #tpu.memory_space<vmem>>, %arg4: memref<4x1x24x64xbf16, #tpu.memory_space<vmem>>) attributes {dimension_semantics = [#tpu.dimension_semantics<parallel>], iteration_bounds = array<i64: 2>, scalar_prefetch = 0 : i64, scratch_operands = 0 : i64, tpu.core_type = #tpu.core_type<tc>, window_params = [{transform_indices = @transform_0, window_bounds = array<i64: 1, 1, 38, 128>}, {pipeline_mode = #tpu.pipeline_mode<synchronous>, transform_indices = @transform_1, window_bounds = array<i64: 16, 128, 64>}, {pipeline_mode = #tpu.pipeline_mode<synchronous>, transform_indices = @transform_2, window_bounds = array<i64: 1, 64>}, {transform_indices = @transform_3, window_bounds = array<i64: 4, 1, 24, 64>}]} {
    %c0 = arith.constant 0 : index
    %c0_0 = arith.constant 0 : index
    %0 = vector.load %arg3[%c0, %c0_0] : memref<1x64xf32, #tpu.memory_space<vmem>>, vector<1x64xf32>
    %1 = vector.shape_cast %0 : vector<1x64xf32> to vector<1x64xf32>
    %2 = vector.broadcast %1 : vector<1x64xf32> to vector<24x64xf32>
    %c0_1 = arith.constant 0 : index
    %c0_2 = arith.constant 0 : index
    %c0_3 = arith.constant 0 : index
    %c0_4 = arith.constant 0 : index
    %3 = vector.load %arg1[%c0_1, %c0_2, %c0_3, %c0_4] : memref<1x1x38x128xbf16, #tpu.memory_space<vmem>>, vector<1x1x24x128xbf16>
    %4 = vector.shape_cast %3 : vector<1x1x24x128xbf16> to vector<24x128xbf16>
    %c0_5 = arith.constant 0 : index
    %c0_6 = arith.constant 0 : index
    %c0_7 = arith.constant 0 : index
    %5 = vector.load %arg2[%c0_5, %c0_6, %c0_7] : memref<16x128x64xbf16, #tpu.memory_space<vmem>>, vector<1x128x64xbf16>
    %6 = vector.shape_cast %5 : vector<1x128x64xbf16> to vector<128x64xbf16>
    %cst = arith.constant dense<0.000000e+00> : vector<24x64xf32>
    %7 = tpu.matmul %4, %6, %cst {dimension_numbers = #tpu.dot_dimension_numbers<[1], [0], [0], [1], [0, 0, 1, 1], [], []>} : vector<24x128xbf16>, vector<128x64xbf16>, vector<24x64xf32> -> vector<24x64xf32>
    %8 = arith.addf %2, %7 : vector<24x64xf32>
    %c0_8 = arith.constant 0 : index
    %c0_9 = arith.constant 0 : index
    %c1 = arith.constant 1 : index
    %c0_10 = arith.constant 0 : index
    %9 = vector.load %arg1[%c0_8, %c0_9, %c1, %c0_10] : memref<1x1x38x128xbf16, #tpu.memory_space<vmem>>, vector<1x1x24x128xbf16>
    %10 = vector.shape_cast %9 : vector<1x1x24x128xbf16> to vector<24x128xbf16>
    %c1_11 = arith.constant 1 : index
    %c0_12 = arith.constant 0 : index
    %c0_13 = arith.constant 0 : index
    %11 = vector.load %arg2[%c1_11, %c0_12, %c0_13] : memref<16x128x64xbf16, #tpu.memory_space<vmem>>, vector<1x128x64xbf16>
    %12 = vector.shape_cast %11 : vector<1x128x64xbf16> to vector<128x64xbf16>
    %cst_14 = arith.constant dense<0.000000e+00> : vector<24x64xf32>
    %13 = tpu.matmul %10, %12, %cst_14 {dimension_numbers = #tpu.dot_dimension_numbers<[1], [0], [0], [1], [0, 0, 1, 1], [], []>} : vector<24x128xbf16>, vector<128x64xbf16>, vector<24x64xf32> -> vector<24x64xf32>
    %14 = arith.addf %8, %13 : vector<24x64xf32>
    %c0_15 = arith.constant 0 : index
    %c0_16 = arith.constant 0 : index
    %c6 = arith.constant 6 : index
    %c0_17 = arith.constant 0 : index
    %15 = vector.load %arg1[%c0_15, %c0_16, %c6, %c0_17] : memref<1x1x38x128xbf16, #tpu.memory_space<vmem>>, vector<1x1x24x128xbf16>
    %16 = vector.shape_cast %15 : vector<1x1x24x128xbf16> to vector<24x128xbf16>
    %c2 = arith.constant 2 : index
    %c0_18 = arith.constant 0 : index
    %c0_19 = arith.constant 0 : index
    %17 = vector.load %arg2[%c2, %c0_18, %c0_19] : memref<16x128x64xbf16, #tpu.memory_space<vmem>>, vector<1x128x64xbf16>
    %18 = vector.shape_cast %17 : vector<1x128x64xbf16> to vector<128x64xbf16>
    %cst_20 = arith.constant dense<0.000000e+00> : vector<24x64xf32>
    %19 = tpu.matmul %16, %18, %cst_20 {dimension_numbers = #tpu.dot_dimension_numbers<[1], [0], [0], [1], [0, 0, 1, 1], [], []>} : vector<24x128xbf16>, vector<128x64xbf16>, vector<24x64xf32> -> vector<24x64xf32>
    %20 = arith.addf %14, %19 : vector<24x64xf32>
    %c0_21 = arith.constant 0 : index
    %c0_22 = arith.constant 0 : index
    %c7 = arith.constant 7 : index
    %c0_23 = arith.constant 0 : index
    %21 = vector.load %arg1[%c0_21, %c0_22, %c7, %c0_23] : memref<1x1x38x128xbf16, #tpu.memory_space<vmem>>, vector<1x1x24x128xbf16>
    %22 = vector.shape_cast %21 : vector<1x1x24x128xbf16> to vector<24x128xbf16>
    %c3 = arith.constant 3 : index
    %c0_24 = arith.constant 0 : index
    %c0_25 = arith.constant 0 : index
    %23 = vector.load %arg2[%c3, %c0_24, %c0_25] : memref<16x128x64xbf16, #tpu.memory_space<vmem>>, vector<1x128x64xbf16>
    %24 = vector.shape_cast %23 : vector<1x128x64xbf16> to vector<128x64xbf16>
    %cst_26 = arith.constant dense<0.000000e+00> : vector<24x64xf32>
    %25 = tpu.matmul %22, %24, %cst_26 {dimension_numbers = #tpu.dot_dimension_numbers<[1], [0], [0], [1], [0, 0, 1, 1], [], []>} : vector<24x128xbf16>, vector<128x64xbf16>, vector<24x64xf32> -> vector<24x64xf32>
    %26 = arith.addf %20, %25 : vector<24x64xf32>
    %cst_27 = arith.constant 0.000000e+00 : f32
    %27 = vector.broadcast %cst_27 : f32 to vector<24x64xf32>
    %28 = arith.maximumf %26, %27 : vector<24x64xf32>
    %29 = arith.truncf %28 : vector<24x64xf32> to vector<24x64xbf16>
    %c0_28 = arith.constant 0 : index
    %c0_29 = arith.constant 0 : index
    %c0_30 = arith.constant 0 : index
    %c0_31 = arith.constant 0 : index
    %30 = vector.load %arg4[%c0_28, %c0_29, %c0_30, %c0_31] : memref<4x1x24x64xbf16, #tpu.memory_space<vmem>>, vector<1x1x24x64xbf16>
    %31 = vector.shape_cast %30 : vector<1x1x24x64xbf16> to vector<24x64xbf16>
    %32 = vector.shape_cast %29 : vector<24x64xbf16> to vector<1x1x24x64xbf16>
    tpu.vector_store %arg4[%c0_28, %c0_29, %c0_30, %c0_31], %32 {strides = array<i32>} : memref<4x1x24x64xbf16, #tpu.memory_space<vmem>>, vector<1x1x24x64xbf16>,
    %c0_32 = arith.constant 0 : index
    %c0_33 = arith.constant 0 : index
    %c1_34 = arith.constant 1 : index
    %c0_35 = arith.constant 0 : index
    %33 = vector.load %arg1[%c0_32, %c0_33, %c1_34, %c0_35] : memref<1x1x38x128xbf16, #tpu.memory_space<vmem>>, vector<1x1x24x128xbf16>
    %34 = vector.shape_cast %33 : vector<1x1x24x128xbf16> to vector<24x128xbf16>
    %c4 = arith.constant 4 : index
    %c0_36 = arith.constant 0 : index
    %c0_37 = arith.constant 0 : index
    %35 = vector.load %arg2[%c4, %c0_36, %c0_37] : memref<16x128x64xbf16, #tpu.memory_space<vmem>>, vector<1x128x64xbf16>
    %36 = vector.shape_cast %35 : vector<1x128x64xbf16> to vector<128x64xbf16>
    %cst_38 = arith.constant dense<0.000000e+00> : vector<24x64xf32>
    %37 = tpu.matmul %34, %36, %cst_38 {dimension_numbers = #tpu.dot_dimension_numbers<[1], [0], [0], [1], [0, 0, 1, 1], [], []>} : vector<24x128xbf16>, vector<128x64xbf16>, vector<24x64xf32> -> vector<24x64xf32>
    %38 = arith.addf %2, %37 : vector<24x64xf32>
    %c0_39 = arith.constant 0 : index
    %c0_40 = arith.constant 0 : index
    %c2_41 = arith.constant 2 : index
    %c0_42 = arith.constant 0 : index
    %39 = vector.load %arg1[%c0_39, %c0_40, %c2_41, %c0_42] : memref<1x1x38x128xbf16, #tpu.memory_space<vmem>>, vector<1x1x24x128xbf16>
    %40 = vector.shape_cast %39 : vector<1x1x24x128xbf16> to vector<24x128xbf16>
    %c5 = arith.constant 5 : index
    %c0_43 = arith.constant 0 : index
    %c0_44 = arith.constant 0 : index
    %41 = vector.load %arg2[%c5, %c0_43, %c0_44] : memref<16x128x64xbf16, #tpu.memory_space<vmem>>, vector<1x128x64xbf16>
    %42 = vector.shape_cast %41 : vector<1x128x64xbf16> to vector<128x64xbf16>
    %cst_45 = arith.constant dense<0.000000e+00> : vector<24x64xf32>
    %43 = tpu.matmul %40, %42, %cst_45 {dimension_numbers = #tpu.dot_dimension_numbers<[1], [0], [0], [1], [0, 0, 1, 1], [], []>} : vector<24x128xbf16>, vector<128x64xbf16>, vector<24x64xf32> -> vector<24x64xf32>
    %44 = arith.addf %38, %43 : vector<24x64xf32>
    %c0_46 = arith.constant 0 : index
    %c0_47 = arith.constant 0 : index
    %c7_48 = arith.constant 7 : index
    %c0_49 = arith.constant 0 : index
    %45 = vector.load %arg1[%c0_46, %c0_47, %c7_48, %c0_49] : memref<1x1x38x128xbf16, #tpu.memory_space<vmem>>, vector<1x1x24x128xbf16>
    %46 = vector.shape_cast %45 : vector<1x1x24x128xbf16> to vector<24x128xbf16>
    %c6_50 = arith.constant 6 : index
    %c0_51 = arith.constant 0 : index
    %c0_52 = arith.constant 0 : index
    %47 = vector.load %arg2[%c6_50, %c0_51, %c0_52] : memref<16x128x64xbf16, #tpu.memory_space<vmem>>, vector<1x128x64xbf16>
    %48 = vector.shape_cast %47 : vector<1x128x64xbf16> to vector<128x64xbf16>
    %cst_53 = arith.constant dense<0.000000e+00> : vector<24x64xf32>
    %49 = tpu.matmul %46, %48, %cst_53 {dimension_numbers = #tpu.dot_dimension_numbers<[1], [0], [0], [1], [0, 0, 1, 1], [], []>} : vector<24x128xbf16>, vector<128x64xbf16>, vector<24x64xf32> -> vector<24x64xf32>
    %50 = arith.addf %44, %49 : vector<24x64xf32>
    %c0_54 = arith.constant 0 : index
    %c0_55 = arith.constant 0 : index
    %c8 = arith.constant 8 : index
    %c0_56 = arith.constant 0 : index
    %51 = vector.load %arg1[%c0_54, %c0_55, %c8, %c0_56] : memref<1x1x38x128xbf16, #tpu.memory_space<vmem>>, vector<1x1x24x128xbf16>
    %52 = vector.shape_cast %51 : vector<1x1x24x128xbf16> to vector<24x128xbf16>
    %c7_57 = arith.constant 7 : index
    %c0_58 = arith.constant 0 : index
    %c0_59 = arith.constant 0 : index
    %53 = vector.load %arg2[%c7_57, %c0_58, %c0_59] : memref<16x128x64xbf16, #tpu.memory_space<vmem>>, vector<1x128x64xbf16>
    %54 = vector.shape_cast %53 : vector<1x128x64xbf16> to vector<128x64xbf16>
    %cst_60 = arith.constant dense<0.000000e+00> : vector<24x64xf32>
    %55 = tpu.matmul %52, %54, %cst_60 {dimension_numbers = #tpu.dot_dimension_numbers<[1], [0], [0], [1], [0, 0, 1, 1], [], []>} : vector<24x128xbf16>, vector<128x64xbf16>, vector<24x64xf32> -> vector<24x64xf32>
    %56 = arith.addf %50, %55 : vector<24x64xf32>
    %cst_61 = arith.constant 0.000000e+00 : f32
    %57 = vector.broadcast %cst_61 : f32 to vector<24x64xf32>
    %58 = arith.maximumf %56, %57 : vector<24x64xf32>
    %59 = arith.truncf %58 : vector<24x64xf32> to vector<24x64xbf16>
    %c1_62 = arith.constant 1 : index
    %c0_63 = arith.constant 0 : index
    %c0_64 = arith.constant 0 : index
    %c0_65 = arith.constant 0 : index
    %60 = vector.load %arg4[%c1_62, %c0_63, %c0_64, %c0_65] : memref<4x1x24x64xbf16, #tpu.memory_space<vmem>>, vector<1x1x24x64xbf16>
    %61 = vector.shape_cast %60 : vector<1x1x24x64xbf16> to vector<24x64xbf16>
    %62 = vector.shape_cast %59 : vector<24x64xbf16> to vector<1x1x24x64xbf16>
    tpu.vector_store %arg4[%c1_62, %c0_63, %c0_64, %c0_65], %62 {strides = array<i32>} : memref<4x1x24x64xbf16, #tpu.memory_space<vmem>>, vector<1x1x24x64xbf16>,
    %c0_66 = arith.constant 0 : index
    %c0_67 = arith.constant 0 : index
    %c6_68 = arith.constant 6 : index
    %c0_69 = arith.constant 0 : index
    %63 = vector.load %arg1[%c0_66, %c0_67, %c6_68, %c0_69] : memref<1x1x38x128xbf16, #tpu.memory_space<vmem>>, vector<1x1x24x128xbf16>
    %64 = vector.shape_cast %63 : vector<1x1x24x128xbf16> to vector<24x128xbf16>
    %c8_70 = arith.constant 8 : index
    %c0_71 = arith.constant 0 : index
    %c0_72 = arith.constant 0 : index
    %65 = vector.load %arg2[%c8_70, %c0_71, %c0_72] : memref<16x128x64xbf16, #tpu.memory_space<vmem>>, vector<1x128x64xbf16>
    %66 = vector.shape_cast %65 : vector<1x128x64xbf16> to vector<128x64xbf16>
    %cst_73 = arith.constant dense<0.000000e+00> : vector<24x64xf32>
    %67 = tpu.matmul %64, %66, %cst_73 {dimension_numbers = #tpu.dot_dimension_numbers<[1], [0], [0], [1], [0, 0, 1, 1], [], []>} : vector<24x128xbf16>, vector<128x64xbf16>, vector<24x64xf32> -> vector<24x64xf32>
    %68 = arith.addf %2, %67 : vector<24x64xf32>
    %c0_74 = arith.constant 0 : index
    %c0_75 = arith.constant 0 : index
    %c7_76 = arith.constant 7 : index
    %c0_77 = arith.constant 0 : index
    %69 = vector.load %arg1[%c0_74, %c0_75, %c7_76, %c0_77] : memref<1x1x38x128xbf16, #tpu.memory_space<vmem>>, vector<1x1x24x128xbf16>
    %70 = vector.shape_cast %69 : vector<1x1x24x128xbf16> to vector<24x128xbf16>
    %c9 = arith.constant 9 : index
    %c0_78 = arith.constant 0 : index
    %c0_79 = arith.constant 0 : index
    %71 = vector.load %arg2[%c9, %c0_78, %c0_79] : memref<16x128x64xbf16, #tpu.memory_space<vmem>>, vector<1x128x64xbf16>
    %72 = vector.shape_cast %71 : vector<1x128x64xbf16> to vector<128x64xbf16>
    %cst_80 = arith.constant dense<0.000000e+00> : vector<24x64xf32>
    %73 = tpu.matmul %70, %72, %cst_80 {dimension_numbers = #tpu.dot_dimension_numbers<[1], [0], [0], [1], [0, 0, 1, 1], [], []>} : vector<24x128xbf16>, vector<128x64xbf16>, vector<24x64xf32> -> vector<24x64xf32>
    %74 = arith.addf %68, %73 : vector<24x64xf32>
    %c0_81 = arith.constant 0 : index
    %c0_82 = arith.constant 0 : index
    %c12 = arith.constant 12 : index
    %c0_83 = arith.constant 0 : index
    %75 = vector.load %arg1[%c0_81, %c0_82, %c12, %c0_83] : memref<1x1x38x128xbf16, #tpu.memory_space<vmem>>, vector<1x1x24x128xbf16>
    %76 = vector.shape_cast %75 : vector<1x1x24x128xbf16> to vector<24x128xbf16>
    %c10 = arith.constant 10 : index
    %c0_84 = arith.constant 0 : index
    %c0_85 = arith.constant 0 : index
    %77 = vector.load %arg2[%c10, %c0_84, %c0_85] : memref<16x128x64xbf16, #tpu.memory_space<vmem>>, vector<1x128x64xbf16>
    %78 = vector.shape_cast %77 : vector<1x128x64xbf16> to vector<128x64xbf16>
    %cst_86 = arith.constant dense<0.000000e+00> : vector<24x64xf32>
    %79 = tpu.matmul %76, %78, %cst_86 {dimension_numbers = #tpu.dot_dimension_numbers<[1], [0], [0], [1], [0, 0, 1, 1], [], []>} : vector<24x128xbf16>, vector<128x64xbf16>, vector<24x64xf32> -> vector<24x64xf32>
    %80 = arith.addf %74, %79 : vector<24x64xf32>
    %c0_87 = arith.constant 0 : index
    %c0_88 = arith.constant 0 : index
    %c13 = arith.constant 13 : index
    %c0_89 = arith.constant 0 : index
    %81 = vector.load %arg1[%c0_87, %c0_88, %c13, %c0_89] : memref<1x1x38x128xbf16, #tpu.memory_space<vmem>>, vector<1x1x24x128xbf16>
    %82 = vector.shape_cast %81 : vector<1x1x24x128xbf16> to vector<24x128xbf16>
    %c11 = arith.constant 11 : index
    %c0_90 = arith.constant 0 : index
    %c0_91 = arith.constant 0 : index
    %83 = vector.load %arg2[%c11, %c0_90, %c0_91] : memref<16x128x64xbf16, #tpu.memory_space<vmem>>, vector<1x128x64xbf16>
    %84 = vector.shape_cast %83 : vector<1x128x64xbf16> to vector<128x64xbf16>
    %cst_92 = arith.constant dense<0.000000e+00> : vector<24x64xf32>
    %85 = tpu.matmul %82, %84, %cst_92 {dimension_numbers = #tpu.dot_dimension_numbers<[1], [0], [0], [1], [0, 0, 1, 1], [], []>} : vector<24x128xbf16>, vector<128x64xbf16>, vector<24x64xf32> -> vector<24x64xf32>
    %86 = arith.addf %80, %85 : vector<24x64xf32>
    %cst_93 = arith.constant 0.000000e+00 : f32
    %87 = vector.broadcast %cst_93 : f32 to vector<24x64xf32>
    %88 = arith.maximumf %86, %87 : vector<24x64xf32>
    %89 = arith.truncf %88 : vector<24x64xf32> to vector<24x64xbf16>
    %c2_94 = arith.constant 2 : index
    %c0_95 = arith.constant 0 : index
    %c0_96 = arith.constant 0 : index
    %c0_97 = arith.constant 0 : index
    %90 = vector.load %arg4[%c2_94, %c0_95, %c0_96, %c0_97] : memref<4x1x24x64xbf16, #tpu.memory_space<vmem>>, vector<1x1x24x64xbf16>
    %91 = vector.shape_cast %90 : vector<1x1x24x64xbf16> to vector<24x64xbf16>
    %92 = vector.shape_cast %89 : vector<24x64xbf16> to vector<1x1x24x64xbf16>
    tpu.vector_store %arg4[%c2_94, %c0_95, %c0_96, %c0_97], %92 {strides = array<i32>} : memref<4x1x24x64xbf16, #tpu.memory_space<vmem>>, vector<1x1x24x64xbf16>,
    %c0_98 = arith.constant 0 : index
    %c0_99 = arith.constant 0 : index
    %c7_100 = arith.constant 7 : index
    %c0_101 = arith.constant 0 : index
    %93 = vector.load %arg1[%c0_98, %c0_99, %c7_100, %c0_101] : memref<1x1x38x128xbf16, #tpu.memory_space<vmem>>, vector<1x1x24x128xbf16>
    %94 = vector.shape_cast %93 : vector<1x1x24x128xbf16> to vector<24x128xbf16>
    %c12_102 = arith.constant 12 : index
    %c0_103 = arith.constant 0 : index
    %c0_104 = arith.constant 0 : index
    %95 = vector.load %arg2[%c12_102, %c0_103, %c0_104] : memref<16x128x64xbf16, #tpu.memory_space<vmem>>, vector<1x128x64xbf16>
    %96 = vector.shape_cast %95 : vector<1x128x64xbf16> to vector<128x64xbf16>
    %cst_105 = arith.constant dense<0.000000e+00> : vector<24x64xf32>
    %97 = tpu.matmul %94, %96, %cst_105 {dimension_numbers = #tpu.dot_dimension_numbers<[1], [0], [0], [1], [0, 0, 1, 1], [], []>} : vector<24x128xbf16>, vector<128x64xbf16>, vector<24x64xf32> -> vector<24x64xf32>
    %98 = arith.addf %2, %97 : vector<24x64xf32>
    %c0_106 = arith.constant 0 : index
    %c0_107 = arith.constant 0 : index
    %c8_108 = arith.constant 8 : index
    %c0_109 = arith.constant 0 : index
    %99 = vector.load %arg1[%c0_106, %c0_107, %c8_108, %c0_109] : memref<1x1x38x128xbf16, #tpu.memory_space<vmem>>, vector<1x1x24x128xbf16>
    %100 = vector.shape_cast %99 : vector<1x1x24x128xbf16> to vector<24x128xbf16>
    %c13_110 = arith.constant 13 : index
    %c0_111 = arith.constant 0 : index
    %c0_112 = arith.constant 0 : index
    %101 = vector.load %arg2[%c13_110, %c0_111, %c0_112] : memref<16x128x64xbf16, #tpu.memory_space<vmem>>, vector<1x128x64xbf16>
    %102 = vector.shape_cast %101 : vector<1x128x64xbf16> to vector<128x64xbf16>
    %cst_113 = arith.constant dense<0.000000e+00> : vector<24x64xf32>
    %103 = tpu.matmul %100, %102, %cst_113 {dimension_numbers = #tpu.dot_dimension_numbers<[1], [0], [0], [1], [0, 0, 1, 1], [], []>} : vector<24x128xbf16>, vector<128x64xbf16>, vector<24x64xf32> -> vector<24x64xf32>
    %104 = arith.addf %98, %103 : vector<24x64xf32>
    %c0_114 = arith.constant 0 : index
    %c0_115 = arith.constant 0 : index
    %c13_116 = arith.constant 13 : index
    %c0_117 = arith.constant 0 : index
    %105 = vector.load %arg1[%c0_114, %c0_115, %c13_116, %c0_117] : memref<1x1x38x128xbf16, #tpu.memory_space<vmem>>, vector<1x1x24x128xbf16>
    %106 = vector.shape_cast %105 : vector<1x1x24x128xbf16> to vector<24x128xbf16>
    %c14 = arith.constant 14 : index
    %c0_118 = arith.constant 0 : index
    %c0_119 = arith.constant 0 : index
    %107 = vector.load %arg2[%c14, %c0_118, %c0_119] : memref<16x128x64xbf16, #tpu.memory_space<vmem>>, vector<1x128x64xbf16>
    %108 = vector.shape_cast %107 : vector<1x128x64xbf16> to vector<128x64xbf16>
    %cst_120 = arith.constant dense<0.000000e+00> : vector<24x64xf32>
    %109 = tpu.matmul %106, %108, %cst_120 {dimension_numbers = #tpu.dot_dimension_numbers<[1], [0], [0], [1], [0, 0, 1, 1], [], []>} : vector<24x128xbf16>, vector<128x64xbf16>, vector<24x64xf32> -> vector<24x64xf32>
    %110 = arith.addf %104, %109 : vector<24x64xf32>
    %c0_121 = arith.constant 0 : index
    %c0_122 = arith.constant 0 : index
    %c14_123 = arith.constant 14 : index
    %c0_124 = arith.constant 0 : index
    %111 = vector.load %arg1[%c0_121, %c0_122, %c14_123, %c0_124] : memref<1x1x38x128xbf16, #tpu.memory_space<vmem>>, vector<1x1x24x128xbf16>
    %112 = vector.shape_cast %111 : vector<1x1x24x128xbf16> to vector<24x128xbf16>
    %c15 = arith.constant 15 : index
    %c0_125 = arith.constant 0 : index
    %c0_126 = arith.constant 0 : index
    %113 = vector.load %arg2[%c15, %c0_125, %c0_126] : memref<16x128x64xbf16, #tpu.memory_space<vmem>>, vector<1x128x64xbf16>
    %114 = vector.shape_cast %113 : vector<1x128x64xbf16> to vector<128x64xbf16>
    %cst_127 = arith.constant dense<0.000000e+00> : vector<24x64xf32>
    %115 = tpu.matmul %112, %114, %cst_127 {dimension_numbers = #tpu.dot_dimension_numbers<[1], [0], [0], [1], [0, 0, 1, 1], [], []>} : vector<24x128xbf16>, vector<128x64xbf16>, vector<24x64xf32> -> vector<24x64xf32>
    %116 = arith.addf %110, %115 : vector<24x64xf32>
    %cst_128 = arith.constant 0.000000e+00 : f32
    %117 = vector.broadcast %cst_128 : f32 to vector<24x64xf32>
    %118 = arith.maximumf %116, %117 : vector<24x64xf32>
    %119 = arith.truncf %118 : vector<24x64xf32> to vector<24x64xbf16>
    %c3_129 = arith.constant 3 : index
    %c0_130 = arith.constant 0 : index
    %c0_131 = arith.constant 0 : index
    %c0_132 = arith.constant 0 : index
    %120 = vector.load %arg4[%c3_129, %c0_130, %c0_131, %c0_132] : memref<4x1x24x64xbf16, #tpu.memory_space<vmem>>, vector<1x1x24x64xbf16>
    %121 = vector.shape_cast %120 : vector<1x1x24x64xbf16> to vector<24x64xbf16>
    %122 = vector.shape_cast %119 : vector<24x64xbf16> to vector<1x1x24x64xbf16>
    tpu.vector_store %arg4[%c3_129, %c0_130, %c0_131, %c0_132], %122 {strides = array<i32>} : memref<4x1x24x64xbf16, #tpu.memory_space<vmem>>, vector<1x1x24x64xbf16>,
    return
  }
  func.func @transform_0(%arg0: i32) -> (i32, i32, i32, i32) {
    %c0_i32 = arith.constant 0 : i32
    %c0_i32_0 = arith.constant 0 : i32
    %c0_i32_1 = arith.constant 0 : i32
    %c0_i32_2 = arith.constant 0 : i32
    return %c0_i32, %arg0, %c0_i32_0, %c0_i32_1 : i32, i32, i32, i32
  }
  func.func @transform_1(%arg0: i32) -> (i32, i32, i32) {
    %c0_i32 = arith.constant 0 : i32
    %c0_i32_0 = arith.constant 0 : i32
    %c0_i32_1 = arith.constant 0 : i32
    %c0_i32_2 = arith.constant 0 : i32
    return %c0_i32, %c0_i32_0, %c0_i32_1 : i32, i32, i32
  }
  func.func @transform_2(%arg0: i32) -> (i32, i32) {
    %c0_i32 = arith.constant 0 : i32
    %c0_i32_0 = arith.constant 0 : i32
    %c0_i32_1 = arith.constant 0 : i32
    return %c0_i32, %c0_i32_0 : i32, i32
  }
  func.func @transform_3(%arg0: i32) -> (i32, i32, i32, i32) {
    %c0_i32 = arith.constant 0 : i32
    %c0_i32_0 = arith.constant 0 : i32
    %c0_i32_1 = arith.constant 0 : i32
    %c0_i32_2 = arith.constant 0 : i32
    return %c0_i32, %arg0, %c0_i32_0, %c0_i32_1 : i32, i32, i32, i32
  }
}

module attributes {stable_mosaic.version = 11 : i64} {
  func.func @_conv_kernel(%arg0: i32, %arg1: memref<1x1x102x64xbf16, #tpu.memory_space<vmem>>, %arg2: memref<16x64x32xbf16, #tpu.memory_space<vmem>>, %arg3: memref<1x32xf32, #tpu.memory_space<vmem>>, %arg4: memref<4x1x80x32xbf16, #tpu.memory_space<vmem>>) attributes {dimension_semantics = [#tpu.dimension_semantics<parallel>], iteration_bounds = array<i64: 2>, scalar_prefetch = 0 : i64, scratch_operands = 0 : i64, tpu.core_type = #tpu.core_type<tc>, window_params = [{transform_indices = @transform_0, window_bounds = array<i64: 1, 1, 102, 64>}, {pipeline_mode = #tpu.pipeline_mode<synchronous>, transform_indices = @transform_1, window_bounds = array<i64: 16, 64, 32>}, {pipeline_mode = #tpu.pipeline_mode<synchronous>, transform_indices = @transform_2, window_bounds = array<i64: 1, 32>}, {transform_indices = @transform_3, window_bounds = array<i64: 4, 1, 80, 32>}]} {
    %c0 = arith.constant 0 : index
    %c0_0 = arith.constant 0 : index
    %0 = vector.load %arg3[%c0, %c0_0] : memref<1x32xf32, #tpu.memory_space<vmem>>, vector<1x32xf32>
    %1 = vector.shape_cast %0 : vector<1x32xf32> to vector<1x32xf32>
    %2 = vector.broadcast %1 : vector<1x32xf32> to vector<80x32xf32>
    %c0_1 = arith.constant 0 : index
    %c0_2 = arith.constant 0 : index
    %c0_3 = arith.constant 0 : index
    %c0_4 = arith.constant 0 : index
    %3 = vector.load %arg1[%c0_1, %c0_2, %c0_3, %c0_4] : memref<1x1x102x64xbf16, #tpu.memory_space<vmem>>, vector<1x1x80x64xbf16>
    %4 = vector.shape_cast %3 : vector<1x1x80x64xbf16> to vector<80x64xbf16>
    %c0_5 = arith.constant 0 : index
    %c0_6 = arith.constant 0 : index
    %c0_7 = arith.constant 0 : index
    %5 = vector.load %arg2[%c0_5, %c0_6, %c0_7] : memref<16x64x32xbf16, #tpu.memory_space<vmem>>, vector<1x64x32xbf16>
    %6 = vector.shape_cast %5 : vector<1x64x32xbf16> to vector<64x32xbf16>
    %cst = arith.constant dense<0.000000e+00> : vector<80x32xf32>
    %7 = tpu.matmul %4, %6, %cst {dimension_numbers = #tpu.dot_dimension_numbers<[1], [0], [0], [1], [0, 0, 1, 1], [], []>} : vector<80x64xbf16>, vector<64x32xbf16>, vector<80x32xf32> -> vector<80x32xf32>
    %8 = arith.addf %2, %7 : vector<80x32xf32>
    %c0_8 = arith.constant 0 : index
    %c0_9 = arith.constant 0 : index
    %c1 = arith.constant 1 : index
    %c0_10 = arith.constant 0 : index
    %9 = vector.load %arg1[%c0_8, %c0_9, %c1, %c0_10] : memref<1x1x102x64xbf16, #tpu.memory_space<vmem>>, vector<1x1x80x64xbf16>
    %10 = vector.shape_cast %9 : vector<1x1x80x64xbf16> to vector<80x64xbf16>
    %c1_11 = arith.constant 1 : index
    %c0_12 = arith.constant 0 : index
    %c0_13 = arith.constant 0 : index
    %11 = vector.load %arg2[%c1_11, %c0_12, %c0_13] : memref<16x64x32xbf16, #tpu.memory_space<vmem>>, vector<1x64x32xbf16>
    %12 = vector.shape_cast %11 : vector<1x64x32xbf16> to vector<64x32xbf16>
    %cst_14 = arith.constant dense<0.000000e+00> : vector<80x32xf32>
    %13 = tpu.matmul %10, %12, %cst_14 {dimension_numbers = #tpu.dot_dimension_numbers<[1], [0], [0], [1], [0, 0, 1, 1], [], []>} : vector<80x64xbf16>, vector<64x32xbf16>, vector<80x32xf32> -> vector<80x32xf32>
    %14 = arith.addf %8, %13 : vector<80x32xf32>
    %c0_15 = arith.constant 0 : index
    %c0_16 = arith.constant 0 : index
    %c10 = arith.constant 10 : index
    %c0_17 = arith.constant 0 : index
    %15 = vector.load %arg1[%c0_15, %c0_16, %c10, %c0_17] : memref<1x1x102x64xbf16, #tpu.memory_space<vmem>>, vector<1x1x80x64xbf16>
    %16 = vector.shape_cast %15 : vector<1x1x80x64xbf16> to vector<80x64xbf16>
    %c2 = arith.constant 2 : index
    %c0_18 = arith.constant 0 : index
    %c0_19 = arith.constant 0 : index
    %17 = vector.load %arg2[%c2, %c0_18, %c0_19] : memref<16x64x32xbf16, #tpu.memory_space<vmem>>, vector<1x64x32xbf16>
    %18 = vector.shape_cast %17 : vector<1x64x32xbf16> to vector<64x32xbf16>
    %cst_20 = arith.constant dense<0.000000e+00> : vector<80x32xf32>
    %19 = tpu.matmul %16, %18, %cst_20 {dimension_numbers = #tpu.dot_dimension_numbers<[1], [0], [0], [1], [0, 0, 1, 1], [], []>} : vector<80x64xbf16>, vector<64x32xbf16>, vector<80x32xf32> -> vector<80x32xf32>
    %20 = arith.addf %14, %19 : vector<80x32xf32>
    %c0_21 = arith.constant 0 : index
    %c0_22 = arith.constant 0 : index
    %c11 = arith.constant 11 : index
    %c0_23 = arith.constant 0 : index
    %21 = vector.load %arg1[%c0_21, %c0_22, %c11, %c0_23] : memref<1x1x102x64xbf16, #tpu.memory_space<vmem>>, vector<1x1x80x64xbf16>
    %22 = vector.shape_cast %21 : vector<1x1x80x64xbf16> to vector<80x64xbf16>
    %c3 = arith.constant 3 : index
    %c0_24 = arith.constant 0 : index
    %c0_25 = arith.constant 0 : index
    %23 = vector.load %arg2[%c3, %c0_24, %c0_25] : memref<16x64x32xbf16, #tpu.memory_space<vmem>>, vector<1x64x32xbf16>
    %24 = vector.shape_cast %23 : vector<1x64x32xbf16> to vector<64x32xbf16>
    %cst_26 = arith.constant dense<0.000000e+00> : vector<80x32xf32>
    %25 = tpu.matmul %22, %24, %cst_26 {dimension_numbers = #tpu.dot_dimension_numbers<[1], [0], [0], [1], [0, 0, 1, 1], [], []>} : vector<80x64xbf16>, vector<64x32xbf16>, vector<80x32xf32> -> vector<80x32xf32>
    %26 = arith.addf %20, %25 : vector<80x32xf32>
    %cst_27 = arith.constant 0.000000e+00 : f32
    %27 = vector.broadcast %cst_27 : f32 to vector<80x32xf32>
    %28 = arith.maximumf %26, %27 : vector<80x32xf32>
    %29 = arith.truncf %28 : vector<80x32xf32> to vector<80x32xbf16>
    %c0_28 = arith.constant 0 : index
    %c0_29 = arith.constant 0 : index
    %c0_30 = arith.constant 0 : index
    %c0_31 = arith.constant 0 : index
    %30 = vector.load %arg4[%c0_28, %c0_29, %c0_30, %c0_31] : memref<4x1x80x32xbf16, #tpu.memory_space<vmem>>, vector<1x1x80x32xbf16>
    %31 = vector.shape_cast %30 : vector<1x1x80x32xbf16> to vector<80x32xbf16>
    %32 = vector.shape_cast %29 : vector<80x32xbf16> to vector<1x1x80x32xbf16>
    tpu.vector_store %arg4[%c0_28, %c0_29, %c0_30, %c0_31], %32 {strides = array<i32>} : memref<4x1x80x32xbf16, #tpu.memory_space<vmem>>, vector<1x1x80x32xbf16>,
    %c0_32 = arith.constant 0 : index
    %c0_33 = arith.constant 0 : index
    %c1_34 = arith.constant 1 : index
    %c0_35 = arith.constant 0 : index
    %33 = vector.load %arg1[%c0_32, %c0_33, %c1_34, %c0_35] : memref<1x1x102x64xbf16, #tpu.memory_space<vmem>>, vector<1x1x80x64xbf16>
    %34 = vector.shape_cast %33 : vector<1x1x80x64xbf16> to vector<80x64xbf16>
    %c4 = arith.constant 4 : index
    %c0_36 = arith.constant 0 : index
    %c0_37 = arith.constant 0 : index
    %35 = vector.load %arg2[%c4, %c0_36, %c0_37] : memref<16x64x32xbf16, #tpu.memory_space<vmem>>, vector<1x64x32xbf16>
    %36 = vector.shape_cast %35 : vector<1x64x32xbf16> to vector<64x32xbf16>
    %cst_38 = arith.constant dense<0.000000e+00> : vector<80x32xf32>
    %37 = tpu.matmul %34, %36, %cst_38 {dimension_numbers = #tpu.dot_dimension_numbers<[1], [0], [0], [1], [0, 0, 1, 1], [], []>} : vector<80x64xbf16>, vector<64x32xbf16>, vector<80x32xf32> -> vector<80x32xf32>
    %38 = arith.addf %2, %37 : vector<80x32xf32>
    %c0_39 = arith.constant 0 : index
    %c0_40 = arith.constant 0 : index
    %c2_41 = arith.constant 2 : index
    %c0_42 = arith.constant 0 : index
    %39 = vector.load %arg1[%c0_39, %c0_40, %c2_41, %c0_42] : memref<1x1x102x64xbf16, #tpu.memory_space<vmem>>, vector<1x1x80x64xbf16>
    %40 = vector.shape_cast %39 : vector<1x1x80x64xbf16> to vector<80x64xbf16>
    %c5 = arith.constant 5 : index
    %c0_43 = arith.constant 0 : index
    %c0_44 = arith.constant 0 : index
    %41 = vector.load %arg2[%c5, %c0_43, %c0_44] : memref<16x64x32xbf16, #tpu.memory_space<vmem>>, vector<1x64x32xbf16>
    %42 = vector.shape_cast %41 : vector<1x64x32xbf16> to vector<64x32xbf16>
    %cst_45 = arith.constant dense<0.000000e+00> : vector<80x32xf32>
    %43 = tpu.matmul %40, %42, %cst_45 {dimension_numbers = #tpu.dot_dimension_numbers<[1], [0], [0], [1], [0, 0, 1, 1], [], []>} : vector<80x64xbf16>, vector<64x32xbf16>, vector<80x32xf32> -> vector<80x32xf32>
    %44 = arith.addf %38, %43 : vector<80x32xf32>
    %c0_46 = arith.constant 0 : index
    %c0_47 = arith.constant 0 : index
    %c11_48 = arith.constant 11 : index
    %c0_49 = arith.constant 0 : index
    %45 = vector.load %arg1[%c0_46, %c0_47, %c11_48, %c0_49] : memref<1x1x102x64xbf16, #tpu.memory_space<vmem>>, vector<1x1x80x64xbf16>
    %46 = vector.shape_cast %45 : vector<1x1x80x64xbf16> to vector<80x64xbf16>
    %c6 = arith.constant 6 : index
    %c0_50 = arith.constant 0 : index
    %c0_51 = arith.constant 0 : index
    %47 = vector.load %arg2[%c6, %c0_50, %c0_51] : memref<16x64x32xbf16, #tpu.memory_space<vmem>>, vector<1x64x32xbf16>
    %48 = vector.shape_cast %47 : vector<1x64x32xbf16> to vector<64x32xbf16>
    %cst_52 = arith.constant dense<0.000000e+00> : vector<80x32xf32>
    %49 = tpu.matmul %46, %48, %cst_52 {dimension_numbers = #tpu.dot_dimension_numbers<[1], [0], [0], [1], [0, 0, 1, 1], [], []>} : vector<80x64xbf16>, vector<64x32xbf16>, vector<80x32xf32> -> vector<80x32xf32>
    %50 = arith.addf %44, %49 : vector<80x32xf32>
    %c0_53 = arith.constant 0 : index
    %c0_54 = arith.constant 0 : index
    %c12 = arith.constant 12 : index
    %c0_55 = arith.constant 0 : index
    %51 = vector.load %arg1[%c0_53, %c0_54, %c12, %c0_55] : memref<1x1x102x64xbf16, #tpu.memory_space<vmem>>, vector<1x1x80x64xbf16>
    %52 = vector.shape_cast %51 : vector<1x1x80x64xbf16> to vector<80x64xbf16>
    %c7 = arith.constant 7 : index
    %c0_56 = arith.constant 0 : index
    %c0_57 = arith.constant 0 : index
    %53 = vector.load %arg2[%c7, %c0_56, %c0_57] : memref<16x64x32xbf16, #tpu.memory_space<vmem>>, vector<1x64x32xbf16>
    %54 = vector.shape_cast %53 : vector<1x64x32xbf16> to vector<64x32xbf16>
    %cst_58 = arith.constant dense<0.000000e+00> : vector<80x32xf32>
    %55 = tpu.matmul %52, %54, %cst_58 {dimension_numbers = #tpu.dot_dimension_numbers<[1], [0], [0], [1], [0, 0, 1, 1], [], []>} : vector<80x64xbf16>, vector<64x32xbf16>, vector<80x32xf32> -> vector<80x32xf32>
    %56 = arith.addf %50, %55 : vector<80x32xf32>
    %cst_59 = arith.constant 0.000000e+00 : f32
    %57 = vector.broadcast %cst_59 : f32 to vector<80x32xf32>
    %58 = arith.maximumf %56, %57 : vector<80x32xf32>
    %59 = arith.truncf %58 : vector<80x32xf32> to vector<80x32xbf16>
    %c1_60 = arith.constant 1 : index
    %c0_61 = arith.constant 0 : index
    %c0_62 = arith.constant 0 : index
    %c0_63 = arith.constant 0 : index
    %60 = vector.load %arg4[%c1_60, %c0_61, %c0_62, %c0_63] : memref<4x1x80x32xbf16, #tpu.memory_space<vmem>>, vector<1x1x80x32xbf16>
    %61 = vector.shape_cast %60 : vector<1x1x80x32xbf16> to vector<80x32xbf16>
    %62 = vector.shape_cast %59 : vector<80x32xbf16> to vector<1x1x80x32xbf16>
    tpu.vector_store %arg4[%c1_60, %c0_61, %c0_62, %c0_63], %62 {strides = array<i32>} : memref<4x1x80x32xbf16, #tpu.memory_space<vmem>>, vector<1x1x80x32xbf16>,
    %c0_64 = arith.constant 0 : index
    %c0_65 = arith.constant 0 : index
    %c10_66 = arith.constant 10 : index
    %c0_67 = arith.constant 0 : index
    %63 = vector.load %arg1[%c0_64, %c0_65, %c10_66, %c0_67] : memref<1x1x102x64xbf16, #tpu.memory_space<vmem>>, vector<1x1x80x64xbf16>
    %64 = vector.shape_cast %63 : vector<1x1x80x64xbf16> to vector<80x64xbf16>
    %c8 = arith.constant 8 : index
    %c0_68 = arith.constant 0 : index
    %c0_69 = arith.constant 0 : index
    %65 = vector.load %arg2[%c8, %c0_68, %c0_69] : memref<16x64x32xbf16, #tpu.memory_space<vmem>>, vector<1x64x32xbf16>
    %66 = vector.shape_cast %65 : vector<1x64x32xbf16> to vector<64x32xbf16>
    %cst_70 = arith.constant dense<0.000000e+00> : vector<80x32xf32>
    %67 = tpu.matmul %64, %66, %cst_70 {dimension_numbers = #tpu.dot_dimension_numbers<[1], [0], [0], [1], [0, 0, 1, 1], [], []>} : vector<80x64xbf16>, vector<64x32xbf16>, vector<80x32xf32> -> vector<80x32xf32>
    %68 = arith.addf %2, %67 : vector<80x32xf32>
    %c0_71 = arith.constant 0 : index
    %c0_72 = arith.constant 0 : index
    %c11_73 = arith.constant 11 : index
    %c0_74 = arith.constant 0 : index
    %69 = vector.load %arg1[%c0_71, %c0_72, %c11_73, %c0_74] : memref<1x1x102x64xbf16, #tpu.memory_space<vmem>>, vector<1x1x80x64xbf16>
    %70 = vector.shape_cast %69 : vector<1x1x80x64xbf16> to vector<80x64xbf16>
    %c9 = arith.constant 9 : index
    %c0_75 = arith.constant 0 : index
    %c0_76 = arith.constant 0 : index
    %71 = vector.load %arg2[%c9, %c0_75, %c0_76] : memref<16x64x32xbf16, #tpu.memory_space<vmem>>, vector<1x64x32xbf16>
    %72 = vector.shape_cast %71 : vector<1x64x32xbf16> to vector<64x32xbf16>
    %cst_77 = arith.constant dense<0.000000e+00> : vector<80x32xf32>
    %73 = tpu.matmul %70, %72, %cst_77 {dimension_numbers = #tpu.dot_dimension_numbers<[1], [0], [0], [1], [0, 0, 1, 1], [], []>} : vector<80x64xbf16>, vector<64x32xbf16>, vector<80x32xf32> -> vector<80x32xf32>
    %74 = arith.addf %68, %73 : vector<80x32xf32>
    %c0_78 = arith.constant 0 : index
    %c0_79 = arith.constant 0 : index
    %c20 = arith.constant 20 : index
    %c0_80 = arith.constant 0 : index
    %75 = vector.load %arg1[%c0_78, %c0_79, %c20, %c0_80] : memref<1x1x102x64xbf16, #tpu.memory_space<vmem>>, vector<1x1x80x64xbf16>
    %76 = vector.shape_cast %75 : vector<1x1x80x64xbf16> to vector<80x64xbf16>
    %c10_81 = arith.constant 10 : index
    %c0_82 = arith.constant 0 : index
    %c0_83 = arith.constant 0 : index
    %77 = vector.load %arg2[%c10_81, %c0_82, %c0_83] : memref<16x64x32xbf16, #tpu.memory_space<vmem>>, vector<1x64x32xbf16>
    %78 = vector.shape_cast %77 : vector<1x64x32xbf16> to vector<64x32xbf16>
    %cst_84 = arith.constant dense<0.000000e+00> : vector<80x32xf32>
    %79 = tpu.matmul %76, %78, %cst_84 {dimension_numbers = #tpu.dot_dimension_numbers<[1], [0], [0], [1], [0, 0, 1, 1], [], []>} : vector<80x64xbf16>, vector<64x32xbf16>, vector<80x32xf32> -> vector<80x32xf32>
    %80 = arith.addf %74, %79 : vector<80x32xf32>
    %c0_85 = arith.constant 0 : index
    %c0_86 = arith.constant 0 : index
    %c21 = arith.constant 21 : index
    %c0_87 = arith.constant 0 : index
    %81 = vector.load %arg1[%c0_85, %c0_86, %c21, %c0_87] : memref<1x1x102x64xbf16, #tpu.memory_space<vmem>>, vector<1x1x80x64xbf16>
    %82 = vector.shape_cast %81 : vector<1x1x80x64xbf16> to vector<80x64xbf16>
    %c11_88 = arith.constant 11 : index
    %c0_89 = arith.constant 0 : index
    %c0_90 = arith.constant 0 : index
    %83 = vector.load %arg2[%c11_88, %c0_89, %c0_90] : memref<16x64x32xbf16, #tpu.memory_space<vmem>>, vector<1x64x32xbf16>
    %84 = vector.shape_cast %83 : vector<1x64x32xbf16> to vector<64x32xbf16>
    %cst_91 = arith.constant dense<0.000000e+00> : vector<80x32xf32>
    %85 = tpu.matmul %82, %84, %cst_91 {dimension_numbers = #tpu.dot_dimension_numbers<[1], [0], [0], [1], [0, 0, 1, 1], [], []>} : vector<80x64xbf16>, vector<64x32xbf16>, vector<80x32xf32> -> vector<80x32xf32>
    %86 = arith.addf %80, %85 : vector<80x32xf32>
    %cst_92 = arith.constant 0.000000e+00 : f32
    %87 = vector.broadcast %cst_92 : f32 to vector<80x32xf32>
    %88 = arith.maximumf %86, %87 : vector<80x32xf32>
    %89 = arith.truncf %88 : vector<80x32xf32> to vector<80x32xbf16>
    %c2_93 = arith.constant 2 : index
    %c0_94 = arith.constant 0 : index
    %c0_95 = arith.constant 0 : index
    %c0_96 = arith.constant 0 : index
    %90 = vector.load %arg4[%c2_93, %c0_94, %c0_95, %c0_96] : memref<4x1x80x32xbf16, #tpu.memory_space<vmem>>, vector<1x1x80x32xbf16>
    %91 = vector.shape_cast %90 : vector<1x1x80x32xbf16> to vector<80x32xbf16>
    %92 = vector.shape_cast %89 : vector<80x32xbf16> to vector<1x1x80x32xbf16>
    tpu.vector_store %arg4[%c2_93, %c0_94, %c0_95, %c0_96], %92 {strides = array<i32>} : memref<4x1x80x32xbf16, #tpu.memory_space<vmem>>, vector<1x1x80x32xbf16>,
    %c0_97 = arith.constant 0 : index
    %c0_98 = arith.constant 0 : index
    %c11_99 = arith.constant 11 : index
    %c0_100 = arith.constant 0 : index
    %93 = vector.load %arg1[%c0_97, %c0_98, %c11_99, %c0_100] : memref<1x1x102x64xbf16, #tpu.memory_space<vmem>>, vector<1x1x80x64xbf16>
    %94 = vector.shape_cast %93 : vector<1x1x80x64xbf16> to vector<80x64xbf16>
    %c12_101 = arith.constant 12 : index
    %c0_102 = arith.constant 0 : index
    %c0_103 = arith.constant 0 : index
    %95 = vector.load %arg2[%c12_101, %c0_102, %c0_103] : memref<16x64x32xbf16, #tpu.memory_space<vmem>>, vector<1x64x32xbf16>
    %96 = vector.shape_cast %95 : vector<1x64x32xbf16> to vector<64x32xbf16>
    %cst_104 = arith.constant dense<0.000000e+00> : vector<80x32xf32>
    %97 = tpu.matmul %94, %96, %cst_104 {dimension_numbers = #tpu.dot_dimension_numbers<[1], [0], [0], [1], [0, 0, 1, 1], [], []>} : vector<80x64xbf16>, vector<64x32xbf16>, vector<80x32xf32> -> vector<80x32xf32>
    %98 = arith.addf %2, %97 : vector<80x32xf32>
    %c0_105 = arith.constant 0 : index
    %c0_106 = arith.constant 0 : index
    %c12_107 = arith.constant 12 : index
    %c0_108 = arith.constant 0 : index
    %99 = vector.load %arg1[%c0_105, %c0_106, %c12_107, %c0_108] : memref<1x1x102x64xbf16, #tpu.memory_space<vmem>>, vector<1x1x80x64xbf16>
    %100 = vector.shape_cast %99 : vector<1x1x80x64xbf16> to vector<80x64xbf16>
    %c13 = arith.constant 13 : index
    %c0_109 = arith.constant 0 : index
    %c0_110 = arith.constant 0 : index
    %101 = vector.load %arg2[%c13, %c0_109, %c0_110] : memref<16x64x32xbf16, #tpu.memory_space<vmem>>, vector<1x64x32xbf16>
    %102 = vector.shape_cast %101 : vector<1x64x32xbf16> to vector<64x32xbf16>
    %cst_111 = arith.constant dense<0.000000e+00> : vector<80x32xf32>
    %103 = tpu.matmul %100, %102, %cst_111 {dimension_numbers = #tpu.dot_dimension_numbers<[1], [0], [0], [1], [0, 0, 1, 1], [], []>} : vector<80x64xbf16>, vector<64x32xbf16>, vector<80x32xf32> -> vector<80x32xf32>
    %104 = arith.addf %98, %103 : vector<80x32xf32>
    %c0_112 = arith.constant 0 : index
    %c0_113 = arith.constant 0 : index
    %c21_114 = arith.constant 21 : index
    %c0_115 = arith.constant 0 : index
    %105 = vector.load %arg1[%c0_112, %c0_113, %c21_114, %c0_115] : memref<1x1x102x64xbf16, #tpu.memory_space<vmem>>, vector<1x1x80x64xbf16>
    %106 = vector.shape_cast %105 : vector<1x1x80x64xbf16> to vector<80x64xbf16>
    %c14 = arith.constant 14 : index
    %c0_116 = arith.constant 0 : index
    %c0_117 = arith.constant 0 : index
    %107 = vector.load %arg2[%c14, %c0_116, %c0_117] : memref<16x64x32xbf16, #tpu.memory_space<vmem>>, vector<1x64x32xbf16>
    %108 = vector.shape_cast %107 : vector<1x64x32xbf16> to vector<64x32xbf16>
    %cst_118 = arith.constant dense<0.000000e+00> : vector<80x32xf32>
    %109 = tpu.matmul %106, %108, %cst_118 {dimension_numbers = #tpu.dot_dimension_numbers<[1], [0], [0], [1], [0, 0, 1, 1], [], []>} : vector<80x64xbf16>, vector<64x32xbf16>, vector<80x32xf32> -> vector<80x32xf32>
    %110 = arith.addf %104, %109 : vector<80x32xf32>
    %c0_119 = arith.constant 0 : index
    %c0_120 = arith.constant 0 : index
    %c22 = arith.constant 22 : index
    %c0_121 = arith.constant 0 : index
    %111 = vector.load %arg1[%c0_119, %c0_120, %c22, %c0_121] : memref<1x1x102x64xbf16, #tpu.memory_space<vmem>>, vector<1x1x80x64xbf16>
    %112 = vector.shape_cast %111 : vector<1x1x80x64xbf16> to vector<80x64xbf16>
    %c15 = arith.constant 15 : index
    %c0_122 = arith.constant 0 : index
    %c0_123 = arith.constant 0 : index
    %113 = vector.load %arg2[%c15, %c0_122, %c0_123] : memref<16x64x32xbf16, #tpu.memory_space<vmem>>, vector<1x64x32xbf16>
    %114 = vector.shape_cast %113 : vector<1x64x32xbf16> to vector<64x32xbf16>
    %cst_124 = arith.constant dense<0.000000e+00> : vector<80x32xf32>
    %115 = tpu.matmul %112, %114, %cst_124 {dimension_numbers = #tpu.dot_dimension_numbers<[1], [0], [0], [1], [0, 0, 1, 1], [], []>} : vector<80x64xbf16>, vector<64x32xbf16>, vector<80x32xf32> -> vector<80x32xf32>
    %116 = arith.addf %110, %115 : vector<80x32xf32>
    %cst_125 = arith.constant 0.000000e+00 : f32
    %117 = vector.broadcast %cst_125 : f32 to vector<80x32xf32>
    %118 = arith.maximumf %116, %117 : vector<80x32xf32>
    %119 = arith.truncf %118 : vector<80x32xf32> to vector<80x32xbf16>
    %c3_126 = arith.constant 3 : index
    %c0_127 = arith.constant 0 : index
    %c0_128 = arith.constant 0 : index
    %c0_129 = arith.constant 0 : index
    %120 = vector.load %arg4[%c3_126, %c0_127, %c0_128, %c0_129] : memref<4x1x80x32xbf16, #tpu.memory_space<vmem>>, vector<1x1x80x32xbf16>
    %121 = vector.shape_cast %120 : vector<1x1x80x32xbf16> to vector<80x32xbf16>
    %122 = vector.shape_cast %119 : vector<80x32xbf16> to vector<1x1x80x32xbf16>
    tpu.vector_store %arg4[%c3_126, %c0_127, %c0_128, %c0_129], %122 {strides = array<i32>} : memref<4x1x80x32xbf16, #tpu.memory_space<vmem>>, vector<1x1x80x32xbf16>,
    return
  }
  func.func @transform_0(%arg0: i32) -> (i32, i32, i32, i32) {
    %c0_i32 = arith.constant 0 : i32
    %c0_i32_0 = arith.constant 0 : i32
    %c0_i32_1 = arith.constant 0 : i32
    %c0_i32_2 = arith.constant 0 : i32
    return %c0_i32, %arg0, %c0_i32_0, %c0_i32_1 : i32, i32, i32, i32
  }
  func.func @transform_1(%arg0: i32) -> (i32, i32, i32) {
    %c0_i32 = arith.constant 0 : i32
    %c0_i32_0 = arith.constant 0 : i32
    %c0_i32_1 = arith.constant 0 : i32
    %c0_i32_2 = arith.constant 0 : i32
    return %c0_i32, %c0_i32_0, %c0_i32_1 : i32, i32, i32
  }
  func.func @transform_2(%arg0: i32) -> (i32, i32) {
    %c0_i32 = arith.constant 0 : i32
    %c0_i32_0 = arith.constant 0 : i32
    %c0_i32_1 = arith.constant 0 : i32
    return %c0_i32, %c0_i32_0 : i32, i32
  }
  func.func @transform_3(%arg0: i32) -> (i32, i32, i32, i32) {
    %c0_i32 = arith.constant 0 : i32
    %c0_i32_0 = arith.constant 0 : i32
    %c0_i32_1 = arith.constant 0 : i32
    %c0_i32_2 = arith.constant 0 : i32
    return %c0_i32, %arg0, %c0_i32_0, %c0_i32_1 : i32, i32, i32, i32
  }
}

module attributes {stable_mosaic.version = 11 : i64} {
  func.func @_conv_kernel(%arg0: i32, %arg1: memref<1x1x326x32xbf16, #tpu.memory_space<vmem>>, %arg2: memref<9x32x4xbf16, #tpu.memory_space<vmem>>, %arg3: memref<1x4xf32, #tpu.memory_space<vmem>>, %arg4: memref<1x1x288x4xf32, #tpu.memory_space<vmem>>) attributes {dimension_semantics = [#tpu.dimension_semantics<parallel>], iteration_bounds = array<i64: 2>, scalar_prefetch = 0 : i64, scratch_operands = 0 : i64, tpu.core_type = #tpu.core_type<tc>, window_params = [{transform_indices = @transform_0, window_bounds = array<i64: 1, 1, 326, 32>}, {pipeline_mode = #tpu.pipeline_mode<synchronous>, transform_indices = @transform_1, window_bounds = array<i64: 9, 32, 4>}, {pipeline_mode = #tpu.pipeline_mode<synchronous>, transform_indices = @transform_2, window_bounds = array<i64: 1, 4>}, {transform_indices = @transform_3, window_bounds = array<i64: 1, 1, 288, 4>}]} {
    %c0 = arith.constant 0 : index
    %c0_0 = arith.constant 0 : index
    %0 = vector.load %arg3[%c0, %c0_0] : memref<1x4xf32, #tpu.memory_space<vmem>>, vector<1x4xf32>
    %1 = vector.shape_cast %0 : vector<1x4xf32> to vector<1x4xf32>
    %2 = vector.broadcast %1 : vector<1x4xf32> to vector<288x4xf32>
    %c0_1 = arith.constant 0 : index
    %c0_2 = arith.constant 0 : index
    %c0_3 = arith.constant 0 : index
    %c0_4 = arith.constant 0 : index
    %3 = vector.load %arg1[%c0_1, %c0_2, %c0_3, %c0_4] : memref<1x1x326x32xbf16, #tpu.memory_space<vmem>>, vector<1x1x288x32xbf16>
    %4 = vector.shape_cast %3 : vector<1x1x288x32xbf16> to vector<288x32xbf16>
    %c0_5 = arith.constant 0 : index
    %c0_6 = arith.constant 0 : index
    %c0_7 = arith.constant 0 : index
    %5 = vector.load %arg2[%c0_5, %c0_6, %c0_7] : memref<9x32x4xbf16, #tpu.memory_space<vmem>>, vector<1x32x4xbf16>
    %6 = vector.shape_cast %5 : vector<1x32x4xbf16> to vector<32x4xbf16>
    %cst = arith.constant dense<0.000000e+00> : vector<288x4xf32>
    %7 = tpu.matmul %4, %6, %cst {dimension_numbers = #tpu.dot_dimension_numbers<[1], [0], [0], [1], [0, 0, 1, 1], [], []>} : vector<288x32xbf16>, vector<32x4xbf16>, vector<288x4xf32> -> vector<288x4xf32>
    %8 = arith.addf %2, %7 : vector<288x4xf32>
    %c0_8 = arith.constant 0 : index
    %c0_9 = arith.constant 0 : index
    %c1 = arith.constant 1 : index
    %c0_10 = arith.constant 0 : index
    %9 = vector.load %arg1[%c0_8, %c0_9, %c1, %c0_10] : memref<1x1x326x32xbf16, #tpu.memory_space<vmem>>, vector<1x1x288x32xbf16>
    %10 = vector.shape_cast %9 : vector<1x1x288x32xbf16> to vector<288x32xbf16>
    %c1_11 = arith.constant 1 : index
    %c0_12 = arith.constant 0 : index
    %c0_13 = arith.constant 0 : index
    %11 = vector.load %arg2[%c1_11, %c0_12, %c0_13] : memref<9x32x4xbf16, #tpu.memory_space<vmem>>, vector<1x32x4xbf16>
    %12 = vector.shape_cast %11 : vector<1x32x4xbf16> to vector<32x4xbf16>
    %cst_14 = arith.constant dense<0.000000e+00> : vector<288x4xf32>
    %13 = tpu.matmul %10, %12, %cst_14 {dimension_numbers = #tpu.dot_dimension_numbers<[1], [0], [0], [1], [0, 0, 1, 1], [], []>} : vector<288x32xbf16>, vector<32x4xbf16>, vector<288x4xf32> -> vector<288x4xf32>
    %14 = arith.addf %8, %13 : vector<288x4xf32>
    %c0_15 = arith.constant 0 : index
    %c0_16 = arith.constant 0 : index
    %c2 = arith.constant 2 : index
    %c0_17 = arith.constant 0 : index
    %15 = vector.load %arg1[%c0_15, %c0_16, %c2, %c0_17] : memref<1x1x326x32xbf16, #tpu.memory_space<vmem>>, vector<1x1x288x32xbf16>
    %16 = vector.shape_cast %15 : vector<1x1x288x32xbf16> to vector<288x32xbf16>
    %c2_18 = arith.constant 2 : index
    %c0_19 = arith.constant 0 : index
    %c0_20 = arith.constant 0 : index
    %17 = vector.load %arg2[%c2_18, %c0_19, %c0_20] : memref<9x32x4xbf16, #tpu.memory_space<vmem>>, vector<1x32x4xbf16>
    %18 = vector.shape_cast %17 : vector<1x32x4xbf16> to vector<32x4xbf16>
    %cst_21 = arith.constant dense<0.000000e+00> : vector<288x4xf32>
    %19 = tpu.matmul %16, %18, %cst_21 {dimension_numbers = #tpu.dot_dimension_numbers<[1], [0], [0], [1], [0, 0, 1, 1], [], []>} : vector<288x32xbf16>, vector<32x4xbf16>, vector<288x4xf32> -> vector<288x4xf32>
    %20 = arith.addf %14, %19 : vector<288x4xf32>
    %c0_22 = arith.constant 0 : index
    %c0_23 = arith.constant 0 : index
    %c18 = arith.constant 18 : index
    %c0_24 = arith.constant 0 : index
    %21 = vector.load %arg1[%c0_22, %c0_23, %c18, %c0_24] : memref<1x1x326x32xbf16, #tpu.memory_space<vmem>>, vector<1x1x288x32xbf16>
    %22 = vector.shape_cast %21 : vector<1x1x288x32xbf16> to vector<288x32xbf16>
    %c3 = arith.constant 3 : index
    %c0_25 = arith.constant 0 : index
    %c0_26 = arith.constant 0 : index
    %23 = vector.load %arg2[%c3, %c0_25, %c0_26] : memref<9x32x4xbf16, #tpu.memory_space<vmem>>, vector<1x32x4xbf16>
    %24 = vector.shape_cast %23 : vector<1x32x4xbf16> to vector<32x4xbf16>
    %cst_27 = arith.constant dense<0.000000e+00> : vector<288x4xf32>
    %25 = tpu.matmul %22, %24, %cst_27 {dimension_numbers = #tpu.dot_dimension_numbers<[1], [0], [0], [1], [0, 0, 1, 1], [], []>} : vector<288x32xbf16>, vector<32x4xbf16>, vector<288x4xf32> -> vector<288x4xf32>
    %26 = arith.addf %20, %25 : vector<288x4xf32>
    %c0_28 = arith.constant 0 : index
    %c0_29 = arith.constant 0 : index
    %c19 = arith.constant 19 : index
    %c0_30 = arith.constant 0 : index
    %27 = vector.load %arg1[%c0_28, %c0_29, %c19, %c0_30] : memref<1x1x326x32xbf16, #tpu.memory_space<vmem>>, vector<1x1x288x32xbf16>
    %28 = vector.shape_cast %27 : vector<1x1x288x32xbf16> to vector<288x32xbf16>
    %c4 = arith.constant 4 : index
    %c0_31 = arith.constant 0 : index
    %c0_32 = arith.constant 0 : index
    %29 = vector.load %arg2[%c4, %c0_31, %c0_32] : memref<9x32x4xbf16, #tpu.memory_space<vmem>>, vector<1x32x4xbf16>
    %30 = vector.shape_cast %29 : vector<1x32x4xbf16> to vector<32x4xbf16>
    %cst_33 = arith.constant dense<0.000000e+00> : vector<288x4xf32>
    %31 = tpu.matmul %28, %30, %cst_33 {dimension_numbers = #tpu.dot_dimension_numbers<[1], [0], [0], [1], [0, 0, 1, 1], [], []>} : vector<288x32xbf16>, vector<32x4xbf16>, vector<288x4xf32> -> vector<288x4xf32>
    %32 = arith.addf %26, %31 : vector<288x4xf32>
    %c0_34 = arith.constant 0 : index
    %c0_35 = arith.constant 0 : index
    %c20 = arith.constant 20 : index
    %c0_36 = arith.constant 0 : index
    %33 = vector.load %arg1[%c0_34, %c0_35, %c20, %c0_36] : memref<1x1x326x32xbf16, #tpu.memory_space<vmem>>, vector<1x1x288x32xbf16>
    %34 = vector.shape_cast %33 : vector<1x1x288x32xbf16> to vector<288x32xbf16>
    %c5 = arith.constant 5 : index
    %c0_37 = arith.constant 0 : index
    %c0_38 = arith.constant 0 : index
    %35 = vector.load %arg2[%c5, %c0_37, %c0_38] : memref<9x32x4xbf16, #tpu.memory_space<vmem>>, vector<1x32x4xbf16>
    %36 = vector.shape_cast %35 : vector<1x32x4xbf16> to vector<32x4xbf16>
    %cst_39 = arith.constant dense<0.000000e+00> : vector<288x4xf32>
    %37 = tpu.matmul %34, %36, %cst_39 {dimension_numbers = #tpu.dot_dimension_numbers<[1], [0], [0], [1], [0, 0, 1, 1], [], []>} : vector<288x32xbf16>, vector<32x4xbf16>, vector<288x4xf32> -> vector<288x4xf32>
    %38 = arith.addf %32, %37 : vector<288x4xf32>
    %c0_40 = arith.constant 0 : index
    %c0_41 = arith.constant 0 : index
    %c36 = arith.constant 36 : index
    %c0_42 = arith.constant 0 : index
    %39 = vector.load %arg1[%c0_40, %c0_41, %c36, %c0_42] : memref<1x1x326x32xbf16, #tpu.memory_space<vmem>>, vector<1x1x288x32xbf16>
    %40 = vector.shape_cast %39 : vector<1x1x288x32xbf16> to vector<288x32xbf16>
    %c6 = arith.constant 6 : index
    %c0_43 = arith.constant 0 : index
    %c0_44 = arith.constant 0 : index
    %41 = vector.load %arg2[%c6, %c0_43, %c0_44] : memref<9x32x4xbf16, #tpu.memory_space<vmem>>, vector<1x32x4xbf16>
    %42 = vector.shape_cast %41 : vector<1x32x4xbf16> to vector<32x4xbf16>
    %cst_45 = arith.constant dense<0.000000e+00> : vector<288x4xf32>
    %43 = tpu.matmul %40, %42, %cst_45 {dimension_numbers = #tpu.dot_dimension_numbers<[1], [0], [0], [1], [0, 0, 1, 1], [], []>} : vector<288x32xbf16>, vector<32x4xbf16>, vector<288x4xf32> -> vector<288x4xf32>
    %44 = arith.addf %38, %43 : vector<288x4xf32>
    %c0_46 = arith.constant 0 : index
    %c0_47 = arith.constant 0 : index
    %c37 = arith.constant 37 : index
    %c0_48 = arith.constant 0 : index
    %45 = vector.load %arg1[%c0_46, %c0_47, %c37, %c0_48] : memref<1x1x326x32xbf16, #tpu.memory_space<vmem>>, vector<1x1x288x32xbf16>
    %46 = vector.shape_cast %45 : vector<1x1x288x32xbf16> to vector<288x32xbf16>
    %c7 = arith.constant 7 : index
    %c0_49 = arith.constant 0 : index
    %c0_50 = arith.constant 0 : index
    %47 = vector.load %arg2[%c7, %c0_49, %c0_50] : memref<9x32x4xbf16, #tpu.memory_space<vmem>>, vector<1x32x4xbf16>
    %48 = vector.shape_cast %47 : vector<1x32x4xbf16> to vector<32x4xbf16>
    %cst_51 = arith.constant dense<0.000000e+00> : vector<288x4xf32>
    %49 = tpu.matmul %46, %48, %cst_51 {dimension_numbers = #tpu.dot_dimension_numbers<[1], [0], [0], [1], [0, 0, 1, 1], [], []>} : vector<288x32xbf16>, vector<32x4xbf16>, vector<288x4xf32> -> vector<288x4xf32>
    %50 = arith.addf %44, %49 : vector<288x4xf32>
    %c0_52 = arith.constant 0 : index
    %c0_53 = arith.constant 0 : index
    %c38 = arith.constant 38 : index
    %c0_54 = arith.constant 0 : index
    %51 = vector.load %arg1[%c0_52, %c0_53, %c38, %c0_54] : memref<1x1x326x32xbf16, #tpu.memory_space<vmem>>, vector<1x1x288x32xbf16>
    %52 = vector.shape_cast %51 : vector<1x1x288x32xbf16> to vector<288x32xbf16>
    %c8 = arith.constant 8 : index
    %c0_55 = arith.constant 0 : index
    %c0_56 = arith.constant 0 : index
    %53 = vector.load %arg2[%c8, %c0_55, %c0_56] : memref<9x32x4xbf16, #tpu.memory_space<vmem>>, vector<1x32x4xbf16>
    %54 = vector.shape_cast %53 : vector<1x32x4xbf16> to vector<32x4xbf16>
    %cst_57 = arith.constant dense<0.000000e+00> : vector<288x4xf32>
    %55 = tpu.matmul %52, %54, %cst_57 {dimension_numbers = #tpu.dot_dimension_numbers<[1], [0], [0], [1], [0, 0, 1, 1], [], []>} : vector<288x32xbf16>, vector<32x4xbf16>, vector<288x4xf32> -> vector<288x4xf32>
    %56 = arith.addf %50, %55 : vector<288x4xf32>
    %cst_58 = arith.constant 5.000000e-01 : f32
    %57 = vector.broadcast %cst_58 : f32 to vector<288x4xf32>
    %58 = arith.mulf %57, %56 : vector<288x4xf32>
    %59 = math.tanh %58 : vector<288x4xf32>
    %cst_59 = arith.constant 1.000000e+00 : f32
    %60 = vector.broadcast %cst_59 : f32 to vector<288x4xf32>
    %61 = arith.addf %59, %60 : vector<288x4xf32>
    %cst_60 = arith.constant 5.000000e-01 : f32
    %62 = vector.broadcast %cst_60 : f32 to vector<288x4xf32>
    %63 = arith.mulf %62, %61 : vector<288x4xf32>
    %c0_61 = arith.constant 0 : index
    %c0_62 = arith.constant 0 : index
    %c0_63 = arith.constant 0 : index
    %c0_64 = arith.constant 0 : index
    %64 = vector.load %arg4[%c0_61, %c0_62, %c0_63, %c0_64] : memref<1x1x288x4xf32, #tpu.memory_space<vmem>>, vector<1x1x288x4xf32>
    %65 = vector.shape_cast %64 : vector<1x1x288x4xf32> to vector<288x4xf32>
    %66 = vector.shape_cast %63 : vector<288x4xf32> to vector<1x1x288x4xf32>
    tpu.vector_store %arg4[%c0_61, %c0_62, %c0_63, %c0_64], %66 {strides = array<i32>} : memref<1x1x288x4xf32, #tpu.memory_space<vmem>>, vector<1x1x288x4xf32>,
    return
  }
  func.func @transform_0(%arg0: i32) -> (i32, i32, i32, i32) {
    %c0_i32 = arith.constant 0 : i32
    %c0_i32_0 = arith.constant 0 : i32
    %c0_i32_1 = arith.constant 0 : i32
    %c0_i32_2 = arith.constant 0 : i32
    return %c0_i32, %arg0, %c0_i32_0, %c0_i32_1 : i32, i32, i32, i32
  }
  func.func @transform_1(%arg0: i32) -> (i32, i32, i32) {
    %c0_i32 = arith.constant 0 : i32
    %c0_i32_0 = arith.constant 0 : i32
    %c0_i32_1 = arith.constant 0 : i32
    %c0_i32_2 = arith.constant 0 : i32
    return %c0_i32, %c0_i32_0, %c0_i32_1 : i32, i32, i32
  }
  func.func @transform_2(%arg0: i32) -> (i32, i32) {
    %c0_i32 = arith.constant 0 : i32
    %c0_i32_0 = arith.constant 0 : i32
    %c0_i32_1 = arith.constant 0 : i32
    return %c0_i32, %c0_i32_0 : i32, i32
  }
  func.func @transform_3(%arg0: i32) -> (i32, i32, i32, i32) {
    %c0_i32 = arith.constant 0 : i32
    %c0_i32_0 = arith.constant 0 : i32
    %c0_i32_1 = arith.constant 0 : i32
    %c0_i32_2 = arith.constant 0 : i32
    return %c0_i32, %arg0, %c0_i32_0, %c0_i32_1 : i32, i32, i32, i32
  }
}

</mosaic_0001>

<bundles_post_ra>
// kernel: vae_forward.8
= control target key start
LH: loop header
LB: loop body
LE: loop exit
PB: predicated region body
PF: predicated region fallthrough
CT: control target
= control target key end

     0   :  { %s5425_s12 = smov 0   ;;  %s6452_s0 = inlined_call_operand.vmem [shape: bf16[1,2,326,4], index: 0, kind: input, shape index: {}]   ;;  %s6453_s1 = inlined_call_operand.vmem [shape: bf16[9,4,32], index: 1, kind: input, shape index: {}]   ;;  %s6454_s2 = inlined_call_operand.vmem [shape: f32[1,32], index: 2, kind: input, shape index: {}]   ;;  %s6455_s3 = inlined_call_operand.vmem [shape: bf16[1,2,288,32], index: 3, kind: output, shape index: {}]  }
   0x1 LB: > { %s4115_s13 = sadd.s32 4294967295, %s5403_s12   ;;  %p4119_p0 = scmp.ge.s32.totalorder %s5403_s12, 1  ;;  %s5403_s12 = sphi %s5425_s12, %s13_s12  }
   0x2   : > { %p137_p1 = scmp.lt.s32.totalorder %s5403_s12, 3 }
   0x4   : > { %p138_p2 = pnand %p4119_p0, %p137_p1 }
   0x5   : > { %v215_v0 = vld [vmem:[%s6453_s1] sm:$0x3] (!%p138_p2)  ;;  %vm361_vm0 = vcmask (!%p138_p2), 1041408   ;;  %p161_p3 = scmp.lt.s32.totalorder (!%p138_p2), %s4115_s13, 1  ;;  %v4255_v2 = vld [vmem:[%s6453_s1 + $0x8] sm:$0x3] (!%p138_p2) }
   0x6   : > { %141 = sbr.rel (%p138_p2) target bundleno = 571 (0x23b), region = 32  ;;  %5286 = vmatprep.subr.msk.bf16.mxu1 (!%p138_p2), %vm361_vm0, %v215_v0  ;;  %v363_v1 = vsel (!%p138_p2), %vm361_vm0, %v215_v0, 0  ;;  %5290 = vmatprep.subr.msk.bf16.mxu0 (!%p138_p2), %vm361_vm0, %v4255_v2  ;;  %v5445_v3 = vsel (!%p138_p2), %vm361_vm0, %v4255_v2, 0  ;;  %v4275_v4 = vld [vmem:[%s6453_s1 + $0xa] sm:$0x3] (!%p138_p2)  ;;  %vm306_vm1 = vcmask (!%p138_p2), 31744  }
   0x7   : > { %4619 = vmatpush3.bf16.msra.mxu1 (!%p138_p2), %v363_v1  ;;  %v4159_v5 = vld [vmem:[%s6453_s1 + $0x2] sm:$0x3] (!%p138_p2)  ;;  %4771 = vmatpush3.bf16.msra.mxu0 (!%p138_p2), %v5445_v3  ;;  %vm1888_vm2 = vsmask.f32 (!%p138_p2), 6400  ;;  %v5466_v7 = vld [vmem:[%s6453_s1 + $0x4] sm:$0x3] (!%p138_p2) }
   0x8   : > { %5287 = vmatprep.subr.msk.bf16.mxu1 (!%p138_p2), %vm361_vm0, %v4159_v5  ;;  %5292 = vmatprep.subr.msk.bf16.mxu0 (!%p138_p2), %vm361_vm0, %v4275_v4  ;;  %v914_v9 = vsel (!%p138_p2), %vm361_vm0, %v4159_v5, 0  ;;  %v2428_v40 = vsel (!%p138_p2), %vm361_vm0, %v4275_v4, 0  ;;  %v5518_v44 = vld [vmem:[%s6453_s1 + $0xc] sm:$0x3] (!%p138_p2)  ;;  %vm2335_vm3 = vcmask (!%p138_p2), 1045504   ;;  %vm1135_vm5 = vcmask (!%p138_p2), 1046528  }
   0x9   : > { %vm710_vm4 = vsmask.f32 (!%p138_p2), 7424  ;;  %vm3088_vm6 = vsmask.f32 (!%p138_p2), 5376  ;;  %vm3535_vm7 = vcmask (!%p138_p2), 1044480   ;;  %vm4023_vm8 = vcmask (!%p138_p2), 257024  }
   0xd   : > { %s6457_s13 = smov (!%p161_p3, %s4115_s13), 1 }
   0xe   : > { %s5296_s22 = smul.u32 164, %s6457_s13 }
   0xf   : > { %s5297_s15 = smul.u32 144, %s6457_s13 }
  0x10   : > { %s5460_s25 = scalar_lea.vmem %s6452_s0, %s5296_s22 }
  0x11   : > { %v5306_v6 = vld [vmem:[%s5460_s25] sm:$0xff]   ;;  %v5307_v8 = vld [vmem:[%s5460_s25 + $0x8] sm:$0xff]   ;;  %v5480_v13 = vld [vmem:[%s5460_s25 + $0x10] sm:$0xff]   ;;  %s6309_s18 = scalar_lea.vmem %s6455_s3, %s5297_s15 }
  0x12   : > { %4620 = vmatprep.mubr.msk.bf16.mxu1 %vm306_vm1, %v5306_v6  ;;  %v1443_v10 = vld [vmem:[%s5460_s25 + $0x8] sm:$0xe]  ;;  %v5473_v11 = vld [vmem:[%s5460_s25 + $0xc] sm:$0xf]  ;;  %v5310_v14 = vld [vmem:[%s5460_s25 + $0x10] sm:$0xff]   ;;  %v1898_v17 = vshrl.u32 %v5480_v13, 16 }
  0x13   : > { %4621 = vmatmul.mubr.msk.bf16.vlgmr.msra.gmra.mrb[0].mxu1 %vm306_vm1, %v5307_v8  ;;  %v5477_v12 = vcombine.low %v1443_v10, %v5473_v11  ;;  %v1901_v18 = vshll.u32 %v5480_v13, 16  ;;  %v5491_v19 = vld [vmem:[%s5460_s25 + $0x18] sm:$0xff]   ;;  %v5495_v25 = vld [vmem:[%s5460_s25 + $0x20] sm:$0xff]   ;;  %v5503_v35 = vld [vmem:[%s5460_s25 + $0x28] sm:$0xff]  }
  0x14   : > { %4657 = vmatpush3.bf16.msra.mxu1 %v914_v9  ;;  %4624 = vmatprep.mubr.msk.bf16.mxu1 %vm306_vm1, %v5310_v14  ;;  %v1900_v22 = vrot.slane %v1898_v17, 1  ;;  %v5312_v24 = vld [vmem:[%s5460_s25 + $0x18] sm:$0xff]   ;;  %v1907_v26 = vshrl.u32 %v5491_v19, 16  ;;  %v1910_v27 = vshll.u32 %v5491_v19, 16  ;;  %v1916_v30 = vshrl.u32 %v5495_v25, 16  ;;  %v5314_v34 = vld [vmem:[%s5460_s25 + $0x20] sm:$0xff]  }
  0x15   : > { %v1890_v15 = vshrl.u32 %v5477_v12, 16  ;;  %v1893_v16 = vshll.u32 %v5477_v12, 16  ;;  %5288 = vmatprep.subr.msk.bf16.mxu1 %vm361_vm0, %v5466_v7  ;;  %v1903_v23 = vrot.slane %v1901_v18, 2  ;;  %v1919_v31 = vshll.u32 %v5495_v25, 16  ;;  %v5513_v43 = vld [vmem:[%s5460_s25 + $0x30] sm:$0xff]   ;;  %v5316_v49 = vld [vmem:[%s5460_s25 + $0x28] sm:$0xff]  }
  0x16   : > { %v1909_v32 = vrot.slane %v1907_v26, 1  ;;  %v1912_v33 = vrot.slane %v1910_v27, 2  ;;  %v1918_v37 = vrot.slane %v1916_v30, 1  ;;  %v1925_v41 = vshrl.u32 %v5503_v35, 16  ;;  %v5527_v53 = vld [vmem:[%s5460_s25 + $0x38] sm:$0xff]   ;;  %v5318_v56 = vld [vmem:[%s5460_s25 + $0x30] sm:$0xff]  }
  0x17   : > { %v1892_v20 = vrot.slane %v1890_v15, 1  ;;  %v1895_v21 = vrot.slane %v1893_v16, 2  ;;  %v1904_v29 = vor.u32 %v1903_v23, %v1900_v22  ;;  %v1921_v38 = vrot.slane %v1919_v31, 2  ;;  %v5534_v60 = vld [vmem:[%s5460_s25 + $0x40] sm:$0xff]   ;;  %v5544_v4 = vld [vmem:[%s5460_s25 + $0x48] sm:$0xff]   ;;  %v5548_v9 = vld [vmem:[%s5460_s25 + $0x50] sm:$0xff]  }
  0x18   : > { %v1913_v39 = vor.u32 %v1912_v33, %v1909_v32  ;;  %v1928_v42 = vshll.u32 %v5503_v35, 16  ;;  %v1927_v47 = vrot.slane %v1925_v41, 1  ;;  %v1934_v50 = vshrl.u32 %v5513_v43, 16  ;;  %v5320_v10 = vld [vmem:[%s5460_s25 + $0x38] sm:$0xff]   ;;  %v5322_v16 = vld [vmem:[%s5460_s25 + $0x40] sm:$0xff]   ;;  %v5324_v30 = vld [vmem:[%s5460_s25 + $0x48] sm:$0xff]  }
  0x19   : > { %v1896_v28 = vor.u32 %v1895_v21, %v1892_v20  ;;  %v1922_v45 = vor.u32 %v1921_v38, %v1918_v37  ;;  %v1937_v52 = vshll.u32 %v5513_v43, 16  ;;  %v1943_v58 = vshrl.u32 %v5527_v53, 16  ;;  %v5562_v26 = vld [vmem:[%s5460_s25 + $0x58] sm:$0xff]   ;;  %v5326_v32 = vld [vmem:[%s5460_s25 + $0x50] sm:$0xff]   ;;  %v2329_v37 = vld [vmem:[%s5460_s25 + $0x8] sm:$0xc] }
  0x1a   : > { %v1914_v46 = vsel %vm1888_vm2, %v1904_v29, %v1913_v39  ;;  %v1930_v48 = vrot.slane %v1928_v42, 2  ;;  %v1936_v55 = vrot.slane %v1934_v50, 1  ;;  %v1946_v59 = vshll.u32 %v5527_v53, 16 }
  0x1b   : > { %v1905_v36 = vsel %vm1888_vm2, %v1896_v28, %v1904_v29  ;;  %4625 = vmatmul.mubr.msk.bf16.gmra.mrb[4].mxu1 %vm306_vm1, %v5312_v24  ;;  %v1923_v51 = vsel %vm1888_vm2, %v1913_v39, %v1922_v45  ;;  %v1939_v57 = vrot.slane %v1937_v52, 2  ;;  %v1945_v62 = vrot.slane %v1943_v58, 1  ;;  %v5591_v52 = vld [vmem:[%s5460_s25 + $0x4] sm:$0xf] }
  0x1c   : > { %4772 = vmatprep.mubr.msk.bf16.mxu0 %vm306_vm1, %v1905_v36  ;;  %4628 = vmatprep.mubr.msk.bf16.mxu1 %vm306_vm1, %v5314_v34  ;;  %v1931_v54 = vor.u32 %v1930_v48, %v1927_v47  ;;  %v1948_v63 = vrot.slane %v1946_v59, 2  ;;  %v1952_v0 = vshrl.u32 %v5534_v60, 16  ;;  %v1955_v2 = vshll.u32 %v5534_v60, 16  ;;  %v5330_v47 = vld [vmem:[%s5460_s25 + $0x60] sm:$0xff]  }
  0x1d   : > { %4773 = vmatmul.mubr.msk.bf16.vlgmr.msra.gmra.mrb[0].mxu0 %vm306_vm1, %v1914_v46  ;;  %v1940_v61 = vor.u32 %v1939_v57, %v1936_v55  ;;  %v1961_v14 = vshrl.u32 %v5544_v4, 16  ;;  %v1964_v17 = vshll.u32 %v5544_v4, 16  ;;  %v1970_v20 = vshrl.u32 %v5548_v9, 16  ;;  %v5332_v55 = vld [vmem:[%s5460_s25 + $0x70] sm:$0xff]  }
  0x1e   : > { %4809 = vmatpush3.bf16.msra.mxu0 %v2428_v40  ;;  %4776 = vmatprep.mubr.msk.bf16.mxu0 %vm306_vm1, %v1923_v51  ;;  %v1932_v1 = vsel %vm1888_vm2, %v1922_v45, %v1931_v54  ;;  %v1954_v6 = vrot.slane %v1952_v0, 1  ;;  %v1957_v8 = vrot.slane %v1955_v2, 2  ;;  %v1949_v15 = vor.u32 %v1948_v63, %v1945_v62  ;;  %v5328_v45 = vld [vmem:[%s5460_s25 + $0x58] sm:$0xff]   ;;  %v578_v51 = vld [vmem:[%s5460_s25] sm:$0xf] }
  0x1f   : > { %5293 = vmatprep.subr.msk.bf16.mxu0 %vm361_vm0, %v5518_v44  ;;  %v1941_v5 = vsel %vm1888_vm2, %v1931_v54, %v1940_v61  ;;  %v1973_v21 = vshll.u32 %v5548_v9, 16  ;;  %v1963_v22 = vrot.slane %v1961_v14, 1  ;;  %v1966_v24 = vrot.slane %v1964_v17, 2  ;;  %v5333_v63 = vld [vmem:[%s5460_s25 + $0x78] sm:$0xff]   ;;  %v5334_v0 = vld [vmem:[%s5460_s25 + $0x80] sm:$0xff]  }
  0x20   : > { %v1958_v18 = vor.u32 %v1957_v8, %v1954_v6  ;;  %v1950_v23 = vsel %vm1888_vm2, %v1940_v61, %v1949_v15  ;;  %v1972_v28 = vrot.slane %v1970_v20, 1  ;;  %v1979_v33 = vshrl.u32 %v5562_v26, 16  ;;  %v5607_v61 = vld [vmem:[%s5460_s25 + $0x8] sm:$0xff]   ;;  %v5625_v8 = vld [vmem:[%s5460_s25 + $0x10] sm:$0xff]  }
  0x21   : > { %v1975_v29 = vrot.slane %v1973_v21, 2  ;;  %v1967_v31 = vor.u32 %v1966_v24, %v1963_v22  ;;  %v1982_v34 = vshll.u32 %v5562_v26, 16  ;;  %v4276_v42 = vcombine.low %v2329_v37, %v5473_v11 }
  0x22   : > { %v1959_v27 = vsel %vm1888_vm2, %v1949_v15, %v1958_v18  ;;  %v1981_v39 = vrot.slane %v1979_v33, 1  ;;  %v2339_v54 = vrot.slane %v5491_v19, 2  ;;  %v4160_v57 = vcombine.low %v578_v51, %v5591_v52  ;;  %v5631_v15 = vld [vmem:[%s5460_s25 + $0x18] sm:$0xff]  }
  0x23   : > { %4629 = vmatmul.mubr.msk.bf16.gmra.mrb[8].mxu1 %vm306_vm1, %v5316_v49  ;;  %v1976_v36 = vor.u32 %v1975_v29, %v1972_v28  ;;  %v1968_v38 = vsel %vm1888_vm2, %v1958_v18, %v1967_v31  ;;  %v1984_v40 = vrot.slane %v1982_v34, 2  ;;  %v2336_v48 = vrot.slane %v4276_v42, 2  ;;  %v5645_v28 = vld [vmem:[%s5460_s25 + $0x20] sm:$0xff]  }
  0x24   : > { %4632 = vmatprep.mubr.msk.bf16.mxu1 %vm306_vm1, %v5318_v56  ;;  %v2337_v49 = vrot.slane %v5480_v13, 2  ;;  %v5331_v13 = vld [vmem:[%s5460_s25 + $0x68] sm:$0xff]   ;;  %v2341_v56 = vrot.slane %v5495_v25, 2  ;;  %v2867_v59 = vsel %vm361_vm0, %v5518_v44, 0  ;;  %v714_v62 = vshll.u32 %v4160_v57, 16  ;;  %v5665_v42 = vld [vmem:[%s5460_s25 + $0x60] sm:$0xff]  }
  0x25   : > { %4777 = vmatmul.mubr.msk.bf16.gmra.mrb[4].mxu0 %vm306_vm1, %v1932_v1  ;;  %v1977_v41 = vsel %vm1888_vm2, %v1967_v31, %v1976_v36  ;;  %v5580_v46 = vor.u32 %v1984_v40, %v1981_v39  ;;  %v5612_v25 = vld [vmem:[%s6453_s1 + $0xe] sm:$0x3]  ;;  %v2343_v44 = vrot.slane %v5503_v35, 2  ;;  %v2345_v1 = vrot.slane %v5513_v43, 2 }
  0x26   : > { %4780 = vmatprep.mubr.msk.bf16.mxu0 %vm306_vm1, %v1941_v5  ;;  %v2338_v11 = vsel %vm2335_vm3, %v2336_v48, %v2337_v49  ;;  %v2340_v58 = vsel %vm2335_vm3, %v2337_v49, %v2339_v54  ;;  %v2342_v19 = vsel %vm2335_vm3, %v2339_v54, %v2341_v56  ;;  %v712_v2 = vshrl.u32 %v4160_v57, 16 }
  0x27   : > { %v1986_v50 = vsel %vm1888_vm2, %v1976_v36, %v5580_v46  ;;  %v716_v5 = vrot.slane %v714_v62, 1  ;;  %v719_v6 = vshll.u32 %v5607_v61, 16  ;;  %v2346_v35 = vsel %vm2335_vm3, %v2343_v44, %v2345_v1 }
  0x28   : > { %v727_v17 = vshll.u32 %v5625_v8, 16  ;;  %v2347_v18 = vrot.slane %v5527_v53, 2  ;;  %v723_v20 = vshrl.u32 %v5607_v61, 16  ;;  %v2349_v21 = vrot.slane %v5534_v60, 2 }
  0x29   : > { %v717_v14 = vor.u32 %v716_v5, %v712_v2  ;;  %v721_v43 = vrot.slane %v719_v6, 1  ;;  %v735_v24 = vshll.u32 %v5631_v15, 16  ;;  %v739_v33 = vshrl.u32 %v5631_v15, 16  ;;  %v5707_v6 = vld [vmem:[%s5460_s25 + $0x68] sm:$0xff]  }
  0x2a   : > { %v2348_v29 = vsel %vm2335_vm3, %v2345_v1, %v2347_v18  ;;  %v2350_v53 = vsel %vm2335_vm3, %v2347_v18, %v2349_v21  ;;  %v743_v34 = vshll.u32 %v5645_v28, 16  ;;  %v1228_v36 = vsel %vm361_vm0, %v5466_v7, 0  ;;  %v5344_v7 = vld [vmem:[%s5460_s25 + $0x30] sm:$0xff]  }
  0x2b   : > { %4633 = vmatmul.mubr.msk.bf16.gmra.mrb[12].mxu1 %vm306_vm1, %v5320_v10  ;;  %v2344_v10 = vsel %vm2335_vm3, %v2341_v56, %v2343_v44  ;;  %v722_v22 = vsel %vm710_vm4, %v717_v14, %v721_v43  ;;  %v737_v31 = vrot.slane %v735_v24, 1  ;;  %v2351_v37 = vrot.slane %v5544_v4, 2  ;;  %v5732_v24 = vld [vmem:[%s5460_s25 + $0x50] sm:$0xff]  }
  0x2c   : > { %4636 = vmatprep.mubr.msk.bf16.mxu1 %vm306_vm1, %v5322_v16  ;;  %v5335_v16 = vld [vmem:[%s5460_s25 + $0x88] sm:$0xff]   ;;  %v2353_v39 = vrot.slane %v5548_v9, 2  ;;  %v1137_v48 = vrot.slane %v5607_v61, 1  ;;  %v745_v49 = vrot.slane %v743_v34, 1  ;;  %v1139_v51 = vrot.slane %v5625_v8, 1 }
  0x2d   : > { %4781 = vmatmul.mubr.msk.bf16.gmra.mrb[8].mxu0 %vm306_vm1, %v1950_v23  ;;  %v731_v23 = vshrl.u32 %v5625_v8, 16  ;;  %v741_v4 = vor.u32 %v739_v33, %v737_v31  ;;  %v2352_v9 = vsel %vm2335_vm3, %v2349_v21, %v2351_v37  ;;  %v1141_v56 = vrot.slane %v5631_v15, 1  ;;  %v5710_v8 = vld [vmem:[%s5460_s25 + $0x70] sm:$0xff]  }
  0x2e   : > { %4784 = vmatprep.mubr.msk.bf16.mxu0 %vm306_vm1, %v1959_v27  ;;  %v729_v27 = vrot.slane %v727_v17, 1  ;;  %v2354_v54 = vsel %vm2335_vm3, %v2351_v37, %v2353_v39  ;;  %v759_v57 = vshll.u32 %v5344_v7, 16  ;;  %v763_v44 = vshrl.u32 %v5344_v7, 16  ;;  %v5749_v37 = vld [vmem:[%s5460_s25 + $0x60] sm:$0xff]  }
  0x2f   : > { %v5690_v62 = vsel %vm1135_vm5, %v1139_v51, %v1141_v56  ;;  %v1143_v2 = vrot.slane %v5645_v28, 1  ;;  %v2359_v33 = vrot.slane %v5707_v6, 2  ;;  %v2361_v34 = vrot.slane %v5710_v8, 2 }
  0x30   : > { %v733_v60 = vor.u32 %v731_v23, %v729_v27  ;;  %v761_v14 = vrot.slane %v759_v57, 1  ;;  %v5785_v57 = vld [vmem:[%s5460_s25 + $0x80] sm:$0xff]  }
  0x31   : > { %v5715_v15 = vsel %vm1135_vm5, %v1141_v56, %v1143_v2  ;;  %v2362_v56 = vsel %vm2335_vm3, %v2359_v33, %v2361_v34 }
  0x32   : > { %v738_v40 = vsel %vm710_vm4, %v733_v60, %v737_v31  ;;  %v5739_v60 = vld [vmem:[%s5460_s25 + $0x58] sm:$0xff]  }
  0x33   : > { %4637 = vmatmul.mubr.msk.bf16.gmra.mrb[16].mxu1 %vm306_vm1, %v5324_v30  ;;  %v725_v30 = vor.u32 %v723_v20, %v721_v43  ;;  %v5348_v43 = vld [vmem:[%s5460_s25 + $0x40] sm:$0xff]  }
  0x34   : > { %4640 = vmatprep.mubr.msk.bf16.mxu1 %vm306_vm1, %v5326_v32  ;;  %v5651_v32 = vld [vmem:[%s5460_s25 + $0x28] sm:$0xff]  }
  0x35   : > { %4785 = vmatmul.mubr.msk.bf16.gmra.mrb[12].mxu0 %vm306_vm1, %v1968_v38  ;;  %v730_v38 = vsel %vm710_vm4, %v725_v30, %v729_v27  ;;  %v755_v61 = vshrl.u32 %v5651_v32, 16  ;;  %v1151_v27 = vrot.slane %v5348_v43, 1 }
  0x36   : > { %4788 = vmatprep.mubr.msk.bf16.mxu0 %vm306_vm1, %v1977_v41  ;;  %v2355_v41 = vrot.slane %v5562_v26, 2  ;;  %v5676_v26 = vld [vmem:[%s5460_s25 + $0x38] sm:$0xff]  }
  0x37   : > { %v1149_v20 = vrot.slane %v5676_v26, 1 }
  0x38   : > { %v2356_v21 = vsel %vm2335_vm3, %v2353_v39, %v2355_v41 }
  0x39   : > { %v5742_v31 = vsel %vm1135_vm5, %v1149_v20, %v1151_v27 }
  0x3b   : > { %4641 = vmatmul.mubr.msk.bf16.gmra.mrb[20].mxu1 %vm306_vm1, %v5328_v45  ;;  %v747_v45 = vshrl.u32 %v5645_v28, 16  ;;  %v765_v28 = vor.u32 %v763_v44, %v761_v14 }
  0x3c   : > { %4644 = vmatprep.mubr.msk.bf16.mxu1 %vm306_vm1, %v5330_v47  ;;  %v751_v47 = vshll.u32 %v5651_v32, 16 }
  0x3d   : > { %4789 = vmatmul.mubr.msk.bf16.gmra.mrb[16].mxu0 %vm306_vm1, %v1986_v50  ;;  %v1129_v50 = vld [vmem:[%s5460_s25] sm:$0xe] }
  0x3e   : > { %4810 = vmatprep.mubr.msk.bf16.mxu0 %vm306_vm1, %v2338_v11  ;;  %v4198_v11 = vcombine.low %v1129_v50, %v5591_v52  ;;  %v2357_v52 = vrot.slane %v5665_v42, 2 }
  0x43   : > { %4645 = vmatmul.mubr.msk.bf16.gmra.mrb[24].mxu1 %vm306_vm1, %v5331_v13  ;;  %v749_v13 = vor.u32 %v747_v45, %v745_v49  ;;  %v1157_v45 = vrot.slane %v5739_v60, 1 }
  0x44   : > { %4648 = vmatprep.mubr.msk.bf16.mxu1 %vm306_vm1, %v5332_v55  ;;  %v753_v55 = vrot.slane %v751_v47, 1 }
  0x45   : > { %4811 = vmatmul.mubr.msk.bf16.vlgmr.msra.gmra.mrb[0].mxu0 %vm306_vm1, %v2340_v58  ;;  %v1136_v58 = vrot.slane %v4198_v11, 1 }
  0x46   : > { %4847 = vmatpush3.bf16.msra.mxu0 %v2867_v59  ;;  %4814 = vmatprep.mubr.msk.bf16.mxu0 %vm306_vm1, %v2342_v19  ;;  %v5683_v59 = vsel %vm1135_vm5, %v1137_v48, %v1139_v51  ;;  %v746_v19 = vsel %vm710_vm4, %v741_v4, %v745_v49  ;;  %v754_v5 = vsel %vm710_vm4, %v749_v13, %v753_v55  ;;  %v1159_v4 = vrot.slane %v5749_v37, 1  ;;  %v5765_v49 = vld [vmem:[%s5460_s25 + $0x68] sm:$0xff]   ;;  %v5780_v13 = vld [vmem:[%s5460_s25 + $0x70] sm:$0xff]  }
  0x47   : > { %5294 = vmatprep.subr.msk.bf16.mxu0 %vm361_vm0, %v5612_v25  ;;  %v5700_v1 = vsel %vm1135_vm5, %v1136_v58, %v1137_v48  ;;  %v757_v23 = vor.u32 %v755_v61, %v753_v55  ;;  %v2360_v51 = vsel %vm2335_vm3, %v2357_v52, %v2359_v33  ;;  %v1161_v55 = vrot.slane %v5765_v49, 1  ;;  %v5788_v61 = vld [vmem:[%s5460_s25 + $0x78] sm:$0xff]  }
  0x48   : > { %v5775_v11 = vsel %vm1135_vm5, %v1157_v45, %v1159_v4 }
  0x49   : > { %v762_v39 = vsel %vm710_vm4, %v757_v23, %v761_v14  ;;  %v5791_v44 = vsel %vm1135_vm5, %v1159_v4, %v1161_v55  ;;  %v799_v23 = vshll.u32 %v5739_v60, 16 }
  0x4b   : > { %4649 = vmatmul.mubr.msk.bf16.gmra.mrb[28].mxu1 %vm306_vm1, %v5333_v63  ;;  %v5695_v63 = vld [vmem:[%s6453_s1 + $0x6] sm:$0x3] }
  0x4c   : > { %4652 = vmatprep.mubr.msk.bf16.mxu1 %vm306_vm1, %v5334_v0  ;;  %v767_v0 = vshll.u32 %v5676_v26, 16 }
  0x4d   : > { %4815 = vmatmul.mubr.msk.bf16.gmra.mrb[4].mxu0 %vm306_vm1, %v2344_v10  ;;  %v1145_v10 = vrot.slane %v5651_v32, 1  ;;  %v1155_v32 = vrot.slane %v5732_v24, 1 }
  0x4e   : > { %4818 = vmatprep.mubr.msk.bf16.mxu0 %vm306_vm1, %v2346_v35  ;;  %v1147_v35 = vrot.slane %v5344_v7, 1  ;;  %v779_v7 = vshrl.u32 %v5348_v43, 16 }
  0x4f   : > { %v5722_v17 = vsel %vm1135_vm5, %v1143_v2, %v1145_v10  ;;  %v5768_v50 = vsel %vm1135_vm5, %v1155_v32, %v1157_v45  ;;  %v791_v2 = vshll.u32 %v5732_v24, 16 }
  0x50   : > { %v5725_v18 = vsel %vm1135_vm5, %v1145_v10, %v1147_v35  ;;  %v5735_v30 = vsel %vm1135_vm5, %v1147_v35, %v1149_v20  ;;  %v5801_v35 = vld [vmem:[%s5460_s25 + $0x80] sm:$0xff]   ;;  %v2365_v20 = vrot.slane %v5785_v57, 2 }
  0x53   : > { %4653 = vmatmul.mubr.msk.bf16.gmra.mrb[32].mxu1 %vm306_vm1, %v5335_v16  ;;  %v5719_v16 = vld [vmem:[%s5460_s25 + $0x48] sm:$0xff]  }
  0x54   : > { %4658 = vmatprep.mubr.msk.bf16.mxu1 %vm306_vm1, %v722_v22  ;;  %v2358_v22 = vsel %vm2335_vm3, %v2355_v41, %v2357_v52  ;;  %v783_v48 = vshll.u32 %v5719_v16, 16  ;;  %v1163_v52 = vrot.slane %v5780_v13, 1  ;;  %v787_v10 = vshrl.u32 %v5719_v16, 16 }
  0x55   : > { %4819 = vmatmul.mubr.msk.bf16.gmra.mrb[8].mxu0 %vm306_vm1, %v2348_v29  ;;  %v769_v29 = vrot.slane %v767_v0, 1 }
  0x56   : > { %4822 = vmatprep.mubr.msk.bf16.mxu0 %vm306_vm1, %v2350_v53  ;;  %v1153_v53 = vrot.slane %v5719_v16, 1  ;;  %v5804_v14 = vsel %vm1135_vm5, %v1161_v55, %v1163_v52  ;;  %v803_v55 = vshrl.u32 %v5739_v60, 16  ;;  %v5860_v60 = vld [vmem:[%s5460_s25 + $0x98] ss:$0 sps:$4 sm:$0x33]  }
  0x57   : > { %v770_v47 = vsel %vm710_vm4, %v765_v28, %v769_v29  ;;  %v1167_v28 = vrot.slane %v5801_v35, 1 }
  0x58   : > { %v5758_v41 = vsel %vm1135_vm5, %v1153_v53, %v1155_v32 }
  0x5b   : > { %4659 = vmatmul.mubr.msk.bf16.vlgmr.msra.gmra.mrb[0].mxu1 %vm306_vm1, %v730_v38  ;;  %v5752_v38 = vsel %vm1135_vm5, %v1151_v27, %v1153_v53  ;;  %v5812_v27 = vld [vmem:[%s5460_s25 + $0x88] sm:$0xff]   ;;  %v793_v53 = vrot.slane %v791_v2, 1  ;;  %v815_v2 = vshll.u32 %v5765_v49, 16 }
  0x5c   : > { %4662 = vmatprep.mubr.msk.bf16.mxu1 %vm306_vm1, %v738_v40  ;;  %4695 = vmatpush3.bf16.msra.mxu1 %v1228_v36  ;;  %v775_v36 = vshll.u32 %v5348_v43, 16  ;;  %v771_v40 = vshrl.u32 %v5676_v26, 16  ;;  %v1165_v43 = vrot.slane %v5788_v61, 1 }
  0x5d   : > { %4823 = vmatmul.mubr.msk.bf16.gmra.mrb[12].mxu0 %vm306_vm1, %v2352_v9  ;;  %5289 = vmatprep.subr.msk.bf16.mxu1 %vm361_vm0, %v5695_v63  ;;  %v5772_v9 = vld [vmem:[%s5460_s25 + $0x78] sm:$0xff]  }
  0x5e   : > { %4826 = vmatprep.mubr.msk.bf16.mxu0 %vm306_vm1, %v2354_v54  ;;  %v777_v26 = vrot.slane %v775_v36, 1  ;;  %v773_v54 = vor.u32 %v771_v40, %v769_v29  ;;  %v2363_v0 = vrot.slane %v5772_v9, 2  ;;  %v5815_v16 = vsel %vm1135_vm5, %v1163_v52, %v1165_v43  ;;  %v5820_v29 = vld [vmem:[%s5460_s25 + $0x88] sm:$0xff]   ;;  %v5828_v36 = vld [vmem:[%s5460_s25 + $0x90] ss:$0 sps:$4 sm:$0x11]  }
  0x5f   : > { %v1169_v40 = vrot.slane %v5812_v27, 1  ;;  %v2367_v4 = vrot.slane %v5820_v29, 2  ;;  %v5852_v52 = vld [vmem:[%s5460_s25 + $0x14] sm:$0xf] }
  0x60   : > { %v781_v58 = vor.u32 %v779_v7, %v777_v26  ;;  %v2364_v32 = vsel %vm2335_vm3, %v2361_v34, %v2363_v0  ;;  %v2366_v45 = vsel %vm2335_vm3, %v2363_v0, %v2365_v20  ;;  %v801_v7 = vrot.slane %v799_v23, 1  ;;  %v5867_v23 = vld [vmem:[%s5460_s25 + $0x18] sm:$0xff]  }
  0x61   : > { %v5836_v34 = vsel %vm1135_vm5, %v1167_v28, %v1169_v40  ;;  %v811_v0 = vshrl.u32 %v5749_v37, 16 }
  0x63   : > { %4663 = vmatmul.mubr.msk.bf16.gmra.mrb[4].mxu1 %vm306_vm1, %v746_v19  ;;  %v785_v19 = vrot.slane %v783_v48, 1  ;;  %v1171_v48 = vrot.slane %v5828_v36, 1 }
  0x64   : > { %4666 = vmatprep.mubr.msk.bf16.mxu1 %vm306_vm1, %v754_v5  ;;  %v778_v5 = vsel %vm710_vm4, %v773_v54, %v777_v26  ;;  %v807_v26 = vshll.u32 %v5749_v37, 16 }
  0x65   : > { %4827 = vmatmul.mubr.msk.bf16.gmra.mrb[16].mxu0 %vm306_vm1, %v2356_v21  ;;  %v786_v21 = vsel %vm710_vm4, %v781_v58, %v785_v19  ;;  %v789_v33 = vor.u32 %v787_v10, %v785_v19  ;;  %v2643_v19 = vld [vmem:[%s5460_s25 + $0x10] sm:$0xc]  ;;  %v2368_v10 = vsel %vm2335_vm3, %v2365_v20, %v2367_v4  ;;  %v2371_v20 = vrot.slane %v5860_v60, 2 }
  0x66   : > { %4830 = vmatprep.mubr.msk.bf16.mxu0 %vm306_vm1, %v2358_v22  ;;  %v795_v22 = vshrl.u32 %v5732_v24, 16  ;;  %v5825_v24 = vld [vmem:[%s5460_s25 + $0x90] sm:$0xff]  }
  0x67   : > { %v2369_v54 = vrot.slane %v5825_v24, 2 }
  0x6b   : > { %4667 = vmatmul.mubr.msk.bf16.gmra.mrb[8].mxu1 %vm306_vm1, %v762_v39  ;;  %v5831_v39 = vsel %vm1135_vm5, %v1165_v43, %v1167_v28  ;;  %v805_v43 = vor.u32 %v803_v55, %v801_v7  ;;  %v817_v28 = vrot.slane %v815_v2, 1 }
  0x6c   : > { %4670 = vmatprep.mubr.msk.bf16.mxu1 %vm306_vm1, %v770_v47  ;;  %v797_v47 = vor.u32 %v795_v22, %v793_v53  ;;  %v2370_v22 = vsel %vm2335_vm3, %v2367_v4, %v2369_v54 }
  0x6d   : > { %4831 = vmatmul.mubr.msk.bf16.gmra.mrb[20].mxu0 %vm306_vm1, %v2360_v51  ;;  %v794_v51 = vsel %vm710_vm4, %v789_v33, %v793_v53  ;;  %v823_v53 = vshll.u32 %v5780_v13, 16 }
  0x6e   : > { %4834 = vmatprep.mubr.msk.bf16.mxu0 %vm306_vm1, %v2362_v56  ;;  %v5847_v56 = vsel %vm1135_vm5, %v1169_v40, %v1171_v48  ;;  %v802_v58 = vsel %vm710_vm4, %v797_v47, %v801_v7  ;;  %v819_v40 = vshrl.u32 %v5765_v49, 16  ;;  %v827_v7 = vshrl.u32 %v5780_v13, 16 }
  0x6f   : > { %v831_v48 = vshll.u32 %v5788_v61, 16  ;;  %v825_v4 = vrot.slane %v823_v53, 1  ;;  %v839_v13 = vshll.u32 %v5801_v35, 16 }
  0x70   : > { %v821_v55 = vor.u32 %v819_v40, %v817_v28  ;;  %v5910_v40 = vld [vmem:[%s5460_s25 + $0x38] sm:$0xff]  }
  0x72   : > { %v826_v2 = vsel %vm710_vm4, %v821_v55, %v825_v4 }
  0x73   : > { %4671 = vmatmul.mubr.msk.bf16.gmra.mrb[12].mxu1 %vm306_vm1, %v778_v5  ;;  %v809_v5 = vrot.slane %v807_v26, 1  ;;  %v2372_v26 = vsel %vm2335_vm3, %v2369_v54, %v2371_v20  ;;  %v5904_v20 = vld [vmem:[%s5460_s25 + $0x30] sm:$0xff]  }
  0x74   : > { %4674 = vmatprep.mubr.msk.bf16.mxu1 %vm306_vm1, %v786_v21  ;;  %v5863_v21 = vcombine.low %v2643_v19, %v5852_v52  ;;  %v829_v19 = vor.u32 %v827_v7, %v825_v4  ;;  %v5915_v7 = vld [vmem:[%s6453_s1 + $0x10] sm:$0x3]  ;;  %v855_v4 = vshll.u32 %v5828_v36, 16 }
  0x75   : > { %4835 = vmatmul.mubr.msk.bf16.gmra.mrb[24].mxu0 %vm306_vm1, %v2364_v32  ;;  %v813_v37 = vor.u32 %v811_v0, %v809_v5  ;;  %v810_v32 = vsel %vm710_vm4, %v805_v43, %v809_v5  ;;  %v833_v0 = vrot.slane %v831_v48, 1  ;;  %v835_v5 = vshrl.u32 %v5788_v61, 16 }
  0x76   : > { %4838 = vmatprep.mubr.msk.bf16.mxu0 %vm306_vm1, %v2366_v45  ;;  %v2775_v33 = vrot.slane %v5863_v21, 2  ;;  %v2776_v45 = vrot.slane %v5867_v23, 2  ;;  %v3314_v61 = vsel %vm361_vm0, %v5612_v25, 0  ;;  %v2782_v25 = vrot.slane %v5904_v20, 2 }
  0x77   : > { %v818_v47 = vsel %vm710_vm4, %v813_v37, %v817_v28  ;;  %v834_v43 = vsel %vm710_vm4, %v829_v19, %v833_v0  ;;  %v847_v37 = vshll.u32 %v5812_v27, 16  ;;  %v841_v28 = vrot.slane %v839_v13, 1  ;;  %v5931_v19 = vld [vmem:[%s5460_s25 + $0x40] sm:$0xff]   ;;  %v5935_v13 = vld [vmem:[%s5460_s25 + $0x48] sm:$0xff]  }
  0x78   : > { %v2777_v49 = vsel %vm2335_vm3, %v2775_v33, %v2776_v45  ;;  %v851_v48 = vshrl.u32 %v5812_v27, 16 }
  0x7b   : > { %4675 = vmatmul.mubr.msk.bf16.gmra.mrb[16].mxu1 %vm306_vm1, %v794_v51  ;;  %v5884_v51 = vld [vmem:[%s5460_s25 + $0x20] sm:$0xff]  }
  0x7c   : > { %4678 = vmatprep.mubr.msk.bf16.mxu1 %vm306_vm1, %v802_v58  ;;  %v5888_v58 = vld [vmem:[%s5460_s25 + $0x28] sm:$0xff]   ;;  %v2778_v54 = vrot.slane %v5884_v51, 2 }
  0x7d   : > { %4839 = vmatmul.mubr.msk.bf16.gmra.mrb[28].mxu0 %vm306_vm1, %v2368_v10  ;;  %v2780_v10 = vrot.slane %v5888_v58, 2 }
  0x7e   : > { %4842 = vmatprep.mubr.msk.bf16.mxu0 %vm306_vm1, %v2370_v22  ;;  %v843_v22 = vshrl.u32 %v5801_v35, 16  ;;  %v2779_v53 = vsel %vm2335_vm3, %v2776_v45, %v2778_v54 }
  0x7f   : > { %v2781_v33 = vsel %vm2335_vm3, %v2778_v54, %v2780_v10  ;;  %v2786_v54 = vrot.slane %v5931_v19, 2 }
  0x80   : > { %v845_v35 = vor.u32 %v843_v22, %v841_v28 }
  0x83   : > { %4679 = vmatmul.mubr.msk.bf16.gmra.mrb[20].mxu1 %vm306_vm1, %v810_v32  ;;  %v837_v32 = vor.u32 %v835_v5, %v833_v0  ;;  %v857_v0 = vrot.slane %v855_v4, 1  ;;  %v2788_v5 = vrot.slane %v5935_v13, 2 }
  0x84   : > { %4682 = vmatprep.mubr.msk.bf16.mxu1 %vm306_vm1, %v818_v47  ;;  %v849_v47 = vrot.slane %v847_v37, 1  ;;  %v5951_v37 = vld [vmem:[%s5460_s25 + $0x58] sm:$0xff]  }
  0x85   : > { %4843 = vmatmul.mubr.msk.bf16.gmra.mrb[32].mxu0 %vm306_vm1, %v2372_v26  ;;  %v842_v45 = vsel %vm710_vm4, %v837_v32, %v841_v28  ;;  %v2784_v26 = vrot.slane %v5910_v40, 2  ;;  %v2789_v22 = vsel %vm2335_vm3, %v2786_v54, %v2788_v5  ;;  %v1667_v32 = vsel %vm361_vm0, %v5695_v63, 0  ;;  %v5386_v63 = vld [vmem:[%s6453_s1 + $0x8] sm:$0x3] }
  0x86   : > { %4848 = vmatprep.mubr.msk.bf16.mxu0 %vm306_vm1, %v2777_v49  ;;  %v850_v55 = vsel %vm710_vm4, %v845_v35, %v849_v47  ;;  %v2783_v49 = vsel %vm2335_vm3, %v2780_v10, %v2782_v25  ;;  %v853_v27 = vor.u32 %v851_v48, %v849_v47  ;;  %v5969_v35 = vld [vmem:[%s5460_s25 + $0x68] sm:$0xff]   ;;  %v5989_v48 = vld [vmem:[%s5460_s25 + $0x78] sm:$0xff]  }
  0x87   : > { %v2785_v36 = vsel %vm2335_vm3, %v2782_v25, %v2784_v26  ;;  %v2787_v10 = vsel %vm2335_vm3, %v2784_v26, %v2786_v54  ;;  %v5985_v25 = vld [vmem:[%s5460_s25 + $0x70] sm:$0xff]   ;;  %v6001_v26 = vld [vmem:[%s5460_s25 + $0x80] sm:$0xff]  }
  0x88   : > { %v2798_v4 = vrot.slane %v5985_v25, 2 }
  0x8b   : > { %4683 = vmatmul.mubr.msk.bf16.gmra.mrb[24].mxu1 %vm306_vm1, %v826_v2  ;;  %v858_v2 = vsel %vm710_vm4, %v853_v27, %v857_v0  ;;  %v2802_v27 = vrot.slane %v6001_v26, 2 }
  0x8c   : > { %4686 = vmatprep.mubr.msk.bf16.mxu1 %vm306_vm1, %v834_v43  ;;  %v5947_v43 = vld [vmem:[%s5460_s25 + $0x50] sm:$0xff]  }
  0x8d   : > { %4849 = vmatmul.mubr.msk.bf16.vlgmr.msra.gmra.mrb[0].mxu0 %vm306_vm1, %v2779_v53  ;;  %v2790_v28 = vrot.slane %v5947_v43, 2  ;;  %v2792_v53 = vrot.slane %v5951_v37, 2 }
  0x8e   : > { %4885 = vmatpush3.bf16.msra.mxu0 %v3314_v61  ;;  %4852 = vmatprep.mubr.msk.bf16.mxu0 %vm306_vm1, %v2781_v33  ;;  %v5965_v61 = vld [vmem:[%s5460_s25 + $0x60] sm:$0xff]  }
  0x8f   : > { %5295 = vmatprep.subr.msk.bf16.mxu0 %vm361_vm0, %v5915_v7  ;;  %v2793_v33 = vsel %vm2335_vm3, %v2790_v28, %v2792_v53 }
  0x93   : > { %4687 = vmatmul.mubr.msk.bf16.gmra.mrb[28].mxu1 %vm306_vm1, %v842_v45 }
  0x94   : > { %4690 = vmatprep.mubr.msk.bf16.mxu1 %vm306_vm1, %v850_v55 }
  0x95   : > { %4853 = vmatmul.mubr.msk.bf16.gmra.mrb[4].mxu0 %vm306_vm1, %v2783_v49  ;;  %v6005_v49 = vld [vmem:[%s5460_s25 + $0x88] sm:$0xff]  }
  0x96   : > { %4856 = vmatprep.mubr.msk.bf16.mxu0 %vm306_vm1, %v2785_v36  ;;  %v2804_v0 = vrot.slane %v6005_v49, 2  ;;  %v6020_v36 = vld [vmem:[%s5460_s25 + $0x98] sm:$0xff]  }
  0x98   : > { %v2805_v54 = vsel %vm2335_vm3, %v2802_v27, %v2804_v0 }
  0x9b   : > { %4691 = vmatmul.mubr.msk.bf16.gmra.mrb[32].mxu1 %vm306_vm1, %v858_v2 }
  0x9c   : > { %4696 = vmatprep.mubr.msk.bf16.mxu1 %vm306_vm1, %v5700_v1  ;;  %v2791_v1 = vsel %vm2335_vm3, %v2788_v5, %v2790_v28  ;;  %v3090_v5 = vshrl.u32 %v5863_v21, 16 }
  0x9d   : > { %4857 = vmatmul.mubr.msk.bf16.gmra.mrb[8].mxu0 %vm306_vm1, %v2787_v10  ;;  %v3093_v10 = vshll.u32 %v5863_v21, 16 }
  0x9e   : > { %4860 = vmatprep.mubr.msk.bf16.mxu0 %vm306_vm1, %v2789_v22  ;;  %v3101_v22 = vshll.u32 %v5867_v23, 16 }
  0xa3   : > { %4697 = vmatmul.mubr.msk.bf16.vlgmr.msra.gmra.mrb[0].mxu1 %vm306_vm1, %v5683_v59  ;;  %v2794_v59 = vrot.slane %v5965_v61, 2 }
  0xa4   : > { %4700 = vmatprep.mubr.msk.bf16.mxu1 %vm306_vm1, %v5690_v62  ;;  %4733 = vmatpush3.bf16.msra.mxu1 %v1667_v32  ;;  %v2796_v62 = vrot.slane %v5969_v35, 2  ;;  %v5382_v32 = vld [vmem:[%s5460_s25 + $0xa0] ss:$0 sps:$4 sm:$0x33]  }
  0xa5   : > { %5291 = vmatprep.subr.msk.bf16.mxu1 %vm361_vm0, %v5386_v63  ;;  %4861 = vmatmul.mubr.msk.bf16.gmra.mrb[12].mxu0 %vm306_vm1, %v2791_v1  ;;  %v2795_v47 = vsel %vm2335_vm3, %v2792_v53, %v2794_v59  ;;  %v3092_v1 = vrot.slane %v3090_v5, 2  ;;  %v2810_v21 = vrot.slane %v5382_v32, 2 }
  0xa6   : > { %4864 = vmatprep.mubr.msk.bf16.mxu0 %vm306_vm1, %v2793_v33  ;;  %v2797_v45 = vsel %vm2335_vm3, %v2794_v59, %v2796_v62  ;;  %v3095_v33 = vrot.slane %v3093_v10, 3  ;;  %v3103_v59 = vrot.slane %v3101_v22, 3 }
  0xab   : > { %4701 = vmatmul.mubr.msk.bf16.gmra.mrb[4].mxu1 %vm306_vm1, %v5715_v15  ;;  %v2800_v15 = vrot.slane %v5989_v48, 2 }
  0xac   : > { %4704 = vmatprep.mubr.msk.bf16.mxu1 %vm306_vm1, %v5722_v17  ;;  %v2799_v17 = vsel %vm2335_vm3, %v2796_v62, %v2798_v4  ;;  %v3107_v62 = vshrl.u32 %v5884_v51, 16 }
  0xad   : > { %4865 = vmatmul.mubr.msk.bf16.gmra.mrb[16].mxu0 %vm306_vm1, %v2795_v47  ;;  %v2801_v55 = vsel %vm2335_vm3, %v2798_v4, %v2800_v15  ;;  %v3096_v47 = vor.u32 %v3095_v33, %v3092_v1  ;;  %v3116_v4 = vshrl.u32 %v5888_v58, 16  ;;  %v3143_v33 = vshrl.u32 %v5931_v19, 16 }
  0xae   : > { %4868 = vmatprep.mubr.msk.bf16.mxu0 %vm306_vm1, %v2797_v45 }
  0xb3   : > { %4705 = vmatmul.mubr.msk.bf16.gmra.mrb[8].mxu1 %vm306_vm1, %v5725_v18  ;;  %v2803_v18 = vsel %vm2335_vm3, %v2800_v15, %v2802_v27 }
  0xb4   : > { %4708 = vmatprep.mubr.msk.bf16.mxu1 %vm306_vm1, %v5735_v30  ;;  %v6017_v30 = vld [vmem:[%s5460_s25 + $0x90] sm:$0xff]  }
  0xb5   : > { %4869 = vmatmul.mubr.msk.bf16.gmra.mrb[20].mxu0 %vm306_vm1, %v2799_v17  ;;  %v2806_v2 = vrot.slane %v6017_v30, 2  ;;  %v3109_v17 = vrot.slane %v3107_v62, 2  ;;  %v3145_v62 = vrot.slane %v3143_v33, 2 }
  0xb6   : > { %4872 = vmatprep.mubr.msk.bf16.mxu0 %vm306_vm1, %v2801_v55 }
  0xb7   : > { %v2807_v28 = vsel %vm2335_vm3, %v2804_v0, %v2806_v2  ;;  %v3118_v0 = vrot.slane %v3116_v4, 2 }
  0xbb   : > { %4709 = vmatmul.mubr.msk.bf16.gmra.mrb[12].mxu1 %vm306_vm1, %v5742_v31  ;;  %v2808_v31 = vrot.slane %v6020_v36, 2 }
  0xbc   : > { %4712 = vmatprep.mubr.msk.bf16.mxu1 %vm306_vm1, %v5752_v38  ;;  %v3098_v38 = vshrl.u32 %v5867_v23, 16 }
  0xbd   : > { %4873 = vmatmul.mubr.msk.bf16.gmra.mrb[24].mxu0 %vm306_vm1, %v2803_v18  ;;  %v2809_v53 = vsel %vm2335_vm3, %v2806_v2, %v2808_v31  ;;  %v2811_v15 = vsel %vm2335_vm3, %v2808_v31, %v2810_v21  ;;  %v3125_v2 = vshrl.u32 %v5904_v20, 16  ;;  %v3134_v31 = vshrl.u32 %v5910_v40, 16 }
  0xbe   : > { %4876 = vmatprep.mubr.msk.bf16.mxu0 %vm306_vm1, %v2805_v54  ;;  %v3100_v63 = vrot.slane %v3098_v38, 2 }
  0xbf   : > { %v3127_v38 = vrot.slane %v3125_v2, 2  ;;  %v3136_v32 = vrot.slane %v3134_v31, 2 }
  0xc0   : > { %v3104_v45 = vor.u32 %v3103_v59, %v3100_v63  ;;  %v3152_v59 = vshrl.u32 %v5935_v13, 16 }
  0xc2   : > { %v3105_v27 = vsel %vm3088_vm6, %v3096_v47, %v3104_v45  ;;  %v1575_v47 = vrot.slane %v5477_v12, 1  ;;  %v3154_v4 = vrot.slane %v3152_v59, 2 }
  0xc3   : > { %4713 = vmatmul.mubr.msk.bf16.gmra.mrb[16].mxu1 %vm306_vm1, %v5758_v41  ;;  %v3110_v41 = vshll.u32 %v5884_v51, 16 }
  0xc4   : > { %4716 = vmatprep.mubr.msk.bf16.mxu1 %vm306_vm1, %v5768_v50  ;;  %v3119_v50 = vshll.u32 %v5888_v58, 16 }
  0xc5   : > { %4877 = vmatmul.mubr.msk.bf16.gmra.mrb[28].mxu0 %vm306_vm1, %v2807_v28  ;;  %v3112_v55 = vrot.slane %v3110_v41, 3  ;;  %v3628_v28 = vsel %vm361_vm0, %v5915_v7, 0  ;;  %v3155_v7 = vshll.u32 %v5935_v13, 16 }
  0xc6   : > { %4880 = vmatprep.mubr.msk.bf16.mxu0 %vm306_vm1, %v2809_v53  ;;  %v3121_v18 = vrot.slane %v3119_v50, 3 }
  0xc7   : > { %v3113_v54 = vor.u32 %v3112_v55, %v3109_v17  ;;  %v3157_v50 = vrot.slane %v3155_v7, 3  ;;  %v3161_v55 = vshrl.u32 %v5947_v43, 16 }
  0xc8   : > { %v3122_v5 = vor.u32 %v3121_v18, %v3118_v0  ;;  %v3170_v0 = vshrl.u32 %v5951_v37, 16  ;;  %v3173_v18 = vshll.u32 %v5951_v37, 16 }
  0xc9   : > { %v3114_v10 = vsel %vm3088_vm6, %v3104_v45, %v3113_v54  ;;  %v3163_v2 = vrot.slane %v3161_v55, 2  ;;  %v3197_v55 = vshrl.u32 %v5985_v25, 16 }
  0xca   : > { %v3123_v53 = vsel %vm3088_vm6, %v3113_v54, %v3122_v5 }
  0xcb   : > { %4717 = vmatmul.mubr.msk.bf16.gmra.mrb[20].mxu1 %vm306_vm1, %v5775_v11  ;;  %v3128_v11 = vshll.u32 %v5904_v20, 16 }
  0xcc   : > { %4720 = vmatprep.mubr.msk.bf16.mxu1 %vm306_vm1, %v5791_v44  ;;  %v3137_v44 = vshll.u32 %v5910_v40, 16 }
  0xcd   : > { %4881 = vmatmul.mubr.msk.bf16.gmra.mrb[32].mxu0 %vm306_vm1, %v2811_v15  ;;  %v3130_v22 = vrot.slane %v3128_v11, 3  ;;  %v5387_v15 = vld [vmem:[%s5460_s25 + $0x10] sm:$0xff]  }
  0xce   : > { %4886 = vmatprep.mubr.msk.bf16.mxu0 %vm306_vm1, %v3105_v27  ;;  %v3139_v1 = vrot.slane %v3137_v44, 3  ;;  %v1576_v17 = vrot.slane %v5387_v15, 1  ;;  %v3158_v27 = vor.u32 %v3157_v50, %v3154_v4  ;;  %v5391_v50 = vld [vmem:[%s5460_s25 + $0x30] sm:$0xff]  }
  0xcf   : > { %v1584_v15 = vrot.slane %v5391_v50, 1 }
  0xd0   : > { %v3140_v63 = vor.u32 %v3139_v1, %v3136_v32  ;;  %v1577_v12 = vsel %vm1135_vm5, %v1575_v47, %v1576_v17  ;;  %v3179_v32 = vshrl.u32 %v5965_v61, 16  ;;  %v3182_v1 = vshll.u32 %v5965_v61, 16 }
  0xd2   : > { %v3181_v7 = vrot.slane %v3179_v32, 2  ;;  %v3218_v32 = vshll.u32 %v6001_v26, 16 }
  0xd3   : > { %4721 = vmatmul.mubr.msk.bf16.gmra.mrb[24].mxu1 %vm306_vm1, %v5804_v14  ;;  %v3131_v14 = vor.u32 %v3130_v22, %v3127_v38  ;;  %v3175_v38 = vrot.slane %v3173_v18, 3  ;;  %v5389_v22 = vld [vmem:[%s5460_s25 + $0x20] sm:$0xff]  }
  0xd4   : > { %4724 = vmatprep.mubr.msk.bf16.mxu1 %vm306_vm1, %v5815_v16  ;;  %v3146_v16 = vshll.u32 %v5931_v19, 16 }
  0xd5   : > { %4887 = vmatmul.mubr.msk.bf16.vlgmr.msra.gmra.mrb[0].mxu0 %vm306_vm1, %v3114_v10  ;;  %v3132_v21 = vsel %vm3088_vm6, %v3122_v5, %v3131_v14  ;;  %v3141_v45 = vsel %vm3088_vm6, %v3131_v14, %v3140_v63  ;;  %v5388_v5 = vld [vmem:[%s5460_s25 + $0x18] sm:$0xff]   ;;  %v3172_v10 = vrot.slane %v3170_v0, 2  ;;  %v3209_v0 = vshll.u32 %v5989_v48, 16 }
  0xd6   : > { %4923 = vmatpush3.bf16.msra.mxu0 %v3628_v28  ;;  %4890 = vmatprep.mubr.msk.bf16.mxu0 %vm306_vm1, %v3123_v53  ;;  %v3148_v41 = vrot.slane %v3146_v16, 3  ;;  %v1578_v31 = vrot.slane %v5388_v5, 1  ;;  %v1580_v28 = vrot.slane %v5389_v22, 1  ;;  %v3188_v16 = vshrl.u32 %v5969_v35, 16 }
  0xd7   : > { %v3176_v14 = vor.u32 %v3175_v38, %v3172_v10  ;;  %v3211_v10 = vrot.slane %v3209_v0, 3  ;;  %v5393_v38 = vld [vmem:[%s5460_s25 + $0x40] sm:$0xff]  }
  0xd8   : > { %v1579_v53 = vsel %vm1135_vm5, %v1576_v17, %v1578_v31  ;;  %v1581_v33 = vsel %vm1135_vm5, %v1578_v31, %v1580_v28  ;;  %v1588_v22 = vrot.slane %v5393_v38, 1  ;;  %v1596_v38 = vrot.slane %v5665_v42, 1 }
  0xdb   : > { %4725 = vmatmul.mubr.msk.bf16.gmra.mrb[28].mxu1 %vm306_vm1, %v5831_v39  ;;  %v3149_v39 = vor.u32 %v3148_v41, %v3145_v62  ;;  %v5390_v62 = vld [vmem:[%s5460_s25 + $0x28] sm:$0xff]  }
  0xdc   : > { %4728 = vmatprep.mubr.msk.bf16.mxu1 %vm306_vm1, %v5836_v34  ;;  %v3164_v34 = vshll.u32 %v5947_v43, 16  ;;  %v1582_v41 = vrot.slane %v5390_v62, 1 }
  0xdd   : > { %4891 = vmatmul.mubr.msk.bf16.gmra.mrb[4].mxu0 %vm306_vm1, %v3132_v21  ;;  %v3150_v54 = vsel %vm3088_vm6, %v3140_v63, %v3149_v39  ;;  %v3159_v44 = vsel %vm3088_vm6, %v3149_v39, %v3158_v27  ;;  %v3191_v63 = vshll.u32 %v5969_v35, 16  ;;  %v3184_v21 = vrot.slane %v3182_v1, 3 }
  0xde   : > { %4894 = vmatprep.mubr.msk.bf16.mxu0 %vm306_vm1, %v3141_v45  ;;  %v3166_v11 = vrot.slane %v3164_v34, 3  ;;  %v3190_v45 = vrot.slane %v3188_v16, 2  ;;  %v1583_v39 = vsel %vm1135_vm5, %v1580_v28, %v1582_v41  ;;  %v3200_v34 = vshll.u32 %v5985_v25, 16 }
  0xdf   : > { %v3193_v4 = vrot.slane %v3191_v63, 3  ;;  %v3185_v17 = vor.u32 %v3184_v21, %v3181_v7  ;;  %v3227_v16 = vshll.u32 %v6005_v49, 16  ;;  %v3220_v7 = vrot.slane %v3218_v32, 3  ;;  %v5394_v21 = vld [vmem:[%s5460_s25 + $0x48] sm:$0xff]  }
  0xe0   : > { %v1590_v62 = vrot.slane %v5394_v21, 1 }
  0xe1   : > { %v3186_v18 = vsel %vm3088_vm6, %v3176_v14, %v3185_v17 }
  0xe3   : > { %4729 = vmatmul.mubr.msk.bf16.gmra.mrb[32].mxu1 %vm306_vm1, %v5847_v56  ;;  %v3167_v56 = vor.u32 %v3166_v11, %v3163_v2  ;;  %v3202_v2 = vrot.slane %v3200_v34, 3  ;;  %v5392_v11 = vld [vmem:[%s5460_s25 + $0x38] sm:$0xff]  }
  0xe4   : > { %4734 = vmatprep.mubr.msk.bf16.mxu1 %vm306_vm1, %v1577_v12  ;;  %v3206_v12 = vshrl.u32 %v5989_v48, 16  ;;  %v1586_v5 = vrot.slane %v5392_v11, 1 }
  0xe5   : > { %4895 = vmatmul.mubr.msk.bf16.gmra.mrb[8].mxu0 %vm306_vm1, %v3150_v54  ;;  %v3168_v59 = vsel %vm3088_vm6, %v3158_v27, %v3167_v56  ;;  %v3177_v47 = vsel %vm3088_vm6, %v3167_v56, %v3176_v14  ;;  %v1585_v27 = vsel %vm1135_vm5, %v1582_v41, %v1584_v15  ;;  %v3199_v54 = vrot.slane %v3197_v55, 2 }
  0xe6   : > { %4898 = vmatprep.mubr.msk.bf16.mxu0 %vm306_vm1, %v3159_v44  ;;  %v3208_v44 = vrot.slane %v3206_v12, 2  ;;  %v1587_v56 = vsel %vm1135_vm5, %v1584_v15, %v1586_v5  ;;  %v1589_v14 = vsel %vm1135_vm5, %v1586_v5, %v1588_v22  ;;  %v3236_v55 = vshll.u32 %v6017_v30, 16  ;;  %v6148_v5 = vld [vmem:[%s5460_s25 + $0xa0] ss:$0 sps:$4 sm:$0x77]  }
  0xe7   : > { %v3203_v28 = vor.u32 %v3202_v2, %v3199_v54  ;;  %v3245_v12 = vshll.u32 %v6020_v36, 16  ;;  %v5396_v2 = vld [vmem:[%s5460_s25 + $0x58] sm:$0xff]  }
  0xe8   : > { %v3212_v1 = vor.u32 %v3211_v10, %v3208_v44  ;;  %v3238_v54 = vrot.slane %v3236_v55, 3  ;;  %v1594_v11 = vrot.slane %v5396_v2, 1 }
  0xe9   : > { %v3247_v10 = vrot.slane %v3245_v12, 3  ;;  %v1606_v12 = vrot.slane %v5820_v29, 1 }
  0xea   : > { %v3213_v41 = vsel %vm3088_vm6, %v3203_v28, %v3212_v1 }
  0xeb   : > { %4735 = vmatmul.mubr.msk.bf16.vlgmr.msra.gmra.mrb[0].mxu1 %vm306_vm1, %v1579_v53  ;;  %v3215_v53 = vshrl.u32 %v6001_v26, 16 }
  0xec   : > { %4738 = vmatprep.mubr.msk.bf16.mxu1 %vm306_vm1, %v1581_v33  ;;  %4961 = vmatpush3.bf16.msra.mxu1 %v5445_v3  ;;  %v3194_v3 = vor.u32 %v3193_v4, %v3190_v45  ;;  %v3224_v33 = vshrl.u32 %v6005_v49, 16  ;;  %v3229_v45 = vrot.slane %v3227_v16, 3  ;;  %v5395_v4 = vld [vmem:[%s5460_s25 + $0x50] sm:$0xff]  }
  0xed   : > { %4899 = vmatmul.mubr.msk.bf16.gmra.mrb[12].mxu0 %vm306_vm1, %v3168_v59  ;;  %v3217_v59 = vrot.slane %v3215_v53, 2  ;;  %v1592_v50 = vrot.slane %v5395_v4, 1  ;;  %v3254_v53 = vshll.u32 %v6148_v5, 16  ;;  %v3537_v4 = vrot.slane %v5867_v23, 3 }
  0xee   : > { %4902 = vmatprep.mubr.msk.bf16.mxu0 %vm306_vm1, %v3177_v47  ;;  %v3195_v31 = vsel %vm3088_vm6, %v3185_v17, %v3194_v3  ;;  %v3204_v63 = vsel %vm3088_vm6, %v3194_v3, %v3203_v28  ;;  %v3226_v47 = vrot.slane %v3224_v33, 2  ;;  %v1591_v17 = vsel %vm1135_vm5, %v1588_v22, %v1590_v62 }
  0xef   : > { %v3221_v15 = vor.u32 %v3220_v7, %v3217_v59  ;;  %v1593_v3 = vsel %vm1135_vm5, %v1590_v62, %v1592_v50  ;;  %v1595_v28 = vsel %vm1135_vm5, %v1592_v50, %v1594_v11  ;;  %v1598_v59 = vrot.slane %v5707_v6, 1 }
  0xf0   : > { %v3230_v34 = vor.u32 %v3229_v45, %v3226_v47  ;;  %v1600_v62 = vrot.slane %v5710_v8, 1  ;;  %v3539_v23 = vrot.slane %v5884_v51, 3  ;;  %v1988_v51 = vshrl.u32 %v5665_v42, 16 }
  0xf1   : > { %v3222_v0 = vsel %vm3088_vm6, %v3212_v1, %v3221_v15  ;;  %v1597_v1 = vsel %vm1135_vm5, %v1594_v11, %v1596_v38  ;;  %v1599_v47 = vsel %vm1135_vm5, %v1596_v38, %v1598_v59  ;;  %v5385_v11 = vld [vmem:[%s5460_s25 + $0x98] ss:$0 sps:$4 sm:$0x11]  }
  0xf2   : > { %v1601_v50 = vsel %vm1135_vm5, %v1598_v59, %v1600_v62 }
  0xf3   : > { %4739 = vmatmul.mubr.msk.bf16.gmra.mrb[4].mxu1 %vm306_vm1, %v1583_v39  ;;  %v3233_v39 = vshrl.u32 %v6017_v30, 16 }
  0xf4   : > { %4742 = vmatprep.mubr.msk.bf16.mxu1 %vm306_vm1, %v1585_v27  ;;  %v3242_v27 = vshrl.u32 %v6020_v36, 16 }
  0xf5   : > { %4903 = vmatmul.mubr.msk.bf16.gmra.mrb[16].mxu0 %vm306_vm1, %v3186_v18  ;;  %v3235_v18 = vrot.slane %v3233_v39, 2  ;;  %v1604_v39 = vrot.slane %v5785_v57, 1 }
  0xf6   : > { %4906 = vmatprep.mubr.msk.bf16.mxu0 %vm306_vm1, %v3195_v31  ;;  %v3231_v31 = vsel %vm3088_vm6, %v3221_v15, %v3230_v34  ;;  %v3244_v44 = vrot.slane %v3242_v27, 2  ;;  %v3540_v27 = vsel %vm3535_vm7, %v3537_v4, %v3539_v23 }
  0xf7   : > { %v3239_v22 = vor.u32 %v3238_v54, %v3235_v18  ;;  %v1608_v18 = vrot.slane %v5825_v24, 1  ;;  %v1991_v54 = vshll.u32 %v5665_v42, 16  ;;  %v1607_v2 = vsel %vm1135_vm5, %v1604_v39, %v1606_v12 }
  0xf8   : > { %v3248_v32 = vor.u32 %v3247_v10, %v3244_v44  ;;  %v1990_v10 = vrot.slane %v1988_v51, 1  ;;  %v1610_v42 = vrot.slane %v5385_v11, 1 }
  0xf9   : > { %v3240_v33 = vsel %vm3088_vm6, %v3230_v34, %v3239_v22  ;;  %v3541_v34 = vrot.slane %v5888_v58, 3  ;;  %v3543_v58 = vrot.slane %v5904_v20, 3  ;;  %v1609_v44 = vsel %vm1135_vm5, %v1606_v12, %v1608_v18 }
  0xfa   : > { %v3249_v7 = vsel %vm3088_vm6, %v3239_v22, %v3248_v32  ;;  %v1993_v38 = vrot.slane %v1991_v54, 2  ;;  %v2000_v20 = vshll.u32 %v5707_v6, 16  ;;  %v3555_v12 = vrot.slane %v5965_v61, 3 }
  0xfb   : > { %4743 = vmatmul.mubr.msk.bf16.gmra.mrb[8].mxu1 %vm306_vm1, %v1587_v56  ;;  %v3251_v56 = vshrl.u32 %v6148_v5, 16  ;;  %v3544_v22 = vsel %vm3535_vm7, %v3541_v34, %v3543_v58  ;;  %v3557_v54 = vrot.slane %v5969_v35, 3  ;;  %v2054_v61 = vshll.u32 %v5860_v60, 16 }
  0xfc   : > { %4746 = vmatprep.mubr.msk.bf16.mxu1 %vm306_vm1, %v1589_v14  ;;  %v3529_v14 = vld [vmem:[%s5460_s25 + $0x10] sm:$0x8]  ;;  %v3559_v35 = vrot.slane %v5985_v25, 3  ;;  %v3563_v25 = vrot.slane %v6001_v26, 3 }
  0xfd   : > { %4907 = vmatmul.mubr.msk.bf16.gmra.mrb[20].mxu0 %vm306_vm1, %v3204_v63  ;;  %v3253_v16 = vrot.slane %v3251_v56, 2  ;;  %v3256_v63 = vrot.slane %v3254_v53, 3  ;;  %v4354_v21 = vcombine.low %v3529_v14, %v5852_v52  ;;  %v1602_v52 = vrot.slane %v5772_v9, 1 }
  0xfe   : > { %4910 = vmatprep.mubr.msk.bf16.mxu0 %vm306_vm1, %v3213_v41  ;;  %v1994_v53 = vor.u32 %v1993_v38, %v1990_v10  ;;  %v1611_v14 = vsel %vm1135_vm5, %v1608_v18, %v1610_v42  ;;  %v2056_v42 = vrot.slane %v2054_v61, 2 }
  0xff   : > { %v3257_v41 = vor.u32 %v3256_v63, %v3253_v16  ;;  %v3536_v45 = vrot.slane %v4354_v21, 3  ;;  %v1603_v55 = vsel %vm1135_vm5, %v1600_v62, %v1602_v52  ;;  %v2002_v16 = vrot.slane %v2000_v20, 2 }
 0x100   : > { %v3549_v63 = vrot.slane %v5935_v13, 3  ;;  %v2018_v62 = vshll.u32 %v5772_v9, 16  ;;  %v2024_v13 = vshrl.u32 %v5785_v57, 16 }
 0x101   : > { %v3258_v15 = vsel %vm3088_vm6, %v3248_v32, %v3257_v41  ;;  %v2009_v32 = vshll.u32 %v5710_v8, 16 }
 0x103   : > { %4747 = vmatmul.mubr.msk.bf16.gmra.mrb[12].mxu1 %vm306_vm1, %v1591_v17  ;;  %v3538_v17 = vsel %vm3535_vm7, %v3536_v45, %v3537_v4  ;;  %v3551_v45 = vrot.slane %v5947_v43, 3  ;;  %v2036_v43 = vshll.u32 %v5820_v29, 16 }
 0x104   : > { %4750 = vmatprep.mubr.msk.bf16.mxu1 %vm306_vm1, %v1593_v3  ;;  %v1605_v3 = vsel %vm1135_vm5, %v1602_v52, %v1604_v39  ;;  %v3553_v52 = vrot.slane %v5951_v37, 3  ;;  %v2042_v37 = vshrl.u32 %v5825_v24, 16 }
 0x105   : > { %4911 = vmatmul.mubr.msk.bf16.gmra.mrb[24].mxu0 %vm306_vm1, %v3222_v0  ;;  %v3542_v0 = vsel %vm3535_vm7, %v3539_v23, %v3541_v34  ;;  %v2038_v51 = vrot.slane %v2036_v43, 2 }
 0x106   : > { %4914 = vmatprep.mubr.msk.bf16.mxu0 %vm306_vm1, %v3231_v31  ;;  %v3545_v31 = vrot.slane %v5910_v40, 3  ;;  %v2006_v40 = vshrl.u32 %v5710_v8, 16  ;;  %v3554_v34 = vsel %vm3535_vm7, %v3551_v45, %v3553_v52 }
 0x108   : > { %v3546_v56 = vsel %vm3535_vm7, %v3543_v58, %v3545_v31  ;;  %v2008_v59 = vrot.slane %v2006_v40, 1  ;;  %v2044_v58 = vrot.slane %v2042_v37, 1 }
 0x10b   : > { %4751 = vmatmul.mubr.msk.bf16.gmra.mrb[16].mxu1 %vm306_vm1, %v1595_v28  ;;  %v1997_v28 = vshrl.u32 %v5707_v6, 16  ;;  %v1995_v6 = vsel %vm1888_vm2, %v5580_v46, %v1994_v53  ;;  %v2027_v46 = vshll.u32 %v5785_v57, 16  ;;  %v3552_v57 = vsel %vm3535_vm7, %v3549_v63, %v3551_v45 }
 0x10c   : > { %4754 = vmatprep.mubr.msk.bf16.mxu1 %vm306_vm1, %v1597_v1  ;;  %v3547_v1 = vrot.slane %v5931_v19, 3  ;;  %v2015_v19 = vshrl.u32 %v5772_v9, 16 }
 0x10d   : > { %4915 = vmatmul.mubr.msk.bf16.gmra.mrb[28].mxu0 %vm306_vm1, %v3240_v33  ;;  %v1999_v33 = vrot.slane %v1997_v28, 1  ;;  %v2029_v39 = vrot.slane %v2027_v46, 2  ;;  %v3561_v28 = vrot.slane %v5989_v48, 3  ;;  %v3565_v48 = vrot.slane %v6005_v49, 3 }
 0x10e   : > { %4918 = vmatprep.mubr.msk.bf16.mxu0 %vm306_vm1, %v3249_v7  ;;  %v2011_v7 = vrot.slane %v2009_v32, 2  ;;  %v3548_v8 = vsel %vm3535_vm7, %v3545_v31, %v3547_v1  ;;  %v3550_v41 = vsel %vm3535_vm7, %v3547_v1, %v3549_v63  ;;  %v2051_v31 = vshrl.u32 %v5860_v60, 16 }
 0x10f   : > { %v2003_v21 = vor.u32 %v2002_v16, %v1999_v33  ;;  %v3560_v60 = vsel %vm3535_vm7, %v3557_v54, %v3559_v35  ;;  %v3564_v32 = vsel %vm3535_vm7, %v3561_v28, %v3563_v25  ;;  %v3566_v1 = vsel %vm3535_vm7, %v3563_v25, %v3565_v48 }
 0x110   : > { %v3569_v33 = vrot.slane %v6020_v36, 3  ;;  %v3571_v49 = vrot.slane %v6148_v5, 3 }
 0x111   : > { %v2004_v4 = vsel %vm1888_vm2, %v1994_v53, %v2003_v21  ;;  %v3562_v53 = vsel %vm3535_vm7, %v3559_v35, %v3561_v28 }
 0x112   : > { %v3572_v63 = vsel %vm3535_vm7, %v3569_v33, %v3571_v49 }
 0x113   : > { %4755 = vmatmul.mubr.msk.bf16.gmra.mrb[20].mxu1 %vm306_vm1, %v1599_v47  ;;  %v2012_v47 = vor.u32 %v2011_v7, %v2008_v59 }
 0x114   : > { %4758 = vmatprep.mubr.msk.bf16.mxu1 %vm306_vm1, %v1601_v50  ;;  %v2017_v50 = vrot.slane %v2015_v19, 1 }
 0x115   : > { %4919 = vmatmul.mubr.msk.bf16.gmra.mrb[32].mxu0 %vm306_vm1, %v3258_v15  ;;  %v2020_v15 = vrot.slane %v2018_v62, 2  ;;  %v2013_v9 = vsel %vm1888_vm2, %v2003_v21, %v2012_v47 }
 0x116   : > { %4924 = vmatprep.mubr.msk.bf16.mxu0 %vm306_vm1, %v3538_v17  ;;  %v2026_v17 = vrot.slane %v2024_v13, 1 }
 0x117   : > { %v2021_v23 = vor.u32 %v2020_v15, %v2017_v50 }
 0x11b   : > { %4759 = vmatmul.mubr.msk.bf16.gmra.mrb[24].mxu1 %vm306_vm1, %v1603_v55  ;;  %v2033_v55 = vshrl.u32 %v5820_v29, 16 }
 0x11c   : > { %4762 = vmatprep.mubr.msk.bf16.mxu1 %vm306_vm1, %v1605_v3  ;;  %v2030_v3 = vor.u32 %v2029_v39, %v2026_v17  ;;  %v6299_v17 = vld [vmem:[%s6454_s2] ss:$0 sm:$0xff] }
 0x11d   : > { %4925 = vmatmul.mubr.msk.bf16.vlgmr.msra.gmra.mrb[0].mxu0 %vm306_vm1, %v3540_v27  ;;  %v2045_v27 = vshll.u32 %v5825_v24, 16  ;;  %v2035_v18 = vrot.slane %v2033_v55, 1  ;;  %v3556_v24 = vsel %vm3535_vm7, %v3553_v52, %v3555_v12 }
 0x11e   : > { %4928 = vmatprep.mubr.msk.bf16.mxu0 %vm306_vm1, %v3542_v0  ;;  %v2022_v0 = vsel %vm1888_vm2, %v2012_v47, %v2021_v23  ;;  %v2031_v29 = vsel %vm1888_vm2, %v2021_v23, %v2030_v3 }
 0x11f   : > { %v2039_v11 = vor.u32 %v2038_v51, %v2035_v18 }
 0x121   : > { %v2040_v38 = vsel %vm1888_vm2, %v2030_v3, %v2039_v11 }
 0x123   : > { %4763 = vmatmul.mubr.msk.bf16.gmra.mrb[28].mxu1 %vm306_vm1, %v1607_v2  ;;  %v2047_v2 = vrot.slane %v2045_v27, 2 }
 0x124   : > { %4766 = vmatprep.mubr.msk.bf16.mxu1 %vm306_vm1, %v1609_v44  ;;  %v3558_v44 = vsel %vm3535_vm7, %v3555_v12, %v3557_v54 }
 0x125   : > { %4929 = vmatmul.mubr.msk.bf16.gmra.mrb[4].mxu0 %vm306_vm1, %v3544_v22  ;;  %v2048_v10 = vor.u32 %v2047_v2, %v2044_v58  ;;  %v2053_v22 = vrot.slane %v2051_v31, 1 }
 0x126   : > { %4932 = vmatprep.mubr.msk.bf16.mxu0 %vm306_vm1, %v3546_v56 }
 0x127   : > { %v2049_v20 = vsel %vm1888_vm2, %v2039_v11, %v2048_v10  ;;  %v2057_v56 = vor.u32 %v2056_v42, %v2053_v22 }
 0x129   : > { %v2058_v40 = vsel %vm1888_vm2, %v2048_v10, %v2057_v56 }
 0x12b   : > { %4767 = vmatmul.mubr.msk.bf16.gmra.mrb[32].mxu1 %vm306_vm1, %v1611_v14  ;;  %v3567_v14 = vrot.slane %v6017_v30, 3 }
 0x12c   : > { %4792 = vmatprep.mubr.msk.bf16.mxu1 %vm306_vm1, %v1995_v6 }
 0x12d   : > { %4933 = vmatmul.mubr.msk.bf16.gmra.mrb[8].mxu0 %vm306_vm1, %v3548_v8  ;;  %v3568_v26 = vsel %vm3535_vm7, %v3565_v48, %v3567_v14  ;;  %v3570_v16 = vsel %vm3535_vm7, %v3567_v14, %v3569_v33 }
 0x12e   : > { %4936 = vmatprep.mubr.msk.bf16.mxu0 %vm306_vm1, %v3550_v41 }
 0x133   : > { %4793 = vmatmul.mubr.msk.bf16.vlgmr.msra.gmra.mrb[20].mxu1 %vm306_vm1, %v2004_v4 }
 0x134   : > { %4796 = vmatprep.mubr.msk.bf16.mxu1 %vm306_vm1, %v2013_v9 }
 0x135   : > { %4937 = vmatmul.mubr.msk.bf16.gmra.mrb[12].mxu0 %vm306_vm1, %v3552_v57 }
 0x136   : > { %4940 = vmatprep.mubr.msk.bf16.mxu0 %vm306_vm1, %v3554_v34 }
 0x13b   : > { %4797 = vmatmul.mubr.msk.bf16.gmra.mrb[24].mxu1 %vm306_vm1, %v2022_v0 }
 0x13c   : > { %4800 = vmatprep.mubr.msk.bf16.mxu1 %vm306_vm1, %v2031_v29 }
 0x13d   : > { %4941 = vmatmul.mubr.msk.bf16.gmra.mrb[16].mxu0 %vm306_vm1, %v3556_v24 }
 0x13e   : > { %4944 = vmatprep.mubr.msk.bf16.mxu0 %vm306_vm1, %v3558_v44 }
 0x143   : > { %4801 = vmatmul.mubr.msk.bf16.gmra.mrb[28].mxu1 %vm306_vm1, %v2040_v38 }
 0x144   : > { %4804 = vmatprep.mubr.msk.bf16.mxu1 %vm306_vm1, %v2049_v20 }
 0x145   : > { %4945 = vmatmul.mubr.msk.bf16.gmra.mrb[20].mxu0 %vm306_vm1, %v3560_v60 }
 0x146   : > { %4948 = vmatprep.mubr.msk.bf16.mxu0 %vm306_vm1, %v3562_v53 }
 0x14b   : > { %4805 = vmatmul.mubr.msk.bf16.gmra.mrb[32].mxu1 %vm306_vm1, %v2058_v40 }
 0x14d   : > { %4949 = vmatmul.mubr.msk.bf16.gmra.mrb[24].mxu0 %vm306_vm1, %v3564_v32 }
 0x14e   : > { %4952 = vmatprep.mubr.msk.bf16.mxu0 %vm306_vm1, %v3566_v1 }
 0x155   : > { %4953 = vmatmul.mubr.msk.bf16.gmra.mrb[28].mxu0 %vm306_vm1, %v3568_v26 }
 0x156   : > { %4956 = vmatprep.mubr.msk.bf16.mxu0 %vm306_vm1, %v3570_v16 }
 0x15d   : > { %4957 = vmatmul.mubr.msk.bf16.gmra.mrb[32].mxu0 %vm306_vm1, %v3572_v63 }
 0x1be   : > { %v4736_v6 = vpop.f32.mrb[0].mxu1 }
 0x1bf   : > { %v1703_v59 = vpop.f32.mrb[1].mxu1  ;;  %v4962_v39 = vadd.f32 %v4736_v6, %v6299_v17 }
 0x1c0   : > { %v4737_v7 = vpop.f32.mrb[2].mxu1  ;;  %v4964_v57 = vadd.f32 %v6299_v17, %v1703_v59 }
 0x1c1   : > { %v1706_v30 = vpop.f32.mrb[3].mxu1  ;;  %v4966_v55 = vadd.f32 %v4737_v7, %v6299_v17 }
 0x1c2   : > { %v4968_v3 = vadd.f32 %v6299_v17, %v1706_v30 }
 0x1c6   : > { %v4740_v8 = vpop.f32.mrb[4].mxu1 }
 0x1c7   : > { %v1719_v36 = vpop.f32.mrb[5].mxu1  ;;  %v4970_v11 = vadd.f32 %v4740_v8, %v6299_v17 }
 0x1c8   : > { %v4741_v21 = vpop.f32.mrb[6].mxu1  ;;  %v4972_v61 = vadd.f32 %v6299_v17, %v1719_v36 }
 0x1c9   : > { %v1722_v19 = vpop.f32.mrb[7].mxu1  ;;  %v4974_v35 = vadd.f32 %v4741_v21, %v6299_v17 }
 0x1ca   : > { %v4976_v42 = vadd.f32 %v6299_v17, %v1722_v19 }
 0x1ce   : > { %v4744_v62 = vpop.f32.mrb[8].mxu1 }
 0x1cf   : > { %v1735_v41 = vpop.f32.mrb[9].mxu1  ;;  %v4978_v33 = vadd.f32 %v4744_v62, %v6299_v17 }
 0x1d0   : > { %v6276_v47 = vpop.f32.mrb[10].mxu1  ;;  %v4980_v16 = vadd.f32 %v6299_v17, %v1735_v41 }
 0x1d1   : > { %v6278_v13 = vpop.f32.mrb[11].mxu1  ;;  %v4982_v6 = vadd.f32 %v6276_v47, %v6299_v17 }
 0x1d2   : > { %v4984_v30 = vadd.f32 %v6299_v17, %v6278_v13 }
 0x1d6   : > { %v6280_v5 = vpop.f32.mrb[12].mxu1 }
 0x1d7   : > { %v6282_v46 = vpop.f32.mrb[13].mxu1 }
 0x1d8   : > { %v6284_v45 = vpop.f32.mrb[14].mxu1 }
 0x1d9   : > { %v6286_v4 = vpop.f32.mrb[15].mxu1 }
 0x1de   : > { %v6288_v50 = vpop.f32.mrb[16].mxu1 }
 0x1df   : > { %v6290_v15 = vpop.f32.mrb[17].mxu1 }
 0x1e0   : > { %v6292_v52 = vpop.f32.mrb[18].mxu1 }
 0x1e1   : > { %v6294_v9 = vpop.f32.mrb[19].mxu1 }
 0x1f0   : > { %v4926_v23 = vpop.f32.mrb[0].mxu0 }
 0x1f1   : > { %v4963_v43 = vadd.f32 %v4962_v39, %v4926_v23  ;;  %v3664_v34 = vpop.f32.mrb[1].mxu0 }
 0x1f2   : > { %v4965_v37 = vadd.f32 %v4964_v57, %v3664_v34  ;;  %v4927_v27 = vpop.f32.mrb[2].mxu0 }
 0x1f3   : > { %v3845_v12 = vmax.f32 %v4963_v43, 0.0  ;;  %v4967_v0 = vadd.f32 %v4966_v55, %v4927_v27  ;;  %v3667_v18 = vpop.f32.mrb[3].mxu0 }
 0x1f4   : > { %v3843_v51 = vmax.f32 %v4965_v37, 0.0  ;;  %v4969_v54 = vadd.f32 %v4968_v3, %v3667_v18  ;;  %v4986_v3 = vadd.f32 %v6280_v5, %v6299_v17  ;;  %v4992_v5 = vadd.f32 %v6299_v17, %v6286_v4 }
 0x1f5   : > { %v4413_v29 = vpack.c.bf16 %v3845_v12, %v3845_v12  ;;  %v3846_v58 = vmax.f32 %v4967_v0, 0.0  ;;  %v4988_v12 = vadd.f32 %v6299_v17, %v6282_v46 }
 0x1f6   : > { %v4411_v2 = vpack.c.bf16 %v3843_v51, %v3843_v51  ;;  %v3844_v24 = vmax.f32 %v4969_v54, 0.0  ;;  %v4990_v51 = vadd.f32 %v6284_v45, %v6299_v17 }
 0x1f7   : > { %4026 = vst.msk [vmem:[%s6309_s18 + $0x8] sm:$0xf] %vm4023_vm8, %v4413_v29  ;;  %v4414_v31 = vpack.c.bf16 %v3846_v58, %v3846_v58 }
 0x1f8   : > { %4024 = vst.msk [vmem:[%s6309_s18] sm:$0xf] %vm4023_vm8, %v4411_v2  ;;  %v4412_v44 = vpack.c.bf16 %v3844_v24, %v3844_v24  ;;  %v4930_v10 = vpop.f32.mrb[4].mxu0 }
 0x1f9   : > { %4027 = vst.msk [vmem:[%s6309_s18 + $0xc] sm:$0xf] %vm4023_vm8, %v4414_v31  ;;  %v4971_v38 = vadd.f32 %v4970_v11, %v4930_v10  ;;  %v3680_v22 = vpop.f32.mrb[5].mxu0 }
 0x1fa   : > { %4025 = vst.msk [vmem:[%s6309_s18 + $0x4] sm:$0xf] %vm4023_vm8, %v4412_v44  ;;  %v4973_v28 = vadd.f32 %v4972_v61, %v3680_v22  ;;  %v4931_v20 = vpop.f32.mrb[6].mxu0 }
 0x1fb   : > { %v3849_v60 = vmax.f32 %v4971_v38, 0.0  ;;  %v4975_v56 = vadd.f32 %v4974_v35, %v4931_v20  ;;  %v3683_v53 = vpop.f32.mrb[7].mxu0 }
 0x1fc   : > { %v3847_v25 = vmax.f32 %v4973_v28, 0.0  ;;  %v4977_v40 = vadd.f32 %v4976_v42, %v3683_v53  ;;  %v4994_v42 = vadd.f32 %v6288_v50, %v6299_v17  ;;  %v5000_v50 = vadd.f32 %v6299_v17, %v6294_v9 }
 0x1fd   : > { %v4417_v48 = vpack.c.bf16 %v3849_v60, %v3849_v60  ;;  %v3850_v32 = vmax.f32 %v4975_v56, 0.0  ;;  %v4996_v60 = vadd.f32 %v6299_v17, %v6290_v15 }
 0x1fe   : > { %v4415_v1 = vpack.c.bf16 %v3847_v25, %v3847_v25  ;;  %v3848_v14 = vmax.f32 %v4977_v40, 0.0  ;;  %v4998_v25 = vadd.f32 %v6292_v52, %v6299_v17 }
 0x1ff   : > { %4030 = vst.msk [vmem:[%s6309_s18 + $0x18] sm:$0xf] %vm4023_vm8, %v4417_v48  ;;  %v4418_v26 = vpack.c.bf16 %v3850_v32, %v3850_v32 }
 0x200   : > { %4028 = vst.msk [vmem:[%s6309_s18 + $0x10] sm:$0xf] %vm4023_vm8, %v4415_v1  ;;  %v4416_v49 = vpack.c.bf16 %v3848_v14, %v3848_v14  ;;  %v4934_v63 = vpop.f32.mrb[8].mxu0 }
 0x201   : > { %4031 = vst.msk [vmem:[%s6309_s18 + $0x1c] sm:$0xf] %vm4023_vm8, %v4418_v26  ;;  %v4979_v59 = vadd.f32 %v4978_v33, %v4934_v63  ;;  %v3696_v7 = vpop.f32.mrb[9].mxu0 }
 0x202   : > { %4029 = vst.msk [vmem:[%s6309_s18 + $0x14] sm:$0xf] %vm4023_vm8, %v4416_v49  ;;  %v4981_v8 = vadd.f32 %v4980_v16, %v3696_v7  ;;  %v4935_v36 = vpop.f32.mrb[10].mxu0 }
 0x203   : > { %v3853_v21 = vmax.f32 %v4979_v59, 0.0  ;;  %v4983_v19 = vadd.f32 %v4982_v6, %v4935_v36  ;;  %v3699_v62 = vpop.f32.mrb[11].mxu0 }
 0x204   : > { %v3851_v41 = vmax.f32 %v4981_v8, 0.0  ;;  %v4985_v39 = vadd.f32 %v4984_v30, %v3699_v62 }
 0x205   : > { %v4421_v47 = vpack.c.bf16 %v3853_v21, %v3853_v21  ;;  %v3854_v23 = vmax.f32 %v4983_v19, 0.0 }
 0x206   : > { %v6337_v57 = vpop.f32.mrb[20].mxu1  ;;  %v4419_v43 = vpack.c.bf16 %v3851_v41, %v3851_v41  ;;  %v3852_v13 = vmax.f32 %v4985_v39, 0.0 }
 0x207   : > { %v6339_v55 = vpop.f32.mrb[21].mxu1  ;;  %4034 = vst.msk [vmem:[%s6309_s18 + $0x28] sm:$0xf] %vm4023_vm8, %v4421_v47  ;;  %v4422_v37 = vpack.c.bf16 %v3854_v23, %v3854_v23  ;;  %v5002_v30 = vadd.f32 %v6337_v57, %v6299_v17 }
 0x208   : > { %v6341_v34 = vpop.f32.mrb[22].mxu1  ;;  %4032 = vst.msk [vmem:[%s6309_s18 + $0x20] sm:$0xf] %vm4023_vm8, %v4419_v43  ;;  %v4420_v0 = vpack.c.bf16 %v3852_v13, %v3852_v13  ;;  %v4938_v18 = vpop.f32.mrb[12].mxu0  ;;  %v5004_v21 = vadd.f32 %v6299_v17, %v6339_v55 }
 0x209   : > { %v6347_v27 = vpop.f32.mrb[23].mxu1  ;;  %4035 = vst.msk [vmem:[%s6309_s18 + $0x2c] sm:$0xf] %vm4023_vm8, %v4422_v37  ;;  %v4987_v54 = vadd.f32 %v4986_v3, %v4938_v18  ;;  %v3712_v29 = vpop.f32.mrb[13].mxu0  ;;  %v5006_v41 = vadd.f32 %v6341_v34, %v6299_v17 }
 0x20a   : > { %4033 = vst.msk [vmem:[%s6309_s18 + $0x24] sm:$0xf] %vm4023_vm8, %v4420_v0  ;;  %v4989_v58 = vadd.f32 %v4988_v12, %v3712_v29  ;;  %v4939_v2 = vpop.f32.mrb[14].mxu0  ;;  %v5008_v57 = vadd.f32 %v6299_v17, %v6347_v27 }
 0x20b   : > { %v3857_v46 = vmax.f32 %v4987_v54, 0.0  ;;  %v4991_v24 = vadd.f32 %v4990_v51, %v4939_v2  ;;  %v3715_v11 = vpop.f32.mrb[15].mxu0 }
 0x20c   : > { %v3855_v31 = vmax.f32 %v4989_v58, 0.0  ;;  %v4993_v61 = vadd.f32 %v4992_v5, %v3715_v11 }
 0x20d   : > { %v4425_v45 = vpack.c.bf16 %v3857_v46, %v3857_v46  ;;  %v3858_v10 = vmax.f32 %v4991_v24, 0.0 }
 0x20e   : > { %v6361_v44 = vpop.f32.mrb[24].mxu1  ;;  %v4423_v38 = vpack.c.bf16 %v3855_v31, %v3855_v31  ;;  %v3856_v4 = vmax.f32 %v4993_v61, 0.0 }
 0x20f   : > { %v6363_v35 = vpop.f32.mrb[25].mxu1  ;;  %4038 = vst.msk [vmem:[%s6309_s18 + $0x38] sm:$0xf] %vm4023_vm8, %v4425_v45  ;;  %v4426_v28 = vpack.c.bf16 %v3858_v10, %v3858_v10  ;;  %v5010_v5 = vadd.f32 %v6361_v44, %v6299_v17 }
 0x210   : > { %v6365_v22 = vpop.f32.mrb[26].mxu1  ;;  %4036 = vst.msk [vmem:[%s6309_s18 + $0x30] sm:$0xf] %vm4023_vm8, %v4423_v38  ;;  %v4424_v56 = vpack.c.bf16 %v3856_v4, %v3856_v4  ;;  %v4942_v53 = vpop.f32.mrb[16].mxu0  ;;  %v5012_v46 = vadd.f32 %v6299_v17, %v6363_v35 }
 0x211   : > { %v6371_v20 = vpop.f32.mrb[27].mxu1  ;;  %4039 = vst.msk [vmem:[%s6309_s18 + $0x3c] sm:$0xf] %vm4023_vm8, %v4426_v28  ;;  %v4995_v40 = vadd.f32 %v4994_v42, %v4942_v53  ;;  %v3728_v48 = vpop.f32.mrb[17].mxu0  ;;  %v5014_v31 = vadd.f32 %v6365_v22, %v6299_v17 }
 0x212   : > { %4037 = vst.msk [vmem:[%s6309_s18 + $0x34] sm:$0xf] %vm4023_vm8, %v4424_v56  ;;  %v4997_v32 = vadd.f32 %v4996_v60, %v3728_v48  ;;  %v4943_v1 = vpop.f32.mrb[18].mxu0  ;;  %v5016_v44 = vadd.f32 %v6299_v17, %v6371_v20 }
 0x213   : > { %v3861_v15 = vmax.f32 %v4995_v40, 0.0  ;;  %v4999_v14 = vadd.f32 %v4998_v25, %v4943_v1  ;;  %v3731_v33 = vpop.f32.mrb[19].mxu0 }
 0x214   : > { %v3859_v26 = vmax.f32 %v4997_v32, 0.0  ;;  %v5001_v16 = vadd.f32 %v5000_v50, %v3731_v33 }
 0x215   : > { %v4429_v52 = vpack.c.bf16 %v3861_v15, %v3861_v15  ;;  %v3862_v63 = vmax.f32 %v4999_v14, 0.0 }
 0x216   : > { %v4802_v49 = vpop.f32.mrb[28].mxu1  ;;  %v4427_v59 = vpack.c.bf16 %v3859_v26, %v3859_v26  ;;  %v3860_v7 = vmax.f32 %v5001_v16, 0.0 }
 0x217   : > { %v2262_v6 = vpop.f32.mrb[29].mxu1  ;;  %4042 = vst.msk [vmem:[%s6309_s18 + $0x48] sm:$0xf] %vm4023_vm8, %v4429_v52  ;;  %v4430_v8 = vpack.c.bf16 %v3862_v63, %v3862_v63  ;;  %v5018_v40 = vadd.f32 %v4802_v49, %v6299_v17 }
 0x218   : > { %v4803_v9 = vpop.f32.mrb[30].mxu1  ;;  %4040 = vst.msk [vmem:[%s6309_s18 + $0x40] sm:$0xf] %vm4023_vm8, %v4427_v59  ;;  %v4428_v19 = vpack.c.bf16 %v3860_v7, %v3860_v7  ;;  %v4946_v62 = vpop.f32.mrb[20].mxu0  ;;  %v5020_v48 = vadd.f32 %v6299_v17, %v2262_v6 }
 0x219   : > { %v2265_v36 = vpop.f32.mrb[31].mxu1  ;;  %4043 = vst.msk [vmem:[%s6309_s18 + $0x4c] sm:$0xf] %vm4023_vm8, %v4430_v8  ;;  %v5003_v39 = vadd.f32 %v5002_v30, %v4946_v62  ;;  %v3744_v47 = vpop.f32.mrb[21].mxu0  ;;  %v5022_v1 = vadd.f32 %v4803_v9, %v6299_v17 }
 0x21a   : > { %4041 = vst.msk [vmem:[%s6309_s18 + $0x44] sm:$0xf] %vm4023_vm8, %v4428_v19  ;;  %v5005_v23 = vadd.f32 %v5004_v21, %v3744_v47  ;;  %v4947_v43 = vpop.f32.mrb[22].mxu0  ;;  %v5024_v33 = vadd.f32 %v6299_v17, %v2265_v36 }
 0x21b   : > { %v3865_v55 = vmax.f32 %v5003_v39, 0.0  ;;  %v5007_v13 = vadd.f32 %v5006_v41, %v4947_v43  ;;  %v3747_v3 = vpop.f32.mrb[23].mxu0 }
 0x21c   : > { %v3863_v37 = vmax.f32 %v5005_v23, 0.0  ;;  %v5009_v12 = vadd.f32 %v5008_v57, %v3747_v3 }
 0x21d   : > { %v4433_v34 = vpack.c.bf16 %v3865_v55, %v3865_v55  ;;  %v3866_v18 = vmax.f32 %v5007_v13, 0.0 }
 0x21e   : > { %v4806_v0 = vpop.f32.mrb[32].mxu1  ;;  %v4431_v54 = vpack.c.bf16 %v3863_v37, %v3863_v37  ;;  %v3864_v29 = vmax.f32 %v5009_v12, 0.0 }
 0x21f   : > { %v2278_v51 = vpop.f32.mrb[33].mxu1  ;;  %4046 = vst.msk [vmem:[%s6309_s18 + $0x58] sm:$0xf] %vm4023_vm8, %v4433_v34  ;;  %v4434_v58 = vpack.c.bf16 %v3866_v18, %v3866_v18  ;;  %v5026_v21 = vadd.f32 %v4806_v0, %v6299_v17 }
 0x220   : > { %v4807_v27 = vpop.f32.mrb[34].mxu1  ;;  %4044 = vst.msk [vmem:[%s6309_s18 + $0x50] sm:$0xf] %vm4023_vm8, %v4431_v54  ;;  %v4432_v24 = vpack.c.bf16 %v3864_v29, %v3864_v29  ;;  %v4950_v11 = vpop.f32.mrb[24].mxu0  ;;  %v5028_v19 = vadd.f32 %v6299_v17, %v2278_v51 }
 0x221   : > { %v2281_v2 = vpop.f32.mrb[35].mxu1  ;;  %4047 = vst.msk [vmem:[%s6309_s18 + $0x5c] sm:$0xf] %vm4023_vm8, %v4434_v58  ;;  %v5011_v61 = vadd.f32 %v5010_v5, %v4950_v11  ;;  %v3760_v45 = vpop.f32.mrb[25].mxu0  ;;  %v5030_v39 = vadd.f32 %v4807_v27, %v6299_v17 }
 0x222   : > { %4045 = vst.msk [vmem:[%s6309_s18 + $0x54] sm:$0xf] %vm4023_vm8, %v4432_v24  ;;  %v5013_v10 = vadd.f32 %v5012_v46, %v3760_v45  ;;  %v4951_v35 = vpop.f32.mrb[26].mxu0  ;;  %v5032_v23 = vadd.f32 %v6299_v17, %v2281_v2 }
 0x223   : > { %v3869_v38 = vmax.f32 %v5011_v61, 0.0  ;;  %v5015_v4 = vadd.f32 %v5014_v31, %v4951_v35  ;;  %v3763_v42 = vpop.f32.mrb[27].mxu0 }
 0x224   : > { %v3867_v28 = vmax.f32 %v5013_v10, 0.0  ;;  %v5017_v60 = vadd.f32 %v5016_v44, %v3763_v42 }
 0x225   : > { %v4437_v22 = vpack.c.bf16 %v3869_v38, %v3869_v38  ;;  %v3870_v56 = vmax.f32 %v5015_v4, 0.0 }
 0x226   : > { %v4435_v53 = vpack.c.bf16 %v3867_v28, %v3867_v28  ;;  %v3868_v25 = vmax.f32 %v5017_v60, 0.0 }
 0x227   : > { %4050 = vst.msk [vmem:[%s6309_s18 + $0x68] sm:$0xf] %vm4023_vm8, %v4437_v22  ;;  %v4438_v20 = vpack.c.bf16 %v3870_v56, %v3870_v56 }
 0x228   : > { %4048 = vst.msk [vmem:[%s6309_s18 + $0x60] sm:$0xf] %vm4023_vm8, %v4435_v53  ;;  %v4436_v50 = vpack.c.bf16 %v3868_v25, %v3868_v25  ;;  %v4954_v32 = vpop.f32.mrb[28].mxu0 }
 0x229   : > { %4051 = vst.msk [vmem:[%s6309_s18 + $0x6c] sm:$0xf] %vm4023_vm8, %v4438_v20  ;;  %v5019_v15 = vadd.f32 %v5018_v40, %v4954_v32  ;;  %v3776_v14 = vpop.f32.mrb[29].mxu0 }
 0x22a   : > { %4049 = vst.msk [vmem:[%s6309_s18 + $0x64] sm:$0xf] %vm4023_vm8, %v4436_v50  ;;  %v5021_v26 = vadd.f32 %v5020_v48, %v3776_v14  ;;  %v4955_v16 = vpop.f32.mrb[30].mxu0 }
 0x22b   : > { %v3873_v49 = vmax.f32 %v5019_v15, 0.0  ;;  %v5023_v52 = vadd.f32 %v5022_v1, %v4955_v16  ;;  %v3779_v63 = vpop.f32.mrb[31].mxu0 }
 0x22c   : > { %v3871_v6 = vmax.f32 %v5021_v26, 0.0  ;;  %v5025_v59 = vadd.f32 %v5024_v33, %v3779_v63 }
 0x22d   : > { %v4441_v7 = vpack.c.bf16 %v3873_v49, %v3873_v49  ;;  %v3874_v9 = vmax.f32 %v5023_v52, 0.0 }
 0x22e   : > { %v4439_v30 = vpack.c.bf16 %v3871_v6, %v3871_v6  ;;  %v3872_v8 = vmax.f32 %v5025_v59, 0.0 }
 0x22f   : > { %4054 = vst.msk [vmem:[%s6309_s18 + $0x78] sm:$0xf] %vm4023_vm8, %v4441_v7  ;;  %v4442_v36 = vpack.c.bf16 %v3874_v9, %v3874_v9 }
 0x230   : > { %4052 = vst.msk [vmem:[%s6309_s18 + $0x70] sm:$0xf] %vm4023_vm8, %v4439_v30  ;;  %v4440_v62 = vpack.c.bf16 %v3872_v8, %v3872_v8  ;;  %v4958_v41 = vpop.f32.mrb[32].mxu0 }
 0x231   : > { %4055 = vst.msk [vmem:[%s6309_s18 + $0x7c] sm:$0xf] %vm4023_vm8, %v4442_v36  ;;  %v5027_v47 = vadd.f32 %v5026_v21, %v4958_v41  ;;  %v3792_v57 = vpop.f32.mrb[33].mxu0 }
 0x232   : > { %4053 = vst.msk [vmem:[%s6309_s18 + $0x74] sm:$0xf] %vm4023_vm8, %v4440_v62  ;;  %v5029_v43 = vadd.f32 %v5028_v19, %v3792_v57  ;;  %v4959_v55 = vpop.f32.mrb[34].mxu0 }
 0x233   : > { %v3877_v13 = vmax.f32 %v5027_v47, 0.0  ;;  %v5031_v3 = vadd.f32 %v5030_v39, %v4959_v55  ;;  %v3795_v37 = vpop.f32.mrb[35].mxu0 }
 0x234   : > { %v3875_v12 = vmax.f32 %v5029_v43, 0.0  ;;  %v5033_v0 = vadd.f32 %v5032_v23, %v3795_v37 }
 0x235   : > { %v4445_v34 = vpack.c.bf16 %v3877_v13, %v3877_v13  ;;  %v3878_v18 = vmax.f32 %v5031_v3, 0.0 }
 0x236   : > { %v4443_v51 = vpack.c.bf16 %v3875_v12, %v3875_v12  ;;  %v3876_v54 = vmax.f32 %v5033_v0, 0.0 }
 0x237   : > { %4058 = vst.msk [vmem:[%s6309_s18 + $0x88] sm:$0xf] %vm4023_vm8, %v4445_v34  ;;  %v4446_v29 = vpack.c.bf16 %v3878_v18, %v3878_v18 }
 0x238   : > { %4056 = vst.msk [vmem:[%s6309_s18 + $0x80] sm:$0xf] %vm4023_vm8, %v4443_v51  ;;  %v4444_v17 = vpack.c.bf16 %v3876_v54, %v3876_v54 }
 0x239   : > { %4059 = vst.msk [vmem:[%s6309_s18 + $0x8c] sm:$0xf] %vm4023_vm8, %v4446_v29 }
 0x23a   : > { %4057 = vst.msk [vmem:[%s6309_s18 + $0x84] sm:$0xf] %vm4023_vm8, %v4444_v17 }
 0x23b PF: > { %s13_s12 = sadd.s32 1, %s5403_s12  }
 0x23c   : > { %p10_p4 = scmp.ge.s32.totalorder %s13_s12, 4  }
 0x23e   :  { %12 = sbr.rel (!%p10_p4) target bundleno = 1 (0x1), region = 70 }

// kernel: vae_forward.9
= control target key start
LH: loop header
LB: loop body
LE: loop exit
PB: predicated region body
PF: predicated region fallthrough
CT: control target
= control target key end

     0   :  { %s2756_s12 = smov 0   ;;  %s2758_s13 = smov 0   ;;  %s3261_s0 = inlined_call_operand.vmem [shape: bf16[4,2,82,32], index: 0, kind: input, shape index: {}]   ;;  %s3262_s1 = inlined_call_operand.vmem [shape: bf16[9,32,64], index: 1, kind: input, shape index: {}]   ;;  %s3263_s2 = inlined_call_operand.vmem [shape: f32[1,64], index: 2, kind: input, shape index: {}]   ;;  %s3264_s3 = inlined_call_operand.vmem [shape: bf16[1,2,72,64], index: 3, kind: output, shape index: {}]  }
   0x1   :  { %s2760_s14 = smov 0  }
   0x2 LB: > { %s1969_s15 = sadd.s32 4294967295, %s2732_s14   ;;  %s2773_s16 = sadd.s32 1, %s2732_s14   ;;  %s2732_s14 = sphi %s2760_s14, %s3267_s14   ;;  %s2728_s13 = sphi %s2758_s13, %s3266_s13   ;;  %s2724_s12 = sphi %s2756_s12, %s3265_s12  }
   0x3   : > { %s17_s17 = ssub.s32 %s2732_s14, %s2773_s16  ;;  %s20_s18 = sadd.s32 1, %s2728_s13 }
   0x4   : > { %p18_p0 = scmp.eq.s32.totalorder %s17_s17, 0  ;;  %p27_p1 = scmp.ne.s32.totalorder %s2728_s13, %s2724_s12 }
   0x5   : > { %p28_p2 = scmp.eq.s32.totalorder %s2732_s14, 0  ;;  %p1972_p4 = scmp.ge.s32.totalorder %s2732_s14, 2 }
   0x6   : > { %s2782_s19 = scalar_select %p18_p0, %s2728_s13, %s20_s18  }
   0x7   : > { %p29_p3 = por %p28_p2, %p27_p1  ;;  %127 = sbr.rel (%p1972_p4) target bundleno = 31 (0x1f), region = 24 }
   0xe   : > { %130 = sbr.rel (!%p29_p3) target bundleno = 31 (0x1f), region = 28  ;;  %s132_s20 = sand.u32 (%p29_p3), 1, %s2728_s13  }
   0xf   : > { %s2622_s21 = smul.u32 (%p29_p3), 44, %s2732_s14 }
  0x10   : > { %s2621_s22 = smul.u32 (%p29_p3), 176, %s132_s20 }
  0x11   : > { %s2790_s25 = scalar_lea.vmem (%p29_p3), %s3261_s0, %s2622_s21 }
  0x12   : > { %v153_v0 = vld [vmem:[%s2790_s25] sm:$0xff] (%p29_p3)   ;;  %v157_v1 = vld [vmem:[%s2790_s25 + $0x8] sm:$0xff] (%p29_p3)   ;;  %v161_v2 = vld [vmem:[%s2790_s25 + $0x10] sm:$0xff] (%p29_p3)   ;;  %s2795_s26 = scalar_lea.vmem (%p29_p3), [#allocation2], %s2621_s22 }
  0x13   : > { %154 = vst [vmem:[%s2795_s26] sm:$0xff] (%p29_p3), %v153_v0   ;;  %158 = vst [vmem:[%s2795_s26 + $0x8] sm:$0xff] (%p29_p3), %v157_v1   ;;  %v165_v3 = vld [vmem:[%s2790_s25 + $0x18] sm:$0xff] (%p29_p3)   ;;  %v169_v4 = vld [vmem:[%s2790_s25 + $0x20] sm:$0xff] (%p29_p3)  }
  0x14   : > { %162 = vst [vmem:[%s2795_s26 + $0x10] sm:$0xff] (%p29_p3), %v161_v2   ;;  %v173_v5 = vld [vmem:[%s2790_s25 + $0x28] sm:$0xf] (%p29_p3)  ;;  %166 = vst [vmem:[%s2795_s26 + $0x18] sm:$0xff] (%p29_p3), %v165_v3   ;;  %v175_v6 = vld [vmem:[%s2790_s25 + $0x58] sm:$0xff] (%p29_p3)  }
  0x15   : > { %170 = vst [vmem:[%s2795_s26 + $0x20] sm:$0xff] %v169_v4   ;;  %174 = vst [vmem:[%s2795_s26 + $0x28] sm:$0xf] %v173_v5  ;;  %v179_v7 = vld [vmem:[%s2790_s25 + $0x60] sm:$0xff]   ;;  %v183_v8 = vld [vmem:[%s2790_s25 + $0x68] sm:$0xff]  }
  0x16   : > { %176 = vst [vmem:[%s2795_s26 + $0x2c] sm:$0xff] %v175_v6   ;;  %180 = vst [vmem:[%s2795_s26 + $0x34] sm:$0xff] %v179_v7   ;;  %v187_v9 = vld [vmem:[%s2790_s25 + $0x70] sm:$0xff]   ;;  %v191_v10 = vld [vmem:[%s2790_s25 + $0x78] sm:$0xff]  }
  0x17   : > { %184 = vst [vmem:[%s2795_s26 + $0x3c] sm:$0xff] %v183_v8   ;;  %v195_v11 = vld [vmem:[%s2790_s25 + $0x80] sm:$0xf]  ;;  %188 = vst [vmem:[%s2795_s26 + $0x44] sm:$0xff] %v187_v9   ;;  %v197_v12 = vld [vmem:[%s2790_s25 + $0xb0] sm:$0xff]  }
  0x18   : > { %192 = vst [vmem:[%s2795_s26 + $0x4c] sm:$0xff] %v191_v10   ;;  %196 = vst [vmem:[%s2795_s26 + $0x54] sm:$0xf] %v195_v11  ;;  %v201_v13 = vld [vmem:[%s2790_s25 + $0xb8] sm:$0xff]   ;;  %v205_v14 = vld [vmem:[%s2790_s25 + $0xc0] sm:$0xff]  }
  0x19   : > { %198 = vst [vmem:[%s2795_s26 + $0x58] sm:$0xff] %v197_v12   ;;  %202 = vst [vmem:[%s2795_s26 + $0x60] sm:$0xff] %v201_v13   ;;  %v209_v15 = vld [vmem:[%s2790_s25 + $0xc8] sm:$0xff]   ;;  %v213_v16 = vld [vmem:[%s2790_s25 + $0xd0] sm:$0xff]  }
  0x1a   : > { %206 = vst [vmem:[%s2795_s26 + $0x68] sm:$0xff] %v205_v14   ;;  %v217_v17 = vld [vmem:[%s2790_s25 + $0xd8] sm:$0xf]  ;;  %210 = vst [vmem:[%s2795_s26 + $0x70] sm:$0xff] %v209_v15   ;;  %v219_v18 = vld [vmem:[%s2790_s25 + $0x108] sm:$0xff]  }
  0x1b   : > { %214 = vst [vmem:[%s2795_s26 + $0x78] sm:$0xff] %v213_v16   ;;  %218 = vst [vmem:[%s2795_s26 + $0x80] sm:$0xf] %v217_v17  ;;  %v223_v19 = vld [vmem:[%s2790_s25 + $0x110] sm:$0xff]   ;;  %v227_v20 = vld [vmem:[%s2790_s25 + $0x118] sm:$0xff]  }
  0x1c   : > { %220 = vst [vmem:[%s2795_s26 + $0x84] sm:$0xff] %v219_v18   ;;  %224 = vst [vmem:[%s2795_s26 + $0x8c] sm:$0xff] %v223_v19   ;;  %v231_v21 = vld [vmem:[%s2790_s25 + $0x120] sm:$0xff]   ;;  %v235_v22 = vld [vmem:[%s2790_s25 + $0x128] sm:$0xff]  }
  0x1d   : > { %228 = vst [vmem:[%s2795_s26 + $0x94] sm:$0xff] %v227_v20   ;;  %v239_v23 = vld [vmem:[%s2790_s25 + $0x130] sm:$0xf]  ;;  %232 = vst [vmem:[%s2795_s26 + $0x9c] sm:$0xff] %v231_v21  }
  0x1e   : > { %236 = vst [vmem:[%s2795_s26 + $0xa4] sm:$0xff] %v235_v22   ;;  %240 = vst [vmem:[%s2795_s26 + $0xac] sm:$0xf] %v239_v23 }
  0x1f PF: > { %p1974_p5 = scmp.ge.s32.totalorder %s2732_s14, 1  ;;  %p350_p6 = scmp.lt.s32.totalorder %s2732_s14, 3 }
  0x21   : > { %p351_p7 = pnand %p1974_p5, %p350_p6 }
  0x22   : > { %v2651_v24 = vld [vmem:[%s3262_s1] sm:$0xff] (!%p351_p7)   ;;  %v2734_v25 = vmov (!%p351_p7), 0.0   ;;  %v2653_v27 = vld [vmem:[%s3262_s1 + $0x8] sm:$0xff] (!%p351_p7)   ;;  %vm2735_vm0 = vmmov (!%p351_p7), 0   ;;  %s357_s6 = sand.u32 (!%p351_p7), 1, %s2724_s12   ;;  %v2657_v29 = vld [vmem:[%s3262_s1 + $0x50] sm:$0xff] (!%p351_p7)  }
  0x23   : > { %354 = sbr.rel (%p351_p7) target bundleno = 439 (0x1b7), region = 69  ;;  %2243 = vmatprep.subr.bf16.mxu1 (!%p351_p7), %v2734_v25  ;;  %2339 = vmatprep.subr.bf16.mxu0 (!%p351_p7), %v2734_v25  ;;  %v2852_v26 = vld [vmem:[%s3262_s1 + $0x40] sm:$0xff] (!%p351_p7)   ;;  %v2865_v28 = vld [vmem:[%s3262_s1 + $0x48] sm:$0xff] (!%p351_p7)   ;;  %v2658_v30 = vld [vmem:[%s3262_s1 + $0x10] sm:$0xff] (!%p351_p7)   ;;  %vm441_vm1 = vcmask (!%p351_p7), 261120   ;;  %vm1734_vm3 = vcmask (!%p351_p7), 1046528  }
  0x24   : > { %2244 = vmatpush3.bf16.msra.mxu1 (!%p351_p7), %v2651_v24  ;;  %2247 = vmatprep.mubr.msk.bf16.mxu1 (!%p351_p7), %vm2735_vm0, %v2734_v25  ;;  %s2623_s9 = smul.u32 (!%p351_p7), 176, %s357_s6  ;;  %v2661_v33 = vld [vmem:[%s3262_s1 + $0x58] sm:$0xff] (!%p351_p7)   ;;  %vm724_vm2 = vsmask.f32 (!%p351_p7), 7424  ;;  %v2667_v51 = vld [vmem:[%s3262_s1 + $0x60] sm:$0xff] (!%p351_p7)   ;;  %v2673_v55 = vld [vmem:[%s3262_s1 + $0x68] sm:$0xff] (!%p351_p7)  }
  0x25   : > { %2340 = vmatpush3.bf16.msra.mxu0 (!%p351_p7), %v2852_v26  ;;  %2245 = vmatprep.subr.bf16.mxu1 (!%p351_p7), %v2734_v25  ;;  %v2668_v37 = vld [vmem:[%s3262_s1 + $0x18] sm:$0xff] (!%p351_p7)   ;;  %v2674_v15 = vld [vmem:[%s3262_s1 + $0x20] sm:$0xff] (!%p351_p7)   ;;  %p380_p8 = scmp.lt.s32.totalorder (!%p351_p7), %s1969_s15, 1  ;;  %vm1898_vm4 = vcmask (!%p351_p7), 519168  }
  0x26   : > { %2341 = vmatprep.subr.bf16.mxu0 (!%p351_p7), %v2734_v25  ;;  %2343 = vmatprep.mubr.msk.bf16.mxu0 (!%p351_p7), %vm2735_vm0, %v2734_v25  ;;  %s2876_s18 = scalar_lea.vmem (!%p351_p7), [#allocation2], %s2623_s9 }
  0x27   : > { %v2655_v31 = vld [vmem:[%s2876_s18] sm:$0xff] (!%p351_p7)   ;;  %v2659_v34 = vld [vmem:[%s2876_s18 + $0x8] sm:$0xff] (!%p351_p7)   ;;  %v2665_v36 = vld [vmem:[%s2876_s18 + $0x58] sm:$0xff] (!%p351_p7)  }
  0x28   : > { %2246 = vmatpush3.bf16.msra.mxu1 (!%p351_p7), %v2653_v27  ;;  %v2656_v32 = vld [vmem:[%s2876_s18 + $0x84] sm:$0xff] (!%p351_p7)   ;;  %v2660_v35 = vld [vmem:[%s2876_s18 + $0x8c] sm:$0xff] (!%p351_p7)   ;;  %v1207_v39 = vshll.u32 (!%p351_p7), %v2665_v36, 16  ;;  %v2663_v41 = vld [vmem:[%s2876_s18 + $0x94] sm:$0xff] (!%p351_p7)   ;;  %v1205_v43 = vshrl.u32 (!%p351_p7), %v2665_v36, 16 }
  0x29   : > { %2342 = vmatpush3.bf16.msra.mxu0 (!%p351_p7), %v2865_v28  ;;  %2267 = vmatprep.subr.bf16.mxu1 (!%p351_p7), %v2734_v25  ;;  %v2666_v38 = vld [vmem:[%s2876_s18 + $0x60] sm:$0xff] (!%p351_p7)   ;;  %v2662_v40 = vld [vmem:[%s2876_s18 + $0x10] sm:$0xff] (!%p351_p7)   ;;  %v2670_v46 = vld [vmem:[%s2876_s18 + $0x68] sm:$0xff] (!%p351_p7)  }
  0x2a   : > { %2363 = vmatprep.subr.bf16.mxu0 %v2734_v25  ;;  %v1212_v42 = vshll.u32 %v2666_v38, 16  ;;  %v1209_v44 = vrot.slane %v1207_v39, 1  ;;  %v2664_v48 = vld [vmem:[%s2876_s18 + $0x18] sm:$0xff]   ;;  %v1220_v49 = vshll.u32 %v2670_v46, 16  ;;  %v1216_v52 = vshrl.u32 %v2666_v38, 16  ;;  %v2925_v53 = vld [vmem:[%s2876_s18 + $0x70] sm:$0xff]  }
  0x2b   : > { %2248 = vmatmul.mubr.msk.bf16.vlgmr.msra.gmra.mrb[0].mxu1 %vm441_vm1, %v2655_v31  ;;  %v2669_v57 = vld [vmem:[%s2876_s18 + $0x20] ss:$0 sps:$4 sm:$0xff]   ;;  %v1228_v58 = vshll.u32 %v2925_v53, 16  ;;  %v1224_v60 = vshrl.u32 %v2670_v46, 16  ;;  %v1232_v62 = vshrl.u32 %v2925_v53, 16  ;;  %v2690_v3 = vld [vmem:[%s2876_s18 + $0x10] sm:$0xff]  }
  0x2c   : > { %2344 = vmatmul.mubr.msk.bf16.vlgmr.msra.gmra.mrb[0].mxu0 %vm441_vm1, %v2656_v32  ;;  %2251 = vmatprep.mubr.msk.bf16.mxu1 %vm2735_vm0, %v2734_v25  ;;  %v1214_v45 = vrot.slane %v1212_v42, 1  ;;  %v1210_v47 = vor.u32 %v1209_v44, %v1205_v43  ;;  %v1222_v54 = vrot.slane %v1220_v49, 1  ;;  %v2939_v59 = vld [vmem:[%s2876_s18 + $0x1c] sm:$0xff]   ;;  %v2957_v5 = vld [vmem:[%s2876_s18 + $0x24] sm:$0x1f]   ;;  %v2671_v6 = vld [vmem:[%s2876_s18 + $0x2c] sm:$0xff]  }
  0x2d   : > { %2364 = vmatpush3.bf16.msra.mxu0 %v2657_v29  ;;  %2268 = vmatpush3.bf16.msra.mxu1 %v2658_v30  ;;  %v1415_v63 = vshll.u32 %v2939_v59, 16  ;;  %v2945_v0 = vld [vmem:[%s2876_s18 + $0x78] sm:$0x1f]   ;;  %v1230_v1 = vrot.slane %v1228_v58, 1  ;;  %v1419_v4 = vshrl.u32 %v2939_v59, 16  ;;  %v741_v8 = vshll.u32 %v2690_v3, 16 }
  0x2e   : > { %2347 = vmatprep.mubr.msk.bf16.mxu0 %vm2735_vm0, %v2734_v25  ;;  %2365 = vmatprep.subr.bf16.mxu0 %v2734_v25  ;;  %v1215_v50 = vsel %vm724_vm2, %v1210_v47, %v1214_v45  ;;  %v1218_v56 = vor.u32 %v1216_v52, %v1214_v45  ;;  %v1226_v7 = vor.u32 %v1224_v60, %v1222_v54  ;;  %v2692_v9 = vld [vmem:[%s2876_s18 + $0x18] sm:$0xff]   ;;  %v1236_v10 = vshll.u32 %v2945_v0, 16  ;;  %v2694_v14 = vld [vmem:[%s2876_s18 + $0x30] sm:$0xff]   ;;  %v2973_v18 = vld [vmem:[%s2876_s18 + $0x20] sm:$0x1f]   ;;  %s3269_s15 = smov (!%p380_p8, %s1969_s15), 1 }
  0x2f   : > { %2269 = vmatprep.subr.bf16.mxu1 %v2734_v25  ;;  %v2949_v2 = vrot.slane %v1415_v63, 1  ;;  %v1423_v12 = vshll.u32 %v2957_v5, 16  ;;  %v745_v13 = vshrl.u32 %v2690_v3, 16  ;;  %v2970_v16 = vrot.slane %v741_v8, 1  ;;  %v2695_v20 = vld [vmem:[%s2876_s18 + $0x38] sm:$0xff]   ;;  %v2698_v44 = vld [vmem:[%s2876_s18 + $0x40] sm:$0xff]  }
  0x30   : > { %v1223_v61 = vsel %vm724_vm2, %v1218_v56, %v1222_v54  ;;  %v749_v17 = vshll.u32 %v2692_v9, 16  ;;  %v753_v19 = vshrl.u32 %v2692_v9, 16  ;;  %v1579_v22 = vshrl.u32 %v2694_v14, 16  ;;  %v2682_v39 = vld [vmem:[%s3262_s1 + $0x28] sm:$0xff]   ;;  %v3016_v60 = vld [vmem:[%s2876_s18 + $0x50] sm:$0x1f]  }
  0x31   : > { %2366 = vmatpush3.bf16.msra.mxu0 %v2661_v33  ;;  %2270 = vmatpush3.bf16.msra.mxu1 %v2668_v37  ;;  %v1421_v11 = vor.u32 %v1419_v4, %v2949_v2  ;;  %v2976_v21 = vrot.slane %v1423_v12, 1  ;;  %v1231_v23 = vsel %vm724_vm2, %v1226_v7, %v1230_v1  ;;  %v747_v24 = vor.u32 %v745_v13, %v2970_v16  ;;  %v1351_v33 = vld [vmem:[%s2876_s18 + $0x4] sm:$0xf]  ;;  %v2675_v47 = vld [vmem:[%s2876_s18 + $0x34] sm:$0xff]   ;;  %s2624_s24 = smul.u32 36, %s3269_s15 }
  0x32   : > { %2387 = vmatprep.subr.bf16.mxu0 %v2734_v25  ;;  %2291 = vmatprep.subr.bf16.mxu1 %v2734_v25  ;;  %v751_v27 = vrot.slane %v749_v17, 1  ;;  %v757_v29 = vshll.u32 %v2973_v18, 16  ;;  %v1581_v31 = vshll.u32 %v2694_v14, 16  ;;  %v1586_v32 = vshll.u32 %v2695_v20, 16  ;;  %v3027_v3 = vld [vmem:[%s2876_s18 + $0x14] sm:$0xff]  }
  0x33   : > { %2252 = vmatmul.mubr.msk.bf16.gmra.mrb[4].mxu1 %vm441_vm1, %v2659_v34  ;;  %v2983_v30 = vsel %vm724_vm2, %v1421_v11, %v2976_v21  ;;  %v1352_v34 = vld [vmem:[%s2876_s18 + $0x8] sm:$0xf]  ;;  %v1238_v38 = vrot.slane %v1236_v10, 1  ;;  %v1234_v42 = vor.u32 %v1232_v62, %v1230_v1  ;;  %v1590_v45 = vshrl.u32 %v2695_v20, 16  ;;  %v1725_v9 = vld [vmem:[%s2876_s18 + $0x4] sm:$0xe]  ;;  %s3224_s27 = scalar_lea.vmem %s3264_s3, %s2624_s24 }
  0x34   : > { %2348 = vmatmul.mubr.msk.bf16.gmra.mrb[4].mxu0 %vm441_vm1, %v2660_v35  ;;  %2255 = vmatprep.mubr.msk.bf16.mxu1 %vm2735_vm0, %v2734_v25  ;;  %v2989_v35 = vsel %vm724_vm2, %v747_v24, %v751_v27  ;;  %v755_v36 = vor.u32 %v753_v19, %v751_v27  ;;  %v2991_v37 = vrot.slane %v757_v29, 1  ;;  %v1594_v49 = vshll.u32 %v2698_v44, 16  ;;  %v2677_v10 = vld [vmem:[%s2876_s18 + $0x3c] sm:$0xff]  }
  0x35   : > { %2351 = vmatprep.mubr.msk.bf16.mxu0 %vm2735_vm0, %v2734_v25  ;;  %v2110_v52 = vcombine.low %v1351_v33, %v1352_v34  ;;  %v1239_v54 = vsel %vm724_vm2, %v1234_v42, %v1238_v38  ;;  %v1610_v4 = vshll.u32 %v3016_v60, 16  ;;  %v2152_v12 = vcombine.low %v1725_v9, %v1352_v34  ;;  %v2678_v34 = vld [vmem:[%s2876_s18 + $0x44] sm:$0xff]  }
  0x36   : > { %v3003_v43 = vsel %vm724_vm2, %v755_v36, %v2991_v37  ;;  %v1596_v56 = vrot.slane %v1594_v49, 1  ;;  %v1738_v14 = vrot.slane %v3027_v3, 1  ;;  %v1742_v29 = vrot.slane %v2957_v5, 1  ;;  %v2685_v36 = vld [vmem:[%s2876_s18] sm:$0xff]   ;;  %v2686_v42 = vld [vmem:[%s2876_s18 + $0x8] sm:$0xff]  }
  0x37   : > { %v3037_v11 = vrot.slane %v1610_v4, 1  ;;  %v1735_v20 = vrot.slane %v2152_v12, 1  ;;  %v726_v49 = vshrl.u32 %v2685_v36, 16 }
  0x3b   : > { %2256 = vmatmul.mubr.msk.bf16.gmra.mrb[8].mxu1 %vm441_vm1, %v2662_v40  ;;  %v1583_v40 = vrot.slane %v1581_v31, 1 }
  0x3c   : > { %2352 = vmatmul.mubr.msk.bf16.gmra.mrb[8].mxu0 %vm441_vm1, %v2663_v41  ;;  %2259 = vmatprep.mubr.msk.bf16.mxu1 %vm2735_vm0, %v2734_v25  ;;  %v1588_v41 = vrot.slane %v1586_v32, 1 }
  0x3d   : > { %2367 = vmatprep.mubr.msk.bf16.mxu0 %vm2735_vm0, %v2734_v25  ;;  %v1584_v46 = vor.u32 %v1583_v40, %v1579_v22 }
  0x3f   : > { %v3010_v53 = vsel %vm724_vm2, %v1584_v46, %v1588_v41 }
  0x43   : > { %2260 = vmatmul.mubr.msk.bf16.gmra.mrb[12].mxu1 %vm441_vm1, %v2664_v48  ;;  %v1592_v48 = vor.u32 %v1590_v45, %v1588_v41  ;;  %v1407_v41 = vshll.u32 %v3027_v3, 16 }
  0x44   : > { %2368 = vmatmul.mubr.msk.bf16.vlgmr.msra.gmra.mrb[0].mxu0 %vm441_vm1, %v1215_v50  ;;  %2263 = vmatprep.mubr.msk.bf16.mxu1 %vm2735_vm0, %v2734_v25  ;;  %v2700_v50 = vld [vmem:[%s2876_s18 + $0x48] sm:$0xff]  }
  0x45   : > { %2388 = vmatpush3.bf16.msra.mxu0 %v2667_v51  ;;  %2371 = vmatprep.mubr.msk.bf16.mxu0 %vm2735_vm0, %v2734_v25  ;;  %v1598_v51 = vshrl.u32 %v2698_v44, 16  ;;  %v1606_v58 = vshrl.u32 %v2700_v50, 16  ;;  %v3021_v62 = vsel %vm724_vm2, %v1592_v48, %v1596_v56  ;;  %v728_v44 = vshll.u32 %v2685_v36, 16  ;;  %v2683_v48 = vld [vmem:[%s2876_s18 + $0x4c] ss:$0 sps:$4 sm:$0xff]  }
  0x46   : > { %2389 = vmatprep.subr.bf16.mxu0 %v2734_v25  ;;  %v1409_v46 = vrot.slane %v1407_v41, 1 }
  0x47   : > { %v1600_v63 = vor.u32 %v1598_v51, %v1596_v56  ;;  %v733_v51 = vshll.u32 %v2686_v42, 16 }
  0x49   : > { %2390 = vmatpush3.bf16.msra.mxu0 %v2673_v55  ;;  %v2680_v55 = vld [vmem:[%s2876_s18 + $0xc] sm:$0xff]   ;;  %v735_v56 = vrot.slane %v733_v51, 1 }
  0x4a   : > { %2411 = vmatprep.subr.bf16.mxu0 %v2734_v25  ;;  %v1399_v7 = vshll.u32 %v2680_v55, 16  ;;  %v1736_v13 = vrot.slane %v2680_v55, 1  ;;  %v1403_v40 = vshrl.u32 %v2680_v55, 16 }
  0x4b   : > { %2264 = vmatmul.mubr.msk.bf16.gmra.mrb[16].mxu1 %vm441_vm1, %v2669_v57  ;;  %v1602_v57 = vshll.u32 %v2700_v50, 16  ;;  %v730_v50 = vrot.slane %v728_v44, 1 }
  0x4c   : > { %2372 = vmatmul.mubr.msk.bf16.gmra.mrb[4].mxu0 %vm441_vm1, %v1223_v61  ;;  %2271 = vmatprep.mubr.msk.bf16.mxu1 %vm2735_vm0, %v2734_v25  ;;  %v1240_v61 = vshrl.u32 %v2945_v0, 16  ;;  %v3045_v22 = vsel %vm1734_vm3, %v1736_v13, %v1738_v14  ;;  %v3050_v31 = vsel %vm1734_vm3, %v1735_v20, %v1736_v13  ;;  %v1401_v33 = vrot.slane %v1399_v7, 1 }
  0x4d   : > { %2375 = vmatprep.mubr.msk.bf16.mxu0 %vm2735_vm0, %v2734_v25  ;;  %v1604_v1 = vrot.slane %v1602_v57, 1  ;;  %v731_v55 = vor.u32 %v730_v50, %v726_v49 }
  0x4e   : > { %v1242_v17 = vor.u32 %v1240_v61, %v1238_v38  ;;  %v1405_v45 = vor.u32 %v1403_v40, %v1401_v33  ;;  %v737_v61 = vshrl.u32 %v2686_v42, 16 }
  0x4f   : > { %v3033_v0 = vsel %vm724_vm2, %v1600_v63, %v1604_v1  ;;  %v1608_v8 = vor.u32 %v1606_v58, %v1604_v1  ;;  %v736_v58 = vsel %vm724_vm2, %v731_v55, %v735_v56  ;;  %v2689_v1 = vld [vmem:[%s3262_s1 + $0x30] sm:$0xff]  }
  0x51   : > { %v3043_v19 = vsel %vm724_vm2, %v1608_v8, %v3037_v11 }
  0x53   : > { %2272 = vmatmul.mubr.msk.bf16.vlgmr.msra.gmra.mrb[0].mxu1 %vm441_vm1, %v2671_v6  ;;  %v1394_v6 = vshll.u32 %v2110_v52, 16 }
  0x54   : > { %2376 = vmatmul.mubr.msk.bf16.gmra.mrb[8].mxu0 %vm441_vm1, %v1231_v23  ;;  %2275 = vmatprep.mubr.msk.bf16.mxu1 %vm2735_vm0, %v2734_v25  ;;  %v1392_v23 = vshrl.u32 %v2110_v52, 16  ;;  %v1410_v52 = vsel %vm724_vm2, %v1405_v45, %v1409_v46 }
  0x55   : > { %2292 = vmatpush3.bf16.msra.mxu1 %v2674_v15  ;;  %2379 = vmatprep.mubr.msk.bf16.mxu0 %vm2735_vm0, %v2734_v25  ;;  %v1740_v15 = vrot.slane %v2939_v59, 1  ;;  %v1396_v24 = vrot.slane %v1394_v6, 1  ;;  %v1427_v6 = vshrl.u32 %v2957_v5, 16 }
  0x56   : > { %2293 = vmatprep.subr.bf16.mxu1 %v2734_v25 }
  0x57   : > { %v3047_v27 = vsel %vm1734_vm3, %v1738_v14, %v1740_v15  ;;  %v3055_v59 = vsel %vm1734_vm3, %v1740_v15, %v1742_v29  ;;  %v1397_v32 = vor.u32 %v1396_v24, %v1392_v23  ;;  %v1429_v7 = vor.u32 %v1427_v6, %v2976_v21 }
  0x58   : > { %v761_v21 = vshrl.u32 %v2973_v18, 16  ;;  %v2699_v18 = vld [vmem:[%s2876_s18 + $0x58] sm:$0xff]  }
  0x59   : > { %2294 = vmatpush3.bf16.msra.mxu1 %v2682_v39  ;;  %v1402_v38 = vsel %vm724_vm2, %v1397_v32, %v1401_v33  ;;  %v2681_v39 = vld [vmem:[%s3262_s1 + $0x70] sm:$0xff]  }
  0x5a   : > { %2315 = vmatprep.subr.bf16.mxu1 %v2734_v25 }
  0x5b   : > { %2276 = vmatmul.mubr.msk.bf16.gmra.mrb[4].mxu1 %vm441_vm1, %v2675_v47  ;;  %v2688_v47 = vld [vmem:[%s3262_s1 + $0x78] sm:$0xff]  }
  0x5c   : > { %2380 = vmatmul.mubr.msk.bf16.gmra.mrb[12].mxu0 %vm441_vm1, %v1239_v54  ;;  %2279 = vmatprep.mubr.msk.bf16.mxu1 %vm2735_vm0, %v2734_v25  ;;  %v1411_v54 = vshrl.u32 %v3027_v3, 16  ;;  %v739_v3 = vor.u32 %v737_v61, %v735_v56 }
  0x5d   : > { %2383 = vmatprep.mubr.msk.bf16.mxu0 %vm2735_vm0, %v2734_v25 }
  0x5e   : > { %v1413_v57 = vor.u32 %v1411_v54, %v1409_v46  ;;  %v744_v4 = vsel %vm724_vm2, %v739_v3, %v2970_v16  ;;  %v2696_v16 = vld [vmem:[%s3262_s1 + $0x80] sm:$0xff]  }
  0x60   : > { %v1418_v63 = vsel %vm724_vm2, %v1413_v57, %v2949_v2  ;;  %v2697_v2 = vld [vmem:[%s3262_s1 + $0x38] sm:$0xff]  }
  0x63   : > { %2280 = vmatmul.mubr.msk.bf16.gmra.mrb[8].mxu1 %vm441_vm1, %v2677_v10 }
  0x64   : > { %2384 = vmatmul.mubr.msk.bf16.gmra.mrb[16].mxu0 %vm441_vm1, %v1242_v17  ;;  %2283 = vmatprep.mubr.msk.bf16.mxu1 %vm2735_vm0, %v2734_v25 }
  0x65   : > { %2391 = vmatprep.mubr.msk.bf16.mxu0 %vm2735_vm0, %v2734_v25 }
  0x6b   : > { %2284 = vmatmul.mubr.msk.bf16.gmra.mrb[12].mxu1 %vm441_vm1, %v2678_v34 }
  0x6c   : > { %2392 = vmatmul.mubr.msk.bf16.vlgmr.msra.gmra.mrb[0].mxu0 %vm441_vm1, %v1402_v38  ;;  %2287 = vmatprep.mubr.msk.bf16.mxu1 %vm2735_vm0, %v2734_v25 }
  0x6d   : > { %2412 = vmatpush3.bf16.msra.mxu0 %v2681_v39  ;;  %2395 = vmatprep.mubr.msk.bf16.mxu0 %vm2735_vm0, %v2734_v25 }
  0x6e   : > { %2413 = vmatprep.subr.bf16.mxu0 %v2734_v25 }
  0x71   : > { %2414 = vmatpush3.bf16.msra.mxu0 %v2688_v47 }
  0x72   : > { %2435 = vmatprep.subr.bf16.mxu0 %v2734_v25 }
  0x73   : > { %2288 = vmatmul.mubr.msk.bf16.gmra.mrb[16].mxu1 %vm441_vm1, %v2683_v48 }
  0x74   : > { %2396 = vmatmul.mubr.msk.bf16.gmra.mrb[4].mxu0 %vm441_vm1, %v1410_v52  ;;  %2295 = vmatprep.mubr.msk.bf16.mxu1 %vm2735_vm0, %v2734_v25 }
  0x75   : > { %2399 = vmatprep.mubr.msk.bf16.mxu0 %vm2735_vm0, %v2734_v25 }
  0x7b   : > { %2296 = vmatmul.mubr.msk.bf16.vlgmr.msra.gmra.mrb[0].mxu1 %vm441_vm1, %v736_v58 }
  0x7c   : > { %2400 = vmatmul.mubr.msk.bf16.gmra.mrb[8].mxu0 %vm441_vm1, %v1418_v63  ;;  %2299 = vmatprep.mubr.msk.bf16.mxu1 %vm2735_vm0, %v2734_v25 }
  0x7d   : > { %2316 = vmatpush3.bf16.msra.mxu1 %v2689_v1  ;;  %2403 = vmatprep.mubr.msk.bf16.mxu0 %vm2735_vm0, %v2734_v25 }
  0x7e   : > { %2317 = vmatprep.subr.bf16.mxu1 %v2734_v25 }
  0x81   : > { %2318 = vmatpush3.bf16.msra.mxu1 %v2697_v2 }
  0x82   : > { %2459 = vmatprep.subr.bf16.mxu1 %v2734_v25 }
  0x83   : > { %2300 = vmatmul.mubr.msk.bf16.gmra.mrb[4].mxu1 %vm441_vm1, %v744_v4 }
  0x84   : > { %2404 = vmatmul.mubr.msk.bf16.gmra.mrb[12].mxu0 %vm441_vm1, %v2983_v30  ;;  %2303 = vmatprep.mubr.msk.bf16.mxu1 %vm2735_vm0, %v2734_v25  ;;  %v2701_v30 = vld [vmem:[%s3262_s1 + $0x88] sm:$0xff]  }
  0x85   : > { %2407 = vmatprep.mubr.msk.bf16.mxu0 %vm2735_vm0, %v2734_v25 }
  0x8b   : > { %2304 = vmatmul.mubr.msk.bf16.gmra.mrb[8].mxu1 %vm441_vm1, %v2989_v35  ;;  %v763_v35 = vor.u32 %v761_v21, %v2991_v37  ;;  %v2702_v37 = vld [vmem:[%s2876_s18 + $0x60] sm:$0xff]  }
  0x8c   : > { %2408 = vmatmul.mubr.msk.bf16.gmra.mrb[16].mxu0 %vm441_vm1, %v1429_v7  ;;  %2307 = vmatprep.mubr.msk.bf16.mxu1 %vm2735_vm0, %v2734_v25 }
  0x8d   : > { %2415 = vmatprep.mubr.msk.bf16.mxu0 %vm2735_vm0, %v2734_v25 }
  0x93   : > { %2308 = vmatmul.mubr.msk.bf16.gmra.mrb[12].mxu1 %vm441_vm1, %v3003_v43  ;;  %v2704_v43 = vld [vmem:[%s2876_s18 + $0x68] sm:$0xff]  }
  0x94   : > { %2416 = vmatmul.mubr.msk.bf16.vlgmr.msra.gmra.mrb[0].mxu0 %vm441_vm1, %v3010_v53  ;;  %2311 = vmatprep.mubr.msk.bf16.mxu1 %vm2735_vm0, %v2734_v25 }
  0x95   : > { %2436 = vmatpush3.bf16.msra.mxu0 %v2696_v16  ;;  %2419 = vmatprep.mubr.msk.bf16.mxu0 %vm2735_vm0, %v2734_v25 }
  0x96   : > { %2437 = vmatprep.subr.bf16.mxu0 %v2734_v25 }
  0x99   : > { %2438 = vmatpush3.bf16.msra.mxu0 %v2701_v30 }
  0x9b   : > { %2312 = vmatmul.mubr.msk.bf16.gmra.mrb[16].mxu1 %vm441_vm1, %v763_v35 }
  0x9c   : > { %2420 = vmatmul.mubr.msk.bf16.gmra.mrb[4].mxu0 %vm441_vm1, %v3021_v62  ;;  %2319 = vmatprep.mubr.msk.bf16.mxu1 %vm2735_vm0, %v2734_v25  ;;  %v2708_v62 = vld [vmem:[%s2876_s18 + $0x9c] sm:$0xff]  }
  0x9d   : > { %2423 = vmatprep.mubr.msk.bf16.mxu0 %vm2735_vm0, %v2734_v25 }
  0xa3   : > { %2320 = vmatmul.mubr.msk.bf16.vlgmr.msra.gmra.mrb[0].mxu1 %vm441_vm1, %v2699_v18 }
  0xa4   : > { %2424 = vmatmul.mubr.msk.bf16.gmra.mrb[8].mxu0 %vm441_vm1, %v3033_v0  ;;  %2323 = vmatprep.mubr.msk.bf16.mxu1 %vm2735_vm0, %v2734_v25  ;;  %v2709_v0 = vld [vmem:[%s2876_s18 + $0xa4] ss:$0 sps:$4 sm:$0xff]  }
  0xa5   : > { %2461 = vmatpush3.bf16.msra.mxu1 %v2852_v26  ;;  %2427 = vmatprep.mubr.msk.bf16.mxu0 %vm2735_vm0, %v2734_v25  ;;  %v1614_v26 = vshrl.u32 %v3016_v60, 16  ;;  %v2707_v60 = vld [vmem:[%s2876_s18 + $0x78] ss:$0 sps:$4 sm:$0xff]  }
  0xa6   : > { %2460 = vmatprep.subr.bf16.mxu1 %v2734_v25 }
  0xa7   : > { %v1616_v53 = vor.u32 %v1614_v26, %v3037_v11 }
  0xa9   : > { %2462 = vmatpush3.bf16.msra.mxu1 %v2865_v28  ;;  %v2705_v28 = vld [vmem:[%s2876_s18 + $0x70] sm:$0xff]  }
  0xab   : > { %2324 = vmatmul.mubr.msk.bf16.gmra.mrb[4].mxu1 %vm441_vm1, %v2702_v37 }
  0xac   : > { %2428 = vmatmul.mubr.msk.bf16.gmra.mrb[12].mxu0 %vm441_vm1, %v3043_v19  ;;  %2327 = vmatprep.mubr.msk.bf16.mxu1 %vm2735_vm0, %v2734_v25 }
  0xad   : > { %2431 = vmatprep.mubr.msk.bf16.mxu0 %vm2735_vm0, %v2734_v25 }
  0xb3   : > { %2328 = vmatmul.mubr.msk.bf16.gmra.mrb[8].mxu1 %vm441_vm1, %v2704_v43 }
  0xb4   : > { %2432 = vmatmul.mubr.msk.bf16.gmra.mrb[16].mxu0 %vm441_vm1, %v1616_v53  ;;  %2331 = vmatprep.mubr.msk.bf16.mxu1 %vm2735_vm0, %v2734_v25 }
  0xb5   : > { %2439 = vmatprep.mubr.msk.bf16.mxu0 %vm2735_vm0, %v2734_v25 }
  0xbb   : > { %2332 = vmatmul.mubr.msk.bf16.gmra.mrb[12].mxu1 %vm441_vm1, %v2705_v28 }
  0xbc   : > { %2440 = vmatmul.mubr.msk.bf16.vlgmr.msra.gmra.mrb[0].mxu0 %vm441_vm1, %v3050_v31  ;;  %2335 = vmatprep.mubr.msk.bf16.mxu1 %vm2735_vm0, %v2734_v25 }
  0xbd   : > { %2443 = vmatprep.mubr.msk.bf16.mxu0 %vm2735_vm0, %v2734_v25 }
  0xc3   : > { %2336 = vmatmul.mubr.msk.bf16.gmra.mrb[16].mxu1 %vm441_vm1, %v2707_v60 }
  0xc4   : > { %2444 = vmatmul.mubr.msk.bf16.gmra.mrb[4].mxu0 %vm441_vm1, %v3045_v22  ;;  %2355 = vmatprep.mubr.msk.bf16.mxu1 %vm2735_vm0, %v2734_v25 }
  0xc5   : > { %2447 = vmatprep.mubr.msk.bf16.mxu0 %vm2735_vm0, %v2734_v25 }
  0xcb   : > { %2356 = vmatmul.mubr.msk.bf16.vlgmr.msra.gmra.mrb[12].mxu1 %vm441_vm1, %v2708_v62 }
  0xcc   : > { %2448 = vmatmul.mubr.msk.bf16.gmra.mrb[8].mxu0 %vm441_vm1, %v3047_v27  ;;  %2359 = vmatprep.mubr.msk.bf16.mxu1 %vm2735_vm0, %v2734_v25 }
  0xcd   : > { %2451 = vmatprep.mubr.msk.bf16.mxu0 %vm2735_vm0, %v2734_v25 }
  0xd3   : > { %2360 = vmatmul.mubr.msk.bf16.gmra.mrb[16].mxu1 %vm441_vm1, %v2709_v0 }
  0xd4   : > { %2452 = vmatmul.mubr.msk.bf16.gmra.mrb[12].mxu0 %vm441_vm1, %v3055_v59 }
  0xd5   : > { %2455 = vmatprep.mubr.msk.bf16.mxu0 %vm2735_vm0, %v2734_v25  ;;  %v3215_v25 = vld [vmem:[%s3263_s2] ss:$0 sm:$0xff] }
  0xdc   : > { %2456 = vmatmul.mubr.msk.bf16.gmra.mrb[16].mxu0 %vm441_vm1, %v1742_v29 }
 0x176   : > { %v971_v8 = vpop.f32.mrb[0].mxu1 }
 0x177   : > { %v2321_v9 = vpop.f32.mrb[1].mxu1  ;;  %v2463_v5 = vadd.f32 %v3215_v25, %v971_v8 }
 0x178   : > { %v974_v10 = vpop.f32.mrb[2].mxu1 }
 0x179   : > { %v2322_v11 = vpop.f32.mrb[3].mxu1  ;;  %v2465_v24 = vadd.f32 %v3215_v25, %v974_v10 }
 0x17e   : > { %v979_v12 = vpop.f32.mrb[4].mxu1 }
 0x17f   : > { %v2325_v13 = vpop.f32.mrb[5].mxu1  ;;  %v2467_v38 = vadd.f32 %v3215_v25, %v979_v12 }
 0x180   : > { %v982_v14 = vpop.f32.mrb[6].mxu1 }
 0x181   : > { %v2326_v15 = vpop.f32.mrb[7].mxu1  ;;  %v2469_v41 = vadd.f32 %v3215_v25, %v982_v14 }
 0x186   : > { %v987_v17 = vpop.f32.mrb[8].mxu1 }
 0x187   : > { %v2329_v19 = vpop.f32.mrb[9].mxu1  ;;  %v2471_v51 = vadd.f32 %v3215_v25, %v987_v17 }
 0x188   : > { %v990_v20 = vpop.f32.mrb[10].mxu1 }
 0x189   : > { %v2330_v22 = vpop.f32.mrb[11].mxu1  ;;  %v2473_v57 = vadd.f32 %v3215_v25, %v990_v20 }
 0x18f   : > { %v1805_v23 = vpop.f32.mrb[0].mxu0 }
 0x190   : > { %v2464_v27 = vadd.f32 %v2463_v5, %v1805_v23  ;;  %v2441_v29 = vpop.f32.mrb[1].mxu0 }
 0x191   : > { %v1808_v31 = vpop.f32.mrb[2].mxu0 }
 0x192   : > { %v1852_v59 = vmax.f32 %v2464_v27, 0.0  ;;  %v2466_v32 = vadd.f32 %v2465_v24, %v1808_v31  ;;  %v2442_v33 = vpop.f32.mrb[3].mxu0 }
 0x194   : > { %v2171_v34 = vpack.c.bf16 %v1852_v59, %v1852_v59  ;;  %v1853_v36 = vmax.f32 %v2466_v32, 0.0 }
 0x196   : > { %1899 = vst.msk [vmem:[%s3224_s27] sm:$0xf] %vm1898_vm4, %v2171_v34  ;;  %v2172_v39 = vpack.c.bf16 %v1853_v36, %v1853_v36 }
 0x197   : > { %v1813_v40 = vpop.f32.mrb[4].mxu0 }
 0x198   : > { %1900 = vst.msk [vmem:[%s3224_s27 + $0x4] sm:$0xf] %vm1898_vm4, %v2172_v39  ;;  %v2468_v42 = vadd.f32 %v2467_v38, %v1813_v40  ;;  %v2445_v44 = vpop.f32.mrb[5].mxu0 }
 0x199   : > { %v1816_v45 = vpop.f32.mrb[6].mxu0 }
 0x19a   : > { %v1854_v46 = vmax.f32 %v2468_v42, 0.0  ;;  %v2470_v47 = vadd.f32 %v2469_v41, %v1816_v45  ;;  %v2446_v48 = vpop.f32.mrb[7].mxu0 }
 0x19c   : > { %v2173_v49 = vpack.c.bf16 %v1854_v46, %v1854_v46  ;;  %v1855_v50 = vmax.f32 %v2470_v47, 0.0 }
 0x19e   : > { %1901 = vst.msk [vmem:[%s3224_s27 + $0x8] sm:$0xf] %vm1898_vm4, %v2173_v49  ;;  %v2174_v52 = vpack.c.bf16 %v1855_v50, %v1855_v50  ;;  %v1141_v54 = vpop.f32.mrb[12].mxu1 }
 0x19f   : > { %v1821_v55 = vpop.f32.mrb[8].mxu0  ;;  %v2357_v56 = vpop.f32.mrb[13].mxu1  ;;  %v2475_v21 = vadd.f32 %v3215_v25, %v1141_v54 }
 0x1a0   : > { %1902 = vst.msk [vmem:[%s3224_s27 + $0xc] sm:$0xf] %vm1898_vm4, %v2174_v52  ;;  %v2472_v58 = vadd.f32 %v2471_v51, %v1821_v55  ;;  %v2449_v61 = vpop.f32.mrb[9].mxu0  ;;  %v1144_v63 = vpop.f32.mrb[14].mxu1 }
 0x1a1   : > { %v1824_v1 = vpop.f32.mrb[10].mxu0  ;;  %v2358_v3 = vpop.f32.mrb[15].mxu1  ;;  %v2477_v26 = vadd.f32 %v3215_v25, %v1144_v63 }
 0x1a2   : > { %v1856_v2 = vmax.f32 %v2472_v58, 0.0  ;;  %v2474_v4 = vadd.f32 %v2473_v57, %v1824_v1  ;;  %v2450_v6 = vpop.f32.mrb[11].mxu0 }
 0x1a4   : > { %v2175_v7 = vpack.c.bf16 %v1856_v2, %v1856_v2  ;;  %v1857_v16 = vmax.f32 %v2474_v4, 0.0 }
 0x1a6   : > { %1903 = vst.msk [vmem:[%s3224_s27 + $0x10] sm:$0xf] %vm1898_vm4, %v2175_v7  ;;  %v2176_v30 = vpack.c.bf16 %v1857_v16, %v1857_v16  ;;  %v1149_v35 = vpop.f32.mrb[16].mxu1 }
 0x1a7   : > { %v1829_v18 = vpop.f32.mrb[12].mxu0  ;;  %v2361_v37 = vpop.f32.mrb[17].mxu1  ;;  %v2479_v12 = vadd.f32 %v3215_v25, %v1149_v35 }
 0x1a8   : > { %1904 = vst.msk [vmem:[%s3224_s27 + $0x14] sm:$0xf] %vm1898_vm4, %v2176_v30  ;;  %v2476_v43 = vadd.f32 %v2475_v21, %v1829_v18  ;;  %v2453_v53 = vpop.f32.mrb[13].mxu0  ;;  %v1152_v28 = vpop.f32.mrb[18].mxu1 }
 0x1a9   : > { %v1832_v60 = vpop.f32.mrb[14].mxu0  ;;  %v2362_v62 = vpop.f32.mrb[19].mxu1 }
 0x1aa   : > { %v1858_v0 = vmax.f32 %v2476_v43, 0.0  ;;  %v2478_v8 = vadd.f32 %v2477_v26, %v1832_v60  ;;  %v2454_v9 = vpop.f32.mrb[15].mxu0 }
 0x1ac   : > { %v2177_v10 = vpack.c.bf16 %v1858_v0, %v1858_v0  ;;  %v1859_v11 = vmax.f32 %v2478_v8, 0.0 }
 0x1ae   : > { %1905 = vst.msk [vmem:[%s3224_s27 + $0x18] sm:$0xf] %vm1898_vm4, %v2177_v10  ;;  %v2178_v13 = vpack.c.bf16 %v1859_v11, %v1859_v11 }
 0x1af   : > { %v1837_v14 = vpop.f32.mrb[16].mxu0 }
 0x1b0   : > { %1906 = vst.msk [vmem:[%s3224_s27 + $0x1c] sm:$0xf] %vm1898_vm4, %v2178_v13  ;;  %v2480_v15 = vadd.f32 %v2479_v12, %v1837_v14  ;;  %v2457_v17 = vpop.f32.mrb[17].mxu0 }
 0x1b1   : > { %v1840_v19 = vpop.f32.mrb[18].mxu0 }
 0x1b2   : > { %v1860_v20 = vmax.f32 %v2480_v15, 0.0  ;;  %v2458_v22 = vpop.f32.mrb[19].mxu0 }
 0x1b4   : > { %v2179_v5 = vpack.c.bf16 %v1860_v20, %v1860_v20 }
 0x1b6   : > { %1907 = vst.msk [vmem:[%s3224_s27 + $0x20] sm:$0xf] %vm1898_vm4, %v2179_v5 }
 0x1b7 PF: > { %p10_p9 = scmp.ge.s32.totalorder %s2773_s16, 4   ;;  %s3265_s12 = smov %s2728_s13 }
 0x1b8   : > { %s3266_s13 = smov %s2782_s19  ;;  %s3267_s14 = smov %s2773_s16 }
 0x1b9   :  { %12 = sbr.rel (!%p10_p9) target bundleno = 2 (0x2), region = 119 }

// kernel: vae_forward.10
= control target key start
LH: loop header
LB: loop body
LE: loop exit
PB: predicated region body
PF: predicated region fallthrough
CT: control target
= control target key end

     0   :  { %s1814_s12 = smov 0   ;;  %s1816_s13 = smov 0   ;;  %s2038_s0 = inlined_call_operand.vmem [shape: bf16[4,2,26,64], index: 0, kind: input, shape index: {}]   ;;  %s2039_s1 = inlined_call_operand.vmem [shape: bf16[9,64,128], index: 1, kind: input, shape index: {}]   ;;  %s2040_s2 = inlined_call_operand.vmem [shape: f32[1,128], index: 2, kind: input, shape index: {}]   ;;  %s2041_s3 = inlined_call_operand.vmem [shape: bf16[1,2,20,128], index: 3, kind: output, shape index: {}]  }
   0x1   :  { %s1818_s14 = smov 0  }
   0x2 LB: > { %s1326_s15 = sadd.s32 4294967295, %s1792_s14   ;;  %s1831_s16 = sadd.s32 1, %s1792_s14   ;;  %s1792_s14 = sphi %s1818_s14, %s2044_s14   ;;  %s1788_s13 = sphi %s1816_s13, %s2043_s13   ;;  %s1784_s12 = sphi %s1814_s12, %s2042_s12  }
   0x3   : > { %s17_s17 = ssub.s32 %s1792_s14, %s1831_s16  ;;  %s20_s18 = sadd.s32 1, %s1788_s13 }
   0x4   : > { %p18_p0 = scmp.eq.s32.totalorder %s17_s17, 0  ;;  %p27_p1 = scmp.ne.s32.totalorder %s1788_s13, %s1784_s12 }
   0x5   : > { %p28_p2 = scmp.eq.s32.totalorder %s1792_s14, 0  ;;  %p1329_p4 = scmp.ge.s32.totalorder %s1792_s14, 2 }
   0x6   : > { %s1840_s19 = scalar_select %p18_p0, %s1788_s13, %s20_s18  }
   0x7   : > { %p29_p3 = por %p28_p2, %p27_p1  ;;  %127 = sbr.rel (%p1329_p4) target bundleno = 22 (0x16), region = 24 }
   0xe   : > { %130 = sbr.rel (!%p29_p3) target bundleno = 22 (0x16), region = 28  ;;  %s132_s20 = sand.u32 (%p29_p3), 1, %s1788_s13  }
   0xf   : > { %s1489_s21 = sshll.u32 (%p29_p3), %s1792_s14, 4  ;;  %s1330_s22 = sshll.u32 (%p29_p3), %s132_s20, 6 }
  0x10   : > { %s137_s25 = scalar_lea.vmem (%p29_p3), %s2038_s0, %s1489_s21  ;;  %s134_s26 = scalar_lea.vmem (%p29_p3), [#allocation2], %s1330_s22 }
  0x11   : > { %v153_v0 = vld [vmem:[%s137_s25] sm:$0xff] (%p29_p3)   ;;  %v157_v1 = vld [vmem:[%s137_s25 + $0x8] sm:$0xff] (%p29_p3)  }
  0x12   : > { %v161_v2 = vld [vmem:[%s137_s25 + $0x20] sm:$0xff] (%p29_p3)   ;;  %154 = vst [vmem:[%s134_s26] sm:$0xff] (%p29_p3), %v153_v0   ;;  %158 = vst [vmem:[%s134_s26 + $0x8] sm:$0xff] (%p29_p3), %v157_v1   ;;  %v165_v3 = vld [vmem:[%s137_s25 + $0x28] sm:$0xff] (%p29_p3)  }
  0x13   : > { %162 = vst [vmem:[%s134_s26 + $0x10] sm:$0xff] (%p29_p3), %v161_v2   ;;  %v169_v4 = vld [vmem:[%s137_s25 + $0x40] sm:$0xff] (%p29_p3)   ;;  %v173_v5 = vld [vmem:[%s137_s25 + $0x48] sm:$0xff] (%p29_p3)   ;;  %166 = vst [vmem:[%s134_s26 + $0x18] sm:$0xff] (%p29_p3), %v165_v3  }
  0x14   : > { %170 = vst [vmem:[%s134_s26 + $0x20] sm:$0xff] (%p29_p3), %v169_v4   ;;  %174 = vst [vmem:[%s134_s26 + $0x28] sm:$0xff] (%p29_p3), %v173_v5   ;;  %v177_v6 = vld [vmem:[%s137_s25 + $0x60] sm:$0xff] (%p29_p3)   ;;  %v181_v7 = vld [vmem:[%s137_s25 + $0x68] sm:$0xff] (%p29_p3)  }
  0x15   : > { %178 = vst [vmem:[%s134_s26 + $0x30] sm:$0xff] %v177_v6   ;;  %182 = vst [vmem:[%s134_s26 + $0x38] sm:$0xff] %v181_v7  }
  0x16 PF: > { %p1333_p5 = scmp.ge.s32.totalorder %s1792_s14, 1  ;;  %p238_p6 = scmp.lt.s32.totalorder %s1792_s14, 3 }
  0x18   : > { %p239_p7 = pnand %p1333_p5, %p238_p6 }
  0x19   : > { %v1719_v8 = vld [vmem:[%s2039_s1] sm:$0xff] (!%p239_p7)   ;;  %s245_s29 = sand.u32 (!%p239_p7), 1, %s1784_s12   ;;  %v1721_v10 = vld [vmem:[%s2039_s1 + $0x8] sm:$0xff] (!%p239_p7)   ;;  %v1723_v12 = vld [vmem:[%s2039_s1 + $0x10] sm:$0xff] (!%p239_p7)   ;;  %vm324_vm0 = vcmask (!%p239_p7), 523264   ;;  %vm1161_vm3 = vcmask (!%p239_p7), 1044480  }
  0x1a   : > { %242 = sbr.rel (%p239_p7) target bundleno = 329 (0x149), region = 69  ;;  %v1720_v9 = vld [vmem:[%s2039_s1 + $0x80] sm:$0xff] (!%p239_p7)   ;;  %1552 = vmatprep.subr.bf16.mxu1 (!%p239_p7), %v1719_v8  ;;  %s1334_s7 = sshll.u32 (!%p239_p7), %s245_s29, 6  ;;  %v1722_v11 = vld [vmem:[%s2039_s1 + $0x88] sm:$0xff] (!%p239_p7)   ;;  %v1724_v13 = vld [vmem:[%s2039_s1 + $0x90] sm:$0xff] (!%p239_p7)  }
  0x1b   : > { %1600 = vmatprep.subr.bf16.mxu0 (!%p239_p7), %v1720_v9  ;;  %1553 = vmatpush3.bf16.msra.mxu1 (!%p239_p7), %v1719_v8  ;;  %v1725_v14 = vld [vmem:[%s2039_s1 + $0x18] sm:$0xff] (!%p239_p7)   ;;  %s1872_s21 = scalar_lea.vmem (!%p239_p7), [#allocation2], %s1334_s7  ;;  %v1728_v17 = vld [vmem:[%s2039_s1 + $0x20] sm:$0xff] (!%p239_p7)   ;;  %v1733_v22 = vld [vmem:[%s2039_s1 + $0x28] sm:$0xff] (!%p239_p7)   ;;  %vm497_vm1 = vsmask.f32 (!%p239_p7), 7424 }
  0x1c   : > { %1601 = vmatpush3.bf16.msra.mxu0 (!%p239_p7), %v1720_v9  ;;  %1554 = vmatprep.subr.bf16.mxu1 (!%p239_p7), %v1721_v10  ;;  %v1875_v15 = vld [vmem:[%s1872_s21] sm:$0xff] (!%p239_p7)   ;;  %v1726_v16 = vld [vmem:[%s2039_s1 + $0x98] sm:$0xff] (!%p239_p7)   ;;  %v1729_v18 = vld [vmem:[%s1872_s21 + $0x30] sm:$0xff] (!%p239_p7)   ;;  %vm928_vm2 = vsmask.f32 (!%p239_p7), 5376  ;;  %p268_p8 = scmp.lt.s32.totalorder (!%p239_p7), %s1326_s15, 1 }
  0x1d   : > { %1602 = vmatprep.subr.bf16.mxu0 (!%p239_p7), %v1722_v11  ;;  %1560 = vmatprep.mubr.msk.bf16.mxu1 (!%p239_p7), %vm324_vm0, %v1875_v15  ;;  %v1730_v19 = vld [vmem:[%s2039_s1 + $0xa0] sm:$0xff] (!%p239_p7)   ;;  %v1731_v20 = vld [vmem:[%s1872_s21 + $0x8] ss:$0 sps:$4 sm:$0x33] (!%p239_p7)   ;;  %v1735_v24 = vld [vmem:[%s2039_s1 + $0x30] sm:$0xff] (!%p239_p7)   ;;  %v500_v34 = vshll.u32 (!%p239_p7), %v1875_v15, 16 }
  0x1e   : > { %1608 = vmatprep.mubr.msk.bf16.mxu0 (!%p239_p7), %vm324_vm0, %v1729_v18  ;;  %v1732_v21 = vld [vmem:[%s1872_s21 + $0x38] ss:$0 sps:$4 sm:$0x33] (!%p239_p7)   ;;  %v1734_v23 = vld [vmem:[%s2039_s1 + $0xa8] sm:$0xff] (!%p239_p7)   ;;  %v1739_v25 = vld [vmem:[%s1872_s21 + $0x10] sm:$0xff] (!%p239_p7)   ;;  %v498_v42 = vshrl.u32 (!%p239_p7), %v1875_v15, 16 }
  0x1f   : > { %1555 = vmatpush3.bf16.msra.mxu1 (!%p239_p7), %v1721_v10  ;;  %v1736_v26 = vld [vmem:[%s2039_s1 + $0xb0] sm:$0xff] (!%p239_p7)   ;;  %v1909_v27 = vld [vmem:[%s1872_s21 + $0x20] sm:$0xff] (!%p239_p7)   ;;  %v1742_v28 = vld [vmem:[%s1872_s21 + $0x28] ss:$0 sps:$4 sm:$0x77] (!%p239_p7)   ;;  %v502_v43 = vrot.slane (!%p239_p7), %v500_v34, 1 }
  0x20   : > { %1603 = vmatpush3.bf16.msra.mxu0 (!%p239_p7), %v1722_v11  ;;  %1556 = vmatprep.subr.bf16.mxu1 (!%p239_p7), %v1723_v12  ;;  %v1737_v29 = vld [vmem:[%s2039_s1 + $0x38] sm:$0xff] (!%p239_p7)   ;;  %v810_v31 = vshrl.u32 (!%p239_p7), %v1909_v27, 16  ;;  %v812_v32 = vshll.u32 (!%p239_p7), %v1909_v27, 16  ;;  %v817_v33 = vshll.u32 (!%p239_p7), %v1742_v28, 16  ;;  %v1740_v35 = vld [vmem:[%s2039_s1 + $0x40] sm:$0xff] (!%p239_p7)   ;;  %v821_v36 = vshrl.u32 (!%p239_p7), %v1742_v28, 16 }
  0x21   : > { %1604 = vmatprep.subr.bf16.mxu0 %v1724_v13  ;;  %v1738_v30 = vld [vmem:[%s2039_s1 + $0xb8] sm:$0xff]   ;;  %v1743_v41 = vld [vmem:[%s2039_s1 + $0xc0] sm:$0xff]   ;;  %v1745_v46 = vld [vmem:[%s2039_s1 + $0x48] sm:$0xff]   ;;  %v503_v51 = vor.u32 %v502_v43, %v498_v42  ;;  %s2046_s15 = smov (!%p268_p8, %s1326_s15), 1 }
  0x22   : > { %v814_v37 = vrot.slane %v812_v32, 1  ;;  %v819_v38 = vrot.slane %v817_v33, 1  ;;  %v1744_v39 = vld [vmem:[%s1872_s21 + $0x18] ss:$0 sps:$4 sm:$0x33]   ;;  %v1746_v47 = vld [vmem:[%s2039_s1 + $0xc8] sm:$0xff]  }
  0x23   : > { %1557 = vmatpush3.bf16.msra.mxu1 %v1723_v12  ;;  %v1751_v48 = vld [vmem:[%s1872_s21 + $0x8] ss:$0 sps:$4 sm:$0x77]   ;;  %v905_v49 = vld [vmem:[%s1872_s21] sm:$0xc]  ;;  %v1747_v54 = vld [vmem:[%s2039_s1 + $0x50] sm:$0xff]  }
  0x24   : > { %1605 = vmatpush3.bf16.msra.mxu0 %v1724_v13  ;;  %1558 = vmatprep.subr.bf16.mxu1 %v1725_v14  ;;  %v815_v40 = vor.u32 %v814_v37, %v810_v31  ;;  %v823_v45 = vor.u32 %v821_v36, %v819_v38  ;;  %v1941_v50 = vld [vmem:[%s1872_s21 + $0x4] sm:$0xf]  ;;  %v505_v52 = vshll.u32 %v1751_v48, 16  ;;  %v1949_v55 = vld [vmem:[%s1872_s21 + $0x8] sm:$0x1f]   ;;  %v1748_v56 = vld [vmem:[%s2039_s1 + $0xd0] sm:$0xff]  }
  0x25   : > { %1606 = vmatprep.subr.bf16.mxu0 %v1726_v16  ;;  %v1441_v53 = vcombine.low %v905_v49, %v1941_v50  ;;  %v938_v60 = vshrl.u32 %v1949_v55, 16  ;;  %v941_v61 = vshll.u32 %v1949_v55, 16  ;;  %v1749_v62 = vld [vmem:[%s2039_s1 + $0x58] sm:$0xff]   ;;  %v509_v6 = vshrl.u32 %v1751_v48, 16  ;;  %v1752_v8 = vld [vmem:[%s2039_s1 + $0x60] sm:$0xff]   ;;  %v1756_v12 = vld [vmem:[%s2039_s1 + $0x68] sm:$0xff]  }
  0x26   : > { %v820_v44 = vsel %vm497_vm1, %v815_v40, %v819_v38  ;;  %v507_v57 = vrot.slane %v505_v52, 1  ;;  %v1750_v63 = vld [vmem:[%s2039_s1 + $0xd8] sm:$0xff]   ;;  %v1755_v10 = vld [vmem:[%s2039_s1 + $0xe0] sm:$0xff]   ;;  %v1763_v13 = vld [vmem:[%s1872_s21 + $0x10] sm:$0xfc]   ;;  %s1694_s12 = smul.u32 12, %s2046_s15 }
  0x27   : > { %1559 = vmatpush3.bf16.msra.mxu1 %v1725_v14  ;;  %v930_v58 = vshrl.u32 %v1441_v53, 16  ;;  %v933_v59 = vshll.u32 %v1441_v53, 16  ;;  %v940_v3 = vrot.slane %v938_v60, 2  ;;  %v943_v4 = vrot.slane %v941_v61, 3  ;;  %v1764_v14 = vld [vmem:[%s1872_s21 + $0x18] sm:$0x1f]  }
  0x28   : > { %1607 = vmatpush3.bf16.msra.mxu0 %v1726_v16  ;;  %1564 = vmatprep.subr.bf16.mxu1 %v1728_v17  ;;  %v508_v0 = vsel %vm497_vm1, %v503_v51, %v507_v57  ;;  %v511_v11 = vor.u32 %v509_v6, %v507_v57  ;;  %v1757_v15 = vld [vmem:[%s2039_s1 + $0xe8] sm:$0xff]   ;;  %v1051_v16 = vshrl.u32 %v1763_v13, 16  ;;  %v1059_v18 = vshrl.u32 %v1764_v14, 16  ;;  %v1760_v31 = vld [vmem:[%s2039_s1 + $0x78] sm:$0xff]   ;;  %v1765_v33 = vld [vmem:[%s2039_s1 + $0x100] sm:$0xff]   ;;  %s272_s20 = scalar_lea.vmem %s2041_s3, %s1694_s12 }
  0x29   : > { %1612 = vmatprep.subr.bf16.mxu0 %v1730_v19  ;;  %v932_v1 = vrot.slane %v930_v58, 2  ;;  %v935_v2 = vrot.slane %v933_v59, 3  ;;  %v944_v7 = vor.u32 %v943_v4, %v940_v3  ;;  %v1761_v32 = vld [vmem:[%s2039_s1 + $0xf8] sm:$0xff]   ;;  %v1762_v36 = vld [vmem:[%s1872_s21 + $0x28] ss:$0 sps:$4 sm:$0x33]  }
  0x2a   : > { %1561 = vmatmul.mubr.msk.bf16.vlgmr.msra.gmra.mrb[0].mxu1 %vm324_vm0, %v1731_v20  ;;  %v1053_v20 = vrot.slane %v1051_v16, 2  ;;  %v1766_v37 = vld [vmem:[%s2039_s1 + $0x108] sm:$0xff]   ;;  %v1768_v40 = vld [vmem:[%s2039_s1 + $0x118] sm:$0xff]  }
  0x2b   : > { %1565 = vmatpush3.bf16.msra.mxu1 %v1728_v17  ;;  %1609 = vmatmul.mubr.msk.bf16.vlgmr.msra.gmra.mrb[0].mxu0 %vm324_vm0, %v1732_v21  ;;  %v936_v5 = vor.u32 %v935_v2, %v932_v1  ;;  %v1054_v17 = vshll.u32 %v1763_v13, 16 }
  0x2c   : > { %1613 = vmatpush3.bf16.msra.mxu0 %v1730_v19  ;;  %1566 = vmatprep.subr.bf16.mxu1 %v1733_v22  ;;  %v1062_v19 = vshll.u32 %v1764_v14, 16 }
  0x2d   : > { %1614 = vmatprep.subr.bf16.mxu0 %v1734_v23  ;;  %1572 = vmatprep.mubr.msk.bf16.mxu1 %vm324_vm0, %v1739_v25  ;;  %v945_v9 = vsel %vm928_vm2, %v936_v5, %v944_v7  ;;  %v1056_v21 = vrot.slane %v1054_v17, 3  ;;  %v1759_v25 = vld [vmem:[%s2039_s1 + $0xf0] sm:$0xff]  }
  0x2e   : > { %1620 = vmatprep.mubr.msk.bf16.mxu0 %vm324_vm0, %v820_v44 }
  0x2f   : > { %1567 = vmatpush3.bf16.msra.mxu1 %v1733_v22  ;;  %v1061_v22 = vrot.slane %v1059_v18, 2 }
  0x30   : > { %1615 = vmatpush3.bf16.msra.mxu0 %v1734_v23  ;;  %1568 = vmatprep.subr.bf16.mxu1 %v1735_v24  ;;  %v1064_v23 = vrot.slane %v1062_v19, 3 }
  0x31   : > { %1616 = vmatprep.subr.bf16.mxu0 %v1736_v26 }
  0x32   : > { %v1065_v28 = vor.u32 %v1064_v23, %v1061_v22 }
  0x33   : > { %1569 = vmatpush3.bf16.msra.mxu1 %v1735_v24  ;;  %v1758_v24 = vld [vmem:[%s2039_s1 + $0x70] sm:$0xff]  }
  0x34   : > { %1617 = vmatpush3.bf16.msra.mxu0 %v1736_v26  ;;  %1570 = vmatprep.subr.bf16.mxu1 %v1737_v29  ;;  %v1057_v26 = vor.u32 %v1056_v21, %v1053_v20 }
  0x35   : > { %1618 = vmatprep.subr.bf16.mxu0 %v1738_v30 }
  0x37   : > { %1571 = vmatpush3.bf16.msra.mxu1 %v1737_v29  ;;  %v1148_v29 = vld [vmem:[%s1872_s21] sm:$0x8] }
  0x38   : > { %1619 = vmatpush3.bf16.msra.mxu0 %v1738_v30  ;;  %1576 = vmatprep.subr.bf16.mxu1 %v1740_v35  ;;  %v1066_v30 = vsel %vm928_vm2, %v1057_v26, %v1065_v28 }
  0x39   : > { %1624 = vmatprep.subr.bf16.mxu0 %v1743_v41 }
  0x3a   : > { %1573 = vmatmul.mubr.msk.bf16.vlgmr.msra.gmra.mrb[0].mxu1 %vm324_vm0, %v1744_v39  ;;  %v1767_v39 = vld [vmem:[%s2039_s1 + $0x110] sm:$0xff]  }
  0x3b   : > { %1577 = vmatpush3.bf16.msra.mxu1 %v1740_v35  ;;  %1621 = vmatmul.mubr.msk.bf16.vlgmr.msra.gmra.mrb[0].mxu0 %vm324_vm0, %v823_v45  ;;  %v1163_v35 = vrot.slane %v1949_v55, 3  ;;  %v1336_v45 = vld [vmem:[%s2040_s2] ss:$0 sm:$0xff] }
  0x3c   : > { %1625 = vmatpush3.bf16.msra.mxu0 %v1743_v41  ;;  %1578 = vmatprep.subr.bf16.mxu1 %v1745_v46 }
  0x3d   : > { %1626 = vmatprep.subr.bf16.mxu0 %v1746_v47  ;;  %1584 = vmatprep.mubr.msk.bf16.mxu1 %vm324_vm0, %v508_v0 }
  0x3e   : > { %1632 = vmatprep.mubr.msk.bf16.mxu0 %vm324_vm0, %v945_v9 }
  0x3f   : > { %1579 = vmatpush3.bf16.msra.mxu1 %v1745_v46 }
  0x40   : > { %1627 = vmatpush3.bf16.msra.mxu0 %v1746_v47  ;;  %1580 = vmatprep.subr.bf16.mxu1 %v1747_v54 }
  0x41   : > { %1628 = vmatprep.subr.bf16.mxu0 %v1748_v56 }
  0x43   : > { %1581 = vmatpush3.bf16.msra.mxu1 %v1747_v54 }
  0x44   : > { %1629 = vmatpush3.bf16.msra.mxu0 %v1748_v56  ;;  %1582 = vmatprep.subr.bf16.mxu1 %v1749_v62 }
  0x45   : > { %1630 = vmatprep.subr.bf16.mxu0 %v1750_v63 }
  0x47   : > { %1583 = vmatpush3.bf16.msra.mxu1 %v1749_v62 }
  0x48   : > { %1631 = vmatpush3.bf16.msra.mxu0 %v1750_v63  ;;  %1588 = vmatprep.subr.bf16.mxu1 %v1752_v8 }
  0x49   : > { %1636 = vmatprep.subr.bf16.mxu0 %v1755_v10 }
  0x4a   : > { %1585 = vmatmul.mubr.msk.bf16.vlgmr.msra.gmra.mrb[0].mxu1 %vm324_vm0, %v511_v11 }
  0x4b   : > { %1589 = vmatpush3.bf16.msra.mxu1 %v1752_v8  ;;  %1633 = vmatmul.mubr.msk.bf16.vlgmr.msra.gmra.mrb[0].mxu0 %vm324_vm0, %v944_v7 }
  0x4c   : > { %1637 = vmatpush3.bf16.msra.mxu0 %v1755_v10  ;;  %1590 = vmatprep.subr.bf16.mxu1 %v1756_v12 }
  0x4d   : > { %1638 = vmatprep.subr.bf16.mxu0 %v1757_v15  ;;  %1596 = vmatprep.mubr.msk.bf16.mxu1 %vm324_vm0, %v1909_v27  ;;  %v1477_v27 = vcombine.low %v1148_v29, %v1941_v50 }
  0x4e   : > { %1644 = vmatprep.mubr.msk.bf16.mxu0 %vm324_vm0, %v1066_v30 }
  0x4f   : > { %1591 = vmatpush3.bf16.msra.mxu1 %v1756_v12  ;;  %v1162_v34 = vrot.slane %v1477_v27, 3 }
  0x50   : > { %1639 = vmatpush3.bf16.msra.mxu0 %v1757_v15  ;;  %1592 = vmatprep.subr.bf16.mxu1 %v1758_v24 }
  0x51   : > { %1640 = vmatprep.subr.bf16.mxu0 %v1759_v25  ;;  %v1164_v38 = vsel %vm1161_vm3, %v1162_v34, %v1163_v35 }
  0x53   : > { %1593 = vmatpush3.bf16.msra.mxu1 %v1758_v24 }
  0x54   : > { %1641 = vmatpush3.bf16.msra.mxu0 %v1759_v25  ;;  %1594 = vmatprep.subr.bf16.mxu1 %v1760_v31 }
  0x55   : > { %1642 = vmatprep.subr.bf16.mxu0 %v1761_v32 }
  0x57   : > { %1595 = vmatpush3.bf16.msra.mxu1 %v1760_v31 }
  0x58   : > { %1643 = vmatpush3.bf16.msra.mxu0 %v1761_v32 }
  0x59   : > { %1648 = vmatprep.subr.bf16.mxu0 %v1765_v33 }
  0x5a   : > { %1597 = vmatmul.mubr.msk.bf16.vlgmr.msra.gmra.mrb[0].mxu1 %vm324_vm0, %v1762_v36 }
  0x5b   : > { %1645 = vmatmul.mubr.msk.bf16.vlgmr.msra.gmra.mrb[0].mxu0 %vm324_vm0, %v1065_v28 }
  0x5c   : > { %1649 = vmatpush3.bf16.msra.mxu0 %v1765_v33  ;;  %1656 = vmatprep.mubr.msk.bf16.mxu0 %vm324_vm0, %v1164_v38 }
  0x5d   : > { %1650 = vmatprep.subr.bf16.mxu0 %v1766_v37 }
  0x60   : > { %1651 = vmatpush3.bf16.msra.mxu0 %v1766_v37 }
  0x61   : > { %1652 = vmatprep.subr.bf16.mxu0 %v1767_v39 }
  0x64   : > { %1653 = vmatpush3.bf16.msra.mxu0 %v1767_v39 }
  0x65   : > { %1654 = vmatprep.subr.bf16.mxu0 %v1768_v40 }
  0x68   : > { %1655 = vmatpush3.bf16.msra.mxu0 %v1768_v40 }
  0x6b   : > { %1657 = vmatmul.mubr.msk.bf16.vlgmr.msra.gmra.mrb[0].mxu0 %vm324_vm0, %v1163_v35 }
 0x12d   : > { %v1598_v41 = vpop.f32.mrb[0].mxu1 }
 0x12e   : > { %v678_v42 = vpop.f32.mrb[1].mxu1  ;;  %v1660_v46 = vadd.f32 %v1598_v41, %v1336_v45 }
 0x12f   : > { %v1599_v43 = vpop.f32.mrb[2].mxu1  ;;  %v1662_v47 = vadd.f32 %v1336_v45, %v678_v42 }
 0x130   : > { %v681_v44 = vpop.f32.mrb[3].mxu1 }
 0x131   : > { %v1664_v51 = vadd.f32 %v1336_v45, %v681_v44 }
 0x13e   : > { %v1658_v48 = vpop.f32.mrb[0].mxu0 }
 0x13f   : > { %v1661_v49 = vadd.f32 %v1660_v46, %v1658_v48  ;;  %v1229_v50 = vpop.f32.mrb[1].mxu0 }
 0x140   : > { %v1663_v52 = vadd.f32 %v1662_v47, %v1229_v50  ;;  %v1659_v53 = vpop.f32.mrb[2].mxu0 }
 0x141   : > { %v1248_v54 = vmax.f32 %v1661_v49, 0.0  ;;  %v1232_v55 = vpop.f32.mrb[3].mxu0 }
 0x142   : > { %v1665_v56 = vadd.f32 %v1664_v51, %v1232_v55  ;;  %v1246_v58 = vmax.f32 %v1663_v52, 0.0 }
 0x143   : > { %v1492_v57 = vpack.c.bf16 %v1248_v54, %v1248_v54 }
 0x144   : > { %v1247_v59 = vmax.f32 %v1665_v56, 0.0 }
 0x145   : > { %1264 = vst [vmem:[%s272_s20 + $0x8] sm:$0x3] %v1492_v57 }
 0x146   : > { %v1496_v60 = vpack.c.bf16 %v1247_v59, %v1246_v58 }
 0x148   : > { %1497 = vst [vmem:[%s272_s20] sm:$0xff] %v1496_v60  }
 0x149 PF: > { %p10_p9 = scmp.ge.s32.totalorder %s1831_s16, 4   ;;  %s2042_s12 = smov %s1788_s13 }
 0x14a   : > { %s2043_s13 = smov %s1840_s19  ;;  %s2044_s14 = smov %s1831_s16 }
 0x14b   :  { %12 = sbr.rel (!%p10_p9) target bundleno = 2 (0x2), region = 119 }

// kernel: vae_forward.12
= control target key start
LH: loop header
LB: loop body
LE: loop exit
PB: predicated region body
PF: predicated region fallthrough
CT: control target
= control target key end

     0   :  { %s485_s12 = smov 0   ;;  %s513_s0 = inlined_call_operand.vmem [shape: bf16[2,8], index: 0, kind: input, shape index: {}]   ;;  %s514_s1 = inlined_call_operand.vmem [shape: bf16[8,2048], index: 1, kind: input, shape index: {}]   ;;  %s515_s2 = inlined_call_operand.vmem [shape: f32[1,2048], index: 2, kind: input, shape index: {}]   ;;  %s516_s3 = inlined_call_operand.vmem [shape: bf16[2,2048], index: 3, kind: output, shape index: {}]  }
   0x1 LB: > { %s419_s13 = sadd.s32 4294967295, %s461_s12   ;;  %p423_p0 = scmp.ge.s32.totalorder %s461_s12, 1  ;;  %s461_s12 = sphi %s485_s12, %s13_s12  }
   0x2   : > { %p148_p1 = scmp.lt.s32.totalorder %s461_s12, 5 }
   0x4   : > { %p149_p2 = pnand %p423_p0, %p148_p1 }
   0x5   : > { %s424_s14 = sshll.u32 (!%p149_p2), %s419_s13, 2  ;;  %v463_v0 = vmov (!%p149_p2), 0   ;;  %vm231_vm0 = vcmask (!%p149_p2), 1043456   ;;  %v192_v9 = vld [vmem:[%s513_s0] sm:$0x1] (!%p149_p2)  ;;  %vm227_vm1 = vcmask (!%p149_p2), 64512   ;;  %v197_v10 = vlaneseq (!%p149_p2) }
   0x6   : > { %152 = sbr.rel (%p149_p2) target bundleno = 245 (0xf5), region = 32  ;;  %p176_p3 = scmp.lt.s32.totalorder (!%p149_p2), %s424_s14, 15  ;;  %276 = vmatprep.mubr.bf16.mxu0 (!%p149_p2), %v463_v0  ;;  %317 = vmatprep.mubr.bf16.mxu1 (!%p149_p2), %v463_v0  ;;  %v464_v16 = vmov (!%p149_p2), 1966171168  }
   0x7   : > { %v198_v11 = vshrl.u32 (!%p149_p2), %v197_v10, 7  ;;  %v337_v17 = vunpack.c.l.s4 (!%p149_p2), %v464_v16 }
   0x9   : > { %v199_v12 = vsub.s32 (!%p149_p2), 0, %v198_v11  ;;  %v207_v13 = vsub.s32 (!%p149_p2), 2, %v198_v11  ;;  %v203_v15 = vsub.s32 (!%p149_p2), 1, %v198_v11  ;;  %v211_v18 = vsub.s32 (!%p149_p2), 3, %v198_v11 }
   0xa   : > { %v338_v22 = vunpack.c.0.s8 (!%p149_p2), %v337_v17 }
   0xc   : > { %v341_v31 = vsub.s32 (!%p149_p2), %v338_v22, %v198_v11 }
   0xd   : > { %s518_s14 = smov (!%p176_p3, %s424_s14), 15 }
   0xe   : > { %s425_s15 = sshll.u32 %s518_s14, 2  ;;  %s184_s23 = scalar_lea.vmem %s515_s2, %s518_s14 }
   0xf   : > { %s179_s18 = scalar_lea.vmem %s514_s1, %s425_s15  ;;  %v195_v14 = vld [vmem:[%s184_s23] sm:$0xf]  ;;  %s189_s26 = scalar_lea.vmem %s516_s3, %s518_s14 }
  0x10   : > { %v193_v1 = vld [vmem:[%s179_s18] sm:$0xff]  ;;  %v194_v2 = vld [vmem:[%s179_s18 + $0x8] sm:$0xff]  ;;  %v200_v19 = vrot.slane %v195_v14, %v199_v12  ;;  %v208_v20 = vrot.slane %v195_v14, %v207_v13  ;;  %v204_v21 = vrot.slane %v195_v14, %v203_v15  ;;  %v212_v23 = vrot.slane %v195_v14, %v211_v18 }
  0x11   : > { %v429_v3 = vcombine.high %v193_v1, %v193_v1  ;;  %v431_v4 = vcombine.high %v194_v2, %v194_v2  ;;  %v428_v5 = vcombine.low %v193_v1, %v193_v1  ;;  %v430_v6 = vcombine.low %v194_v2, %v194_v2 }
  0x13   : > { %432 = vmatprep.subr.msk.bf16.mxu0 %vm231_vm0, %v429_v3  ;;  %434 = vmatprep.subr.msk.bf16.mxu1 %vm231_vm0, %v431_v4  ;;  %v233_v7 = vsel %vm231_vm0, %v428_v5, 0  ;;  %v239_v8 = vsel %vm231_vm0, %v430_v6, 0 }
  0x14   : > { %245 = vmatpush1.bf16.msra.mxu0 %v233_v7  ;;  %286 = vmatpush1.bf16.msra.mxu1 %v239_v8 }
  0x17   : > { %433 = vmatmul.mubr.msk.bf16.vlgmr.msra.gmra.mrb[0].mxu0 %vm227_vm1, %v192_v9  ;;  %435 = vmatmul.mubr.msk.bf16.vlgmr.msra.gmra.mrb[0].mxu1 %vm227_vm1, %v192_v9 }
  0xea   : > { %v278_v24 = vpop.f32.mrb[0].mxu0  ;;  %v319_v25 = vpop.f32.mrb[0].mxu1 }
  0xeb   : > { %v279_v26 = vadd.f32 %v278_v24, %v200_v19  ;;  %v320_v27 = vadd.f32 %v319_v25, %v208_v20  ;;  %v280_v28 = vpop.f32.mrb[1].mxu0  ;;  %v321_v29 = vpop.f32.mrb[1].mxu1 }
  0xec   : > { %v281_v30 = vadd.f32 %v280_v28, %v204_v21  ;;  %v322_v32 = vadd.f32 %v321_v29, %v212_v23  ;;  %v282_v33 = vpop.f32.mrb[2].mxu0  ;;  %v323_v34 = vpop.f32.mrb[2].mxu1 }
  0xed   : > { %v283_v35 = vpop.f32.mrb[3].mxu0  ;;  %v324_v36 = vpop.f32.mrb[3].mxu1 }
  0xee   : > { %v436_v37 = vpack.c.bf16 %v281_v30, %v279_v26  ;;  %v437_v38 = vpack.c.bf16 %v322_v32, %v320_v27 }
  0xf0   : > { %v342_v39 = vrot.slane %v436_v37, %v341_v31  ;;  %v349_v40 = vrot.slane %v437_v38, %v341_v31 }
  0xf2   : > { %v350_v41 = vcombine.low %v342_v39, %v349_v40 }
  0xf4   : > { %438 = vst.sshfl [vmem:[%s189_s26] sm:$0x55 pattern:$0x73625140] %v350_v41 }
  0xf5 PF: > { %s13_s12 = sadd.s32 1, %s461_s12  }
  0xf6   : > { %p10_p4 = scmp.ge.s32.totalorder %s13_s12, 6  }
  0xf8   :  { %12 = sbr.rel (!%p10_p4) target bundleno = 1 (0x1), region = 65 }

// kernel: vae_forward.11
= control target key start
LH: loop header
LB: loop body
LE: loop exit
PB: predicated region body
PF: predicated region fallthrough
CT: control target
= control target key end

     0   :  { %14 = vsyncpa [#allocation3], 0  ;;  %s1719_s0 = inlined_call_operand.vmem [shape: bf16[2,2048], index: 0, kind: input, shape index: {}]   ;;  %s1720_s1 = inlined_call_operand.vmem [shape: bf16[2048,8], index: 1, kind: input, shape index: {}]   ;;  %s1721_s2 = inlined_call_operand.vmem [shape: bf16[2048,8], index: 2, kind: input, shape index: {}]   ;;  %s1722_s3 = inlined_call_operand.vmem [shape: f32[1,8], index: 3, kind: input, shape index: {}]   ;;  %s1723_s4 = inlined_call_operand.vmem [shape: f32[1,8], index: 4, kind: input, shape index: {}]   ;;  %s1724_s5 = inlined_call_operand.vmem [shape: f32[2,8], index: 5, kind: input, shape index: {}]   ;;  %s1725_s6 = inlined_call_operand.hbm [shape: f32[2,8], index: 6, kind: output, shape index: {0}]   ;;  %s1726_s7 = inlined_call_operand.hbm [shape: f32[2,8], index: 7, kind: output, shape index: {1}]   ;;  %s1727_s8 = inlined_call_operand.vmem [shape: f32[2,8], index: 8, kind: output, shape index: {2}]  }
   0x1   :  { %15 = vsyncpa [#allocation5], 0  ;;  %s1547_s27 = smov 0  }
   0x2 LB: > { %s1553_s28 = sadd.s32 4294967295, %s1497_s27   ;;  %p1173_p0 = scmp.ge.s32.totalorder %s1497_s27, 1  ;;  %s1497_s27 = sphi %s1547_s27, %s21_s27  }
   0x3   : > { %p276_p1 = scmp.lt.s32.totalorder %s1497_s27, 5 }
   0x5   : > { %p277_p2 = pnand %p1173_p0, %p276_p1 }
   0x6   : > { %s1174_s29 = sshll.u32 (!%p277_p2), %s1553_s28, 2  ;;  %s1175_s30 = sshll.u32 (!%p277_p2), %s1553_s28, 6 }
   0x7   : > { %280 = sbr.rel (%p277_p2) target bundleno = 386 (0x182), region = 44  ;;  %p315_p3 = scmp.lt.s32.totalorder (!%p277_p2), %s1174_s29, 15 }
   0x8   : > { %p320_p4 = scmp.lt.s32.totalorder (!%p277_p2), %s1175_s30, 255  ;;  %p1179_p5 = scmp.ne.s32.totalorder (!%p277_p2), %s1553_s28, 0 }
   0xe   : > { %s1729_s29 = smov (!%p315_p3, %s1174_s29), 15  ;;  %s1731_s30 = smov (!%p320_p4, %s1175_s30), 255 }
   0xf   : > { %s317_s11 = scalar_lea.vmem %s1719_s0, %s1729_s29  ;;  %s1176_s12 = sshll.u32 %s1731_s30, 2  ;;  %v1180_v0 = vld [vmem:[%s1722_s3] ss:$0 sm:$0xff] (!%p1179_p5)  ;;  %vm343_vm0 = vcmask (!%p1179_p5), 58368  }
  0x10   : > { %s1568_s15 = scalar_lea.vmem %s1720_s1, %s1176_s12  ;;  %s1573_s18 = scalar_lea.vmem %s1721_s2, %s1176_s12  ;;  %v1181_v1 = vld [vmem:[%s1723_s4] ss:$0 sm:$0xff] (!%p1179_p5)  ;;  %344 = vst.msk [vmem:[#allocation2] sm:$0x3] (!%p1179_p5), %vm343_vm0, %v1180_v0 }
  0x11   : > { %335 = sbr.rel (%p1179_p5) target bundleno = 24 (0x18), region = 48  ;;  %352 = vst.msk [vmem:[#allocation4] sm:$0x3] (!%p1179_p5), %vm343_vm0, %v1181_v1 }
  0x18 PF: > { %v1365_v2 = vld [vmem:[%s1568_s15 + $0x40] sm:$0xff]   ;;  %v1369_v6 = vld [vmem:[%s1568_s15 + $0x48] sm:$0xff]   ;;  %v1373_v10 = vld [vmem:[%s1568_s15 + $0x50] sm:$0xff]   ;;  %v431_v32 = vlaneseq  ;;  %v1499_v36 = vmov 1966171168   ;;  %vm721_vm1 = vcmask 58368  }
  0x19   : > { %v1366_v3 = vld [vmem:[%s1568_s15 + $0xc0] sm:$0xff]   ;;  %1254 = vmatprep.subr.bf16.mxu0 %v1365_v2  ;;  %v1370_v7 = vld [vmem:[%s1568_s15 + $0xc8] sm:$0xff]   ;;  %v1374_v11 = vld [vmem:[%s1568_s15 + $0xd0] sm:$0xff]   ;;  %v429_v37 = vunpack.c.l.s4 %v1499_v36  ;;  %p1247_p6 = scmp.ne.s32.totalorder %s1553_s28, 3 }
  0x1a   : > { %v1367_v4 = vld [vmem:[%s1568_s15] sm:$0xff]   ;;  %1276 = vmatprep.subr.bf16.mxu1 %v1366_v3  ;;  %v1371_v8 = vld [vmem:[%s1568_s15 + $0x8] sm:$0xff]   ;;  %v1375_v12 = vld [vmem:[%s1568_s15 + $0x10] sm:$0xff]   ;;  %v432_v38 = vshrl.u32 %v431_v32, 7 }
  0x1b   : > { %v1368_v5 = vld [vmem:[%s1568_s15 + $0x80] sm:$0xff]   ;;  %1255 = vmatpush3.bf16.msra.mxu0 %v1367_v4  ;;  %v1372_v9 = vld [vmem:[%s1568_s15 + $0x88] sm:$0xff]   ;;  %v1376_v13 = vld [vmem:[%s1568_s15 + $0x90] sm:$0xff]   ;;  %v430_v42 = vunpack.c.0.s8 %v429_v37 }
  0x1c   : > { %1277 = vmatpush3.bf16.msra.mxu1 %v1368_v5  ;;  %1256 = vmatprep.subr.bf16.mxu0 %v1369_v6  ;;  %v1377_v14 = vld [vmem:[%s1568_s15 + $0x58] sm:$0xff]   ;;  %v1381_v18 = vld [vmem:[%s1568_s15 + $0x60] sm:$0xff]   ;;  %v1385_v22 = vld [vmem:[%s1568_s15 + $0x68] sm:$0xff]  }
  0x1d   : > { %1278 = vmatprep.subr.bf16.mxu1 %v1370_v7  ;;  %v1378_v15 = vld [vmem:[%s1568_s15 + $0xd8] sm:$0xff]   ;;  %v1382_v19 = vld [vmem:[%s1568_s15 + $0xe0] sm:$0xff]   ;;  %v1386_v23 = vld [vmem:[%s1568_s15 + $0xe8] sm:$0xff]   ;;  %v433_v43 = vsub.s32 %v430_v42, %v432_v38 }
  0x1e   : > { %v1379_v16 = vld [vmem:[%s1568_s15 + $0x18] sm:$0xff]   ;;  %v1383_v20 = vld [vmem:[%s1568_s15 + $0x20] sm:$0xff]   ;;  %v1387_v24 = vld [vmem:[%s1568_s15 + $0x28] sm:$0xff]  }
  0x1f   : > { %1257 = vmatpush3.bf16.msra.mxu0 %v1371_v8  ;;  %v1380_v17 = vld [vmem:[%s1568_s15 + $0x98] sm:$0xff]   ;;  %v1384_v21 = vld [vmem:[%s1568_s15 + $0xa0] sm:$0xff]   ;;  %v1388_v25 = vld [vmem:[%s1568_s15 + $0xa8] sm:$0xff]  }
  0x20   : > { %1279 = vmatpush3.bf16.msra.mxu1 %v1372_v9  ;;  %1258 = vmatprep.subr.bf16.mxu0 %v1373_v10  ;;  %v1389_v26 = vld [vmem:[%s1568_s15 + $0x70] sm:$0xff]   ;;  %v1393_v30 = vld [vmem:[%s1568_s15 + $0x78] sm:$0xff]   ;;  %v1182_v35 = vld.sshfl [vmem:[%s317_s11] sm:$0x33 pattern:$0x75316420] }
  0x21   : > { %1280 = vmatprep.subr.bf16.mxu1 %v1374_v11  ;;  %v1390_v27 = vld [vmem:[%s1568_s15 + $0xf0] sm:$0xff]   ;;  %v1394_v31 = vld [vmem:[%s1568_s15 + $0xf8] sm:$0xff]   ;;  %v1397_v39 = vld [vmem:[%s1573_s18 + $0x40] sm:$0xff]   ;;  %v427_v41 = vcombine.high %v1182_v35, %v1182_v35  ;;  %v1621_v45 = vrot.slane %v1182_v35, %v433_v43 }
  0x22   : > { %v1391_v28 = vld [vmem:[%s1568_s15 + $0x30] sm:$0xff]   ;;  %v1395_v33 = vld [vmem:[%s1568_s15 + $0x38] sm:$0xff]   ;;  %v1398_v40 = vld [vmem:[%s1573_s18 + $0xc0] sm:$0xff]  }
  0x23   : > { %1259 = vmatpush3.bf16.msra.mxu0 %v1375_v12  ;;  %v1392_v29 = vld [vmem:[%s1568_s15 + $0xb0] sm:$0xff]   ;;  %v1396_v34 = vld [vmem:[%s1568_s15 + $0xb8] sm:$0xff]   ;;  %v441_v44 = vrot.slane %v427_v41, %v433_v43  ;;  %v1399_v46 = vld [vmem:[%s1573_s18] sm:$0xff]   ;;  %v1627_v49 = vcombine.high %v1621_v45, %v1621_v45 }
  0x24   : > { %1281 = vmatpush3.bf16.msra.mxu1 %v1376_v13  ;;  %1260 = vmatprep.subr.bf16.mxu0 %v1377_v14  ;;  %v1401_v47 = vld [vmem:[%s1573_s18 + $0x48] sm:$0xff]   ;;  %v1400_v50 = vld [vmem:[%s1573_s18 + $0x80] sm:$0xff]   ;;  %v1405_v53 = vld [vmem:[%s1573_s18 + $0x50] sm:$0xff]  }
  0x25   : > { %1282 = vmatprep.subr.bf16.mxu1 %v1378_v15  ;;  %672 = vmatprep.mubr.bf16.mxu0 %v441_v44  ;;  %v443_v48 = vcombine.high %v441_v44, %v441_v44  ;;  %v1402_v51 = vld [vmem:[%s1573_s18 + $0xc8] sm:$0xff]   ;;  %v1406_v55 = vld [vmem:[%s1573_s18 + $0xd0] sm:$0xff]   ;;  %v1409_v57 = vld [vmem:[%s1573_s18 + $0x58] sm:$0xff]  }
  0x26   : > { %v1403_v52 = vld [vmem:[%s1573_s18 + $0x8] sm:$0xff]   ;;  %v1407_v56 = vld [vmem:[%s1573_s18 + $0x10] sm:$0xff]   ;;  %v1410_v59 = vld [vmem:[%s1573_s18 + $0xd8] sm:$0xff]  }
  0x27   : > { %1261 = vmatpush3.bf16.msra.mxu0 %v1379_v16  ;;  %712 = vmatprep.mubr.bf16.mxu1 %v443_v48  ;;  %v1404_v54 = vld [vmem:[%s1573_s18 + $0x88] sm:$0xff]   ;;  %v1408_v58 = vld [vmem:[%s1573_s18 + $0x90] sm:$0xff]   ;;  %v1411_v60 = vld [vmem:[%s1573_s18 + $0x18] sm:$0xff]  }
  0x28   : > { %1283 = vmatpush3.bf16.msra.mxu1 %v1380_v17  ;;  %1262 = vmatprep.subr.bf16.mxu0 %v1381_v18  ;;  %v1413_v61 = vld [vmem:[%s1573_s18 + $0x60] sm:$0xff]   ;;  %v1412_v62 = vld [vmem:[%s1573_s18 + $0x98] sm:$0xff]   ;;  %v1417_v1 = vld [vmem:[%s1573_s18 + $0x68] sm:$0xff]  }
  0x29   : > { %1284 = vmatprep.subr.bf16.mxu1 %v1382_v19  ;;  %v1414_v63 = vld [vmem:[%s1573_s18 + $0xe0] sm:$0xff]   ;;  %v1418_v3 = vld [vmem:[%s1573_s18 + $0xe8] sm:$0xff]   ;;  %v1421_v5 = vld [vmem:[%s1573_s18 + $0x70] sm:$0xff]  }
  0x2a   : > { %v1415_v0 = vld [vmem:[%s1573_s18 + $0x20] sm:$0xff]   ;;  %v1419_v4 = vld [vmem:[%s1573_s18 + $0x28] sm:$0xff]   ;;  %v1422_v7 = vld [vmem:[%s1573_s18 + $0xf0] sm:$0xff]  }
  0x2b   : > { %1263 = vmatpush3.bf16.msra.mxu0 %v1383_v20  ;;  %v1416_v2 = vld [vmem:[%s1573_s18 + $0xa0] sm:$0xff]   ;;  %v1420_v6 = vld [vmem:[%s1573_s18 + $0xa8] sm:$0xff]   ;;  %v1423_v8 = vld [vmem:[%s1573_s18 + $0x30] sm:$0xff]  }
  0x2c   : > { %1285 = vmatpush3.bf16.msra.mxu1 %v1384_v21  ;;  %1264 = vmatprep.subr.bf16.mxu0 %v1385_v22  ;;  %v1425_v9 = vld [vmem:[%s1573_s18 + $0x78] sm:$0xff]   ;;  %v1424_v10 = vld [vmem:[%s1573_s18 + $0xb0] sm:$0xff]   ;;  %v723_v36 = vld [vmem:[#allocation4] sm:$0x3] }
  0x2d   : > { %1286 = vmatprep.subr.bf16.mxu1 %v1386_v23  ;;  %v1426_v11 = vld [vmem:[%s1573_s18 + $0xf8] sm:$0xff]   ;;  %v354_v23 = vld [vmem:[#allocation2] sm:$0x3] }
  0x2e   : > { %v1427_v12 = vld [vmem:[%s1573_s18 + $0x38] sm:$0xff]   ;;  %v1067_v43 = vld [vmem:[%s1724_s5] sm:$0x3] (!%p1247_p6) }
  0x2f   : > { %1265 = vmatpush3.bf16.msra.mxu0 %v1387_v24  ;;  %v1428_v13 = vld [vmem:[%s1573_s18 + $0xb8] sm:$0xff]  }
  0x30   : > { %1287 = vmatpush3.bf16.msra.mxu1 %v1388_v25  ;;  %1266 = vmatprep.subr.bf16.mxu0 %v1389_v26 }
  0x31   : > { %1288 = vmatprep.subr.bf16.mxu1 %v1390_v27 }
  0x33   : > { %1267 = vmatpush3.bf16.msra.mxu0 %v1391_v28 }
  0x34   : > { %1289 = vmatpush3.bf16.msra.mxu1 %v1392_v29  ;;  %1268 = vmatprep.subr.bf16.mxu0 %v1393_v30 }
  0x35   : > { %1290 = vmatprep.subr.bf16.mxu1 %v1394_v31 }
  0x37   : > { %1269 = vmatpush3.bf16.msra.mxu0 %v1395_v33 }
  0x38   : > { %1291 = vmatpush3.bf16.msra.mxu1 %v1396_v34  ;;  %1298 = vmatprep.subr.bf16.mxu0 %v1397_v39 }
  0x39   : > { %1320 = vmatprep.subr.bf16.mxu1 %v1398_v40 }
  0x3a   : > { %673 = vmatmul.mubr.bf16.vlgmr.msra.gmra.mrb[0].mxu0 %v1621_v45 }
  0x3b   : > { %1299 = vmatpush3.bf16.msra.mxu0 %v1399_v46  ;;  %713 = vmatmul.mubr.bf16.vlgmr.msra.gmra.mrb[0].mxu1 %v1627_v49 }
  0x3c   : > { %1300 = vmatprep.subr.bf16.mxu0 %v1401_v47  ;;  %1321 = vmatpush3.bf16.msra.mxu1 %v1400_v50 }
  0x3d   : > { %1012 = vmatprep.mubr.bf16.mxu0 %v441_v44  ;;  %1322 = vmatprep.subr.bf16.mxu1 %v1402_v51 }
  0x3e   : > { %1052 = vmatprep.mubr.bf16.mxu1 %v443_v48 }
  0x3f   : > { %1301 = vmatpush3.bf16.msra.mxu0 %v1403_v52 }
  0x40   : > { %1302 = vmatprep.subr.bf16.mxu0 %v1405_v53  ;;  %1323 = vmatpush3.bf16.msra.mxu1 %v1404_v54 }
  0x41   : > { %1324 = vmatprep.subr.bf16.mxu1 %v1406_v55 }
  0x43   : > { %1303 = vmatpush3.bf16.msra.mxu0 %v1407_v56 }
  0x44   : > { %1304 = vmatprep.subr.bf16.mxu0 %v1409_v57  ;;  %1325 = vmatpush3.bf16.msra.mxu1 %v1408_v58 }
  0x45   : > { %1326 = vmatprep.subr.bf16.mxu1 %v1410_v59 }
  0x47   : > { %1305 = vmatpush3.bf16.msra.mxu0 %v1411_v60 }
  0x48   : > { %1306 = vmatprep.subr.bf16.mxu0 %v1413_v61  ;;  %1327 = vmatpush3.bf16.msra.mxu1 %v1412_v62 }
  0x49   : > { %1328 = vmatprep.subr.bf16.mxu1 %v1414_v63 }
  0x4b   : > { %1307 = vmatpush3.bf16.msra.mxu0 %v1415_v0 }
  0x4c   : > { %1308 = vmatprep.subr.bf16.mxu0 %v1417_v1  ;;  %1329 = vmatpush3.bf16.msra.mxu1 %v1416_v2 }
  0x4d   : > { %1330 = vmatprep.subr.bf16.mxu1 %v1418_v3 }
  0x4f   : > { %1309 = vmatpush3.bf16.msra.mxu0 %v1419_v4 }
  0x50   : > { %1310 = vmatprep.subr.bf16.mxu0 %v1421_v5  ;;  %1331 = vmatpush3.bf16.msra.mxu1 %v1420_v6 }
  0x51   : > { %1332 = vmatprep.subr.bf16.mxu1 %v1422_v7 }
  0x53   : > { %1311 = vmatpush3.bf16.msra.mxu0 %v1423_v8 }
  0x54   : > { %1312 = vmatprep.subr.bf16.mxu0 %v1425_v9  ;;  %1333 = vmatpush3.bf16.msra.mxu1 %v1424_v10 }
  0x55   : > { %1334 = vmatprep.subr.bf16.mxu1 %v1426_v11 }
  0x57   : > { %1313 = vmatpush3.bf16.msra.mxu0 %v1427_v12 }
  0x58   : > { %1335 = vmatpush3.bf16.msra.mxu1 %v1428_v13 }
  0x5a   : > { %1013 = vmatmul.mubr.bf16.vlgmr.msra.gmra.mrb[4].mxu0 %v1621_v45 }
  0x5b   : > { %1053 = vmatmul.mubr.bf16.vlgmr.msra.gmra.mrb[4].mxu1 %v1627_v49 }
 0x10d   : > { %v1270_v14 = vpop.f32.mrb[0].mxu0 }
 0x10e   : > { %v1271_v15 = vpop.f32.mrb[1].mxu0  ;;  %v1292_v16 = vpop.f32.mrb[0].mxu1 }
 0x10f   : > { %v1272_v17 = vadd.f32 %v1271_v15, %v1270_v14  ;;  %v1273_v18 = vpop.f32.mrb[2].mxu0  ;;  %v1293_v19 = vpop.f32.mrb[1].mxu1 }
 0x110   : > { %v1274_v20 = vpop.f32.mrb[3].mxu0  ;;  %v1294_v21 = vadd.f32 %v1293_v19, %v1292_v16  ;;  %v1295_v22 = vpop.f32.mrb[2].mxu1 }
 0x111   : > { %v1296_v24 = vpop.f32.mrb[3].mxu1 }
 0x112   : > { %v715_v25 = vadd.f32 %v1294_v21, %v1272_v17 }
 0x114   : > { %v720_v26 = vadd.f32 %v715_v25, %v354_v23 }
 0x116   : > { %722 = vst.msk [vmem:[#allocation2] sm:$0x3] %vm721_vm1, %v720_v26 }
 0x11d   : > { %v1066_v45 = vld [vmem:[#allocation2] sm:$0x3] (!%p1247_p6) }
 0x12d   : > { %v1314_v27 = vpop.f32.mrb[4].mxu0 }
 0x12e   : > { %v1315_v28 = vpop.f32.mrb[5].mxu0  ;;  %v1336_v29 = vpop.f32.mrb[4].mxu1 }
 0x12f   : > { %v1316_v30 = vadd.f32 %v1315_v28, %v1314_v27  ;;  %v1317_v31 = vpop.f32.mrb[6].mxu0  ;;  %v1337_v32 = vpop.f32.mrb[5].mxu1 }
 0x130   : > { %v1318_v33 = vpop.f32.mrb[7].mxu0  ;;  %v1338_v34 = vadd.f32 %v1337_v32, %v1336_v29  ;;  %v1339_v35 = vpop.f32.mrb[6].mxu1  ;;  %1065 = sbr.rel (%p1247_p6) target bundleno = 338 (0x152), region = 52 }
 0x131   : > { %v1340_v37 = vpop.f32.mrb[7].mxu1 }
 0x132   : > { %v1055_v38 = vadd.f32 %v1338_v34, %v1316_v30 }
 0x134   : > { %v1060_v39 = vadd.f32 %v1055_v38, %v723_v36 }
 0x136   : > { %1061 = vst.msk [vmem:[#allocation4] sm:$0x3] %vm721_vm1, %v1060_v39 }
 0x13d   : > { %v1068_v40 = vld [vmem:[#allocation4] sm:$0x3] }
 0x13e   : > { %v1069_v41 = vmul.f32 0.5, %v1068_v40 }
 0x140   : > { %v1070_v42 = vmul.f32 1.442695, %v1069_v41 }
 0x142   : > { %1429 = vpow2.f32 %v1070_v42 }
 0x14c   : > { %v1430_v44 = vpop.eup %1429 }
 0x14d   : > { %v1072_v46 = vmul.f32 %v1430_v44, %v1067_v43 }
 0x14f   : > { %v1073_v47 = vadd.f32 %v1072_v46, %v1066_v45 }
 0x151   : > { %1074 = vst.msk [vmem:[%s1727_s8] sm:$0x3] %vm721_vm1, %v1073_v47 }
 0x152 PF: > { %p1350_p7 = scmp.eq.s32.totalorder %s1553_s28, 3  ;;  %s1500_s9 = smov [#allocation2]  }
 0x153   : > { %s1082_s10 = sshll.u32 %s1500_s9, 4  ;;  %s1501_s11 = smov [#allocation4]   ;;  %s1083_s10 = int_to_ptr.vmem [resolvable:$true] %s1082_s10 }
 0x154   : > { %s1093_s12 = sshll.u32 %s1501_s11, 4  ;;  %s1431_s13 = scalar_lea.vmem %s1083_s10, 32  ;;  %s1094_s12 = int_to_ptr.vmem [resolvable:$true] %s1093_s12 }
 0x155   : > { %p1432_p8 = scmp.ne.s32.totalorder %s1083_s10, %s1431_s13  ;;  %p1438_p11 = scmp.lt.s32.totalorder %s1083_s10, %s1083_s10 }
 0x156   : > { %p1439_p12 = scmp.lt.s32.totalorder %s1431_s13, %s1431_s13 }
 0x157   : > { %p1433_p9 = pnand %p1432_p8, %p1350_p7 }
 0x158   : > { %p1440_p13 = por %p1439_p12, %p1438_p11 }
 0x159   : > { %p1434_p10 = pneg %p1433_p9 }
 0x15b   : > { %p1441_p0 = pnand %p1440_p13, %p1434_p10 }
 0x15d   : > { %1444 = shalt.err (!%p1441_p0)
}
 0x15e   : > { %s1445_s16 = scalar_lea.hbm %s1725_s6, 32 }
 0x15f   : > { %p1446_p1 = scmp.ne.s32.totalorder %s1725_s6, %s1445_s16  ;;  %p1451_p4 = scmp.lt.u32.totalorder %s1445_s16, %s1725_s6 }
 0x161   : > { %p1447_p2 = pnand %p1446_p1, %p1350_p7 }
 0x163   : > { %p1448_p3 = pneg %p1447_p2 }
 0x165   : > { %p1453_p5 = pnand %p1451_p4, %p1448_p3 }
 0x167   : > { %1456 = shalt.err (!%p1453_p5)
}
 0x168   : > { %1343 = dma.vmem_to_hbm [thread:$0]  (%p1350_p7), %s1083_s10, 32, %s1725_s6, [#allocation3]  }
 0x169   : > { %s1457_s23 = scalar_lea.vmem %s1094_s12, 32  ;;  %p1464_p10 = scmp.lt.s32.totalorder %s1094_s12, %s1094_s12 }
 0x16a   : > { %p1458_p6 = scmp.ne.s32.totalorder %s1094_s12, %s1457_s23  ;;  %p1465_p11 = scmp.lt.s32.totalorder %s1457_s23, %s1457_s23 }
 0x16c   : > { %p1459_p8 = pnand %p1458_p6, %p1350_p7  ;;  %p1466_p12 = por %p1465_p11, %p1464_p10 }
 0x16e   : > { %p1460_p9 = pneg %p1459_p8 }
 0x170   : > { %p1467_p13 = pnand %p1466_p12, %p1460_p9 }
 0x172   : > { %1470 = shalt.err (!%p1467_p13)
}
 0x173   : > { %s1471_s26 = scalar_lea.hbm %s1726_s7, 32 }
 0x174   : > { %p1472_p0 = scmp.ne.s32.totalorder %s1726_s7, %s1471_s26  ;;  %p1477_p3 = scmp.lt.u32.totalorder %s1471_s26, %s1726_s7 }
 0x176   : > { %p1473_p1 = pnand %p1472_p0, %p1350_p7 }
 0x178   : > { %p1474_p2 = pneg %p1473_p1 }
 0x17a   : > { %p1479_p4 = pnand %p1477_p3, %p1474_p2 }
 0x17c   : > { %1482 = shalt.err (!%p1479_p4)
}
 0x17d   : > { %1345 = dma.vmem_to_hbm [thread:$0]  (%p1350_p7), %s1094_s12, 32, %s1726_s7, [#allocation5]  }
 0x17e   : > { %1488 = dma.done.wait (%p1350_p7), [#allocation3], 32  }
 0x17f   : > { %1490 = vsyncadd (%p1350_p7), [#allocation3], 4294967264 }
 0x180   : > { %1492 = dma.done.wait (%p1350_p7), [#allocation5], 32  }
 0x181   : > { %1494 = vsyncadd (%p1350_p7), [#allocation5], 4294967264 }
 0x182 PF: > { %s21_s27 = sadd.s32 1, %s1497_s27  }
 0x183   : > { %p18_p5 = scmp.ge.s32.totalorder %s21_s27, 6  }
 0x185   :  { %20 = sbr.rel (!%p18_p5) target bundleno = 2 (0x2), region = 101 }
 0x18c   :  { %1116 = vsyncpa [#allocation3], 1 }
 0x18d   :  { %1118 = vsyncpa [#allocation3 + $0x1], 1 }
 0x18e   :  { %1119 = vsyncpa [#allocation5], 1 }

// kernel: vae_forward.13
= control target key start
LH: loop header
LB: loop body
LE: loop exit
PB: predicated region body
PF: predicated region fallthrough
CT: control target
= control target key end

     0   :  { %s3775_s12 = smov 0   ;;  %s3777_s13 = smov 0   ;;  %s4406_s0 = inlined_call_operand.vmem [shape: bf16[1,2,38,128], index: 0, kind: input, shape index: {}]   ;;  %s4407_s1 = inlined_call_operand.vmem [shape: bf16[16,128,64], index: 1, kind: input, shape index: {}]   ;;  %s4408_s2 = inlined_call_operand.vmem [shape: f32[1,64], index: 2, kind: input, shape index: {}]   ;;  %s4409_s3 = inlined_call_operand.vmem [shape: bf16[4,2,24,64], index: 3, kind: output, shape index: {}]  }
   0x1   :  { %s3779_s14 = smov 0  }
   0x2 LB: > { %s3788_s15 = sadd.s32 4294967295, %s3753_s14   ;;  %s3790_s16 = sadd.s32 1, %s3753_s14   ;;  %s3753_s14 = sphi %s3779_s14, %s4413_s14   ;;  %s3749_s13 = sphi %s3777_s13, %s4412_s13   ;;  %s3745_s12 = sphi %s3775_s12, %s4411_s12  }
   0x3   : > { %s85_s17 = ssub.s32 %s3753_s14, %s3790_s16  ;;  %s88_s18 = sadd.s32 1, %s3749_s13 }
   0x4   : > { %p86_p0 = scmp.eq.s32.totalorder %s85_s17, 0  ;;  %p98_p1 = scmp.ne.s32.totalorder %s3749_s13, %s3745_s12 }
   0x5   : > { %p99_p2 = scmp.eq.s32.totalorder %s3788_s15, 1  ;;  %p2575_p3 = scmp.ge.s32.totalorder %s3753_s14, 1 }
   0x6   : > { %s3798_s19 = scalar_select %p86_p0, %s3749_s13, %s88_s18  }
   0x7   : > { %p3800_p4 = por %p99_p2, %p98_p1  ;;  %p137_p5 = scmp.lt.s32.totalorder %s3753_s14, 3 }
   0x9   : > { %p138_p6 = pnand %p2575_p3, %p137_p5 }
   0xa   : > { %v3576_v0 = vld [vmem:[%s4407_s1] sm:$0xff] (!%p138_p6)   ;;  %v3578_v2 = vld [vmem:[%s4407_s1 + $0x8] sm:$0xff] (!%p138_p6)   ;;  %p160_p7 = scmp.lt.s32.totalorder (!%p138_p6), %s3788_s15, 1  ;;  %v3580_v4 = vld [vmem:[%s4407_s1 + $0x10] sm:$0xff] (!%p138_p6)   ;;  %vm332_vm0 = vsmask.f32 (!%p138_p6), 7424 }
   0xb   : > { %141 = sbr.rel (%p138_p6) target bundleno = 498 (0x1f2), region = 32  ;;  %v3577_v1 = vld [vmem:[%s4407_s1 + $0x100] sm:$0xff] (!%p138_p6)   ;;  %3169 = vmatprep.subr.bf16.mxu0 (!%p138_p6), %v3576_v0  ;;  %v3579_v3 = vld [vmem:[%s4407_s1 + $0x108] sm:$0xff] (!%p138_p6)   ;;  %v3581_v5 = vld [vmem:[%s4407_s1 + $0x110] sm:$0xff] (!%p138_p6)   ;;  %vm907_vm1 = vcmask (!%p138_p6), 1046528   ;;  %vm474_vm2 = vcmask (!%p138_p6), 1044480  }
   0xc   : > { %3249 = vmatprep.subr.bf16.mxu1 (!%p138_p6), %v3577_v1  ;;  %3170 = vmatpush3.bf16.msra.mxu0 (!%p138_p6), %v3576_v0  ;;  %v3582_v6 = vld [vmem:[%s4407_s1 + $0x18] sm:$0xff] (!%p138_p6)   ;;  %v3584_v8 = vld [vmem:[%s4407_s1 + $0x20] sm:$0xff] (!%p138_p6)   ;;  %v3586_v10 = vld [vmem:[%s4407_s1 + $0x28] sm:$0xff] (!%p138_p6)   ;;  %vm600_vm3 = vsmask.f32 (!%p138_p6), 4352  ;;  %vm1600_vm4 = vcmask (!%p138_p6), 1045504  }
   0xd   : > { %3250 = vmatpush3.bf16.msra.mxu1 (!%p138_p6), %v3577_v1  ;;  %3171 = vmatprep.subr.bf16.mxu0 (!%p138_p6), %v3578_v2  ;;  %v3583_v7 = vld [vmem:[%s4407_s1 + $0x118] sm:$0xff] (!%p138_p6)   ;;  %v3585_v9 = vld [vmem:[%s4407_s1 + $0x120] sm:$0xff] (!%p138_p6)   ;;  %v3587_v12 = vld [vmem:[%s4407_s1 + $0x128] sm:$0xff] (!%p138_p6)   ;;  %vm1726_vm5 = vsmask.f32 (!%p138_p6), 5376  ;;  %s157_s14 = sand.u32 (!%p138_p6), 1, %s3745_s12  }
   0xe   : > { %3251 = vmatprep.subr.bf16.mxu1 (!%p138_p6), %v3579_v3  ;;  %v3588_v18 = vld [vmem:[%s4407_s1 + $0x30] sm:$0xff] (!%p138_p6)   ;;  %v3590_v25 = vld [vmem:[%s4407_s1 + $0x38] sm:$0xff] (!%p138_p6)   ;;  %v3593_v32 = vld [vmem:[%s4407_s1 + $0x40] sm:$0xff] (!%p138_p6)   ;;  %s3549_s21 = smul.u32 (!%p138_p6), 48, %s157_s14  ;;  %vm735_vm6 = vcmask (!%p138_p6), 519168  }
   0xf   : > { %v3589_v21 = vld [vmem:[%s4407_s1 + $0x130] sm:$0xff] (!%p138_p6)   ;;  %v3591_v27 = vld [vmem:[%s4407_s1 + $0x138] sm:$0xff] (!%p138_p6)   ;;  %v3596_v33 = vld [vmem:[%s4407_s1 + $0x140] sm:$0xff] (!%p138_p6)  }
  0x10   : > { %3172 = vmatpush3.bf16.msra.mxu0 (!%p138_p6), %v3578_v2  ;;  %v3598_v36 = vld [vmem:[%s4407_s1 + $0x48] sm:$0xff] (!%p138_p6)   ;;  %v3600_v38 = vld [vmem:[%s4407_s1 + $0x50] sm:$0xff] (!%p138_p6)   ;;  %v3602_v52 = vld [vmem:[%s4407_s1 + $0x58] sm:$0xff] (!%p138_p6)   ;;  %s4356_s12 = scalar_lea.vmem (!%p138_p6), [#allocation2], %s3549_s21 }
  0x11   : > { %3252 = vmatpush3.bf16.msra.mxu1 (!%p138_p6), %v3579_v3  ;;  %3173 = vmatprep.subr.bf16.mxu0 (!%p138_p6), %v3580_v4  ;;  %v3599_v37 = vld [vmem:[%s4407_s1 + $0x148] sm:$0xff] (!%p138_p6)   ;;  %v3601_v43 = vld [vmem:[%s4407_s1 + $0x150] sm:$0xff] (!%p138_p6)   ;;  %v3603_v53 = vld [vmem:[%s4407_s1 + $0x158] sm:$0xff] (!%p138_p6)  }
  0x12   : > { %s161_s6 = scalar_select %p160_p7, %s3788_s15, 1  ;;  %3253 = vmatprep.subr.bf16.mxu1 %v3581_v5  ;;  %v3604_v59 = vld [vmem:[%s4407_s1 + $0x60] sm:$0xff]   ;;  %v3606_v62 = vld [vmem:[%s4407_s1 + $0x68] sm:$0xff]   ;;  %v3608_v0 = vld [vmem:[%s4407_s1 + $0x70] sm:$0xff]  }
  0x13   : > { %v3605_v60 = vld [vmem:[%s4407_s1 + $0x160] sm:$0xff]   ;;  %v3607_v63 = vld [vmem:[%s4407_s1 + $0x168] sm:$0xff]   ;;  %v3609_v1 = vld [vmem:[%s4407_s1 + $0x170] sm:$0xff]   ;;  %s3551_s22 = smul.u32 (%p3800_p4), 12, %s3788_s15 }
  0x14   : > { %3174 = vmatpush3.bf16.msra.mxu0 %v3580_v4  ;;  %s3550_s11 = smul.u32 20, %s161_s6  ;;  %v3610_v3 = vld [vmem:[%s4407_s1 + $0x78] sm:$0xff]  }
  0x15   : > { %3254 = vmatpush3.bf16.msra.mxu1 %v3581_v5  ;;  %3175 = vmatprep.subr.bf16.mxu0 %v3582_v6  ;;  %s2437_s20 = scalar_lea.vmem (%p3800_p4), %s4409_s3, %s3551_s22 }
  0x16   : > { %3255 = vmatprep.subr.bf16.mxu1 %v3583_v7  ;;  %s3842_s26 = scalar_lea.vmem %s4406_s0, %s3550_s11 }
  0x17   : > { %v3592_v11 = vld [vmem:[%s3842_s26] sm:$0xff]   ;;  %v3853_v15 = vld [vmem:[%s3842_s26 + $0x8] sm:$0xf]  ;;  %v742_v16 = vld [vmem:[%s3842_s26 + $0xc] sm:$0x1] }
  0x18   : > { %3176 = vmatpush3.bf16.msra.mxu0 %v3582_v6  ;;  %3185 = vmatprep.mubr.bf16.mxu0 %v3592_v11  ;;  %v739_v13 = vld [vmem:[%s3842_s26] sm:$0xf]  ;;  %v3850_v14 = vld [vmem:[%s3842_s26 + $0x4] sm:$0xf]  ;;  %v3861_v19 = vcombine.low %v3853_v15, %v742_v16  ;;  %v3597_v34 = vld [vmem:[%s3842_s26 + $0x8] ss:$0 sps:$4 sm:$0xff]  }
  0x19   : > { %3256 = vmatpush3.bf16.msra.mxu1 %v3583_v7  ;;  %3177 = vmatprep.subr.bf16.mxu0 %v3584_v8  ;;  %v2684_v17 = vcombine.low %v739_v13, %v3850_v14  ;;  %v2761_v20 = vcombine.low %v3850_v14, %v3853_v15  ;;  %v301_v39 = vld [vmem:[%s3842_s26] sm:$0xf]  ;;  %v302_v40 = vld [vmem:[%s3842_s26 + $0x4] sm:$0xf]  ;;  %v3896_v41 = vld [vmem:[%s3842_s26 + $0x8] sm:$0xf] }
  0x1a   : > { %3257 = vmatprep.subr.bf16.mxu1 %v3585_v9  ;;  %v778_v24 = vshll.u32 %v3861_v19, 16  ;;  %v782_v31 = vshrl.u32 %v3861_v19, 16  ;;  %v304_v42 = vld [vmem:[%s3842_s26 + $0xc] sm:$0x1]  ;;  %v2604_v44 = vcombine.low %v301_v39, %v302_v40  ;;  %v909_v46 = vrot.slane %v3861_v19, 1  ;;  %v3611_v7 = vld [vmem:[%s4407_s1 + $0x178] sm:$0xff]  }
  0x1b   : > { %v771_v22 = vshrl.u32 %v2684_v17, 16  ;;  %v773_v23 = vshll.u32 %v2684_v17, 16  ;;  %v3903_v45 = vcombine.low %v3896_v41, %v304_v42  ;;  %v886_v47 = vld [vmem:[%s3842_s26] sm:$0xe]  ;;  %v450_v4 = vld [vmem:[%s3842_s26 + $0xc] sm:$0x7] }
  0x1c   : > { %3178 = vmatpush3.bf16.msra.mxu0 %v3584_v8  ;;  %v780_v28 = vrot.slane %v778_v24, 1  ;;  %v334_v48 = vshrl.u32 %v2604_v44, 16  ;;  %v336_v49 = vshll.u32 %v2604_v44, 16  ;;  %v2710_v51 = vcombine.low %v886_v47, %v3850_v14  ;;  %v449_v2 = vld [vmem:[%s3842_s26] sm:$0x8]  ;;  %v3621_v19 = vld [vmem:[%s4407_s1 + $0x98] sm:$0xff]  }
  0x1d   : > { %3258 = vmatpush3.bf16.msra.mxu1 %v3585_v9  ;;  %3179 = vmatprep.subr.bf16.mxu0 %v3586_v10  ;;  %v775_v26 = vrot.slane %v773_v23, 1  ;;  %v341_v50 = vshll.u32 %v3903_v45, 16  ;;  %v1012_v5 = vld [vmem:[%s3842_s26] sm:$0x8]  ;;  %v3943_v6 = vld [vmem:[%s3842_s26 + $0xc] sm:$0xf]  ;;  %v3948_v8 = vcombine.low %v449_v2, %v302_v40 }
  0x1e   : > { %3259 = vmatprep.subr.bf16.mxu1 %v3587_v12  ;;  %v784_v35 = vor.u32 %v782_v31, %v780_v28  ;;  %v338_v54 = vrot.slane %v336_v49, 1  ;;  %v908_v56 = vrot.slane %v2710_v51, 1  ;;  %v2735_v9 = vcombine.low %v1012_v5, %v3850_v14  ;;  %v3614_v13 = vld [vmem:[%s4407_s1 + $0x80] sm:$0xff]   ;;  %v579_v42 = vld [vmem:[%s3842_s26 + $0xc] sm:$0xf]  ;;  %v3628_v47 = vld [vmem:[%s4407_s1 + $0x1b0] sm:$0xff]  }
  0x1f   : > { %v776_v29 = vor.u32 %v775_v26, %v771_v22  ;;  %v343_v55 = vrot.slane %v341_v50, 1  ;;  %v345_v11 = vshrl.u32 %v3903_v45, 16  ;;  %v475_v23 = vrot.slane %v3948_v8, 3  ;;  %v3623_v39 = vld [vmem:[%s4407_s1 + $0xa0] sm:$0xff]   ;;  %v3626_v44 = vld [vmem:[%s4407_s1 + $0x1a8] sm:$0xff]   ;;  %v3641_v2 = vld [vmem:[%s4407_s1 + $0xd8] sm:$0xff]  }
  0x20   : > { %3180 = vmatpush3.bf16.msra.mxu0 %v3586_v10  ;;  %v339_v57 = vor.u32 %v338_v54, %v334_v48  ;;  %v910_v58 = vsel %vm907_vm1, %v908_v56, %v909_v46  ;;  %v2736_v10 = vcombine.low %v3853_v15, %v3943_v6  ;;  %v1038_v16 = vshrl.u32 %v2735_v9, 16  ;;  %v3624_v40 = vld [vmem:[%s4407_s1 + $0x1a0] sm:$0xff]  }
  0x21   : > { %3260 = vmatpush3.bf16.msra.mxu1 %v3587_v12  ;;  %3181 = vmatprep.subr.bf16.mxu0 %v3588_v18  ;;  %v781_v30 = vsel %vm332_vm0, %v776_v29, %v780_v28  ;;  %v2631_v12 = vcombine.low %v3896_v41, %v450_v4  ;;  %v1041_v17 = vshll.u32 %v2735_v9, 16  ;;  %v3617_v28 = vld [vmem:[%s4407_s1 + $0x88] sm:$0xff]   ;;  %v2656_v45 = vcombine.low %v3896_v41, %v579_v42  ;;  %v3629_v41 = vld [vmem:[%s4407_s1 + $0xb8] sm:$0xff]   ;;  %v3643_v14 = vld [vmem:[%s4407_s1 + $0xe0] sm:$0xff]  }
  0x22   : > { %3261 = vmatprep.subr.bf16.mxu1 %v3589_v21  ;;  %3265 = vmatprep.mubr.bf16.mxu1 %v781_v30  ;;  %v344_v61 = vsel %vm332_vm0, %v339_v57, %v343_v55  ;;  %v1049_v22 = vshll.u32 %v2736_v10, 16  ;;  %v1040_v24 = vrot.slane %v1038_v16, 3  ;;  %v602_v48 = vshrl.u32 %v3948_v8, 16  ;;  %v3633_v57 = vld [vmem:[%s4407_s1 + $0xc0] sm:$0xff]   ;;  %v3645_v4 = vld [vmem:[%s4407_s1 + $0xe8] sm:$0xff]   ;;  %v3658_v42 = vld [vmem:[%s4407_s1 + $0x210] sm:$0xff]  }
  0x23   : > { %v3965_v29 = vrot.slane %v2631_v12, 3  ;;  %v605_v49 = vshll.u32 %v3948_v8, 16  ;;  %v610_v50 = vshrl.u32 %v2656_v45, 16  ;;  %v613_v51 = vshll.u32 %v2656_v45, 16  ;;  %v3644_v15 = vld [vmem:[%s4407_s1 + $0x1e0] sm:$0xff]   ;;  %v3646_v9 = vld [vmem:[%s4407_s1 + $0x1e8] sm:$0xff]  }
  0x24   : > { %3182 = vmatpush3.bf16.msra.mxu0 %v3588_v18  ;;  %v1046_v18 = vshrl.u32 %v2736_v10, 16  ;;  %v1051_v30 = vrot.slane %v1049_v22, 4  ;;  %v4062_v5 = vld [vmem:[%s3842_s26 + $0x4] sm:$0xf]  ;;  %v4068_v8 = vld [vmem:[%s3842_s26 + $0xc] sm:$0xf] }
  0x25   : > { %3262 = vmatpush3.bf16.msra.mxu1 %v3589_v21  ;;  %3183 = vmatprep.subr.bf16.mxu0 %v3590_v25  ;;  %v3616_v21 = vld [vmem:[%s4407_s1 + $0x180] sm:$0xff]   ;;  %v607_v54 = vrot.slane %v605_v49, 4  ;;  %v615_v56 = vrot.slane %v613_v51, 4  ;;  %v4083_v16 = vld [vmem:[%s3842_s26 + $0x8] sm:$0xf]  ;;  %v3661_v45 = vld [vmem:[%s4407_s1 + $0x318] sm:$0xff]  }
  0x26   : > { %3263 = vmatprep.subr.bf16.mxu1 %v3591_v27  ;;  %v1048_v26 = vrot.slane %v1046_v18, 3  ;;  %v3649_v18 = vld [vmem:[%s4407_s1 + $0xf8] sm:$0xff]   ;;  %v3664_v49 = vld [vmem:[%s4407_s1 + $0x228] sm:$0xff]  }
  0x28   : > { %3184 = vmatpush3.bf16.msra.mxu0 %v3590_v25  ;;  %v1043_v25 = vrot.slane %v1041_v17, 4  ;;  %v1298_v17 = vld [vmem:[%s3842_s26 + $0xc] sm:$0x7] }
  0x29   : > { %3264 = vmatpush3.bf16.msra.mxu1 %v3591_v27  ;;  %3189 = vmatprep.subr.bf16.mxu0 %v3593_v32  ;;  %v347_v27 = vor.u32 %v345_v11, %v343_v55  ;;  %v612_v55 = vrot.slane %v610_v50, 3  ;;  %v3647_v11 = vld [vmem:[%s4407_s1 + $0xf0] sm:$0xff]   ;;  %v3665_v50 = vld [vmem:[%s4407_s1 + $0x328] sm:$0xff]  }
  0x2a   : > { %3269 = vmatprep.subr.bf16.mxu1 %v3596_v33  ;;  %v1044_v31 = vor.u32 %v1043_v25, %v1040_v24  ;;  %v3650_v25 = vld [vmem:[%s4407_s1 + $0x1f8] sm:$0xff]  }
  0x2b   : > { %3186 = vmatmul.mubr.bf16.vlgmr.msra.gmra.mrb[0].mxu0 %v3597_v34  ;;  %v477_v34 = vsel %vm474_vm2, %v475_v23, %v3965_v29 }
  0x2c   : > { %3190 = vmatpush3.bf16.msra.mxu0 %v3593_v32  ;;  %3266 = vmatmul.mubr.bf16.vlgmr.msra.gmra.mrb[0].mxu1 %v784_v35  ;;  %v3967_v32 = vor.u32 %v1051_v30, %v1048_v26  ;;  %v4093_v26 = vld [vmem:[%s3842_s26] sm:$0xf8]  }
  0x2d   : > { %3270 = vmatpush3.bf16.msra.mxu1 %v3596_v33  ;;  %3191 = vmatprep.subr.bf16.mxu0 %v3598_v36  ;;  %v3618_v33 = vld [vmem:[%s4407_s1 + $0x188] sm:$0xff]  }
  0x2e   : > { %3271 = vmatprep.subr.bf16.mxu1 %v3599_v37  ;;  %3285 = vmatprep.mubr.bf16.mxu1 %v910_v58  ;;  %v1053_v35 = vsel %vm600_vm3, %v1044_v31, %v3967_v32  ;;  %v3636_v58 = vld [vmem:[%s4407_s1 + $0x1c0] sm:$0xff]  }
  0x2f   : > { %3205 = vmatprep.mubr.bf16.mxu0 %v344_v61  ;;  %v3637_v61 = vld [vmem:[%s4407_s1 + $0xc8] sm:$0xff]  }
  0x30   : > { %3192 = vmatpush3.bf16.msra.mxu0 %v3598_v36  ;;  %v3619_v36 = vld [vmem:[%s4407_s1 + $0x90] sm:$0xff]  }
  0x31   : > { %3272 = vmatpush3.bf16.msra.mxu1 %v3599_v37  ;;  %3193 = vmatprep.subr.bf16.mxu0 %v3600_v38  ;;  %v3620_v37 = vld [vmem:[%s4407_s1 + $0x190] sm:$0xff]  }
  0x32   : > { %3273 = vmatprep.subr.bf16.mxu1 %v3601_v43 }
  0x34   : > { %3194 = vmatpush3.bf16.msra.mxu0 %v3600_v38  ;;  %v3622_v38 = vld [vmem:[%s4407_s1 + $0x198] sm:$0xff]  }
  0x35   : > { %3274 = vmatpush3.bf16.msra.mxu1 %v3601_v43  ;;  %3195 = vmatprep.subr.bf16.mxu0 %v3602_v52  ;;  %v3625_v43 = vld [vmem:[%s4407_s1 + $0xa8] sm:$0xff]  }
  0x36   : > { %3275 = vmatprep.subr.bf16.mxu1 %v3603_v53 }
  0x38   : > { %3196 = vmatpush3.bf16.msra.mxu0 %v3602_v52  ;;  %v3630_v52 = vld [vmem:[%s4407_s1 + $0x1b8] sm:$0xff]  }
  0x39   : > { %3276 = vmatpush3.bf16.msra.mxu1 %v3603_v53  ;;  %3197 = vmatprep.subr.bf16.mxu0 %v3604_v59  ;;  %v604_v53 = vrot.slane %v602_v48, 3  ;;  %v1430_v48 = vld [vmem:[%s3842_s26 + $0xc] sm:$0xf] }
  0x3a   : > { %3277 = vmatprep.subr.bf16.mxu1 %v3605_v60  ;;  %v2819_v51 = vcombine.low %v4083_v16, %v1430_v48  ;;  %v3698_v48 = vld [vmem:[%s4407_s1 + $0x390] sm:$0xff]  }
  0x3c   : > { %3198 = vmatpush3.bf16.msra.mxu0 %v3604_v59  ;;  %v608_v59 = vor.u32 %v607_v54, %v604_v53  ;;  %v1452_v53 = vshrl.u32 %v4093_v26, 16  ;;  %v1455_v54 = vshll.u32 %v4093_v26, 16 }
  0x3d   : > { %3278 = vmatpush3.bf16.msra.mxu1 %v3605_v60  ;;  %3199 = vmatprep.subr.bf16.mxu0 %v3606_v62  ;;  %v4024_v60 = vor.u32 %v615_v56, %v612_v55  ;;  %v1460_v55 = vshrl.u32 %v2819_v51, 16  ;;  %v1463_v56 = vshll.u32 %v2819_v51, 16  ;;  %v3701_v51 = vld [vmem:[%s4407_s1 + $0x2a0] sm:$0xff]  }
  0x3e   : > { %3279 = vmatprep.subr.bf16.mxu1 %v3607_v63 }
  0x40   : > { %3200 = vmatpush3.bf16.msra.mxu0 %v3606_v62  ;;  %v3638_v62 = vld [vmem:[%s4407_s1 + $0x1c8] sm:$0xff]  }
  0x41   : > { %3280 = vmatpush3.bf16.msra.mxu1 %v3607_v63  ;;  %3201 = vmatprep.subr.bf16.mxu0 %v3608_v0  ;;  %v617_v63 = vsel %vm600_vm3, %v608_v59, %v4024_v60  ;;  %v1454_v59 = vrot.slane %v1452_v53, 3  ;;  %v3703_v53 = vld [vmem:[%s4407_s1 + $0x2a8] sm:$0xff]  }
  0x42   : > { %3281 = vmatprep.subr.bf16.mxu1 %v3609_v1 }
  0x44   : > { %3202 = vmatpush3.bf16.msra.mxu0 %v3608_v0  ;;  %v3639_v0 = vld [vmem:[%s4407_s1 + $0xd0] sm:$0xff]  }
  0x45   : > { %3282 = vmatpush3.bf16.msra.mxu1 %v3609_v1  ;;  %3203 = vmatprep.subr.bf16.mxu0 %v3610_v3  ;;  %v3640_v1 = vld [vmem:[%s4407_s1 + $0x1d0] sm:$0xff]  }
  0x46   : > { %3283 = vmatprep.subr.bf16.mxu1 %v3611_v7 }
  0x48   : > { %3204 = vmatpush3.bf16.msra.mxu0 %v3610_v3  ;;  %v3642_v3 = vld [vmem:[%s4407_s1 + $0x1d8] sm:$0xff]  }
  0x49   : > { %3284 = vmatpush3.bf16.msra.mxu1 %v3611_v7  ;;  %3209 = vmatprep.subr.bf16.mxu0 %v3614_v13  ;;  %v4065_v7 = vld [vmem:[%s3842_s26 + $0x8] sm:$0xf] }
  0x4a   : > { %3289 = vmatprep.subr.bf16.mxu1 %v3616_v21  ;;  %v2902_v12 = vcombine.low %v4065_v7, %v4068_v8 }
  0x4b   : > { %3206 = vmatmul.mubr.bf16.vlgmr.msra.gmra.mrb[0].mxu0 %v347_v27  ;;  %v2794_v27 = vcombine.low %v4083_v16, %v1298_v17  ;;  %v4203_v16 = vld [vmem:[%s3842_s26 + $0x8] sm:$0xf] }
  0x4c   : > { %3210 = vmatpush3.bf16.msra.mxu0 %v3614_v13  ;;  %3286 = vmatmul.mubr.bf16.vlgmr.msra.gmra.mrb[0].mxu1 %v909_v46  ;;  %v3627_v46 = vld [vmem:[%s4407_s1 + $0xb0] sm:$0xff]   ;;  %v1905_v23 = vshrl.u32 %v2902_v12, 16  ;;  %v1908_v24 = vshll.u32 %v2902_v12, 16  ;;  %v3685_v12 = vld [vmem:[%s4407_s1 + $0x268] sm:$0xff]  }
  0x4d   : > { %3290 = vmatpush3.bf16.msra.mxu1 %v3616_v21  ;;  %3211 = vmatprep.subr.bf16.mxu0 %v3617_v28  ;;  %v3648_v13 = vld [vmem:[%s4407_s1 + $0x1f0] sm:$0xff]   ;;  %v3686_v17 = vld [vmem:[%s4407_s1 + $0x368] sm:$0xff]  }
  0x4e   : > { %3291 = vmatprep.subr.bf16.mxu1 %v3618_v33  ;;  %3225 = vmatprep.mubr.bf16.mxu0 %v477_v34  ;;  %v1907_v30 = vrot.slane %v1905_v23, 3  ;;  %v1910_v31 = vrot.slane %v1908_v24, 4  ;;  %v1326_v34 = vrot.slane %v4093_v26, 3  ;;  %v3688_v23 = vld [vmem:[%s4407_s1 + $0x370] sm:$0xff]   ;;  %v4219_v24 = vld [vmem:[%s3842_s26 + $0xc] sm:$0xf] }
  0x4f   : > { %3305 = vmatprep.mubr.bf16.mxu1 %v1053_v35  ;;  %v4103_v35 = vrot.slane %v2794_v27, 3 }
  0x50   : > { %3212 = vmatpush3.bf16.msra.mxu0 %v3617_v28 }
  0x51   : > { %3292 = vmatpush3.bf16.msra.mxu1 %v3618_v33  ;;  %3213 = vmatprep.subr.bf16.mxu0 %v3619_v36  ;;  %v3655_v33 = vld [vmem:[%s4407_s1 + $0x300] sm:$0xff]  }
  0x52   : > { %3293 = vmatprep.subr.bf16.mxu1 %v3620_v37 }
  0x54   : > { %3214 = vmatpush3.bf16.msra.mxu0 %v3619_v36  ;;  %v2762_v36 = vcombine.low %v3943_v6, %v3943_v6 }
  0x55   : > { %3294 = vmatpush3.bf16.msra.mxu1 %v3620_v37  ;;  %3215 = vmatprep.subr.bf16.mxu0 %v3621_v19 }
  0x56   : > { %3295 = vmatprep.subr.bf16.mxu1 %v3622_v38 }
  0x58   : > { %3216 = vmatpush3.bf16.msra.mxu0 %v3621_v19  ;;  %v4107_v19 = vor.u32 %v1910_v31, %v1907_v30  ;;  %v3689_v30 = vld [vmem:[%s4407_s1 + $0x278] sm:$0xff]  }
  0x59   : > { %3296 = vmatpush3.bf16.msra.mxu1 %v3622_v38  ;;  %3217 = vmatprep.subr.bf16.mxu0 %v3623_v39  ;;  %v3656_v38 = vld [vmem:[%s4407_s1 + $0x208] sm:$0xff]   ;;  %v3690_v31 = vld [vmem:[%s4407_s1 + $0x378] sm:$0xff]  }
  0x5a   : > { %3297 = vmatprep.subr.bf16.mxu1 %v3624_v40 }
  0x5c   : > { %3218 = vmatpush3.bf16.msra.mxu0 %v3623_v39  ;;  %v3657_v39 = vld [vmem:[%s4407_s1 + $0x308] sm:$0xff]  }
  0x5d   : > { %3298 = vmatpush3.bf16.msra.mxu1 %v3624_v40  ;;  %3219 = vmatprep.subr.bf16.mxu0 %v3625_v43  ;;  %v1328_v40 = vsel %vm474_vm2, %v1326_v34, %v4103_v35 }
  0x5e   : > { %3299 = vmatprep.subr.bf16.mxu1 %v3626_v44 }
  0x60   : > { %3220 = vmatpush3.bf16.msra.mxu0 %v3625_v43  ;;  %v3659_v43 = vld [vmem:[%s4407_s1 + $0x310] sm:$0xff]  }
  0x61   : > { %3300 = vmatpush3.bf16.msra.mxu1 %v3626_v44  ;;  %3221 = vmatprep.subr.bf16.mxu0 %v3627_v46  ;;  %v3660_v44 = vld [vmem:[%s4407_s1 + $0x218] sm:$0xff]  }
  0x62   : > { %3301 = vmatprep.subr.bf16.mxu1 %v3628_v47 }
  0x64   : > { %3222 = vmatpush3.bf16.msra.mxu0 %v3627_v46  ;;  %v3662_v46 = vld [vmem:[%s4407_s1 + $0x220] sm:$0xff]  }
  0x65   : > { %3302 = vmatpush3.bf16.msra.mxu1 %v3628_v47  ;;  %3223 = vmatprep.subr.bf16.mxu0 %v3629_v41  ;;  %v3663_v47 = vld [vmem:[%s4407_s1 + $0x320] sm:$0xff]  }
  0x66   : > { %3303 = vmatprep.subr.bf16.mxu1 %v3630_v52 }
  0x68   : > { %3224 = vmatpush3.bf16.msra.mxu0 %v3629_v41  ;;  %v3666_v41 = vld [vmem:[%s4407_s1 + $0x230] sm:$0xff]  }
  0x69   : > { %3304 = vmatpush3.bf16.msra.mxu1 %v3630_v52  ;;  %3229 = vmatprep.subr.bf16.mxu0 %v3633_v57  ;;  %v3667_v52 = vld [vmem:[%s4407_s1 + $0x330] sm:$0xff]  }
  0x6a   : > { %3309 = vmatprep.subr.bf16.mxu1 %v3636_v58 }
  0x6b   : > { %3226 = vmatmul.mubr.bf16.vlgmr.msra.gmra.mrb[0].mxu0 %v3965_v29 }
  0x6c   : > { %3230 = vmatpush3.bf16.msra.mxu0 %v3633_v57  ;;  %3306 = vmatmul.mubr.bf16.vlgmr.msra.gmra.mrb[0].mxu1 %v3967_v32  ;;  %v3654_v32 = vld [vmem:[%s4407_s1 + $0x200] sm:$0xff]   ;;  %v3668_v57 = vld [vmem:[%s4407_s1 + $0x238] sm:$0xff]  }
  0x6d   : > { %3310 = vmatpush3.bf16.msra.mxu1 %v3636_v58  ;;  %3231 = vmatprep.subr.bf16.mxu0 %v3637_v61  ;;  %v3669_v58 = vld [vmem:[%s4407_s1 + $0x338] sm:$0xff]  }
  0x6e   : > { %3311 = vmatprep.subr.bf16.mxu1 %v3638_v62  ;;  %3245 = vmatprep.mubr.bf16.mxu0 %v617_v63  ;;  %v3673_v63 = vld [vmem:[%s4407_s1 + $0x240] sm:$0xff]  }
  0x6f   : > { %3325 = vmatprep.mubr.bf16.mxu1 %v2761_v20  ;;  %v1865_v20 = vld [vmem:[%s3842_s26] sm:$0x8] }
  0x70   : > { %3232 = vmatpush3.bf16.msra.mxu0 %v3637_v61  ;;  %v2901_v10 = vcombine.low %v1865_v20, %v4062_v5  ;;  %v1462_v61 = vrot.slane %v1460_v55, 3  ;;  %v2927_v20 = vcombine.low %v4062_v5, %v4065_v7  ;;  %v3681_v5 = vld [vmem:[%s4407_s1 + $0x258] sm:$0xff]  }
  0x71   : > { %3312 = vmatpush3.bf16.msra.mxu1 %v3638_v62  ;;  %3233 = vmatprep.subr.bf16.mxu0 %v3639_v0  ;;  %v1465_v62 = vrot.slane %v1463_v56, 4  ;;  %v3682_v7 = vld [vmem:[%s4407_s1 + $0x358] sm:$0xff]   ;;  %v3705_v56 = vld [vmem:[%s4407_s1 + $0x2b0] sm:$0xff]  }
  0x72   : > { %3313 = vmatprep.subr.bf16.mxu1 %v3640_v1  ;;  %v1897_v21 = vshrl.u32 %v2901_v10, 16  ;;  %v1900_v22 = vshll.u32 %v2901_v10, 16  ;;  %v3683_v10 = vld [vmem:[%s4407_s1 + $0x260] sm:$0xff]  }
  0x74   : > { %3234 = vmatpush3.bf16.msra.mxu0 %v3639_v0  ;;  %v1899_v28 = vrot.slane %v1897_v21, 3  ;;  %v1902_v29 = vrot.slane %v1900_v22, 4  ;;  %v3676_v0 = vld [vmem:[%s4407_s1 + $0x340] sm:$0xff]   ;;  %v4210_v21 = vld [vmem:[%s3842_s26 + $0xc] sm:$0x7f]  }
  0x75   : > { %3314 = vmatpush3.bf16.msra.mxu1 %v3640_v1  ;;  %3235 = vmatprep.subr.bf16.mxu0 %v3641_v2  ;;  %v3687_v22 = vld [vmem:[%s4407_s1 + $0x270] sm:$0xff]  }
  0x76   : > { %3315 = vmatprep.subr.bf16.mxu1 %v3642_v3  ;;  %v1903_v37 = vor.u32 %v1902_v29, %v1899_v28  ;;  %v2174_v28 = vshrl.u32 %v4210_v21, 16  ;;  %v2177_v29 = vshll.u32 %v4210_v21, 16 }
  0x78   : > { %3236 = vmatpush3.bf16.msra.mxu0 %v3641_v2  ;;  %v1912_v6 = vsel %vm600_vm3, %v1903_v37, %v4107_v19  ;;  %v4166_v2 = vor.u32 %v1465_v62, %v1462_v61  ;;  %v2179_v37 = vrot.slane %v2177_v29, 3  ;;  %v3707_v62 = vld [vmem:[%s4407_s1 + $0x2b8] sm:$0xff]  }
  0x79   : > { %3316 = vmatpush3.bf16.msra.mxu1 %v3642_v3  ;;  %3237 = vmatprep.subr.bf16.mxu0 %v3643_v14  ;;  %v3677_v3 = vld [vmem:[%s4407_s1 + $0x248] sm:$0xff]   ;;  %v3728_v29 = vld [vmem:[%s4407_s1 + $0x2f8] sm:$0xff]  }
  0x7a   : > { %3317 = vmatprep.subr.bf16.mxu1 %v3644_v15 }
  0x7c   : > { %3238 = vmatpush3.bf16.msra.mxu0 %v3643_v14  ;;  %v3678_v14 = vld [vmem:[%s4407_s1 + $0x348] sm:$0xff]  }
  0x7d   : > { %3318 = vmatpush3.bf16.msra.mxu1 %v3644_v15  ;;  %3239 = vmatprep.subr.bf16.mxu0 %v3645_v4 }
  0x7e   : > { %3319 = vmatprep.subr.bf16.mxu1 %v3646_v9 }
  0x80   : > { %3240 = vmatpush3.bf16.msra.mxu0 %v3645_v4  ;;  %v3679_v4 = vld [vmem:[%s4407_s1 + $0x250] sm:$0xff]  }
  0x81   : > { %3320 = vmatpush3.bf16.msra.mxu1 %v3646_v9  ;;  %3241 = vmatprep.subr.bf16.mxu0 %v3647_v11  ;;  %v3680_v9 = vld [vmem:[%s4407_s1 + $0x350] sm:$0xff]  }
  0x82   : > { %3321 = vmatprep.subr.bf16.mxu1 %v3648_v13 }
  0x84   : > { %3242 = vmatpush3.bf16.msra.mxu0 %v3647_v11  ;;  %v3684_v11 = vld [vmem:[%s4407_s1 + $0x360] sm:$0xff]  }
  0x85   : > { %3322 = vmatpush3.bf16.msra.mxu1 %v3648_v13  ;;  %3243 = vmatprep.subr.bf16.mxu0 %v3649_v18  ;;  %v2134_v13 = vld [vmem:[%s3842_s26 + $0x4] sm:$0xc] }
  0x86   : > { %3323 = vmatprep.subr.bf16.mxu1 %v3650_v25 }
  0x88   : > { %3244 = vmatpush3.bf16.msra.mxu0 %v3649_v18  ;;  %v2953_v18 = vcombine.low %v2134_v13, %v4203_v16 }
  0x89   : > { %3324 = vmatpush3.bf16.msra.mxu1 %v3650_v25  ;;  %3329 = vmatprep.subr.bf16.mxu0 %v3654_v32  ;;  %v1572_v25 = vld [vmem:[%s3842_s26 + $0x10] sm:$0x3] }
  0x8a   : > { %3409 = vmatprep.subr.bf16.mxu1 %v3655_v33  ;;  %v2166_v26 = vshrl.u32 %v2953_v18, 16  ;;  %v2169_v27 = vshll.u32 %v2953_v18, 16  ;;  %v3719_v18 = vld [vmem:[%s4407_s1 + $0x3d0] sm:$0xff]  }
  0x8b   : > { %3246 = vmatmul.mubr.bf16.vlgmr.msra.gmra.mrb[0].mxu0 %v4024_v60  ;;  %v1457_v60 = vrot.slane %v1455_v54, 4  ;;  %v3704_v54 = vld [vmem:[%s4407_s1 + $0x3a8] sm:$0xff]  }
  0x8c   : > { %3326 = vmatmul.mubr.bf16.vlgmr.msra.gmra.mrb[0].mxu1 %v2762_v36  ;;  %3330 = vmatpush3.bf16.msra.mxu0 %v3654_v32  ;;  %v4231_v32 = vld [vmem:[%s3842_s26 + $0x4] sm:$0xfc]   ;;  %v2168_v34 = vrot.slane %v2166_v26, 2  ;;  %v2176_v36 = vrot.slane %v2174_v28, 2  ;;  %v3727_v28 = vld [vmem:[%s4407_s1 + $0x3f0] sm:$0xff]  }
  0x8d   : > { %3410 = vmatpush3.bf16.msra.mxu1 %v3655_v33  ;;  %3331 = vmatprep.subr.bf16.mxu0 %v3656_v38  ;;  %v1458_v1 = vor.u32 %v1457_v60, %v1454_v59  ;;  %v2845_v33 = vcombine.low %v4219_v24, %v1572_v25  ;;  %v1731_v59 = vshll.u32 %v4231_v32, 16  ;;  %v3724_v25 = vld [vmem:[%s4407_s1 + $0x2e8] sm:$0xff]  }
  0x8e   : > { %3411 = vmatprep.subr.bf16.mxu1 %v3657_v39  ;;  %3345 = vmatprep.mubr.bf16.mxu0 %v1328_v40  ;;  %v3725_v26 = vld [vmem:[%s4407_s1 + $0x3e8] sm:$0xff]  }
  0x8f   : > { %3425 = vmatprep.mubr.bf16.mxu1 %v1912_v6  ;;  %v1467_v15 = vsel %vm600_vm3, %v1458_v1, %v4166_v2  ;;  %v4241_v40 = vrot.slane %v2845_v33, 2  ;;  %v2928_v6 = vcombine.low %v4068_v8, %v4068_v8 }
  0x90   : > { %3332 = vmatpush3.bf16.msra.mxu0 %v3656_v38  ;;  %v3693_v38 = vld [vmem:[%s4407_s1 + $0x380] sm:$0xff]  }
  0x91   : > { %3412 = vmatpush3.bf16.msra.mxu1 %v3657_v39  ;;  %3333 = vmatprep.subr.bf16.mxu0 %v3658_v42  ;;  %v1601_v39 = vrot.slane %v4231_v32, 2 }
  0x92   : > { %3413 = vmatprep.subr.bf16.mxu1 %v3659_v43 }
  0x93   : > { %v1603_v8 = vsel %vm1600_vm4, %v1601_v39, %v4241_v40 }
  0x94   : > { %3334 = vmatpush3.bf16.msra.mxu0 %v3658_v42 }
  0x95   : > { %3414 = vmatpush3.bf16.msra.mxu1 %v3659_v43  ;;  %3335 = vmatprep.subr.bf16.mxu0 %v3660_v44  ;;  %v4245_v43 = vor.u32 %v2179_v37, %v2176_v36 }
  0x96   : > { %3415 = vmatprep.subr.bf16.mxu1 %v3661_v45 }
  0x98   : > { %3336 = vmatpush3.bf16.msra.mxu0 %v3660_v44  ;;  %v3695_v44 = vld [vmem:[%s4407_s1 + $0x288] sm:$0xff]  }
  0x99   : > { %3416 = vmatpush3.bf16.msra.mxu1 %v3661_v45  ;;  %3337 = vmatprep.subr.bf16.mxu0 %v3662_v46  ;;  %v3696_v45 = vld [vmem:[%s4407_s1 + $0x388] sm:$0xff]  }
  0x9a   : > { %3417 = vmatprep.subr.bf16.mxu1 %v3663_v47 }
  0x9c   : > { %3338 = vmatpush3.bf16.msra.mxu0 %v3662_v46 }
  0x9d   : > { %3418 = vmatpush3.bf16.msra.mxu1 %v3663_v47  ;;  %3339 = vmatprep.subr.bf16.mxu0 %v3664_v49  ;;  %v3697_v47 = vld [vmem:[%s4407_s1 + $0x290] sm:$0xff]  }
  0x9e   : > { %3419 = vmatprep.subr.bf16.mxu1 %v3665_v50 }
  0xa0   : > { %3340 = vmatpush3.bf16.msra.mxu0 %v3664_v49  ;;  %v3699_v49 = vld [vmem:[%s4407_s1 + $0x298] sm:$0xff]  }
  0xa1   : > { %3420 = vmatpush3.bf16.msra.mxu1 %v3665_v50  ;;  %3341 = vmatprep.subr.bf16.mxu0 %v3666_v41  ;;  %v3700_v50 = vld [vmem:[%s4407_s1 + $0x398] sm:$0xff]  }
  0xa2   : > { %3421 = vmatprep.subr.bf16.mxu1 %v3667_v52 }
  0xa4   : > { %3342 = vmatpush3.bf16.msra.mxu0 %v3666_v41  ;;  %v3702_v41 = vld [vmem:[%s4407_s1 + $0x3a0] sm:$0xff]  }
  0xa5   : > { %3422 = vmatpush3.bf16.msra.mxu1 %v3667_v52  ;;  %3343 = vmatprep.subr.bf16.mxu0 %v3668_v57  ;;  %v1705_v52 = vld [vmem:[%s3842_s26 + $0x10] sm:$0x7] }
  0xa6   : > { %3423 = vmatprep.subr.bf16.mxu1 %v3669_v58  ;;  %v2870_v55 = vcombine.low %v4219_v24, %v1705_v52  ;;  %v3723_v24 = vld [vmem:[%s4407_s1 + $0x3e0] sm:$0xff]  }
  0xa8   : > { %3344 = vmatpush3.bf16.msra.mxu0 %v3668_v57  ;;  %v3706_v57 = vld [vmem:[%s4407_s1 + $0x3b0] sm:$0xff]   ;;  %v1736_v60 = vshrl.u32 %v2870_v55, 16  ;;  %v1739_v61 = vshll.u32 %v2870_v55, 16 }
  0xa9   : > { %3424 = vmatpush3.bf16.msra.mxu1 %v3669_v58  ;;  %3349 = vmatprep.subr.bf16.mxu0 %v3673_v63  ;;  %v1728_v58 = vshrl.u32 %v4231_v32, 16 }
  0xaa   : > { %3429 = vmatprep.subr.bf16.mxu1 %v3676_v0 }
  0xab   : > { %3346 = vmatmul.mubr.bf16.vlgmr.msra.gmra.mrb[4].mxu0 %v4103_v35  ;;  %v2171_v35 = vrot.slane %v2169_v27, 3  ;;  %v1730_v1 = vrot.slane %v1728_v58, 2  ;;  %v3726_v27 = vld [vmem:[%s4407_s1 + $0x2f0] sm:$0xff]  }
  0xac   : > { %3350 = vmatpush3.bf16.msra.mxu0 %v3673_v63  ;;  %3426 = vmatmul.mubr.bf16.vlgmr.msra.gmra.mrb[4].mxu1 %v4107_v19  ;;  %v3691_v19 = vld [vmem:[%s4407_s1 + $0x280] sm:$0xff]  }
  0xad   : > { %3430 = vmatpush3.bf16.msra.mxu1 %v3676_v0  ;;  %3351 = vmatprep.subr.bf16.mxu0 %v3677_v3  ;;  %v2172_v42 = vor.u32 %v2171_v35, %v2168_v34  ;;  %v2283_v63 = vld [vmem:[%s3842_s26 + $0x4] sm:$0x8]  ;;  %v3708_v0 = vld [vmem:[%s4407_s1 + $0x3b8] sm:$0xff]  }
  0xae   : > { %3431 = vmatprep.subr.bf16.mxu1 %v3678_v14  ;;  %3365 = vmatprep.mubr.bf16.mxu0 %v1467_v15  ;;  %v2979_v15 = vcombine.low %v2283_v63, %v4203_v16 }
  0xaf   : > { %3445 = vmatprep.mubr.bf16.mxu1 %v2927_v20  ;;  %v2181_v46 = vsel %vm1726_vm5, %v2172_v42, %v4245_v43  ;;  %v3712_v20 = vld [vmem:[%s4407_s1 + $0x2c0] sm:$0xff]  }
  0xb0   : > { %3352 = vmatpush3.bf16.msra.mxu0 %v3677_v3  ;;  %v1738_v3 = vrot.slane %v1736_v60, 2 }
  0xb1   : > { %3432 = vmatpush3.bf16.msra.mxu1 %v3678_v14  ;;  %3353 = vmatprep.subr.bf16.mxu0 %v3679_v4  ;;  %v1741_v14 = vrot.slane %v1739_v61, 3 }
  0xb2   : > { %3433 = vmatprep.subr.bf16.mxu1 %v3680_v9 }
  0xb4   : > { %3354 = vmatpush3.bf16.msra.mxu0 %v3679_v4  ;;  %v3715_v4 = vld [vmem:[%s4407_s1 + $0x3c0] sm:$0xff]  }
  0xb5   : > { %3434 = vmatpush3.bf16.msra.mxu1 %v3680_v9  ;;  %3355 = vmatprep.subr.bf16.mxu0 %v3681_v5 }
  0xb6   : > { %3435 = vmatprep.subr.bf16.mxu1 %v3682_v7 }
  0xb8   : > { %3356 = vmatpush3.bf16.msra.mxu0 %v3681_v5  ;;  %v1742_v5 = vor.u32 %v1741_v14, %v1738_v3 }
  0xb9   : > { %3436 = vmatpush3.bf16.msra.mxu1 %v3682_v7  ;;  %3357 = vmatprep.subr.bf16.mxu0 %v3683_v10  ;;  %v2304_v7 = vrot.slane %v2979_v15, 3 }
  0xba   : > { %3437 = vmatprep.subr.bf16.mxu1 %v3684_v11 }
  0xbc   : > { %3358 = vmatpush3.bf16.msra.mxu0 %v3683_v10  ;;  %v2305_v10 = vrot.slane %v4210_v21, 3  ;;  %v3720_v21 = vld [vmem:[%s4407_s1 + $0x2d8] sm:$0xff]  }
  0xbd   : > { %3438 = vmatpush3.bf16.msra.mxu1 %v3684_v11  ;;  %3359 = vmatprep.subr.bf16.mxu0 %v3685_v12  ;;  %v3716_v11 = vld [vmem:[%s4407_s1 + $0x2c8] sm:$0xff]  }
  0xbe   : > { %3439 = vmatprep.subr.bf16.mxu1 %v3686_v17  ;;  %v2306_v16 = vsel %vm474_vm2, %v2304_v7, %v2305_v10 }
  0xc0   : > { %3360 = vmatpush3.bf16.msra.mxu0 %v3685_v12  ;;  %v3717_v12 = vld [vmem:[%s4407_s1 + $0x3c8] sm:$0xff]  }
  0xc1   : > { %3440 = vmatpush3.bf16.msra.mxu1 %v3686_v17  ;;  %3361 = vmatprep.subr.bf16.mxu0 %v3687_v22  ;;  %v3718_v17 = vld [vmem:[%s4407_s1 + $0x2d0] sm:$0xff]  }
  0xc2   : > { %3441 = vmatprep.subr.bf16.mxu1 %v3688_v23 }
  0xc4   : > { %3362 = vmatpush3.bf16.msra.mxu0 %v3687_v22  ;;  %v3721_v22 = vld [vmem:[%s4407_s1 + $0x3d8] sm:$0xff]  }
  0xc5   : > { %3442 = vmatpush3.bf16.msra.mxu1 %v3688_v23  ;;  %3363 = vmatprep.subr.bf16.mxu0 %v3689_v30  ;;  %v3722_v23 = vld [vmem:[%s4407_s1 + $0x2e0] sm:$0xff]  }
  0xc6   : > { %3443 = vmatprep.subr.bf16.mxu1 %v3690_v31 }
  0xc8   : > { %3364 = vmatpush3.bf16.msra.mxu0 %v3689_v30  ;;  %v3729_v30 = vld [vmem:[%s4407_s1 + $0x3f8] sm:$0xff]  }
  0xc9   : > { %3444 = vmatpush3.bf16.msra.mxu1 %v3690_v31  ;;  %3369 = vmatprep.subr.bf16.mxu0 %v3691_v19  ;;  %v2577_v31 = vld [vmem:[%s4408_s2] ss:$0 sm:$0xff] }
  0xca   : > { %3449 = vmatprep.subr.bf16.mxu1 %v3693_v38 }
  0xcb   : > { %3366 = vmatmul.mubr.bf16.vlgmr.msra.gmra.mrb[4].mxu0 %v4166_v2  ;;  %v1733_v2 = vrot.slane %v1731_v59, 3 }
  0xcc   : > { %3370 = vmatpush3.bf16.msra.mxu0 %v3691_v19  ;;  %3446 = vmatmul.mubr.bf16.vlgmr.msra.gmra.mrb[4].mxu1 %v2928_v6 }
  0xcd   : > { %3450 = vmatpush3.bf16.msra.mxu1 %v3693_v38  ;;  %3371 = vmatprep.subr.bf16.mxu0 %v3695_v44  ;;  %v1734_v9 = vor.u32 %v1733_v2, %v1730_v1 }
  0xce   : > { %3451 = vmatprep.subr.bf16.mxu1 %v3696_v45  ;;  %3385 = vmatprep.mubr.bf16.mxu0 %v1603_v8 }
  0xcf   : > { %3465 = vmatprep.mubr.bf16.mxu1 %v2181_v46  ;;  %v1743_v13 = vsel %vm1726_vm5, %v1734_v9, %v1742_v5 }
  0xd0   : > { %3372 = vmatpush3.bf16.msra.mxu0 %v3695_v44 }
  0xd1   : > { %3452 = vmatpush3.bf16.msra.mxu1 %v3696_v45  ;;  %3373 = vmatprep.subr.bf16.mxu0 %v3697_v47 }
  0xd2   : > { %3453 = vmatprep.subr.bf16.mxu1 %v3698_v48 }
  0xd4   : > { %3374 = vmatpush3.bf16.msra.mxu0 %v3697_v47 }
  0xd5   : > { %3454 = vmatpush3.bf16.msra.mxu1 %v3698_v48  ;;  %3375 = vmatprep.subr.bf16.mxu0 %v3699_v49 }
  0xd6   : > { %3455 = vmatprep.subr.bf16.mxu1 %v3700_v50 }
  0xd8   : > { %3376 = vmatpush3.bf16.msra.mxu0 %v3699_v49 }
  0xd9   : > { %3456 = vmatpush3.bf16.msra.mxu1 %v3700_v50  ;;  %3377 = vmatprep.subr.bf16.mxu0 %v3701_v51 }
  0xda   : > { %3457 = vmatprep.subr.bf16.mxu1 %v3702_v41 }
  0xdc   : > { %3378 = vmatpush3.bf16.msra.mxu0 %v3701_v51 }
  0xdd   : > { %3458 = vmatpush3.bf16.msra.mxu1 %v3702_v41  ;;  %3379 = vmatprep.subr.bf16.mxu0 %v3703_v53 }
  0xde   : > { %3459 = vmatprep.subr.bf16.mxu1 %v3704_v54 }
  0xe0   : > { %3380 = vmatpush3.bf16.msra.mxu0 %v3703_v53 }
  0xe1   : > { %3460 = vmatpush3.bf16.msra.mxu1 %v3704_v54  ;;  %3381 = vmatprep.subr.bf16.mxu0 %v3705_v56 }
  0xe2   : > { %3461 = vmatprep.subr.bf16.mxu1 %v3706_v57 }
  0xe4   : > { %3382 = vmatpush3.bf16.msra.mxu0 %v3705_v56 }
  0xe5   : > { %3462 = vmatpush3.bf16.msra.mxu1 %v3706_v57  ;;  %3383 = vmatprep.subr.bf16.mxu0 %v3707_v62 }
  0xe6   : > { %3463 = vmatprep.subr.bf16.mxu1 %v3708_v0 }
  0xe8   : > { %3384 = vmatpush3.bf16.msra.mxu0 %v3707_v62 }
  0xe9   : > { %3464 = vmatpush3.bf16.msra.mxu1 %v3708_v0  ;;  %3389 = vmatprep.subr.bf16.mxu0 %v3712_v20 }
  0xea   : > { %3469 = vmatprep.subr.bf16.mxu1 %v3715_v4 }
  0xeb   : > { %3386 = vmatmul.mubr.bf16.vlgmr.msra.gmra.mrb[4].mxu0 %v4241_v40 }
  0xec   : > { %3390 = vmatpush3.bf16.msra.mxu0 %v3712_v20  ;;  %3466 = vmatmul.mubr.bf16.vlgmr.msra.gmra.mrb[4].mxu1 %v4245_v43 }
  0xed   : > { %3470 = vmatpush3.bf16.msra.mxu1 %v3715_v4  ;;  %3391 = vmatprep.subr.bf16.mxu0 %v3716_v11 }
  0xee   : > { %3471 = vmatprep.subr.bf16.mxu1 %v3717_v12  ;;  %3405 = vmatprep.mubr.bf16.mxu0 %v1743_v13 }
  0xef   : > { %3485 = vmatprep.mubr.bf16.mxu1 %v2306_v16 }
  0xf0   : > { %3392 = vmatpush3.bf16.msra.mxu0 %v3716_v11 }
  0xf1   : > { %3472 = vmatpush3.bf16.msra.mxu1 %v3717_v12  ;;  %3393 = vmatprep.subr.bf16.mxu0 %v3718_v17 }
  0xf2   : > { %3473 = vmatprep.subr.bf16.mxu1 %v3719_v18 }
  0xf4   : > { %3394 = vmatpush3.bf16.msra.mxu0 %v3718_v17 }
  0xf5   : > { %3474 = vmatpush3.bf16.msra.mxu1 %v3719_v18  ;;  %3395 = vmatprep.subr.bf16.mxu0 %v3720_v21 }
  0xf6   : > { %3475 = vmatprep.subr.bf16.mxu1 %v3721_v22 }
  0xf8   : > { %3396 = vmatpush3.bf16.msra.mxu0 %v3720_v21 }
  0xf9   : > { %3476 = vmatpush3.bf16.msra.mxu1 %v3721_v22  ;;  %3397 = vmatprep.subr.bf16.mxu0 %v3722_v23 }
  0xfa   : > { %3477 = vmatprep.subr.bf16.mxu1 %v3723_v24 }
  0xfc   : > { %3398 = vmatpush3.bf16.msra.mxu0 %v3722_v23 }
  0xfd   : > { %3478 = vmatpush3.bf16.msra.mxu1 %v3723_v24  ;;  %3399 = vmatprep.subr.bf16.mxu0 %v3724_v25 }
  0xfe   : > { %3479 = vmatprep.subr.bf16.mxu1 %v3725_v26 }
 0x100   : > { %3400 = vmatpush3.bf16.msra.mxu0 %v3724_v25 }
 0x101   : > { %3480 = vmatpush3.bf16.msra.mxu1 %v3725_v26  ;;  %3401 = vmatprep.subr.bf16.mxu0 %v3726_v27 }
 0x102   : > { %3481 = vmatprep.subr.bf16.mxu1 %v3727_v28 }
 0x104   : > { %3402 = vmatpush3.bf16.msra.mxu0 %v3726_v27 }
 0x105   : > { %3482 = vmatpush3.bf16.msra.mxu1 %v3727_v28  ;;  %3403 = vmatprep.subr.bf16.mxu0 %v3728_v29 }
 0x106   : > { %3483 = vmatprep.subr.bf16.mxu1 %v3729_v30 }
 0x108   : > { %3404 = vmatpush3.bf16.msra.mxu0 %v3728_v29 }
 0x109   : > { %3484 = vmatpush3.bf16.msra.mxu1 %v3729_v30 }
 0x10b   : > { %3406 = vmatmul.mubr.bf16.vlgmr.msra.gmra.mrb[4].mxu0 %v1742_v5 }
 0x10c   : > { %3486 = vmatmul.mubr.bf16.vlgmr.msra.gmra.mrb[4].mxu1 %v2305_v10 }
 0x15e   : > { %v3247_v32 = vpop.f32.mrb[0].mxu0 }
 0x15f   : > { %v3489_v33 = vadd.f32 %v3247_v32, %v2577_v31  ;;  %v3327_v34 = vpop.f32.mrb[0].mxu1  ;;  %v702_v35 = vpop.f32.mrb[1].mxu0 }
 0x160   : > { %v3492_v36 = vadd.f32 %v3327_v34, %v2577_v31  ;;  %v3490_v37 = vadd.f32 %v2577_v31, %v702_v35  ;;  %v1258_v19 = vpop.f32.mrb[1].mxu1  ;;  %v3248_v38 = vpop.f32.mrb[2].mxu0 }
 0x161   : > { %v721_v39 = vmax.f32 %v3489_v33, 0.0  ;;  %v3493_v40 = vadd.f32 %v2577_v31, %v1258_v19  ;;  %v3328_v6 = vpop.f32.mrb[2].mxu1  ;;  %v705_v42 = vpop.f32.mrb[3].mxu0 }
 0x162   : > { %v1277_v43 = vmax.f32 %v3492_v36, 0.0  ;;  %v719_v44 = vmax.f32 %v3490_v37, 0.0  ;;  %v3491_v45 = vadd.f32 %v2577_v31, %v705_v42  ;;  %v1261_v8 = vpop.f32.mrb[3].mxu1 }
 0x163   : > { %v2999_v46 = vpack.c.bf16 %v721_v39, %v721_v39  ;;  %v1275_v47 = vmax.f32 %v3493_v40, 0.0  ;;  %v3494_v48 = vadd.f32 %v2577_v31, %v1261_v8 }
 0x164   : > { %v3002_v49 = vpack.c.bf16 %v1277_v43, %v1277_v43  ;;  %v2997_v50 = vpack.c.bf16 %v719_v44, %v719_v44  ;;  %v720_v51 = vmax.f32 %v3491_v45, 0.0 }
 0x165   : > { %738 = vst.msk [vmem:[%s4356_s12 + $0x8] sm:$0xf] %vm735_vm6, %v2999_v46  ;;  %v3000_v41 = vpack.c.bf16 %v1275_v47, %v1275_v47  ;;  %v1276_v52 = vmax.f32 %v3494_v48, 0.0 }
 0x166   : > { %2776 = vst.msk [vmem:[%s4356_s12 + $0x14] sm:$0xf] %vm735_vm6, %v3002_v49  ;;  %736 = vst.msk [vmem:[%s4356_s12] sm:$0xf] %vm735_vm6, %v2997_v50  ;;  %v2998_v53 = vpack.c.bf16 %v720_v51, %v720_v51 }
 0x167   : > { %2774 = vst.msk [vmem:[%s4356_s12 + $0xc] sm:$0xf] %vm735_vm6, %v3000_v41  ;;  %v3001_v54 = vpack.c.bf16 %v1276_v52, %v1276_v52 }
 0x168   : > { %737 = vst.msk [vmem:[%s4356_s12 + $0x4] sm:$0xf] %vm735_vm6, %v2998_v53 }
 0x169   : > { %2775 = vst.msk [vmem:[%s4356_s12 + $0x10] sm:$0xf] %vm735_vm6, %v3001_v54 }
 0x16c   : > { %v2457_v21 = vld [vmem:[%s4356_s12 + $0x8] sm:$0xf] (%p3800_p4) }
 0x16d   : > { %v2463_v23 = vld [vmem:[%s4356_s12 + $0x14] sm:$0xf] (%p3800_p4)  ;;  %2458 = vst [vmem:[%s2437_s20 + $0x8] sm:$0xf] (%p3800_p4), %v2457_v21 }
 0x16e   : > { %2464 = vst [vmem:[%s2437_s20 + $0x20] sm:$0xf] (%p3800_p4), %v2463_v23 }
 0x16f   : > { %v2453_v18 = vld [vmem:[%s4356_s12] sm:$0xff] (%p3800_p4)  }
 0x170   : > { %v2459_v22 = vld [vmem:[%s4356_s12 + $0xc] sm:$0xff] (%p3800_p4)   ;;  %2454 = vst [vmem:[%s2437_s20] sm:$0xff] (%p3800_p4), %v2453_v18  }
 0x171   : > { %2460 = vst [vmem:[%s2437_s20 + $0x18] sm:$0xff] (%p3800_p4), %v2459_v22  }
 0x1de   : > { %v3407_v55 = vpop.f32.mrb[4].mxu0 }
 0x1df   : > { %v3495_v56 = vadd.f32 %v3407_v55, %v2577_v31  ;;  %v3487_v57 = vpop.f32.mrb[4].mxu1  ;;  %v1828_v58 = vpop.f32.mrb[5].mxu0 }
 0x1e0   : > { %v3498_v59 = vadd.f32 %v3487_v57, %v2577_v31  ;;  %v3496_v60 = vadd.f32 %v2577_v31, %v1828_v58  ;;  %v2391_v61 = vpop.f32.mrb[5].mxu1  ;;  %v3408_v62 = vpop.f32.mrb[6].mxu0 }
 0x1e1   : > { %v1847_v63 = vmax.f32 %v3495_v56, 0.0  ;;  %v3499_v0 = vadd.f32 %v2577_v31, %v2391_v61  ;;  %v3488_v1 = vpop.f32.mrb[6].mxu1  ;;  %v1831_v2 = vpop.f32.mrb[7].mxu0 }
 0x1e2   : > { %v2410_v3 = vmax.f32 %v3498_v59, 0.0  ;;  %v1845_v14 = vmax.f32 %v3496_v60, 0.0  ;;  %v3497_v15 = vadd.f32 %v2577_v31, %v1831_v2  ;;  %v2394_v20 = vpop.f32.mrb[7].mxu1 }
 0x1e3   : > { %v3005_v4 = vpack.c.bf16 %v1847_v63, %v1847_v63  ;;  %v2408_v9 = vmax.f32 %v3499_v0, 0.0  ;;  %v3500_v5 = vadd.f32 %v2577_v31, %v2394_v20  ;;  %2434 = sbr.rel (!%p3800_p4) target bundleno = 498 (0x1f2), region = 36 }
 0x1e4   : > { %v3008_v7 = vpack.c.bf16 %v2410_v3, %v2410_v3  ;;  %v3003_v10 = vpack.c.bf16 %v1845_v14, %v1845_v14  ;;  %v1846_v11 = vmax.f32 %v3497_v15, 0.0 }
 0x1e5   : > { %2884 = vst.msk [vmem:[%s4356_s12 + $0x20] sm:$0xf] %vm735_vm6, %v3005_v4  ;;  %v3006_v12 = vpack.c.bf16 %v2408_v9, %v2408_v9  ;;  %v2409_v13 = vmax.f32 %v3500_v5, 0.0 }
 0x1e6   : > { %2993 = vst.msk [vmem:[%s4356_s12 + $0x2c] sm:$0xf] %vm735_vm6, %v3008_v7  ;;  %2882 = vst.msk [vmem:[%s4356_s12 + $0x18] sm:$0xf] %vm735_vm6, %v3003_v10  ;;  %v3004_v16 = vpack.c.bf16 %v1846_v11, %v1846_v11 }
 0x1e7   : > { %2991 = vst.msk [vmem:[%s4356_s12 + $0x24] sm:$0xf] %vm735_vm6, %v3006_v12  ;;  %v3007_v17 = vpack.c.bf16 %v2409_v13, %v2409_v13 }
 0x1e8   : > { %2883 = vst.msk [vmem:[%s4356_s12 + $0x1c] sm:$0xf] %vm735_vm6, %v3004_v16 }
 0x1e9   : > { %2992 = vst.msk [vmem:[%s4356_s12 + $0x28] sm:$0xf] %vm735_vm6, %v3007_v17 }
 0x1ec   : > { %v2469_v25 = vld [vmem:[%s4356_s12 + $0x20] sm:$0xf] }
 0x1ed   : > { %v2475_v27 = vld [vmem:[%s4356_s12 + $0x2c] sm:$0xf]  ;;  %2470 = vst [vmem:[%s2437_s20 + $0x38] sm:$0xf] %v2469_v25 }
 0x1ee   : > { %2476 = vst [vmem:[%s2437_s20 + $0x50] sm:$0xf] %v2475_v27 }
 0x1ef   : > { %v2465_v24 = vld [vmem:[%s4356_s12 + $0x18] sm:$0xff]  }
 0x1f0   : > { %v2471_v26 = vld [vmem:[%s4356_s12 + $0x24] sm:$0xff]   ;;  %2466 = vst [vmem:[%s2437_s20 + $0x30] sm:$0xff] %v2465_v24  }
 0x1f1   : > { %2472 = vst [vmem:[%s2437_s20 + $0x48] sm:$0xff] %v2471_v26  }
 0x1f2 PF: > { %p10_p8 = scmp.ge.s32.totalorder %s3790_s16, 4   ;;  %s4411_s12 = smov %s3749_s13 }
 0x1f3   : > { %s4412_s13 = smov %s3798_s19  ;;  %s4413_s14 = smov %s3790_s16 }
 0x1f4   :  { %12 = sbr.rel (!%p10_p8) target bundleno = 2 (0x2), region = 121 }

// kernel: vae_forward.14
= control target key start
LH: loop header
LB: loop body
LE: loop exit
PB: predicated region body
PF: predicated region fallthrough
CT: control target
= control target key end

     0   :  { %s5147_s12 = smov 0   ;;  %s5149_s13 = smov 0   ;;  %s6194_s0 = inlined_call_operand.vmem [shape: bf16[1,2,102,64], index: 0, kind: input, shape index: {}]   ;;  %s6195_s1 = inlined_call_operand.vmem [shape: bf16[16,64,32], index: 1, kind: input, shape index: {}]   ;;  %s6196_s2 = inlined_call_operand.vmem [shape: f32[1,32], index: 2, kind: input, shape index: {}]   ;;  %s6197_s3 = inlined_call_operand.vmem [shape: bf16[4,2,80,32], index: 3, kind: output, shape index: {}]  }
   0x1   :  { %s5151_s14 = smov 0  }
   0x2 LB: > { %s5160_s15 = sadd.s32 4294967295, %s5123_s14   ;;  %s5162_s16 = sadd.s32 1, %s5123_s14   ;;  %s5123_s14 = sphi %s5151_s14, %s6201_s14   ;;  %s5119_s13 = sphi %s5149_s13, %s6200_s13   ;;  %s5115_s12 = sphi %s5147_s12, %s6199_s12  }
   0x3   : > { %s85_s17 = ssub.s32 %s5123_s14, %s5162_s16  ;;  %s88_s18 = sadd.s32 1, %s5119_s13 }
   0x4   : > { %p86_p0 = scmp.eq.s32.totalorder %s85_s17, 0  ;;  %p98_p1 = scmp.ne.s32.totalorder %s5119_s13, %s5115_s12 }
   0x5   : > { %p99_p2 = scmp.eq.s32.totalorder %s5160_s15, 1  ;;  %p3636_p3 = scmp.ge.s32.totalorder %s5123_s14, 1 }
   0x6   : > { %s5170_s19 = scalar_select %p86_p0, %s5119_s13, %s88_s18  }
   0x7   : > { %p5172_p4 = por %p99_p2, %p98_p1  ;;  %p137_p5 = scmp.lt.s32.totalorder %s5123_s14, 3 }
   0x9   : > { %p138_p6 = pnand %p3636_p3, %p137_p5 }
   0xa   : > { %v4977_v0 = vld [vmem:[%s6195_s1] sm:$0xff] (!%p138_p6)   ;;  %v5125_v1 = vmov (!%p138_p6), 0.0   ;;  %v4979_v3 = vld [vmem:[%s6195_s1 + $0x8] sm:$0xff] (!%p138_p6)   ;;  %vm5126_vm0 = vmmov (!%p138_p6), 0   ;;  %p160_p7 = scmp.lt.s32.totalorder (!%p138_p6), %s5160_s15, 1  ;;  %v4981_v5 = vld [vmem:[%s6195_s1 + $0x10] sm:$0xff] (!%p138_p6)  }
   0xb   : > { %141 = sbr.rel (%p138_p6) target bundleno = 574 (0x23e), region = 32  ;;  %4220 = vmatprep.subr.bf16.mxu0 (!%p138_p6), %v5125_v1  ;;  %4332 = vmatprep.subr.bf16.mxu1 (!%p138_p6), %v5125_v1  ;;  %v4978_v2 = vld [vmem:[%s6195_s1 + $0x80] sm:$0xff] (!%p138_p6)   ;;  %v4980_v4 = vld [vmem:[%s6195_s1 + $0x88] sm:$0xff] (!%p138_p6)   ;;  %v4982_v6 = vld [vmem:[%s6195_s1 + $0x90] sm:$0xff] (!%p138_p6)   ;;  %vm387_vm1 = vsmask.f32 (!%p138_p6), 7424 }
   0xc   : > { %4221 = vmatpush3.bf16.msra.mxu0 (!%p138_p6), %v4977_v0  ;;  %4228 = vmatprep.mubr.msk.bf16.mxu0 (!%p138_p6), %vm5126_vm0, %v5125_v1  ;;  %v4983_v7 = vld [vmem:[%s6195_s1 + $0x18] sm:$0xff] (!%p138_p6)   ;;  %vm240_vm2 = vcmask (!%p138_p6), 523264   ;;  %v4988_v17 = vld [vmem:[%s6195_s1 + $0x20] sm:$0xff] (!%p138_p6)   ;;  %v4992_v25 = vld [vmem:[%s6195_s1 + $0x28] sm:$0xff] (!%p138_p6)   ;;  %vm602_vm3 = vcmask (!%p138_p6), 1046528   ;;  %vm1582_vm5 = vcmask (!%p138_p6), 1045504  }
   0xd   : > { %4333 = vmatpush3.bf16.msra.mxu1 (!%p138_p6), %v4978_v2  ;;  %4222 = vmatprep.subr.bf16.mxu0 (!%p138_p6), %v5125_v1  ;;  %v4984_v10 = vld [vmem:[%s6195_s1 + $0x98] sm:$0xff] (!%p138_p6)   ;;  %v4989_v21 = vld [vmem:[%s6195_s1 + $0xa0] sm:$0xff] (!%p138_p6)   ;;  %v4993_v28 = vld [vmem:[%s6195_s1 + $0xa8] sm:$0xff] (!%p138_p6)   ;;  %vm749_vm4 = vsmask.f32 (!%p138_p6), 6400  ;;  %vm3182_vm7 = vcmask (!%p138_p6), 1044480  }
   0xe   : > { %4334 = vmatprep.subr.bf16.mxu1 (!%p138_p6), %v5125_v1  ;;  %4340 = vmatprep.mubr.msk.bf16.mxu1 (!%p138_p6), %vm5126_vm0, %v5125_v1  ;;  %v4996_v32 = vld [vmem:[%s6195_s1 + $0x30] sm:$0xff] (!%p138_p6)   ;;  %v5000_v37 = vld [vmem:[%s6195_s1 + $0x38] sm:$0xff] (!%p138_p6)   ;;  %vm2340_vm6 = vsmask.f32 (!%p138_p6), 5376  ;;  %vm975_vm8 = vcmask (!%p138_p6), 257024  }
   0xf   : > { %v4997_v36 = vld [vmem:[%s6195_s1 + $0xb0] sm:$0xff] (!%p138_p6)   ;;  %v5001_v42 = vld [vmem:[%s6195_s1 + $0xb8] sm:$0xff] (!%p138_p6)  }
  0x10   : > { %4223 = vmatpush3.bf16.msra.mxu0 (!%p138_p6), %v4979_v3 }
  0x11   : > { %4335 = vmatpush3.bf16.msra.mxu1 (!%p138_p6), %v4980_v4  ;;  %4224 = vmatprep.subr.bf16.mxu0 (!%p138_p6), %v5125_v1 }
  0x12   : > { %s161_s29 = scalar_select %p160_p7, %s5160_s15, 1  ;;  %4336 = vmatprep.subr.bf16.mxu1 %v5125_v1 }
  0x13   : > { %s4950_s9 = smul.u32 (%p5172_p4), 40, %s5160_s15 }
  0x14   : > { %s4949_s5 = smul.u32 52, %s161_s29  ;;  %4225 = vmatpush3.bf16.msra.mxu0 %v4981_v5 }
  0x15   : > { %4337 = vmatpush3.bf16.msra.mxu1 %v4982_v6  ;;  %4226 = vmatprep.subr.bf16.mxu0 %v5125_v1  ;;  %s6148_s14 = scalar_lea.vmem (%p5172_p4), %s6197_s3, %s4950_s9 }
  0x16   : > { %s5209_s10 = scalar_lea.vmem %s6194_s0, %s4949_s5  ;;  %4338 = vmatprep.subr.bf16.mxu1 %v5125_v1 }
  0x17   : > { %v986_v8 = vld [vmem:[%s5209_s10] sm:$0xf]  ;;  %v5216_v9 = vld [vmem:[%s5209_s10 + $0x4] sm:$0xf]  ;;  %v5224_v12 = vld [vmem:[%s5209_s10 + $0x8] sm:$0xff]  }
  0x18   : > { %v3735_v11 = vcombine.low %v986_v8, %v5216_v9  ;;  %v4985_v13 = vld [vmem:[%s5209_s10] sm:$0xff]   ;;  %v1042_v16 = vshll.u32 %v5224_v12, 16  ;;  %4227 = vmatpush3.bf16.msra.mxu0 %v4983_v7  ;;  %v5234_v20 = vld [vmem:[%s5209_s10 + $0x10] sm:$0xff]   ;;  %v1046_v23 = vshrl.u32 %v5224_v12, 16  ;;  %v4990_v27 = vld [vmem:[%s5209_s10 + $0x8] sm:$0xff]   ;;  %v1214_v5 = vrot.slane %v5224_v12, 1 }
  0x19   : > { %4339 = vmatpush3.bf16.msra.mxu1 %v4984_v10  ;;  %4248 = vmatprep.subr.bf16.mxu0 %v5125_v1  ;;  %v1050_v24 = vshll.u32 %v5234_v20, 16  ;;  %v5258_v31 = vld [vmem:[%s5209_s10 + $0x18] sm:$0xff]   ;;  %v1054_v33 = vshrl.u32 %v5234_v20, 16  ;;  %v4994_v38 = vld [vmem:[%s5209_s10 + $0x10] sm:$0xff]   ;;  %v5284_v41 = vld [vmem:[%s5209_s10 + $0x20] sm:$0xff]  }
  0x1a   : > { %v1035_v14 = vshrl.u32 %v3735_v11, 16  ;;  %v1037_v15 = vshll.u32 %v3735_v11, 16  ;;  %v1044_v19 = vrot.slane %v1042_v16, 1  ;;  %4360 = vmatprep.subr.bf16.mxu1 %v5125_v1  ;;  %v1058_v35 = vshll.u32 %v5258_v31, 16  ;;  %v4998_v47 = vld [vmem:[%s5209_s10 + $0x18] sm:$0xff]   ;;  %v5004_v50 = vld [vmem:[%s5209_s10] sm:$0xff]  }
  0x1b   : > { %4229 = vmatmul.mubr.msk.bf16.vlgmr.msra.gmra.mrb[0].mxu0 %vm240_vm2, %v4985_v13  ;;  %v1052_v30 = vrot.slane %v1050_v24, 1  ;;  %v1062_v44 = vshrl.u32 %v5258_v31, 16  ;;  %v1066_v45 = vshll.u32 %v5284_v41, 16  ;;  %v5299_v46 = vld [vmem:[%s5209_s10 + $0x28] ss:$0 sps:$4 sm:$0x11]  }
  0x1c   : > { %v1039_v18 = vrot.slane %v1037_v15, 1  ;;  %4249 = vmatpush3.bf16.msra.mxu0 %v4988_v17  ;;  %4232 = vmatprep.mubr.msk.bf16.mxu0 %vm5126_vm0, %v5125_v1  ;;  %v1048_v29 = vor.u32 %v1046_v23, %v1044_v19  ;;  %v1060_v40 = vrot.slane %v1058_v35, 1  ;;  %v1070_v51 = vshrl.u32 %v5284_v41, 16  ;;  %v5005_v54 = vld [vmem:[%s5209_s10 + $0x8] sm:$0xff]   ;;  %v5002_v56 = vld [vmem:[%s5209_s10 + $0x20] sm:$0xff]   ;;  %v5009_v3 = vld [vmem:[%s5209_s10 + $0x10] sm:$0xff]  }
  0x1d   : > { %4250 = vmatprep.subr.bf16.mxu0 %v5125_v1  ;;  %v1056_v39 = vor.u32 %v1054_v33, %v1052_v30  ;;  %v1068_v49 = vrot.slane %v1066_v45, 1  ;;  %v1074_v53 = vshll.u32 %v5299_v46, 16  ;;  %v391_v55 = vshll.u32 %v5004_v50, 16  ;;  %v1200_v62 = vld [vmem:[%s5209_s10] sm:$0xe]  ;;  %v5010_v13 = vld [vmem:[%s6195_s1 + $0x48] sm:$0xff]  }
  0x1e   : > { %v1040_v22 = vor.u32 %v1039_v18, %v1035_v14  ;;  %v1053_v34 = vsel %vm387_vm1, %v1048_v29, %v1052_v30  ;;  %v1064_v48 = vor.u32 %v1062_v44, %v1060_v40  ;;  %v396_v59 = vshll.u32 %v5005_v54, 16  ;;  %v5007_v7 = vld [vmem:[%s6195_s1 + $0x40] sm:$0xff]   ;;  %v5012_v16 = vld [vmem:[%s5209_s10 + $0x18] sm:$0xff]   ;;  %v5011_v18 = vld [vmem:[%s6195_s1 + $0xc8] sm:$0xff]  }
  0x1f   : > { %v1061_v43 = vsel %vm387_vm1, %v1056_v39, %v1060_v40  ;;  %v1072_v57 = vor.u32 %v1070_v51, %v1068_v49  ;;  %v1076_v58 = vrot.slane %v1074_v53, 1  ;;  %v389_v60 = vshrl.u32 %v5004_v50, 16  ;;  %v5008_v12 = vld [vmem:[%s6195_s1 + $0xc0] sm:$0xff]   ;;  %v5013_v23 = vld [vmem:[%s6195_s1 + $0x50] sm:$0xff]   ;;  %v5017_v33 = vld [vmem:[%s6195_s1 + $0xd8] sm:$0xff]  }
  0x20   : > { %v1045_v26 = vsel %vm387_vm1, %v1040_v22, %v1044_v19  ;;  %4251 = vmatpush3.bf16.msra.mxu0 %v4992_v25  ;;  %v1069_v52 = vsel %vm387_vm1, %v1064_v48, %v1068_v49  ;;  %v393_v61 = vrot.slane %v391_v55, 1  ;;  %v398_v0 = vrot.slane %v396_v59, 1  ;;  %v5014_v24 = vld [vmem:[%s6195_s1 + $0xd0] sm:$0xff]   ;;  %v5015_v25 = vld [vmem:[%s5209_s10 + $0x20] sm:$0xff]  }
  0x21   : > { %4341 = vmatmul.mubr.msk.bf16.vlgmr.msra.gmra.mrb[0].mxu1 %vm240_vm2, %v1045_v26  ;;  %4252 = vmatprep.subr.bf16.mxu0 %v5125_v1  ;;  %v1077_v63 = vsel %vm387_vm1, %v1072_v57, %v1076_v58  ;;  %v3758_v2 = vcombine.low %v1200_v62, %v5216_v9  ;;  %v400_v9 = vshrl.u32 %v5005_v54, 16  ;;  %v404_v10 = vshll.u32 %v5009_v3, 16  ;;  %v5018_v35 = vld [vmem:[%s5209_s10 + $0x28] ss:$0 sps:$4 sm:$0x11]   ;;  %v5396_v45 = vld [vmem:[%s5209_s10 + $0xc] sm:$0xff]  }
  0x22   : > { %4361 = vmatpush3.bf16.msra.mxu1 %v4989_v21  ;;  %4344 = vmatprep.mubr.msk.bf16.mxu1 %vm5126_vm0, %v5125_v1  ;;  %v394_v4 = vor.u32 %v393_v61, %v389_v60  ;;  %v1216_v17 = vrot.slane %v5234_v20, 1  ;;  %v408_v21 = vshrl.u32 %v5009_v3, 16  ;;  %v412_v22 = vshll.u32 %v5012_v16, 16  ;;  %v5404_v50 = vld [vmem:[%s5209_s10 + $0xc] sm:$0xff]   ;;  %v5407_v51 = vld [vmem:[%s5209_s10 + $0x4] sm:$0xfe]  }
  0x23   : > { %4362 = vmatprep.subr.bf16.mxu1 %v5125_v1  ;;  %4233 = vmatmul.mubr.msk.bf16.gmra.mrb[4].mxu0 %vm240_vm2, %v4990_v27  ;;  %v1213_v6 = vrot.slane %v3758_v2, 1  ;;  %v402_v14 = vor.u32 %v400_v9, %v398_v0  ;;  %v406_v15 = vrot.slane %v404_v10, 1  ;;  %v1218_v29 = vrot.slane %v5258_v31, 1  ;;  %v5023_v2 = vld [vmem:[%s6195_s1 + $0x60] sm:$0xff]  }
  0x24   : > { %4236 = vmatprep.mubr.msk.bf16.mxu0 %vm5126_vm0, %v5125_v1  ;;  %4253 = vmatpush3.bf16.msra.mxu0 %v4996_v32  ;;  %v399_v8 = vsel %vm387_vm1, %v394_v4, %v398_v0  ;;  %v1217_v20 = vsel %vm602_vm3, %v1214_v5, %v1216_v17  ;;  %v414_v27 = vrot.slane %v412_v22, 1  ;;  %v416_v30 = vshrl.u32 %v5012_v16, 16  ;;  %v5024_v10 = vld [vmem:[%s6195_s1 + $0xe0] sm:$0xff]  }
  0x25   : > { %4254 = vmatprep.subr.bf16.mxu0 %v5125_v1  ;;  %v1215_v11 = vsel %vm602_vm3, %v1213_v6, %v1214_v5  ;;  %v407_v19 = vsel %vm387_vm1, %v402_v14, %v406_v15  ;;  %v410_v26 = vor.u32 %v408_v21, %v406_v15  ;;  %v420_v32 = vshll.u32 %v5015_v25, 16  ;;  %v5027_v15 = vld [vmem:[%s6195_s1 + $0x68] sm:$0xff]   ;;  %v5463_v22 = vld [vmem:[%s5209_s10 + $0x1c] sm:$0xff]  }
  0x26   : > { %4363 = vmatpush3.bf16.msra.mxu1 %v4993_v28  ;;  %v5016_v28 = vld [vmem:[%s6195_s1 + $0x58] sm:$0xff]   ;;  %v1219_v31 = vsel %vm602_vm3, %v1216_v17, %v1218_v29  ;;  %v424_v39 = vshrl.u32 %v5015_v25, 16  ;;  %v428_v40 = vshll.u32 %v5018_v35, 16  ;;  %v1222_v53 = vrot.slane %v5299_v46, 1  ;;  %v5028_v17 = vld [vmem:[%s6195_s1 + $0xe8] sm:$0xff]  }
  0x27   : > { %4364 = vmatprep.subr.bf16.mxu1 %v5125_v1  ;;  %v604_v58 = vrot.slane %v5404_v50, 1  ;;  %v603_v59 = vrot.slane %v5407_v51, 1  ;;  %v5421_v46 = vld [vmem:[%s5209_s10 + $0x14] sm:$0xff]  }
  0x28   : > { %4255 = vmatpush3.bf16.msra.mxu0 %v5000_v37  ;;  %v422_v37 = vrot.slane %v420_v32, 1  ;;  %v430_v49 = vrot.slane %v428_v40, 1  ;;  %v1412_v5 = vshrl.u32 %v5421_v46, 16  ;;  %v1415_v6 = vshll.u32 %v5421_v46, 16  ;;  %v5036_v35 = vld [vmem:[%s6195_s1 + $0xf8] sm:$0xff]  }
  0x29   : > { %4345 = vmatmul.mubr.msk.bf16.gmra.mrb[4].mxu1 %vm240_vm2, %v1053_v34  ;;  %4276 = vmatprep.subr.bf16.mxu0 %v5125_v1  ;;  %v415_v34 = vsel %vm387_vm1, %v410_v26, %v414_v27 }
  0x2a   : > { %4348 = vmatprep.mubr.msk.bf16.mxu1 %vm5126_vm0, %v5125_v1  ;;  %4365 = vmatpush3.bf16.msra.mxu1 %v4997_v36  ;;  %v418_v36 = vor.u32 %v416_v30, %v414_v27  ;;  %v426_v48 = vor.u32 %v424_v39, %v422_v37  ;;  %v5035_v30 = vld [vmem:[%s6195_s1 + $0x78] sm:$0xff]  }
  0x2b   : > { %4366 = vmatprep.subr.bf16.mxu1 %v5125_v1  ;;  %4237 = vmatmul.mubr.msk.bf16.gmra.mrb[8].mxu0 %vm240_vm2, %v4994_v38  ;;  %v1220_v38 = vrot.slane %v5284_v41, 1 }
  0x2c   : > { %4240 = vmatprep.mubr.msk.bf16.mxu0 %vm5126_vm0, %v5125_v1  ;;  %v423_v44 = vsel %vm387_vm1, %v418_v36, %v422_v37  ;;  %v431_v57 = vsel %vm387_vm1, %v426_v48, %v430_v49  ;;  %v5500_v37 = vld [vmem:[%s5209_s10 + $0x2c] ss:$0 sps:$4 sm:$0x33]   ;;  %v751_v49 = vshrl.u32 %v5407_v51, 16 }
  0x2d   : > { %v1223_v61 = vsel %vm602_vm3, %v1220_v38, %v1222_v53 }
  0x2e   : > { %4367 = vmatpush3.bf16.msra.mxu1 %v5001_v42  ;;  %v1346_v42 = vld [vmem:[%s5209_s10 + $0x4] sm:$0xe] }
  0x2f   : > { %4388 = vmatprep.subr.bf16.mxu1 %v5125_v1 }
  0x31   : > { %4349 = vmatmul.mubr.msk.bf16.gmra.mrb[8].mxu1 %vm240_vm2, %v1061_v43  ;;  %v5392_v43 = vld [vmem:[%s5209_s10 + $0x8] sm:$0xf] }
  0x32   : > { %4352 = vmatprep.mubr.msk.bf16.mxu1 %vm5126_vm0, %v5125_v1  ;;  %v3776_v41 = vcombine.low %v1346_v42, %v5392_v43  ;;  %v5037_v42 = vld [vmem:[%s5209_s10 + $0x2c] ss:$0 sps:$4 sm:$0x11]  }
  0x33   : > { %4241 = vmatmul.mubr.msk.bf16.gmra.mrb[12].mxu0 %vm240_vm2, %v4998_v47  ;;  %v1221_v47 = vsel %vm602_vm3, %v1218_v29, %v1220_v38  ;;  %v5482_v29 = vld [vmem:[%s5209_s10 + $0x24] sm:$0xff]  }
  0x34   : > { %4244 = vmatprep.mubr.msk.bf16.mxu0 %vm5126_vm0, %v5125_v1  ;;  %v1395_v54 = vshrl.u32 %v3776_v41, 16  ;;  %v1398_v55 = vshll.u32 %v3776_v41, 16  ;;  %v610_v36 = vrot.slane %v5482_v29, 1  ;;  %v1442_v41 = vshll.u32 %v5500_v37, 16 }
  0x36   : > { %v1397_v62 = vrot.slane %v1395_v54, 1 }
  0x39   : > { %4353 = vmatmul.mubr.msk.bf16.gmra.mrb[12].mxu1 %vm240_vm2, %v1069_v52  ;;  %v1403_v52 = vshrl.u32 %v5396_v45, 16 }
  0x3a   : > { %4356 = vmatprep.mubr.msk.bf16.mxu1 %vm5126_vm0, %v5125_v1 }
  0x3b   : > { %4245 = vmatmul.mubr.msk.bf16.gmra.mrb[16].mxu0 %vm240_vm2, %v5002_v56  ;;  %v1406_v56 = vshll.u32 %v5396_v45, 16  ;;  %v1405_v60 = vrot.slane %v1403_v52, 1  ;;  %v754_v52 = vshll.u32 %v5407_v51, 16 }
  0x3c   : > { %4256 = vmatprep.mubr.msk.bf16.mxu0 %vm5126_vm0, %v5125_v1 }
  0x3d   : > { %v1408_v0 = vrot.slane %v1406_v56, 2  ;;  %v612_v56 = vrot.slane %v5037_v42, 1 }
  0x3f   : > { %v1409_v4 = vor.u32 %v1408_v0, %v1405_v60  ;;  %v756_v60 = vrot.slane %v754_v52, 2 }
  0x41   : > { %4357 = vmatmul.mubr.msk.bf16.gmra.mrb[16].mxu1 %vm240_vm2, %v1077_v63  ;;  %v1400_v63 = vrot.slane %v1398_v55, 2  ;;  %v1444_v55 = vrot.slane %v1442_v41, 2  ;;  %v2577_v41 = vld [vmem:[%s5209_s10 + $0x4] sm:$0xe] }
  0x42   : > { %4368 = vmatprep.mubr.msk.bf16.mxu1 %vm5126_vm0, %v5125_v1 }
  0x43   : > { %4257 = vmatmul.mubr.msk.bf16.vlgmr.msra.gmra.mrb[0].mxu0 %vm240_vm2, %v399_v8  ;;  %v1401_v3 = vor.u32 %v1400_v63, %v1397_v62  ;;  %v5435_v8 = vld [vmem:[%s5209_s10 + $0x14] sm:$0xff]   ;;  %v613_v62 = vsel %vm602_vm3, %v610_v36, %v612_v56 }
  0x44   : > { %4277 = vmatpush3.bf16.msra.mxu0 %v5007_v7  ;;  %4260 = vmatprep.mubr.msk.bf16.mxu0 %vm5126_vm0, %v5125_v1  ;;  %v605_v7 = vsel %vm602_vm3, %v603_v59, %v604_v58  ;;  %v606_v14 = vrot.slane %v5435_v8, 1  ;;  %v753_v59 = vrot.slane %v751_v49, 1 }
  0x45   : > { %4278 = vmatprep.subr.bf16.mxu0 %v5125_v1  ;;  %v1410_v9 = vsel %vm749_vm4, %v1401_v3, %v1409_v4 }
  0x46   : > { %v607_v21 = vsel %vm602_vm3, %v604_v58, %v606_v14  ;;  %v762_v58 = vshll.u32 %v5404_v50, 16 }
  0x48   : > { %4279 = vmatpush3.bf16.msra.mxu0 %v5010_v13  ;;  %v5443_v13 = vld [vmem:[%s5209_s10 + $0x1c] sm:$0xff]   ;;  %v764_v0 = vrot.slane %v762_v58, 2 }
  0x49   : > { %4369 = vmatmul.mubr.msk.bf16.vlgmr.msra.gmra.mrb[0].mxu1 %vm240_vm2, %v1215_v11  ;;  %4280 = vmatprep.subr.bf16.mxu0 %v5125_v1  ;;  %v1414_v11 = vrot.slane %v1412_v5, 1  ;;  %v768_v5 = vshrl.u32 %v5435_v8, 16 }
  0x4a   : > { %4389 = vmatpush3.bf16.msra.mxu1 %v5008_v12  ;;  %4372 = vmatprep.mubr.msk.bf16.mxu1 %vm5126_vm0, %v5125_v1  ;;  %v1417_v12 = vrot.slane %v1415_v6, 2  ;;  %v771_v6 = vshll.u32 %v5435_v8, 16 }
  0x4b   : > { %4390 = vmatprep.subr.bf16.mxu1 %v5125_v1  ;;  %4261 = vmatmul.mubr.msk.bf16.gmra.mrb[4].mxu0 %vm240_vm2, %v407_v19  ;;  %v1424_v19 = vshll.u32 %v5443_v13, 16 }
  0x4c   : > { %4264 = vmatprep.mubr.msk.bf16.mxu0 %vm5126_vm0, %v5125_v1  ;;  %4281 = vmatpush3.bf16.msra.mxu0 %v5013_v23  ;;  %v1418_v16 = vor.u32 %v1417_v12, %v1414_v11  ;;  %v5031_v23 = vld [vmem:[%s6195_s1 + $0x70] sm:$0xff]   ;;  %v770_v11 = vrot.slane %v768_v5, 1  ;;  %v773_v12 = vrot.slane %v771_v6, 2 }
  0x4d   : > { %4282 = vmatprep.subr.bf16.mxu0 %v5125_v1  ;;  %v1426_v27 = vrot.slane %v1424_v19, 2  ;;  %v5043_v19 = vld [vmem:[%s6195_s1 + $0x188] sm:$0xff]  }
  0x4e   : > { %4391 = vmatpush3.bf16.msra.mxu1 %v5011_v18  ;;  %v1421_v18 = vshrl.u32 %v5443_v13, 16  ;;  %v1419_v25 = vsel %vm749_vm4, %v1409_v4, %v1418_v16 }
  0x4f   : > { %4392 = vmatprep.subr.bf16.mxu1 %v5125_v1 }
  0x50   : > { %4283 = vmatpush3.bf16.msra.mxu0 %v5016_v28  ;;  %v1423_v26 = vrot.slane %v1421_v18, 1  ;;  %v608_v28 = vrot.slane %v5463_v22, 1  ;;  %v1586_v18 = vrot.slane %v5421_v46, 2 }
  0x51   : > { %4373 = vmatmul.mubr.msk.bf16.gmra.mrb[4].mxu1 %vm240_vm2, %v1217_v20  ;;  %4304 = vmatprep.subr.bf16.mxu0 %v5125_v1  ;;  %v5032_v20 = vld [vmem:[%s6195_s1 + $0xf0] sm:$0xff]  }
  0x52   : > { %4376 = vmatprep.mubr.msk.bf16.mxu1 %vm5126_vm0, %v5125_v1  ;;  %4393 = vmatpush3.bf16.msra.mxu1 %v5014_v24  ;;  %v5473_v24 = vld [vmem:[%s5209_s10 + $0x24] sm:$0xff]   ;;  %v611_v48 = vsel %vm602_vm3, %v608_v28, %v610_v36 }
  0x53   : > { %4394 = vmatprep.subr.bf16.mxu1 %v5125_v1  ;;  %4265 = vmatmul.mubr.msk.bf16.gmra.mrb[8].mxu0 %vm240_vm2, %v415_v34  ;;  %v1430_v32 = vshrl.u32 %v5473_v24, 16  ;;  %v1433_v34 = vshll.u32 %v5473_v24, 16 }
  0x54   : > { %4268 = vmatprep.mubr.msk.bf16.mxu0 %vm5126_vm0, %v5125_v1 }
  0x55   : > { %v1432_v39 = vrot.slane %v1430_v32, 1  ;;  %v1435_v40 = vrot.slane %v1433_v34, 2  ;;  %v1588_v32 = vrot.slane %v5443_v13, 2 }
  0x56   : > { %4395 = vmatpush3.bf16.msra.mxu1 %v5017_v33  ;;  %v1427_v33 = vor.u32 %v1426_v27, %v1423_v26  ;;  %v786_v27 = vshrl.u32 %v5482_v29, 16 }
  0x57   : > { %4416 = vmatprep.subr.bf16.mxu1 %v5125_v1  ;;  %v1589_v13 = vsel %vm1582_vm5, %v1586_v18, %v1588_v32 }
  0x58   : > { %v1428_v38 = vsel %vm749_vm4, %v1418_v16, %v1427_v33  ;;  %v777_v16 = vshrl.u32 %v5463_v22, 16  ;;  %v788_v34 = vrot.slane %v786_v27, 1  ;;  %v5062_v27 = vld [vmem:[%s6195_s1 + $0x1b0] sm:$0xff]  }
  0x59   : > { %4377 = vmatmul.mubr.msk.bf16.gmra.mrb[8].mxu1 %vm240_vm2, %v1219_v31  ;;  %v609_v31 = vsel %vm602_vm3, %v606_v14, %v608_v28  ;;  %v5041_v14 = vld [vmem:[%s6195_s1 + $0x180] sm:$0xff]   ;;  %v789_v28 = vshll.u32 %v5482_v29, 16 }
  0x5a   : > { %4380 = vmatprep.mubr.msk.bf16.mxu1 %vm5126_vm0, %v5125_v1 }
  0x5b   : > { %4269 = vmatmul.mubr.msk.bf16.gmra.mrb[12].mxu0 %vm240_vm2, %v423_v44  ;;  %v1436_v44 = vor.u32 %v1435_v40, %v1432_v39  ;;  %v1590_v40 = vrot.slane %v5473_v24, 2 }
  0x5c   : > { %4272 = vmatprep.mubr.msk.bf16.mxu0 %vm5126_vm0, %v5125_v1 }
  0x5d   : > { %v1437_v53 = vsel %vm749_vm4, %v1427_v33, %v1436_v44  ;;  %v5047_v33 = vld [vmem:[%s6195_s1 + $0x198] sm:$0xff]   ;;  %v1591_v49 = vsel %vm1582_vm5, %v1588_v32, %v1590_v40 }
  0x5e   : > { %v5065_v32 = vld [vmem:[%s6195_s1 + $0x138] sm:$0xff]  }
  0x61   : > { %4381 = vmatmul.mubr.msk.bf16.gmra.mrb[12].mxu1 %vm240_vm2, %v1221_v47  ;;  %v1439_v47 = vshrl.u32 %v5500_v37, 16 }
  0x62   : > { %4384 = vmatprep.mubr.msk.bf16.mxu1 %vm5126_vm0, %v5125_v1 }
  0x63   : > { %4273 = vmatmul.mubr.msk.bf16.gmra.mrb[16].mxu0 %vm240_vm2, %v431_v57  ;;  %v1441_v54 = vrot.slane %v1439_v47, 1  ;;  %v759_v57 = vshrl.u32 %v5404_v50, 16  ;;  %v757_v50 = vor.u32 %v756_v60, %v753_v59  ;;  %v5624_v59 = vld [vmem:[%s5209_s10 + $0x4] sm:$0xfe]   ;;  %v5627_v60 = vld [vmem:[%s5209_s10 + $0xc] sm:$0xff]  }
  0x64   : > { %4284 = vmatprep.mubr.msk.bf16.mxu0 %vm5126_vm0, %v5125_v1 }
  0x65   : > { %v1445_v51 = vor.u32 %v1444_v55, %v1441_v54  ;;  %v761_v63 = vrot.slane %v759_v57, 1  ;;  %v1592_v54 = vrot.slane %v5500_v37, 2 }
  0x67   : > { %v765_v4 = vor.u32 %v764_v0, %v761_v63 }
  0x69   : > { %4385 = vmatmul.mubr.msk.bf16.gmra.mrb[16].mxu1 %vm240_vm2, %v1223_v61  ;;  %v1569_v61 = vld [vmem:[%s5209_s10 + $0x4] sm:$0xc] }
  0x6a   : > { %4396 = vmatprep.mubr.msk.bf16.mxu1 %vm5126_vm0, %v5125_v1  ;;  %v3799_v3 = vcombine.low %v1569_v61, %v5392_v43  ;;  %v5040_v43 = vld [vmem:[%s6195_s1 + $0x100] sm:$0xff]   ;;  %v1593_v61 = vsel %vm1582_vm5, %v1590_v40, %v1592_v54  ;;  %v5715_v40 = vld [vmem:[%s5209_s10 + $0x2c] ss:$0 sps:$4 sm:$0x33]  }
  0x6b   : > { %4285 = vmatmul.mubr.msk.bf16.vlgmr.msra.gmra.mrb[0].mxu0 %vm240_vm2, %v605_v7 }
  0x6c   : > { %4305 = vmatpush3.bf16.msra.mxu0 %v5023_v2  ;;  %4288 = vmatprep.mubr.msk.bf16.mxu0 %vm5126_vm0, %v5125_v1  ;;  %v1446_v2 = vsel %vm749_vm4, %v1436_v44, %v1445_v51  ;;  %v1583_v7 = vrot.slane %v3799_v3, 2  ;;  %v1825_v3 = vrot.slane %v5624_v59, 1 }
  0x6d   : > { %4306 = vmatprep.subr.bf16.mxu0 %v5125_v1 }
  0x70   : > { %4307 = vmatpush3.bf16.msra.mxu0 %v5027_v15  ;;  %v5042_v15 = vld [vmem:[%s6195_s1 + $0x108] sm:$0xff]  }
  0x71   : > { %4397 = vmatmul.mubr.msk.bf16.vlgmr.msra.gmra.mrb[0].mxu1 %vm240_vm2, %v1410_v9  ;;  %4308 = vmatprep.subr.bf16.mxu0 %v5125_v1  ;;  %v1584_v9 = vrot.slane %v5396_v45, 2  ;;  %v774_v45 = vor.u32 %v773_v12, %v770_v11  ;;  %v5054_v12 = vld [vmem:[%s6195_s1 + $0x1a0] sm:$0xff]  }
  0x72   : > { %4417 = vmatpush3.bf16.msra.mxu1 %v5024_v10  ;;  %4400 = vmatprep.mubr.msk.bf16.mxu1 %vm5126_vm0, %v5125_v1  ;;  %v766_v10 = vsel %vm749_vm4, %v757_v50, %v765_v4  ;;  %v1826_v50 = vrot.slane %v5627_v60, 1 }
  0x73   : > { %4418 = vmatprep.subr.bf16.mxu1 %v5125_v1  ;;  %4289 = vmatmul.mubr.msk.bf16.gmra.mrb[4].mxu0 %vm240_vm2, %v607_v21  ;;  %v1585_v8 = vsel %vm1582_vm5, %v1583_v7, %v1584_v9  ;;  %v775_v21 = vsel %vm749_vm4, %v765_v4, %v774_v45  ;;  %v1587_v46 = vsel %vm1582_vm5, %v1584_v9, %v1586_v18  ;;  %v5058_v18 = vld [vmem:[%s6195_s1 + $0x1a8] sm:$0xff]  }
  0x74   : > { %4292 = vmatprep.mubr.msk.bf16.mxu0 %vm5126_vm0, %v5125_v1  ;;  %4309 = vmatpush3.bf16.msra.mxu0 %v5031_v23  ;;  %v1827_v9 = vsel %vm602_vm3, %v1825_v3, %v1826_v50 }
  0x75   : > { %4310 = vmatprep.subr.bf16.mxu0 %v5125_v1 }
  0x76   : > { %4419 = vmatpush3.bf16.msra.mxu1 %v5028_v17  ;;  %v780_v17 = vshll.u32 %v5463_v22, 16  ;;  %v779_v22 = vrot.slane %v777_v16, 1  ;;  %v5057_v16 = vld [vmem:[%s6195_s1 + $0x128] sm:$0xff]  }
  0x77   : > { %4420 = vmatprep.subr.bf16.mxu1 %v5125_v1 }
  0x78   : > { %4311 = vmatpush3.bf16.msra.mxu0 %v5035_v30  ;;  %v782_v23 = vrot.slane %v780_v17, 2  ;;  %v5046_v30 = vld [vmem:[%s6195_s1 + $0x118] sm:$0xff]  }
  0x79   : > { %4401 = vmatmul.mubr.msk.bf16.gmra.mrb[4].mxu1 %vm240_vm2, %v1419_v25  ;;  %4444 = vmatprep.subr.bf16.mxu0 %v5125_v1  ;;  %v5045_v25 = vld [vmem:[%s6195_s1 + $0x190] sm:$0xff]  }
  0x7a   : > { %4404 = vmatprep.mubr.msk.bf16.mxu1 %vm5126_vm0, %v5125_v1  ;;  %4421 = vmatpush3.bf16.msra.mxu1 %v5032_v20  ;;  %v5044_v20 = vld [vmem:[%s6195_s1 + $0x110] sm:$0xff]   ;;  %v783_v26 = vor.u32 %v782_v23, %v779_v22  ;;  %v5676_v23 = vld [vmem:[%s5209_s10 + $0x1c] sm:$0xff]  }
  0x7b   : > { %4422 = vmatprep.subr.bf16.mxu1 %v5125_v1  ;;  %4293 = vmatmul.mubr.msk.bf16.gmra.mrb[8].mxu0 %vm240_vm2, %v609_v31  ;;  %v5048_v31 = vld [vmem:[%s5209_s10 + $0x2c] ss:$0 sps:$4 sm:$0x33]  }
  0x7c   : > { %4296 = vmatprep.mubr.msk.bf16.mxu0 %vm5126_vm0, %v5125_v1  ;;  %v784_v29 = vsel %vm749_vm4, %v774_v45, %v783_v26  ;;  %v798_v39 = vshll.u32 %v5048_v31, 16  ;;  %v5656_v45 = vld [vmem:[%s5209_s10 + $0x1c] sm:$0xff]  }
  0x7e   : > { %4423 = vmatpush3.bf16.msra.mxu1 %v5036_v35  ;;  %v791_v35 = vrot.slane %v789_v28, 2  ;;  %v800_v47 = vrot.slane %v798_v39, 2  ;;  %v5688_v28 = vld [vmem:[%s5209_s10 + $0x24] sm:$0xff]  }
  0x7f   : > { %4556 = vmatprep.subr.bf16.mxu1 %v5125_v1 }
  0x80   : > { %v792_v36 = vor.u32 %v791_v35, %v788_v34  ;;  %v2664_v34 = vshll.u32 %v5688_v28, 16  ;;  %v5066_v35 = vld [vmem:[%s6195_s1 + $0x1b8] sm:$0xff]  }
  0x81   : > { %4405 = vmatmul.mubr.msk.bf16.gmra.mrb[8].mxu1 %vm240_vm2, %v1428_v38  ;;  %v795_v38 = vshrl.u32 %v5048_v31, 16 }
  0x82   : > { %4408 = vmatprep.mubr.msk.bf16.mxu1 %vm5126_vm0, %v5125_v1  ;;  %v793_v42 = vsel %vm749_vm4, %v783_v26, %v792_v36  ;;  %v2666_v39 = vrot.slane %v2664_v34, 2 }
  0x83   : > { %4297 = vmatmul.mubr.msk.bf16.gmra.mrb[12].mxu0 %vm240_vm2, %v611_v48  ;;  %v797_v44 = vrot.slane %v795_v38, 1  ;;  %v5606_v48 = vld [vmem:[%s5209_s10 + $0x8] sm:$0xf] }
  0x84   : > { %4300 = vmatprep.mubr.msk.bf16.mxu0 %vm5126_vm0, %v5125_v1  ;;  %v3939_v52 = vcombine.low %v2577_v41, %v5606_v48  ;;  %v2673_v41 = vshll.u32 %v5715_v40, 16 }
  0x85   : > { %v801_v24 = vor.u32 %v800_v47, %v797_v44  ;;  %v2670_v47 = vshrl.u32 %v5715_v40, 16 }
  0x86   : > { %v2626_v55 = vshrl.u32 %v3939_v52, 16  ;;  %v2629_v56 = vshll.u32 %v3939_v52, 16  ;;  %v5067_v52 = vld [vmem:[%s5209_s10 + $0x2c] ss:$0 sps:$4 sm:$0x11]  }
  0x87   : > { %v802_v51 = vsel %vm749_vm4, %v792_v36, %v801_v24  ;;  %v2672_v54 = vrot.slane %v2670_v47, 1 }
  0x88   : > { %v2628_v37 = vrot.slane %v2626_v55, 1  ;;  %v2675_v55 = vrot.slane %v2673_v41, 2 }
  0x89   : > { %4409 = vmatmul.mubr.msk.bf16.gmra.mrb[12].mxu1 %vm240_vm2, %v1437_v53  ;;  %v5612_v53 = vld [vmem:[%s5209_s10 + $0xc] sm:$0xff]  }
  0x8a   : > { %4412 = vmatprep.mubr.msk.bf16.mxu1 %vm5126_vm0, %v5125_v1  ;;  %v2634_v57 = vshrl.u32 %v5612_v53, 16  ;;  %v2637_v58 = vshll.u32 %v5612_v53, 16 }
  0x8b   : > { %4301 = vmatmul.mubr.msk.bf16.gmra.mrb[16].mxu0 %vm240_vm2, %v613_v62  ;;  %v2631_v62 = vrot.slane %v2629_v56, 2  ;;  %v1972_v56 = vshrl.u32 %v5624_v59, 16 }
  0x8c   : > { %4312 = vmatprep.mubr.msk.bf16.mxu0 %vm5126_vm0, %v5125_v1  ;;  %v2636_v63 = vrot.slane %v2634_v57, 1  ;;  %v2639_v0 = vrot.slane %v2637_v58, 2  ;;  %v1834_v57 = vrot.slane %v5067_v52, 1  ;;  %v1975_v58 = vshll.u32 %v5624_v59, 16  ;;  %v5819_v52 = vld [vmem:[%s5209_s10 + $0xc] sm:$0xf] }
  0x8d   : > { %v2632_v4 = vor.u32 %v2631_v62, %v2628_v37  ;;  %v2676_v37 = vor.u32 %v2675_v55, %v2672_v54  ;;  %v1974_v62 = vrot.slane %v1972_v56, 1  ;;  %v5825_v55 = vld [vmem:[%s5209_s10 + $0x10] sm:$0xff]   ;;  %v2822_v56 = vrot.slane %v5715_v40, 2 }
  0x8e   : > { %v2640_v5 = vor.u32 %v2639_v0, %v2636_v63  ;;  %v1977_v0 = vrot.slane %v1975_v58, 2 }
  0x90   : > { %v2641_v11 = vsel %vm749_vm4, %v2632_v4, %v2640_v5  ;;  %v2800_v4 = vld [vmem:[%s5209_s10 + $0x4] sm:$0xc] }
  0x91   : > { %4413 = vmatmul.mubr.msk.bf16.gmra.mrb[16].mxu1 %vm240_vm2, %v1446_v2  ;;  %v5632_v2 = vld [vmem:[%s5209_s10 + $0x14] sm:$0xff]  }
  0x92   : > { %4424 = vmatprep.mubr.msk.bf16.mxu1 %vm5126_vm0, %v5125_v1  ;;  %v2643_v6 = vshrl.u32 %v5632_v2, 16  ;;  %v2646_v7 = vshll.u32 %v5632_v2, 16 }
  0x93   : > { %4313 = vmatmul.mubr.msk.bf16.vlgmr.msra.gmra.mrb[0].mxu0 %vm240_vm2, %v766_v10  ;;  %v5053_v10 = vld [vmem:[%s6195_s1 + $0x120] sm:$0xff]  }
  0x94   : > { %4445 = vmatpush3.bf16.msra.mxu0 %v5040_v43  ;;  %4316 = vmatprep.mubr.msk.bf16.mxu0 %vm5126_vm0, %v5125_v1  ;;  %v5648_v43 = vld [vmem:[%s5209_s10 + $0x14] sm:$0xff]  }
  0x95   : > { %4446 = vmatprep.subr.bf16.mxu0 %v5125_v1 }
  0x98   : > { %4447 = vmatpush3.bf16.msra.mxu0 %v5042_v15  ;;  %v1828_v15 = vrot.slane %v5648_v43, 1 }
  0x99   : > { %4425 = vmatmul.mubr.msk.bf16.vlgmr.msra.gmra.mrb[0].mxu1 %vm240_vm2, %v1585_v8  ;;  %4448 = vmatprep.subr.bf16.mxu0 %v5125_v1  ;;  %v2645_v8 = vrot.slane %v2643_v6, 1 }
  0x9a   : > { %4557 = vmatpush3.bf16.msra.mxu1 %v5041_v14  ;;  %4428 = vmatprep.mubr.msk.bf16.mxu1 %vm5126_vm0, %v5125_v1  ;;  %v2648_v14 = vrot.slane %v2646_v7, 2  ;;  %v1829_v22 = vsel %vm602_vm3, %v1826_v50, %v1828_v15  ;;  %v1989_v7 = vshrl.u32 %v5648_v43, 16 }
  0x9b   : > { %4558 = vmatprep.subr.bf16.mxu1 %v5125_v1  ;;  %4317 = vmatmul.mubr.msk.bf16.gmra.mrb[4].mxu0 %vm240_vm2, %v775_v21  ;;  %v2655_v21 = vshll.u32 %v5656_v45, 16 }
  0x9c   : > { %4320 = vmatprep.mubr.msk.bf16.mxu0 %vm5126_vm0, %v5125_v1  ;;  %4449 = vmatpush3.bf16.msra.mxu0 %v5044_v20  ;;  %v2649_v17 = vor.u32 %v2648_v14, %v2645_v8  ;;  %v5061_v20 = vld [vmem:[%s6195_s1 + $0x130] sm:$0xff]   ;;  %v1991_v8 = vrot.slane %v1989_v7, 1 }
  0x9d   : > { %4450 = vmatprep.subr.bf16.mxu0 %v5125_v1  ;;  %v2657_v26 = vrot.slane %v2655_v21, 2  ;;  %v5073_v21 = vld [vmem:[%s6195_s1 + $0x1c8] sm:$0xff]  }
  0x9e   : > { %4559 = vmatpush3.bf16.msra.mxu1 %v5043_v19  ;;  %v2652_v19 = vshrl.u32 %v5656_v45, 16 }
  0x9f   : > { %4560 = vmatprep.subr.bf16.mxu1 %v5125_v1 }
  0xa0   : > { %4451 = vmatpush3.bf16.msra.mxu0 %v5046_v30  ;;  %v1830_v30 = vrot.slane %v5676_v23, 1 }
  0xa1   : > { %4429 = vmatmul.mubr.msk.bf16.gmra.mrb[4].mxu1 %vm240_vm2, %v1587_v46  ;;  %4472 = vmatprep.subr.bf16.mxu0 %v5125_v1  ;;  %v2650_v46 = vsel %vm749_vm4, %v2640_v5, %v2649_v17  ;;  %v3962_v5 = vcombine.low %v2800_v4, %v5606_v48  ;;  %v5070_v48 = vld [vmem:[%s6195_s1 + $0x140] sm:$0xff]  }
  0xa2   : > { %4432 = vmatprep.mubr.msk.bf16.mxu1 %vm5126_vm0, %v5125_v1  ;;  %4561 = vmatpush3.bf16.msra.mxu1 %v5045_v25  ;;  %v2654_v25 = vrot.slane %v2652_v19, 1  ;;  %v1831_v31 = vsel %vm602_vm3, %v1828_v15, %v1830_v30  ;;  %v5071_v15 = vld [vmem:[%s6195_s1 + $0x1c0] sm:$0xff]   ;;  %v2816_v19 = vrot.slane %v5632_v2, 2 }
  0xa3   : > { %4562 = vmatprep.subr.bf16.mxu1 %v5125_v1  ;;  %4321 = vmatmul.mubr.msk.bf16.gmra.mrb[8].mxu0 %vm240_vm2, %v784_v29  ;;  %v2661_v29 = vshrl.u32 %v5688_v28, 16 }
  0xa4   : > { %4324 = vmatprep.mubr.msk.bf16.mxu0 %vm5126_vm0, %v5125_v1 }
  0xa5   : > { %v2663_v38 = vrot.slane %v2661_v29, 1  ;;  %v5077_v29 = vld [vmem:[%s6195_s1 + $0x1d8] sm:$0xff]  }
  0xa6   : > { %4563 = vmatpush3.bf16.msra.mxu1 %v5047_v33  ;;  %v2658_v33 = vor.u32 %v2657_v26, %v2654_v25  ;;  %v5075_v25 = vld [vmem:[%s6195_s1 + $0x1d0] sm:$0xff]  }
  0xa7   : > { %4584 = vmatprep.subr.bf16.mxu1 %v5125_v1  ;;  %v2667_v44 = vor.u32 %v2666_v39, %v2663_v38 }
  0xa8   : > { %v2659_v36 = vsel %vm749_vm4, %v2649_v17, %v2658_v33  ;;  %v1998_v17 = vshrl.u32 %v5676_v23, 16 }
  0xa9   : > { %4433 = vmatmul.mubr.msk.bf16.gmra.mrb[8].mxu1 %vm240_vm2, %v1589_v13  ;;  %v5708_v13 = vld [vmem:[%s5209_s10 + $0x24] sm:$0xff]   ;;  %v2668_v24 = vsel %vm749_vm4, %v2658_v33, %v2667_v44  ;;  %v2677_v59 = vsel %vm749_vm4, %v2667_v44, %v2676_v37  ;;  %v2818_v33 = vrot.slane %v5656_v45, 2 }
  0xaa   : > { %4436 = vmatprep.mubr.msk.bf16.mxu1 %vm5126_vm0, %v5125_v1 }
  0xab   : > { %4325 = vmatmul.mubr.msk.bf16.gmra.mrb[12].mxu0 %vm240_vm2, %v793_v42  ;;  %v1832_v42 = vrot.slane %v5708_v13, 1  ;;  %v2819_v45 = vsel %vm1582_vm5, %v2816_v19, %v2818_v33 }
  0xac   : > { %4328 = vmatprep.mubr.msk.bf16.mxu0 %vm5126_vm0, %v5125_v1 }
  0xad   : > { %v1835_v63 = vsel %vm602_vm3, %v1832_v42, %v1834_v57 }
  0xb1   : > { %4437 = vmatmul.mubr.msk.bf16.gmra.mrb[12].mxu1 %vm240_vm2, %v1591_v49  ;;  %v1833_v49 = vsel %vm602_vm3, %v1830_v30, %v1832_v42  ;;  %v2010_v30 = vshll.u32 %v5708_v13, 16  ;;  %v2820_v42 = vrot.slane %v5688_v28, 2 }
  0xb2   : > { %4440 = vmatprep.mubr.msk.bf16.mxu1 %vm5126_vm0, %v5125_v1 }
  0xb3   : > { %4329 = vmatmul.mubr.msk.bf16.gmra.mrb[16].mxu0 %vm240_vm2, %v802_v51  ;;  %v1980_v51 = vshrl.u32 %v5627_v60, 16 }
  0xb4   : > { %4452 = vmatprep.mubr.msk.bf16.mxu0 %vm5126_vm0, %v5125_v1 }
  0xb5   : > { %v1982_v3 = vrot.slane %v1980_v51, 1  ;;  %v3003_v51 = vshrl.u32 %v5825_v55, 16 }
  0xb9   : > { %4441 = vmatmul.mubr.msk.bf16.gmra.mrb[16].mxu1 %vm240_vm2, %v1593_v61  ;;  %v1983_v61 = vshll.u32 %v5627_v60, 16  ;;  %v1978_v60 = vor.u32 %v1977_v0, %v1974_v62  ;;  %v5837_v62 = vld [vmem:[%s5209_s10 + $0x8] sm:$0xfc]   ;;  %v2823_v0 = vsel %vm1582_vm5, %v2820_v42, %v2822_v56 }
  0xba   : > { %4564 = vmatprep.mubr.msk.bf16.mxu1 %vm5126_vm0, %v5125_v1 }
  0xbb   : > { %4453 = vmatmul.mubr.msk.bf16.vlgmr.msra.gmra.mrb[20].mxu0 %vm240_vm2, %v1827_v9  ;;  %v1985_v50 = vrot.slane %v1983_v61, 2  ;;  %v1992_v9 = vshll.u32 %v5648_v43, 16  ;;  %v3006_v61 = vshll.u32 %v5825_v55, 16 }
  0xbc   : > { %4473 = vmatpush3.bf16.msra.mxu0 %v5053_v10  ;;  %4456 = vmatprep.mubr.msk.bf16.mxu0 %vm5126_vm0, %v5125_v1  ;;  %v2813_v10 = vrot.slane %v3962_v5, 2  ;;  %v2194_v5 = vrot.slane %v5837_v62, 2 }
  0xbd   : > { %4474 = vmatprep.subr.bf16.mxu0 %v5125_v1  ;;  %v1986_v6 = vor.u32 %v1985_v50, %v1982_v3  ;;  %v1994_v14 = vrot.slane %v1992_v9, 2  ;;  %v3005_v50 = vrot.slane %v3003_v51, 2  ;;  %v3008_v4 = vrot.slane %v3006_v61, 3 }
  0xbe   : > { %v2342_v51 = vshrl.u32 %v5837_v62, 16  ;;  %v2345_v61 = vshll.u32 %v5837_v62, 16 }
  0xbf   : > { %v3009_v7 = vor.u32 %v3008_v4, %v3005_v50 }
  0xc0   : > { %4475 = vmatpush3.bf16.msra.mxu0 %v5057_v16  ;;  %v5072_v16 = vld [vmem:[%s6195_s1 + $0x148] sm:$0xff]   ;;  %v2344_v50 = vrot.slane %v2342_v51, 2  ;;  %v2347_v4 = vrot.slane %v2345_v61, 3 }
  0xc1   : > { %4565 = vmatmul.mubr.msk.bf16.vlgmr.msra.gmra.mrb[20].mxu1 %vm240_vm2, %v2641_v11  ;;  %4476 = vmatprep.subr.bf16.mxu0 %v5125_v1  ;;  %v2814_v11 = vrot.slane %v5612_v53, 2  ;;  %v1995_v53 = vor.u32 %v1994_v14, %v1991_v8  ;;  %v5084_v14 = vld [vmem:[%s6195_s1 + $0x1e0] sm:$0xff]  }
  0xc2   : > { %4585 = vmatpush3.bf16.msra.mxu1 %v5054_v12  ;;  %4568 = vmatprep.mubr.msk.bf16.mxu1 %vm5126_vm0, %v5125_v1  ;;  %v1987_v12 = vsel %vm749_vm4, %v1978_v60, %v1986_v6 }
  0xc3   : > { %4586 = vmatprep.subr.bf16.mxu1 %v5125_v1  ;;  %4457 = vmatmul.mubr.msk.bf16.gmra.mrb[24].mxu0 %vm240_vm2, %v1829_v22  ;;  %v2815_v43 = vsel %vm1582_vm5, %v2813_v10, %v2814_v11  ;;  %v1996_v22 = vsel %vm749_vm4, %v1986_v6, %v1995_v53  ;;  %v2817_v2 = vsel %vm1582_vm5, %v2814_v11, %v2816_v19  ;;  %v5088_v19 = vld [vmem:[%s6195_s1 + $0x1e8] sm:$0xff]  }
  0xc4   : > { %4460 = vmatprep.mubr.msk.bf16.mxu0 %vm5126_vm0, %v5125_v1  ;;  %4477 = vmatpush3.bf16.msra.mxu0 %v5061_v20 }
  0xc5   : > { %4478 = vmatprep.subr.bf16.mxu0 %v5125_v1 }
  0xc6   : > { %4587 = vmatpush3.bf16.msra.mxu1 %v5058_v18  ;;  %v2001_v18 = vshll.u32 %v5676_v23, 16  ;;  %v2000_v23 = vrot.slane %v1998_v17, 1  ;;  %v5087_v17 = vld [vmem:[%s6195_s1 + $0x168] sm:$0xff]  }
  0xc7   : > { %4588 = vmatprep.subr.bf16.mxu1 %v5125_v1 }
  0xc8   : > { %4479 = vmatpush3.bf16.msra.mxu0 %v5065_v32  ;;  %v2003_v20 = vrot.slane %v2001_v18, 2  ;;  %v5076_v32 = vld [vmem:[%s6195_s1 + $0x158] sm:$0xff]  }
  0xc9   : > { %4569 = vmatmul.mubr.msk.bf16.gmra.mrb[24].mxu1 %vm240_vm2, %v2650_v46  ;;  %4500 = vmatprep.subr.bf16.mxu0 %v5125_v1  ;;  %v5074_v46 = vld [vmem:[%s6195_s1 + $0x150] sm:$0xff]  }
  0xca   : > { %4572 = vmatprep.mubr.msk.bf16.mxu1 %vm5126_vm0, %v5125_v1  ;;  %4589 = vmatpush3.bf16.msra.mxu1 %v5062_v27  ;;  %v2004_v26 = vor.u32 %v2003_v20, %v2000_v23  ;;  %v2007_v27 = vshrl.u32 %v5708_v13, 16  ;;  %v5078_v13 = vld [vmem:[%s5209_s10 + $0x2c] ss:$0 sps:$4 sm:$0x33]   ;;  %v5889_v20 = vld [vmem:[%s5209_s10 + $0x20] sm:$0xff]  }
  0xcb   : > { %4590 = vmatprep.subr.bf16.mxu1 %v5125_v1  ;;  %4461 = vmatmul.mubr.msk.bf16.gmra.mrb[28].mxu0 %vm240_vm2, %v1831_v31  ;;  %v2012_v31 = vrot.slane %v2010_v30, 2  ;;  %v2016_v38 = vshrl.u32 %v5078_v13, 16  ;;  %v2019_v39 = vshll.u32 %v5078_v13, 16  ;;  %v5901_v30 = vld [vmem:[%s5209_s10 + $0x28] sm:$0xff]  }
  0xcc   : > { %4464 = vmatprep.mubr.msk.bf16.mxu0 %vm5126_vm0, %v5125_v1  ;;  %v2005_v34 = vsel %vm749_vm4, %v1995_v53, %v2004_v26  ;;  %v5869_v53 = vld [vmem:[%s5209_s10 + $0x20] sm:$0xff]  }
  0xcd   : > { %v2018_v47 = vrot.slane %v2016_v38, 1  ;;  %v2021_v41 = vrot.slane %v2019_v39, 2 }
  0xce   : > { %4591 = vmatpush3.bf16.msra.mxu1 %v5066_v35  ;;  %v2009_v35 = vrot.slane %v2007_v27, 1  ;;  %v5092_v27 = vld [vmem:[%s6195_s1 + $0x1f0] sm:$0xff]  }
  0xcf   : > { %4612 = vmatprep.subr.bf16.mxu1 %v5125_v1  ;;  %v2022_v28 = vor.u32 %v2021_v41, %v2018_v47  ;;  %v5097_v41 = vld [vmem:[%s5209_s10 + $0x30] ss:$0 sps:$4 sm:$0x33]  }
  0xd0   : > { %v2203_v56 = vrot.slane %v5097_v41, 2 }
  0xd1   : > { %4573 = vmatmul.mubr.msk.bf16.gmra.mrb[28].mxu1 %vm240_vm2, %v2659_v36  ;;  %v2013_v36 = vor.u32 %v2012_v31, %v2009_v35  ;;  %v3033_v35 = vshll.u32 %v5901_v30, 16  ;;  %v5096_v31 = vld [vmem:[%s6195_s1 + $0x1f8] sm:$0xff]  }
  0xd2   : > { %4576 = vmatprep.mubr.msk.bf16.mxu1 %vm5126_vm0, %v5125_v1 }
  0xd3   : > { %4465 = vmatmul.mubr.msk.bf16.gmra.mrb[32].mxu0 %vm240_vm2, %v1833_v49  ;;  %v2014_v44 = vsel %vm749_vm4, %v2004_v26, %v2013_v36  ;;  %v2946_v49 = vld [vmem:[%s5209_s10 + $0x8] sm:$0xc]  ;;  %v2023_v37 = vsel %vm749_vm4, %v2013_v36, %v2022_v28  ;;  %v3035_v39 = vrot.slane %v3033_v35, 3 }
  0xd4   : > { %4468 = vmatprep.mubr.msk.bf16.mxu0 %vm5126_vm0, %v5125_v1  ;;  %v3980_v54 = vcombine.low %v2946_v49, %v5819_v52 }
  0xd6   : > { %v2995_v57 = vshrl.u32 %v3980_v54, 16  ;;  %v2998_v58 = vshll.u32 %v3980_v54, 16 }
  0xd8   : > { %v2997_v40 = vrot.slane %v2995_v57, 2  ;;  %v3000_v3 = vrot.slane %v2998_v58, 3 }
  0xd9   : > { %4577 = vmatmul.mubr.msk.bf16.gmra.mrb[32].mxu1 %vm240_vm2, %v2668_v24  ;;  %v2821_v24 = vsel %vm1582_vm5, %v2818_v33, %v2820_v42  ;;  %v5095_v33 = vld [vmem:[%s6195_s1 + $0x178] sm:$0xff]   ;;  %v5927_v42 = vld [vmem:[%s5209_s10 + $0x30] ss:$0 sps:$4 sm:$0x77]  }
  0xda   : > { %4580 = vmatprep.mubr.msk.bf16.mxu1 %vm5126_vm0, %v5125_v1  ;;  %v3001_v6 = vor.u32 %v3000_v3, %v2997_v40  ;;  %v3039_v49 = vshrl.u32 %v5927_v42, 16 }
  0xdb   : > { %4469 = vmatmul.mubr.msk.bf16.gmra.mrb[36].mxu0 %vm240_vm2, %v1835_v63  ;;  %v5840_v63 = vld [vmem:[%s5209_s10 + $0x10] sm:$0xff]  }
  0xdc   : > { %4480 = vmatprep.mubr.msk.bf16.mxu0 %vm5126_vm0, %v5125_v1  ;;  %v2195_v60 = vrot.slane %v5840_v63, 2  ;;  %v3010_v8 = vsel %vm2340_vm6, %v3001_v6, %v3009_v7  ;;  %v3041_v57 = vrot.slane %v3039_v49, 2  ;;  %v3169_v6 = vld [vmem:[%s5209_s10 + $0x8] sm:$0x8] }
  0xde   : > { %v2196_v11 = vsel %vm1582_vm5, %v2194_v5, %v2195_v60 }
  0xe1   : > { %4581 = vmatmul.mubr.msk.bf16.gmra.mrb[36].mxu1 %vm240_vm2, %v2677_v59  ;;  %v5845_v59 = vld [vmem:[%s5209_s10 + $0x18] sm:$0xff]  }
  0xe2   : > { %4592 = vmatprep.mubr.msk.bf16.mxu1 %vm5126_vm0, %v5125_v1  ;;  %v3012_v9 = vshrl.u32 %v5845_v59, 16  ;;  %v3015_v10 = vshll.u32 %v5845_v59, 16 }
  0xe3   : > { %4481 = vmatmul.mubr.msk.bf16.vlgmr.msra.gmra.mrb[20].mxu0 %vm240_vm2, %v1987_v12  ;;  %v5083_v12 = vld [vmem:[%s6195_s1 + $0x160] sm:$0xff]  }
  0xe4   : > { %4501 = vmatpush3.bf16.msra.mxu0 %v5070_v48  ;;  %4484 = vmatprep.mubr.msk.bf16.mxu0 %vm5126_vm0, %v5125_v1  ;;  %v5861_v48 = vld [vmem:[%s5209_s10 + $0x18] sm:$0xff]  }
  0xe5   : > { %4502 = vmatprep.subr.bf16.mxu0 %v5125_v1 }
  0xe8   : > { %4503 = vmatpush3.bf16.msra.mxu0 %v5072_v16  ;;  %v2197_v16 = vrot.slane %v5861_v48, 2 }
  0xe9   : > { %4593 = vmatmul.mubr.msk.bf16.vlgmr.msra.gmra.mrb[20].mxu1 %vm240_vm2, %v2815_v43  ;;  %4504 = vmatprep.subr.bf16.mxu0 %v5125_v1  ;;  %v3014_v43 = vrot.slane %v3012_v9, 2 }
  0xea   : > { %4613 = vmatpush3.bf16.msra.mxu1 %v5071_v15  ;;  %4596 = vmatprep.mubr.msk.bf16.mxu1 %vm5126_vm0, %v5125_v1  ;;  %v3017_v15 = vrot.slane %v3015_v10, 3  ;;  %v2198_v23 = vsel %vm1582_vm5, %v2195_v60, %v2197_v16  ;;  %v2359_v10 = vshrl.u32 %v5861_v48, 16 }
  0xeb   : > { %4614 = vmatprep.subr.bf16.mxu1 %v5125_v1  ;;  %4485 = vmatmul.mubr.msk.bf16.gmra.mrb[24].mxu0 %vm240_vm2, %v1996_v22  ;;  %v3024_v22 = vshll.u32 %v5869_v53, 16 }
  0xec   : > { %4488 = vmatprep.mubr.msk.bf16.mxu0 %vm5126_vm0, %v5125_v1  ;;  %4505 = vmatpush3.bf16.msra.mxu0 %v5074_v46  ;;  %v3018_v18 = vor.u32 %v3017_v15, %v3014_v43  ;;  %v5091_v46 = vld [vmem:[%s6195_s1 + $0x170] sm:$0xff]  }
  0xed   : > { %4506 = vmatprep.subr.bf16.mxu0 %v5125_v1  ;;  %v3026_v26 = vrot.slane %v3024_v22, 3 }
  0xee   : > { %4615 = vmatpush3.bf16.msra.mxu1 %v5073_v21  ;;  %v3021_v21 = vshrl.u32 %v5869_v53, 16 }
  0xef   : > { %4616 = vmatprep.subr.bf16.mxu1 %v5125_v1 }
  0xf0   : > { %4507 = vmatpush3.bf16.msra.mxu0 %v5076_v32  ;;  %v2199_v32 = vrot.slane %v5889_v20, 2 }
  0xf1   : > { %4597 = vmatmul.mubr.msk.bf16.gmra.mrb[24].mxu1 %vm240_vm2, %v2817_v2  ;;  %4528 = vmatprep.subr.bf16.mxu0 %v5125_v1  ;;  %v3019_v2 = vsel %vm2340_vm6, %v3009_v7, %v3018_v18  ;;  %v4003_v7 = vcombine.low %v3169_v6, %v5819_v52  ;;  %v2361_v52 = vrot.slane %v2359_v10, 2 }
  0xf2   : > { %4600 = vmatprep.mubr.msk.bf16.mxu1 %vm5126_vm0, %v5125_v1  ;;  %4617 = vmatpush3.bf16.msra.mxu1 %v5075_v25  ;;  %v3023_v25 = vrot.slane %v3021_v21, 2  ;;  %v2200_v13 = vsel %vm1582_vm5, %v2197_v16, %v2199_v32  ;;  %v2368_v16 = vshrl.u32 %v5889_v20, 16 }
  0xf3   : > { %4618 = vmatprep.subr.bf16.mxu1 %v5125_v1  ;;  %4489 = vmatmul.mubr.msk.bf16.gmra.mrb[28].mxu0 %vm240_vm2, %v2005_v34  ;;  %v3030_v34 = vshrl.u32 %v5901_v30, 16 }
  0xf4   : > { %4492 = vmatprep.mubr.msk.bf16.mxu0 %vm5126_vm0, %v5125_v1 }
  0xf5   : > { %v3032_v38 = vrot.slane %v3030_v34, 2 }
  0xf6   : > { %4619 = vmatpush3.bf16.msra.mxu1 %v5077_v29  ;;  %v3027_v29 = vor.u32 %v3026_v26, %v3023_v25 }
  0xf7   : > { %4640 = vmatprep.subr.bf16.mxu1 %v5125_v1  ;;  %v3036_v47 = vor.u32 %v3035_v39, %v3032_v38  ;;  %v3192_v38 = vrot.slane %v5927_v42, 3 }
  0xf8   : > { %v3028_v36 = vsel %vm2340_vm6, %v3018_v18, %v3027_v29 }
  0xf9   : > { %4601 = vmatmul.mubr.msk.bf16.gmra.mrb[28].mxu1 %vm240_vm2, %v2819_v45  ;;  %v5921_v45 = vld [vmem:[%s5209_s10 + $0x28] sm:$0xff]   ;;  %v3037_v28 = vsel %vm2340_vm6, %v3027_v29, %v3036_v47 }
  0xfa   : > { %4604 = vmatprep.mubr.msk.bf16.mxu1 %vm5126_vm0, %v5125_v1 }
  0xfb   : > { %4493 = vmatmul.mubr.msk.bf16.gmra.mrb[32].mxu0 %vm240_vm2, %v2014_v44  ;;  %v2201_v44 = vrot.slane %v5921_v45, 2 }
  0xfc   : > { %4496 = vmatprep.mubr.msk.bf16.mxu0 %vm5126_vm0, %v5125_v1 }
  0xfd   : > { %v2202_v54 = vsel %vm1582_vm5, %v2199_v32, %v2201_v44  ;;  %v2204_v40 = vsel %vm1582_vm5, %v2201_v44, %v2203_v56  ;;  %v6012_v44 = vld [vmem:[%s6196_s2] ss:$0 sm:$0xff] }
 0x101   : > { %4605 = vmatmul.mubr.msk.bf16.gmra.mrb[32].mxu1 %vm240_vm2, %v2821_v24  ;;  %v3042_v24 = vshll.u32 %v5927_v42, 16 }
 0x102   : > { %4608 = vmatprep.mubr.msk.bf16.mxu1 %vm5126_vm0, %v5125_v1 }
 0x103   : > { %4497 = vmatmul.mubr.msk.bf16.gmra.mrb[36].mxu0 %vm240_vm2, %v2023_v37  ;;  %v3044_v58 = vrot.slane %v3042_v24, 3  ;;  %v2350_v37 = vshrl.u32 %v5840_v63, 16 }
 0x104   : > { %4508 = vmatprep.mubr.msk.bf16.mxu0 %vm5126_vm0, %v5125_v1 }
 0x105   : > { %v3045_v3 = vor.u32 %v3044_v58, %v3041_v57  ;;  %v2352_v5 = vrot.slane %v2350_v37, 2 }
 0x107   : > { %v3046_v62 = vsel %vm2340_vm6, %v3036_v47, %v3045_v3 }
 0x109   : > { %4609 = vmatmul.mubr.msk.bf16.gmra.mrb[36].mxu1 %vm240_vm2, %v2823_v0  ;;  %v2353_v0 = vshll.u32 %v5840_v63, 16  ;;  %v2348_v63 = vor.u32 %v2347_v4, %v2344_v50 }
 0x10a   : > { %4620 = vmatprep.mubr.msk.bf16.mxu1 %vm5126_vm0, %v5125_v1 }
 0x10b   : > { %4509 = vmatmul.mubr.msk.bf16.vlgmr.msra.gmra.mrb[20].mxu0 %vm240_vm2, %v2196_v11  ;;  %v2355_v60 = vrot.slane %v2353_v0, 3  ;;  %v2362_v11 = vshll.u32 %v5861_v48, 16 }
 0x10c   : > { %4529 = vmatpush3.bf16.msra.mxu0 %v5083_v12  ;;  %4512 = vmatprep.mubr.msk.bf16.mxu0 %vm5126_vm0, %v5125_v1  ;;  %v3183_v12 = vrot.slane %v4003_v7, 3 }
 0x10d   : > { %4530 = vmatprep.subr.bf16.mxu0 %v5125_v1  ;;  %v2356_v9 = vor.u32 %v2355_v60, %v2352_v5  ;;  %v2364_v43 = vrot.slane %v2362_v11, 3 }
 0x10f   : > { %v2365_v48 = vor.u32 %v2364_v43, %v2361_v52 }
 0x110   : > { %4531 = vmatpush3.bf16.msra.mxu0 %v5087_v17  ;;  %v2371_v17 = vshll.u32 %v5889_v20, 16  ;;  %v2377_v20 = vshrl.u32 %v5921_v45, 16 }
 0x111   : > { %4621 = vmatmul.mubr.msk.bf16.vlgmr.msra.gmra.mrb[20].mxu1 %vm240_vm2, %v3010_v8  ;;  %4532 = vmatprep.subr.bf16.mxu0 %v5125_v1  ;;  %v3184_v8 = vrot.slane %v5825_v55, 3  ;;  %v3186_v55 = vrot.slane %v5845_v59, 3  ;;  %v2366_v18 = vsel %vm2340_vm6, %v2356_v9, %v2365_v48  ;;  %v3188_v59 = vrot.slane %v5869_v53, 3 }
 0x112   : > { %4641 = vmatpush3.bf16.msra.mxu1 %v5084_v14  ;;  %4624 = vmatprep.mubr.msk.bf16.mxu1 %vm5126_vm0, %v5125_v1  ;;  %v2357_v14 = vsel %vm2340_vm6, %v2348_v63, %v2356_v9  ;;  %v2373_v21 = vrot.slane %v2371_v17, 3  ;;  %v2379_v25 = vrot.slane %v2377_v20, 2  ;;  %v3190_v53 = vrot.slane %v5901_v30, 3 }
 0x113   : > { %4642 = vmatprep.subr.bf16.mxu1 %v5125_v1  ;;  %4513 = vmatmul.mubr.msk.bf16.gmra.mrb[24].mxu0 %vm240_vm2, %v2198_v23  ;;  %v3185_v15 = vsel %vm3182_vm7, %v3183_v12, %v3184_v8  ;;  %v3187_v22 = vsel %vm3182_vm7, %v3184_v8, %v3186_v55  ;;  %v3189_v32 = vsel %vm3182_vm7, %v3186_v55, %v3188_v59 }
 0x114   : > { %4516 = vmatprep.mubr.msk.bf16.mxu0 %vm5126_vm0, %v5125_v1  ;;  %4533 = vmatpush3.bf16.msra.mxu0 %v5091_v46  ;;  %v2380_v46 = vshll.u32 %v5921_v45, 16  ;;  %v3191_v45 = vsel %vm3182_vm7, %v3188_v59, %v3190_v53  ;;  %v3193_v39 = vsel %vm3182_vm7, %v3190_v53, %v3192_v38 }
 0x115   : > { %4534 = vmatprep.subr.bf16.mxu0 %v5125_v1 }
 0x116   : > { %4643 = vmatpush3.bf16.msra.mxu1 %v5088_v19  ;;  %v2370_v19 = vrot.slane %v2368_v16, 2  ;;  %v2382_v26 = vrot.slane %v2380_v46, 3 }
 0x117   : > { %4644 = vmatprep.subr.bf16.mxu1 %v5125_v1 }
 0x118   : > { %4535 = vmatpush3.bf16.msra.mxu0 %v5095_v33  ;;  %v2374_v23 = vor.u32 %v2373_v21, %v2370_v19  ;;  %v2383_v33 = vor.u32 %v2382_v26, %v2379_v25 }
 0x119   : > { %4625 = vmatmul.mubr.msk.bf16.gmra.mrb[24].mxu1 %vm240_vm2, %v3019_v2 }
 0x11a   : > { %4628 = vmatprep.mubr.msk.bf16.mxu1 %vm5126_vm0, %v5125_v1  ;;  %4645 = vmatpush3.bf16.msra.mxu1 %v5092_v27  ;;  %v2375_v2 = vsel %vm2340_vm6, %v2365_v48, %v2374_v23  ;;  %v5100_v27 = vld [vmem:[%s5209_s10 + $0x30] ss:$0 sps:$4 sm:$0x77]   ;;  %v2384_v35 = vsel %vm2340_vm6, %v2374_v23, %v2383_v33  ;;  %s157_s10 = sand.u32 1, %s5115_s12  }
 0x11b   : > { %4646 = vmatprep.subr.bf16.mxu1 %v5125_v1  ;;  %4517 = vmatmul.mubr.msk.bf16.gmra.mrb[28].mxu0 %vm240_vm2, %v2200_v13  ;;  %v2386_v29 = vshrl.u32 %v5100_v27, 16  ;;  %v2389_v34 = vshll.u32 %v5100_v27, 16  ;;  %s4948_s8 = smul.u32 160, %s157_s10 }
 0x11c   : > { %4520 = vmatprep.mubr.msk.bf16.mxu0 %vm5126_vm0, %v5125_v1 }
 0x11d   : > { %v2391_v13 = vrot.slane %v2389_v34, 3  ;;  %s6018_s12 = scalar_lea.vmem [#allocation2], %s4948_s8 }
 0x11e   : > { %4647 = vmatpush3.bf16.msra.mxu1 %v5096_v31  ;;  %v2388_v31 = vrot.slane %v2386_v29, 2 }
 0x121   : > { %4629 = vmatmul.mubr.msk.bf16.gmra.mrb[28].mxu1 %vm240_vm2, %v3028_v36  ;;  %v2392_v36 = vor.u32 %v2391_v13, %v2388_v31 }
 0x122   : > { %4632 = vmatprep.mubr.msk.bf16.mxu1 %vm5126_vm0, %v5125_v1 }
 0x123   : > { %4521 = vmatmul.mubr.msk.bf16.gmra.mrb[32].mxu0 %vm240_vm2, %v2202_v54  ;;  %v2393_v30 = vsel %vm2340_vm6, %v2383_v33, %v2392_v36 }
 0x124   : > { %4524 = vmatprep.mubr.msk.bf16.mxu0 %vm5126_vm0, %v5125_v1 }
 0x129   : > { %4633 = vmatmul.mubr.msk.bf16.gmra.mrb[32].mxu1 %vm240_vm2, %v3037_v28 }
 0x12a   : > { %4636 = vmatprep.mubr.msk.bf16.mxu1 %vm5126_vm0, %v5125_v1 }
 0x12b   : > { %4525 = vmatmul.mubr.msk.bf16.gmra.mrb[36].mxu0 %vm240_vm2, %v2204_v40 }
 0x12c   : > { %4536 = vmatprep.mubr.msk.bf16.mxu0 %vm5126_vm0, %v5125_v1 }
 0x131   : > { %4637 = vmatmul.mubr.msk.bf16.gmra.mrb[36].mxu1 %vm240_vm2, %v3046_v62 }
 0x132   : > { %4648 = vmatprep.mubr.msk.bf16.mxu1 %vm5126_vm0, %v5125_v1 }
 0x133   : > { %4537 = vmatmul.mubr.msk.bf16.vlgmr.msra.gmra.mrb[20].mxu0 %vm240_vm2, %v2357_v14 }
 0x134   : > { %4540 = vmatprep.mubr.msk.bf16.mxu0 %vm5126_vm0, %v5125_v1 }
 0x139   : > { %4649 = vmatmul.mubr.msk.bf16.vlgmr.msra.gmra.mrb[20].mxu1 %vm240_vm2, %v3185_v15 }
 0x13a   : > { %4652 = vmatprep.mubr.msk.bf16.mxu1 %vm5126_vm0, %v5125_v1 }
 0x13b   : > { %4541 = vmatmul.mubr.msk.bf16.gmra.mrb[24].mxu0 %vm240_vm2, %v2366_v18 }
 0x13c   : > { %4544 = vmatprep.mubr.msk.bf16.mxu0 %vm5126_vm0, %v5125_v1 }
 0x141   : > { %4653 = vmatmul.mubr.msk.bf16.gmra.mrb[24].mxu1 %vm240_vm2, %v3187_v22 }
 0x142   : > { %4656 = vmatprep.mubr.msk.bf16.mxu1 %vm5126_vm0, %v5125_v1 }
 0x143   : > { %4545 = vmatmul.mubr.msk.bf16.gmra.mrb[28].mxu0 %vm240_vm2, %v2375_v2 }
 0x144   : > { %4548 = vmatprep.mubr.msk.bf16.mxu0 %vm5126_vm0, %v5125_v1 }
 0x149   : > { %4657 = vmatmul.mubr.msk.bf16.gmra.mrb[28].mxu1 %vm240_vm2, %v3189_v32 }
 0x14a   : > { %4660 = vmatprep.mubr.msk.bf16.mxu1 %vm5126_vm0, %v5125_v1 }
 0x14b   : > { %4549 = vmatmul.mubr.msk.bf16.gmra.mrb[32].mxu0 %vm240_vm2, %v2384_v35 }
 0x14c   : > { %4552 = vmatprep.mubr.msk.bf16.mxu0 %vm5126_vm0, %v5125_v1 }
 0x151   : > { %4661 = vmatmul.mubr.msk.bf16.gmra.mrb[32].mxu1 %vm240_vm2, %v3191_v45 }
 0x152   : > { %4664 = vmatprep.mubr.msk.bf16.mxu1 %vm5126_vm0, %v5125_v1 }
 0x153   : > { %4553 = vmatmul.mubr.msk.bf16.gmra.mrb[36].mxu0 %vm240_vm2, %v2393_v30 }
 0x159   : > { %4665 = vmatmul.mubr.msk.bf16.gmra.mrb[36].mxu1 %vm240_vm2, %v3193_v39 }
 0x166   : > { %v876_v47 = vpop.f32.mrb[0].mxu0 }
 0x167   : > { %v4668_v1 = vadd.f32 %v6012_v44, %v876_v47  ;;  %v4314_v41 = vpop.f32.mrb[1].mxu0 }
 0x168   : > { %v879_v42 = vpop.f32.mrb[2].mxu0 }
 0x169   : > { %v925_v49 = vmax.f32 %v4668_v1, 0.0  ;;  %v4669_v54 = vadd.f32 %v6012_v44, %v879_v42  ;;  %v4315_v28 = vpop.f32.mrb[3].mxu0 }
 0x16b   : > { %v4036_v58 = vpack.c.bf16 %v925_v49, %v925_v49  ;;  %v926_v51 = vmax.f32 %v4669_v54, 0.0 }
 0x16c   : > { %v1667_v24 = vpop.f32.mrb[0].mxu1 }
 0x16d   : > { %v4678_v56 = vadd.f32 %v6012_v44, %v1667_v24  ;;  %v4426_v57 = vpop.f32.mrb[1].mxu1  ;;  %976 = vst.msk [vmem:[%s6018_s12] sm:$0xf] %vm975_vm8, %v4036_v58  ;;  %v4037_v3 = vpack.c.bf16 %v926_v51, %v926_v51 }
 0x16e   : > { %v1670_v61 = vpop.f32.mrb[2].mxu1  ;;  %v884_v5 = vpop.f32.mrb[4].mxu0 }
 0x16f   : > { %v1716_v37 = vmax.f32 %v4678_v56, 0.0  ;;  %v4679_v0 = vadd.f32 %v6012_v44, %v1670_v61  ;;  %v4427_v40 = vpop.f32.mrb[3].mxu1  ;;  %977 = vst.msk [vmem:[%s6018_s12 + $0x4] sm:$0xf] %vm975_vm8, %v4037_v3  ;;  %v4670_v60 = vadd.f32 %v6012_v44, %v884_v5  ;;  %v4318_v6 = vpop.f32.mrb[5].mxu0 }
 0x170   : > { %v887_v7 = vpop.f32.mrb[6].mxu0 }
 0x171   : > { %v4046_v50 = vpack.c.bf16 %v1716_v37, %v1716_v37  ;;  %v1717_v4 = vmax.f32 %v4679_v0, 0.0  ;;  %v927_v63 = vmax.f32 %v4670_v60, 0.0  ;;  %v4671_v10 = vadd.f32 %v6012_v44, %v887_v7  ;;  %v4319_v11 = vpop.f32.mrb[7].mxu0 }
 0x173   : > { %3819 = vst.msk [vmem:[%s6018_s12 + $0x28] sm:$0xf] %vm975_vm8, %v4046_v50  ;;  %v4047_v62 = vpack.c.bf16 %v1717_v4, %v1717_v4  ;;  %v4038_v14 = vpack.c.bf16 %v927_v63, %v927_v63  ;;  %v928_v52 = vmax.f32 %v4671_v10, 0.0 }
 0x174   : > { %v1675_v9 = vpop.f32.mrb[4].mxu1 }
 0x175   : > { %3820 = vst.msk [vmem:[%s6018_s12 + $0x2c] sm:$0xf] %vm975_vm8, %v4047_v62  ;;  %v4680_v12 = vadd.f32 %v6012_v44, %v1675_v9  ;;  %v4430_v8 = vpop.f32.mrb[5].mxu1  ;;  %978 = vst.msk [vmem:[%s6018_s12 + $0x8] sm:$0xf] %vm975_vm8, %v4038_v14  ;;  %v4039_v17 = vpack.c.bf16 %v928_v52, %v928_v52 }
 0x176   : > { %v1678_v43 = vpop.f32.mrb[6].mxu1  ;;  %v892_v19 = vpop.f32.mrb[8].mxu0 }
 0x177   : > { %v1718_v15 = vmax.f32 %v4680_v12, 0.0  ;;  %v4681_v48 = vadd.f32 %v6012_v44, %v1678_v43  ;;  %v4431_v16 = vpop.f32.mrb[7].mxu1  ;;  %979 = vst.msk [vmem:[%s6018_s12 + $0xc] sm:$0xf] %vm975_vm8, %v4039_v17  ;;  %v4672_v21 = vadd.f32 %v6012_v44, %v892_v19  ;;  %v4322_v22 = vpop.f32.mrb[9].mxu0 }
 0x178   : > { %v895_v20 = vpop.f32.mrb[10].mxu0 }
 0x179   : > { %v4048_v55 = vpack.c.bf16 %v1718_v15, %v1718_v15  ;;  %v1719_v18 = vmax.f32 %v4681_v48, 0.0  ;;  %v929_v46 = vmax.f32 %v4672_v21, 0.0  ;;  %v4673_v2 = vadd.f32 %v6012_v44, %v895_v20  ;;  %v4323_v25 = vpop.f32.mrb[11].mxu0 }
 0x17b   : > { %3821 = vst.msk [vmem:[%s6018_s12 + $0x30] sm:$0xf] %vm975_vm8, %v4048_v55  ;;  %v4049_v23 = vpack.c.bf16 %v1719_v18, %v1719_v18  ;;  %v4040_v32 = vpack.c.bf16 %v929_v46, %v929_v46  ;;  %v930_v33 = vmax.f32 %v4673_v2, 0.0 }
 0x17c   : > { %v1683_v59 = vpop.f32.mrb[8].mxu1 }
 0x17d   : > { %3822 = vst.msk [vmem:[%s6018_s12 + $0x34] sm:$0xf] %vm975_vm8, %v4049_v23  ;;  %v4682_v26 = vadd.f32 %v6012_v44, %v1683_v59  ;;  %v4434_v27 = vpop.f32.mrb[9].mxu1  ;;  %980 = vst.msk [vmem:[%s6018_s12 + $0x10] sm:$0xf] %vm975_vm8, %v4040_v32  ;;  %v4041_v31 = vpack.c.bf16 %v930_v33, %v930_v33 }
 0x17e   : > { %v1686_v29 = vpop.f32.mrb[10].mxu1  ;;  %v900_v36 = vpop.f32.mrb[12].mxu0 }
 0x17f   : > { %v1720_v34 = vmax.f32 %v4682_v26, 0.0  ;;  %v4683_v53 = vadd.f32 %v6012_v44, %v1686_v29  ;;  %v4435_v35 = vpop.f32.mrb[11].mxu1  ;;  %981 = vst.msk [vmem:[%s6018_s12 + $0x14] sm:$0xf] %vm975_vm8, %v4041_v31  ;;  %v4674_v38 = vadd.f32 %v6012_v44, %v900_v36  ;;  %v4326_v30 = vpop.f32.mrb[13].mxu0 }
 0x180   : > { %v903_v47 = vpop.f32.mrb[14].mxu0 }
 0x181   : > { %v4050_v13 = vpack.c.bf16 %v1720_v34, %v1720_v34  ;;  %v1721_v45 = vmax.f32 %v4683_v53, 0.0  ;;  %v931_v1 = vmax.f32 %v4674_v38, 0.0  ;;  %v4675_v42 = vadd.f32 %v6012_v44, %v903_v47  ;;  %v4327_v49 = vpop.f32.mrb[15].mxu0 }
 0x183   : > { %3823 = vst.msk [vmem:[%s6018_s12 + $0x38] sm:$0xf] %vm975_vm8, %v4050_v13  ;;  %v4051_v39 = vpack.c.bf16 %v1721_v45, %v1721_v45  ;;  %v4042_v28 = vpack.c.bf16 %v931_v1, %v931_v1  ;;  %v932_v56 = vmax.f32 %v4675_v42, 0.0 }
 0x184   : > { %v1691_v41 = vpop.f32.mrb[12].mxu1 }
 0x185   : > { %3824 = vst.msk [vmem:[%s6018_s12 + $0x3c] sm:$0xf] %vm975_vm8, %v4051_v39  ;;  %v4684_v24 = vadd.f32 %v6012_v44, %v1691_v41  ;;  %v4438_v54 = vpop.f32.mrb[13].mxu1  ;;  %982 = vst.msk [vmem:[%s6018_s12 + $0x18] sm:$0xf] %vm975_vm8, %v4042_v28  ;;  %v4043_v37 = vpack.c.bf16 %v932_v56, %v932_v56 }
 0x186   : > { %v1694_v57 = vpop.f32.mrb[14].mxu1  ;;  %v908_v3 = vpop.f32.mrb[16].mxu0 }
 0x187   : > { %v1722_v58 = vmax.f32 %v4684_v24, 0.0  ;;  %v4685_v51 = vadd.f32 %v6012_v44, %v1694_v57  ;;  %v4439_v61 = vpop.f32.mrb[15].mxu1  ;;  %983 = vst.msk [vmem:[%s6018_s12 + $0x1c] sm:$0xf] %vm975_vm8, %v4043_v37  ;;  %v4676_v50 = vadd.f32 %v6012_v44, %v908_v3  ;;  %v4330_v4 = vpop.f32.mrb[17].mxu0 }
 0x188   : > { %v911_v60 = vpop.f32.mrb[18].mxu0 }
 0x189   : > { %v4052_v0 = vpack.c.bf16 %v1722_v58, %v1722_v58  ;;  %v1723_v40 = vmax.f32 %v4685_v51, 0.0  ;;  %v933_v6 = vmax.f32 %v4676_v50, 0.0  ;;  %v4677_v7 = vadd.f32 %v6012_v44, %v911_v60  ;;  %v4331_v63 = vpop.f32.mrb[19].mxu0 }
 0x18b   : > { %3825 = vst.msk [vmem:[%s6018_s12 + $0x40] sm:$0xf] %vm975_vm8, %v4052_v0  ;;  %v4053_v5 = vpack.c.bf16 %v1723_v40, %v1723_v40  ;;  %v4044_v11 = vpack.c.bf16 %v933_v6, %v933_v6  ;;  %v934_v12 = vmax.f32 %v4677_v7, 0.0 }
 0x18c   : > { %v1699_v62 = vpop.f32.mrb[16].mxu1 }
 0x18d   : > { %3826 = vst.msk [vmem:[%s6018_s12 + $0x44] sm:$0xf] %vm975_vm8, %v4053_v5  ;;  %v4686_v9 = vadd.f32 %v6012_v44, %v1699_v62  ;;  %v4442_v10 = vpop.f32.mrb[17].mxu1  ;;  %984 = vst.msk [vmem:[%s6018_s12 + $0x20] sm:$0xf] %vm975_vm8, %v4044_v11  ;;  %v4045_v15 = vpack.c.bf16 %v934_v12, %v934_v12 }
 0x18e   : > { %v1702_v8 = vpop.f32.mrb[18].mxu1 }
 0x18f   : > { %v1724_v14 = vmax.f32 %v4686_v9, 0.0  ;;  %v4687_v52 = vadd.f32 %v6012_v44, %v1702_v8  ;;  %v4443_v43 = vpop.f32.mrb[19].mxu1  ;;  %985 = vst.msk [vmem:[%s6018_s12 + $0x24] sm:$0xf] %vm975_vm8, %v4045_v15 }
 0x191   : > { %v4054_v48 = vpack.c.bf16 %v1724_v14, %v1724_v14  ;;  %v1725_v16 = vmax.f32 %v4687_v52, 0.0 }
 0x193   : > { %3827 = vst.msk [vmem:[%s6018_s12 + $0x48] sm:$0xf] %vm975_vm8, %v4054_v48  ;;  %v4055_v17 = vpack.c.bf16 %v1725_v16, %v1725_v16 }
 0x195   : > { %3828 = vst.msk [vmem:[%s6018_s12 + $0x4c] sm:$0xf] %vm975_vm8, %v4055_v17 }
 0x206   : > { %v2467_v55 = vpop.f32.mrb[20].mxu0 }
 0x207   : > { %v4688_v18 = vadd.f32 %v6012_v44, %v2467_v55  ;;  %v4538_v19 = vpop.f32.mrb[21].mxu0 }
 0x208   : > { %v2470_v21 = vpop.f32.mrb[22].mxu0 }
 0x209   : > { %v2516_v22 = vmax.f32 %v4688_v18, 0.0  ;;  %v4689_v20 = vadd.f32 %v6012_v44, %v2470_v21  ;;  %v4539_v46 = vpop.f32.mrb[23].mxu0 }
 0x20b   : > { %v4056_v25 = vpack.c.bf16 %v2516_v22, %v2516_v22  ;;  %v2517_v26 = vmax.f32 %v4689_v20, 0.0 }
 0x20c   : > { %v3267_v23 = vpop.f32.mrb[20].mxu1 }
 0x20d   : > { %v4698_v59 = vadd.f32 %v6012_v44, %v3267_v23  ;;  %v4650_v2 = vpop.f32.mrb[21].mxu1  ;;  %3921 = vst.msk [vmem:[%s6018_s12 + $0x50] sm:$0xf] %vm975_vm8, %v4056_v25  ;;  %v4057_v34 = vpack.c.bf16 %v2517_v26, %v2517_v26 }
 0x20e   : > { %v3270_v27 = vpop.f32.mrb[22].mxu1  ;;  %v2475_v31 = vpop.f32.mrb[24].mxu0 }
 0x20f   : > { %v3316_v32 = vmax.f32 %v4698_v59, 0.0  ;;  %v4699_v33 = vadd.f32 %v6012_v44, %v3270_v27  ;;  %v4651_v29 = vpop.f32.mrb[23].mxu1  ;;  %3922 = vst.msk [vmem:[%s6018_s12 + $0x54] sm:$0xf] %vm975_vm8, %v4057_v34  ;;  %v4690_v13 = vadd.f32 %v6012_v44, %v2475_v31  ;;  %v4542_v45 = vpop.f32.mrb[25].mxu0 }
 0x210   : > { %v2478_v38 = vpop.f32.mrb[26].mxu0 }
 0x211   : > { %v4066_v53 = vpack.c.bf16 %v3316_v32, %v3316_v32  ;;  %v3317_v35 = vmax.f32 %v4699_v33, 0.0  ;;  %v2518_v30 = vmax.f32 %v4690_v13, 0.0  ;;  %v4691_v47 = vadd.f32 %v6012_v44, %v2478_v38  ;;  %v4543_v1 = vpop.f32.mrb[27].mxu0 }
 0x213   : > { %4023 = vst.msk [vmem:[%s6018_s12 + $0x78] sm:$0xf] %vm975_vm8, %v4066_v53  ;;  %v4067_v36 = vpack.c.bf16 %v3317_v35, %v3317_v35  ;;  %v4058_v49 = vpack.c.bf16 %v2518_v30, %v2518_v30  ;;  %v2519_v24 = vmax.f32 %v4691_v47, 0.0 }
 0x214   : > { %v3275_v39 = vpop.f32.mrb[24].mxu1 }
 0x215   : > { %4024 = vst.msk [vmem:[%s6018_s12 + $0x7c] sm:$0xf] %vm975_vm8, %v4067_v36  ;;  %v4700_v41 = vadd.f32 %v6012_v44, %v3275_v39  ;;  %v4654_v42 = vpop.f32.mrb[25].mxu1  ;;  %3923 = vst.msk [vmem:[%s6018_s12 + $0x58] sm:$0xf] %vm975_vm8, %v4058_v49  ;;  %v4059_v58 = vpack.c.bf16 %v2519_v24, %v2519_v24 }
 0x216   : > { %v3278_v54 = vpop.f32.mrb[26].mxu1  ;;  %v2483_v37 = vpop.f32.mrb[28].mxu0 }
 0x217   : > { %v3318_v28 = vmax.f32 %v4700_v41, 0.0  ;;  %v4701_v56 = vadd.f32 %v6012_v44, %v3278_v54  ;;  %v4655_v57 = vpop.f32.mrb[27].mxu1  ;;  %3924 = vst.msk [vmem:[%s6018_s12 + $0x5c] sm:$0xf] %vm975_vm8, %v4059_v58  ;;  %v4692_v0 = vadd.f32 %v6012_v44, %v2483_v37  ;;  %v4546_v40 = vpop.f32.mrb[29].mxu0  ;;  %v3414_v37 = vld [vmem:[%s6018_s12 + $0x18] sm:$0xff] (%p5172_p4)  }
 0x218   : > { %v2486_v50 = vpop.f32.mrb[30].mxu0  ;;  %v3422_v40 = vld [vmem:[%s6018_s12 + $0x28] sm:$0xff] (%p5172_p4)   ;;  %3415 = vst [vmem:[%s6148_s14 + $0x18] sm:$0xff] (%p5172_p4), %v3414_v37  }
 0x219   : > { %v4068_v51 = vpack.c.bf16 %v3318_v28, %v3318_v28  ;;  %v3319_v61 = vmax.f32 %v4701_v56, 0.0  ;;  %v2520_v4 = vmax.f32 %v4692_v0, 0.0  ;;  %v4693_v60 = vadd.f32 %v6012_v44, %v2486_v50  ;;  %v4547_v6 = vpop.f32.mrb[31].mxu0  ;;  %v3418_v0 = vld [vmem:[%s6018_s12 + $0x20] sm:$0xff] (%p5172_p4)   ;;  %v3430_v50 = vld [vmem:[%s6018_s12 + $0x38] sm:$0xff] (%p5172_p4)   ;;  %3423 = vst [vmem:[%s6148_s14 + $0x50] sm:$0xff] (%p5172_p4), %v3422_v40  }
 0x21a   : > { %3419 = vst [vmem:[%s6148_s14 + $0x20] sm:$0xff] (%p5172_p4), %v3418_v0   ;;  %3431 = vst [vmem:[%s6148_s14 + $0x60] sm:$0xff] (%p5172_p4), %v3430_v50  }
 0x21b   : > { %4025 = vst.msk [vmem:[%s6018_s12 + $0x80] sm:$0xf] %vm975_vm8, %v4068_v51  ;;  %v4069_v3 = vpack.c.bf16 %v3319_v61, %v3319_v61  ;;  %v4060_v63 = vpack.c.bf16 %v2520_v4, %v2520_v4  ;;  %v2521_v9 = vmax.f32 %v4693_v60, 0.0  ;;  %v3406_v51 = vld [vmem:[%s6018_s12 + $0x8] sm:$0xff] (%p5172_p4)   ;;  %v3410_v61 = vld [vmem:[%s6018_s12 + $0x10] sm:$0xff] (%p5172_p4)   ;;  %v3434_v4 = vld [vmem:[%s6018_s12 + $0x40] sm:$0xff] (%p5172_p4)  }
 0x21c   : > { %v3283_v5 = vpop.f32.mrb[28].mxu1  ;;  %3407 = vst [vmem:[%s6148_s14 + $0x8] sm:$0xff] (%p5172_p4), %v3406_v51   ;;  %3411 = vst [vmem:[%s6148_s14 + $0x10] sm:$0xff] (%p5172_p4), %v3410_v61   ;;  %v3442_v60 = vld [vmem:[%s6018_s12 + $0x50] sm:$0xff] (%p5172_p4)  }
 0x21d   : > { %4026 = vst.msk [vmem:[%s6018_s12 + $0x84] sm:$0xf] %vm975_vm8, %v4069_v3  ;;  %v4702_v62 = vadd.f32 %v6012_v44, %v3283_v5  ;;  %v4658_v7 = vpop.f32.mrb[29].mxu1  ;;  %3925 = vst.msk [vmem:[%s6018_s12 + $0x60] sm:$0xf] %vm975_vm8, %v4060_v63  ;;  %v4061_v14 = vpack.c.bf16 %v2521_v9, %v2521_v9  ;;  %v3426_v3 = vld [vmem:[%s6018_s12 + $0x30] sm:$0xff] (%p5172_p4)  }
 0x21e   : > { %v3286_v10 = vpop.f32.mrb[30].mxu1  ;;  %v2491_v15 = vpop.f32.mrb[32].mxu0  ;;  %3427 = vst [vmem:[%s6148_s14 + $0x58] sm:$0xff] (%p5172_p4), %v3426_v3   ;;  %3435 = vst [vmem:[%s6148_s14 + $0x68] sm:$0xff] (%p5172_p4), %v3434_v4   ;;  %v3438_v5 = vld [vmem:[%s6018_s12 + $0x48] sm:$0xff] (%p5172_p4)   ;;  %v3446_v6 = vld [vmem:[%s6018_s12 + $0x58] sm:$0xff] (%p5172_p4)  }
 0x21f   : > { %v3320_v11 = vmax.f32 %v4702_v62, 0.0  ;;  %v4703_v12 = vadd.f32 %v6012_v44, %v3286_v10  ;;  %v4659_v8 = vpop.f32.mrb[31].mxu1  ;;  %3926 = vst.msk [vmem:[%s6018_s12 + $0x64] sm:$0xf] %vm975_vm8, %v4061_v14  ;;  %v4694_v48 = vadd.f32 %v6012_v44, %v2491_v15  ;;  %v4550_v16 = vpop.f32.mrb[33].mxu0  ;;  %3439 = vst [vmem:[%s6148_s14 + $0x70] sm:$0xff] (%p5172_p4), %v3438_v5  }
 0x220   : > { %v2494_v55 = vpop.f32.mrb[34].mxu0  ;;  %3443 = vst [vmem:[%s6148_s14 + $0xa0] sm:$0xff] (%p5172_p4), %v3442_v60   ;;  %3447 = vst [vmem:[%s6148_s14 + $0xa8] sm:$0xff] (%p5172_p4), %v3446_v6   ;;  %v3462_v9 = vld [vmem:[%s6018_s12 + $0x78] sm:$0xff] (%p5172_p4)  }
 0x221   : > { %v4070_v52 = vpack.c.bf16 %v3320_v11, %v3320_v11  ;;  %v3321_v43 = vmax.f32 %v4703_v12, 0.0  ;;  %v2522_v18 = vmax.f32 %v4694_v48, 0.0  ;;  %v4695_v21 = vadd.f32 %v6012_v44, %v2494_v55  ;;  %v4551_v22 = vpop.f32.mrb[35].mxu0  ;;  %3463 = vst [vmem:[%s6148_s14 + $0xf0] sm:$0xff] (%p5172_p4), %v3462_v9  }
 0x223   : > { %4027 = vst.msk [vmem:[%s6018_s12 + $0x88] sm:$0xf] %vm975_vm8, %v4070_v52  ;;  %v4071_v17 = vpack.c.bf16 %v3321_v43, %v3321_v43  ;;  %v4062_v46 = vpack.c.bf16 %v2522_v18, %v2522_v18  ;;  %v2523_v59 = vmax.f32 %v4695_v21, 0.0 }
 0x224   : > { %v3291_v19 = vpop.f32.mrb[32].mxu1  ;;  %v3466_v10 = vld [vmem:[%s6018_s12 + $0x80] sm:$0xff] (%p5172_p4)  }
 0x225   : > { %4028 = vst.msk [vmem:[%s6018_s12 + $0x8c] sm:$0xf] %vm975_vm8, %v4071_v17  ;;  %v4704_v23 = vadd.f32 %v6012_v44, %v3291_v19  ;;  %v4662_v20 = vpop.f32.mrb[33].mxu1  ;;  %3927 = vst.msk [vmem:[%s6018_s12 + $0x68] sm:$0xf] %vm975_vm8, %v4062_v46  ;;  %v4063_v32 = vpack.c.bf16 %v2523_v59, %v2523_v59 }
 0x226   : > { %v3294_v2 = vpop.f32.mrb[34].mxu1  ;;  %v2499_v34 = vpop.f32.mrb[36].mxu0  ;;  %v3450_v62 = vld [vmem:[%s6018_s12 + $0x60] sm:$0xff] (%p5172_p4)   ;;  %3467 = vst [vmem:[%s6148_s14 + $0xf8] sm:$0xff] (%p5172_p4), %v3466_v10  }
 0x227   : > { %v3322_v25 = vmax.f32 %v4704_v23, 0.0  ;;  %v4705_v26 = vadd.f32 %v6012_v44, %v3294_v2  ;;  %v4663_v27 = vpop.f32.mrb[35].mxu1  ;;  %3928 = vst.msk [vmem:[%s6018_s12 + $0x6c] sm:$0xf] %vm975_vm8, %v4063_v32  ;;  %v4696_v53 = vadd.f32 %v6012_v44, %v2499_v34  ;;  %v4554_v35 = vpop.f32.mrb[37].mxu0  ;;  %3451 = vst [vmem:[%s6148_s14 + $0xb0] sm:$0xff] (%p5172_p4), %v3450_v62  }
 0x228   : > { %v2502_v13 = vpop.f32.mrb[38].mxu0 }
 0x229   : > { %v4072_v33 = vpack.c.bf16 %v3322_v25, %v3322_v25  ;;  %v3323_v29 = vmax.f32 %v4705_v26, 0.0  ;;  %v2524_v45 = vmax.f32 %v4696_v53, 0.0  ;;  %v4697_v38 = vadd.f32 %v6012_v44, %v2502_v13  ;;  %v4555_v30 = vpop.f32.mrb[39].mxu0 }
 0x22b   : > { %4029 = vst.msk [vmem:[%s6018_s12 + $0x90] sm:$0xf] %vm975_vm8, %v4072_v33  ;;  %v4073_v31 = vpack.c.bf16 %v3323_v29, %v3323_v29  ;;  %v4064_v1 = vpack.c.bf16 %v2524_v45, %v2524_v45  ;;  %v2525_v41 = vmax.f32 %v4697_v38, 0.0 }
 0x22c   : > { %v3299_v36 = vpop.f32.mrb[36].mxu1  ;;  %v3470_v11 = vld [vmem:[%s6018_s12 + $0x88] sm:$0xff] (%p5172_p4)  }
 0x22d   : > { %4030 = vst.msk [vmem:[%s6018_s12 + $0x94] sm:$0xf] %vm975_vm8, %v4073_v31  ;;  %v4706_v39 = vadd.f32 %v6012_v44, %v3299_v36  ;;  %v4666_v47 = vpop.f32.mrb[37].mxu1  ;;  %3929 = vst.msk [vmem:[%s6018_s12 + $0x70] sm:$0xf] %vm975_vm8, %v4064_v1  ;;  %v4065_v28 = vpack.c.bf16 %v2525_v41, %v2525_v41 }
 0x22e   : > { %v3302_v42 = vpop.f32.mrb[38].mxu1  ;;  %v3454_v7 = vld [vmem:[%s6018_s12 + $0x68] sm:$0xff] (%p5172_p4)   ;;  %3471 = vst [vmem:[%s6148_s14 + $0x100] sm:$0xff] (%p5172_p4), %v3470_v11  }
 0x22f   : > { %v3324_v49 = vmax.f32 %v4706_v39, 0.0  ;;  %v4707_v24 = vadd.f32 %v6012_v44, %v3302_v42  ;;  %v4667_v54 = vpop.f32.mrb[39].mxu1  ;;  %3930 = vst.msk [vmem:[%s6018_s12 + $0x74] sm:$0xf] %vm975_vm8, %v4065_v28  ;;  %3383 = sbr.rel (!%p5172_p4) target bundleno = 574 (0x23e), region = 36  ;;  %v3402_v44 = vld [vmem:[%s6018_s12] sm:$0xff] (%p5172_p4)  }
 0x230   : > { %3403 = vst [vmem:[%s6148_s14] sm:$0xff] (%p5172_p4), %v3402_v44   ;;  %3455 = vst [vmem:[%s6148_s14 + $0xb8] sm:$0xff] (%p5172_p4), %v3454_v7  }
 0x231   : > { %v4074_v56 = vpack.c.bf16 %v3324_v49, %v3324_v49  ;;  %v3325_v57 = vmax.f32 %v4707_v24, 0.0 }
 0x233   : > { %4031 = vst.msk [vmem:[%s6018_s12 + $0x98] sm:$0xf] %vm975_vm8, %v4074_v56  ;;  %v4075_v58 = vpack.c.bf16 %v3325_v57, %v3325_v57 }
 0x234   : > { %v3474_v12 = vld [vmem:[%s6018_s12 + $0x90] sm:$0xff] (%p5172_p4)  }
 0x235   : > { %4032 = vst.msk [vmem:[%s6018_s12 + $0x9c] sm:$0xf] %vm975_vm8, %v4075_v58  ;;  %3475 = vst [vmem:[%s6148_s14 + $0x108] sm:$0xff] (%p5172_p4), %v3474_v12  }
 0x236   : > { %v3458_v63 = vld [vmem:[%s6018_s12 + $0x70] sm:$0xff]  }
 0x237   : > { %3459 = vst [vmem:[%s6148_s14 + $0xc0] sm:$0xff] %v3458_v63  }
 0x23c   : > { %v3478_v8 = vld [vmem:[%s6018_s12 + $0x98] sm:$0xff]  }
 0x23d   : > { %3479 = vst [vmem:[%s6148_s14 + $0x110] sm:$0xff] %v3478_v8  }
 0x23e PF: > { %p10_p8 = scmp.ge.s32.totalorder %s5162_s16, 4   ;;  %s6199_s12 = smov %s5119_s13 }
 0x23f   : > { %s6200_s13 = smov %s5170_s19  ;;  %s6201_s14 = smov %s5162_s16 }
 0x240   :  { %12 = sbr.rel (!%p10_p8) target bundleno = 2 (0x2), region = 121 }

// kernel: vae_forward.15
= control target key start
LH: loop header
LB: loop body
LE: loop exit
PB: predicated region body
PF: predicated region fallthrough
CT: control target
= control target key end

     0   :  { %s5579_s12 = smov 0   ;;  %s6635_s0 = inlined_call_operand.vmem [shape: bf16[1,2,326,32], index: 0, kind: input, shape index: {}]   ;;  %s6636_s1 = inlined_call_operand.vmem [shape: bf16[9,32,4], index: 1, kind: input, shape index: {}]   ;;  %s6637_s2 = inlined_call_operand.vmem [shape: f32[1,4], index: 2, kind: input, shape index: {}]   ;;  %s6638_s3 = inlined_call_operand.vmem [shape: f32[1,2,288,4], index: 3, kind: output, shape index: {}]  }
   0x1 LB: > { %s4186_s13 = sadd.s32 4294967295, %s5557_s12   ;;  %p4190_p0 = scmp.ge.s32.totalorder %s5557_s12, 1  ;;  %s5557_s12 = sphi %s5579_s12, %s13_s12  }
   0x2   : > { %p137_p1 = scmp.lt.s32.totalorder %s5557_s12, 3 }
   0x4   : > { %p138_p2 = pnand %p4190_p0, %p137_p1 }
   0x5   : > { %v5366_v0 = vld [vmem:[%s6636_s1] sm:$0xff] (!%p138_p2)   ;;  %p161_p3 = scmp.lt.s32.totalorder (!%p138_p2), %s4186_s13, 1  ;;  %v5367_v1 = vld [vmem:[%s6636_s1 + $0x8] sm:$0xff] (!%p138_p2)   ;;  %v5374_v4 = vld [vmem:[%s6636_s1 + $0x50] sm:$0xff] (!%p138_p2)   ;;  %vm321_vm0 = vcmask (!%p138_p2), 261120   ;;  %vm2397_vm2 = vcmask (!%p138_p2), 1045504  }
   0x6   : > { %141 = sbr.rel (%p138_p2) target bundleno = 584 (0x248), region = 32  ;;  %4668 = vmatprep.subr.bf16.mxu1 (!%p138_p2), %v5366_v0  ;;  %v5368_v2 = vld [vmem:[%s6636_s1 + $0x40] sm:$0xff] (!%p138_p2)   ;;  %v5371_v3 = vld [vmem:[%s6636_s1 + $0x48] sm:$0xff] (!%p138_p2)   ;;  %v5378_v5 = vld [vmem:[%s6636_s1 + $0x10] sm:$0xff] (!%p138_p2)   ;;  %vm1938_vm1 = vsmask.f32 (!%p138_p2), 6400 }
   0x7   : > { %4669 = vmatpush3.bf16.msra.mxu1 (!%p138_p2), %v5366_v0  ;;  %4828 = vmatprep.subr.bf16.mxu0 (!%p138_p2), %v5368_v2  ;;  %v5387_v56 = vld [vmem:[%s6636_s1 + $0x58] sm:$0xff] (!%p138_p2)   ;;  %vm724_vm3 = vsmask.f32 (!%p138_p2), 7424  ;;  %vm1161_vm4 = vcmask (!%p138_p2), 1046528   ;;  %vm3174_vm5 = vsmask.f32 (!%p138_p2), 5376 }
   0x8   : > { %4670 = vmatprep.subr.bf16.mxu1 (!%p138_p2), %v5367_v1  ;;  %4829 = vmatpush3.bf16.msra.mxu0 (!%p138_p2), %v5368_v2  ;;  %vm3633_vm6 = vcmask (!%p138_p2), 1044480   ;;  %vm4094_vm7 = vcmask (!%p138_p2), 31744  }
   0x9   : > { %4830 = vmatprep.subr.bf16.mxu0 (!%p138_p2), %v5371_v3 }
   0xb   : > { %4671 = vmatpush3.bf16.msra.mxu1 (!%p138_p2), %v5367_v1 }
   0xc   : > { %4708 = vmatprep.subr.bf16.mxu1 (!%p138_p2), %v5378_v5  ;;  %4831 = vmatpush3.bf16.msra.mxu0 (!%p138_p2), %v5371_v3 }
   0xd   : > { %s6640_s13 = smov (!%p161_p3, %s4186_s13), 1  ;;  %4868 = vmatprep.subr.bf16.mxu0 %v5374_v4 }
   0xe   : > { %s5356_s22 = smul.u32 164, %s6640_s13 }
   0xf   : > { %s5357_s8 = smul.u32 288, %s6640_s13 }
  0x10   : > { %s5608_s27 = scalar_lea.vmem %s6635_s0, %s5356_s22 }
  0x11   : > { %v5369_v6 = vld [vmem:[%s5608_s27] sm:$0xff]   ;;  %v5370_v7 = vld [vmem:[%s5608_s27 + $0x8] sm:$0xff]   ;;  %v5625_v11 = vld [vmem:[%s5608_s27 + $0x10] sm:$0xff]   ;;  %s6476_s13 = scalar_lea.vmem %s6638_s3, %s5357_s8 }
  0x12   : > { %4672 = vmatprep.mubr.msk.bf16.mxu1 %vm321_vm0, %v5369_v6  ;;  %v1478_v8 = vld [vmem:[%s5608_s27 + $0x8] sm:$0xe]  ;;  %v5618_v9 = vld [vmem:[%s5608_s27 + $0xc] sm:$0xf]  ;;  %v5375_v12 = vld [vmem:[%s5608_s27 + $0x10] sm:$0xff]   ;;  %v1948_v15 = vshrl.u32 %v5625_v11, 16 }
  0x13   : > { %4673 = vmatmul.mubr.msk.bf16.vlgmr.msra.gmra.mrb[0].mxu1 %vm321_vm0, %v5370_v7  ;;  %v5622_v10 = vcombine.low %v1478_v8, %v5618_v9  ;;  %v1951_v16 = vshll.u32 %v5625_v11, 16  ;;  %v5634_v17 = vld [vmem:[%s5608_s27 + $0x18] sm:$0xff]   ;;  %v5638_v23 = vld [vmem:[%s5608_s27 + $0x20] sm:$0xff]   ;;  %v5646_v33 = vld [vmem:[%s5608_s27 + $0x28] sm:$0xff]  }
  0x14   : > { %4709 = vmatpush3.bf16.msra.mxu1 %v5378_v5  ;;  %4676 = vmatprep.mubr.msk.bf16.mxu1 %vm321_vm0, %v5375_v12  ;;  %v1950_v20 = vrot.slane %v1948_v15, 1  ;;  %v5377_v22 = vld [vmem:[%s5608_s27 + $0x18] sm:$0xff]   ;;  %v1957_v24 = vshrl.u32 %v5634_v17, 16  ;;  %v1960_v25 = vshll.u32 %v5634_v17, 16  ;;  %v1966_v28 = vshrl.u32 %v5638_v23, 16  ;;  %v5380_v32 = vld [vmem:[%s5608_s27 + $0x20] sm:$0xff]  }
  0x15   : > { %v1940_v13 = vshrl.u32 %v5622_v10, 16  ;;  %v1943_v14 = vshll.u32 %v5622_v10, 16  ;;  %v1953_v21 = vrot.slane %v1951_v16, 2  ;;  %v1969_v29 = vshll.u32 %v5638_v23, 16  ;;  %v5655_v40 = vld [vmem:[%s5608_s27 + $0x30] sm:$0xff]   ;;  %v5382_v45 = vld [vmem:[%s5608_s27 + $0x28] sm:$0xff]  }
  0x16   : > { %v1959_v30 = vrot.slane %v1957_v24, 1  ;;  %v1962_v31 = vrot.slane %v1960_v25, 2  ;;  %v1968_v35 = vrot.slane %v1966_v28, 1  ;;  %v1975_v38 = vshrl.u32 %v5646_v33, 16  ;;  %v5664_v49 = vld [vmem:[%s5608_s27 + $0x38] sm:$0xff]   ;;  %v5384_v52 = vld [vmem:[%s5608_s27 + $0x30] sm:$0xff]  }
  0x17   : > { %v1942_v18 = vrot.slane %v1940_v13, 1  ;;  %v1945_v19 = vrot.slane %v1943_v14, 2  ;;  %v1954_v27 = vor.u32 %v1953_v21, %v1950_v20  ;;  %v1971_v36 = vrot.slane %v1969_v29, 2  ;;  %v5674_v57 = vld [vmem:[%s5608_s27 + $0x40] sm:$0xff]   ;;  %v5678_v61 = vld [vmem:[%s5608_s27 + $0x48] sm:$0xff]   ;;  %v5386_v5 = vld [vmem:[%s5608_s27 + $0x38] sm:$0xff]  }
  0x18   : > { %v1963_v37 = vor.u32 %v1962_v31, %v1959_v30  ;;  %v1978_v39 = vshll.u32 %v5646_v33, 16  ;;  %v1977_v43 = vrot.slane %v1975_v38, 1  ;;  %v1984_v46 = vshrl.u32 %v5655_v40, 16  ;;  %v5389_v8 = vld [vmem:[%s5608_s27 + $0x40] sm:$0xff]   ;;  %v5703_v21 = vld [vmem:[%s5608_s27 + $0x58] sm:$0xff]   ;;  %v5391_v24 = vld [vmem:[%s5608_s27 + $0x48] sm:$0xff]  }
  0x19   : > { %v1946_v26 = vor.u32 %v1945_v19, %v1942_v18  ;;  %v1972_v41 = vor.u32 %v1971_v36, %v1968_v35  ;;  %v1987_v48 = vshll.u32 %v5655_v40, 16  ;;  %v1993_v54 = vshrl.u32 %v5664_v49, 16  ;;  %v5397_v18 = vld [vmem:[%s6636_s1 + $0x60] sm:$0xff]   ;;  %v5393_v28 = vld [vmem:[%s5608_s27 + $0x50] sm:$0xff]  }
  0x1a   : > { %v1964_v42 = vsel %vm1938_vm1, %v1954_v27, %v1963_v37  ;;  %v1980_v44 = vrot.slane %v1978_v39, 2  ;;  %v1986_v51 = vrot.slane %v1984_v46, 1  ;;  %v1996_v55 = vshll.u32 %v5664_v49, 16 }
  0x1b   : > { %v1955_v34 = vsel %vm1938_vm1, %v1946_v26, %v1954_v27  ;;  %4677 = vmatmul.mubr.msk.bf16.gmra.mrb[4].mxu1 %vm321_vm0, %v5377_v22  ;;  %v1973_v47 = vsel %vm1938_vm1, %v1963_v37, %v1972_v41  ;;  %v1989_v53 = vrot.slane %v1987_v48, 2  ;;  %v1995_v59 = vrot.slane %v1993_v54, 1  ;;  %v5400_v27 = vld [vmem:[%s6636_s1 + $0x18] sm:$0xff]   ;;  %v589_v48 = vld [vmem:[%s5608_s27] sm:$0xf] }
  0x1c   : > { %4832 = vmatprep.mubr.msk.bf16.mxu0 %vm321_vm0, %v1955_v34  ;;  %4680 = vmatprep.mubr.msk.bf16.mxu1 %vm321_vm0, %v5380_v32  ;;  %v1981_v50 = vor.u32 %v1980_v44, %v1977_v43  ;;  %v1998_v60 = vrot.slane %v1996_v55, 2  ;;  %v2002_v63 = vshrl.u32 %v5674_v57, 16  ;;  %v2005_v0 = vshll.u32 %v5674_v57, 16  ;;  %v2388_v34 = vld [vmem:[%s5608_s27 + $0x8] sm:$0xc]  ;;  %v5398_v43 = vld [vmem:[%s5608_s27 + $0x60] sm:$0xff]  }
  0x1d   : > { %4833 = vmatmul.mubr.msk.bf16.vlgmr.msra.gmra.mrb[0].mxu0 %vm321_vm0, %v1964_v42  ;;  %v1990_v58 = vor.u32 %v1989_v53, %v1986_v51  ;;  %v2011_v6 = vshrl.u32 %v5678_v61, 16  ;;  %v2014_v12 = vshll.u32 %v5678_v61, 16  ;;  %v2029_v30 = vshrl.u32 %v5703_v21, 16  ;;  %4710 = vmatprep.subr.bf16.mxu1 %v5400_v27 }
  0x1e   : > { %4869 = vmatpush3.bf16.msra.mxu0 %v5374_v4  ;;  %4836 = vmatprep.mubr.msk.bf16.mxu0 %vm321_vm0, %v1973_v47  ;;  %v1982_v62 = vsel %vm1938_vm1, %v1972_v41, %v1981_v50  ;;  %v2004_v2 = vrot.slane %v2002_v63, 1  ;;  %v2007_v3 = vrot.slane %v2005_v0, 2  ;;  %v5686_v4 = vld [vmem:[%s5608_s27 + $0x50] sm:$0xff]   ;;  %v1999_v7 = vor.u32 %v1998_v60, %v1995_v59  ;;  %v5395_v41 = vld [vmem:[%s5608_s27 + $0x58] sm:$0xff]   ;;  %v5403_v63 = vld [vmem:[%s5608_s27 + $0x80] sm:$0xff]  }
  0x1f   : > { %4870 = vmatprep.subr.bf16.mxu0 %v5387_v56  ;;  %v1991_v1 = vsel %vm1938_vm1, %v1981_v50, %v1990_v58  ;;  %v2020_v13 = vshrl.u32 %v5686_v4, 16  ;;  %v2023_v14 = vshll.u32 %v5686_v4, 16  ;;  %v2013_v16 = vrot.slane %v2011_v6, 1  ;;  %4711 = vmatpush3.bf16.msra.mxu1 %v5400_v27  ;;  %v5740_v50 = vld [vmem:[%s5608_s27 + $0x4] sm:$0xf]  ;;  %v5774_v6 = vld [vmem:[%s5608_s27 + $0x18] sm:$0xff]  }
  0x20   : > { %v2008_v15 = vor.u32 %v2007_v3, %v2004_v2  ;;  %v2000_v19 = vsel %vm1938_vm1, %v1990_v58, %v1999_v7  ;;  %v2016_v20 = vrot.slane %v2014_v12, 2  ;;  %v2032_v31 = vshll.u32 %v5703_v21, 16  ;;  %v5769_v3 = vld [vmem:[%s5608_s27 + $0x10] sm:$0xff]   ;;  %v5404_v12 = vld [vmem:[%s5608_s27 + $0x88] sm:$0xff]  }
  0x21   : > { %v2022_v25 = vrot.slane %v2020_v13, 1  ;;  %v2025_v26 = vrot.slane %v2023_v14, 2  ;;  %v2031_v36 = vrot.slane %v2029_v30, 1  ;;  %v4372_v39 = vcombine.low %v2388_v34, %v5618_v9  ;;  %v5735_v9 = vld [vmem:[%s6636_s1 + $0x20] sm:$0xff]   ;;  %v5784_v14 = vld [vmem:[%s6636_s1 + $0x70] sm:$0xff]  }
  0x22   : > { %4871 = vmatpush3.bf16.msra.mxu0 %v5387_v56  ;;  %v2009_v22 = vsel %vm1938_vm1, %v1999_v7, %v2008_v15  ;;  %v2017_v29 = vor.u32 %v2016_v20, %v2013_v16  ;;  %v2034_v37 = vrot.slane %v2032_v31, 2  ;;  %4748 = vmatprep.subr.bf16.mxu1 %v5735_v9  ;;  %v2401_v51 = vrot.slane %v5634_v17, 2  ;;  %v5754_v56 = vld [vmem:[%s5608_s27 + $0x8] sm:$0xff]  }
  0x23   : > { %4681 = vmatmul.mubr.msk.bf16.gmra.mrb[8].mxu1 %vm321_vm0, %v5382_v45  ;;  %4908 = vmatprep.subr.bf16.mxu0 %v5397_v18  ;;  %v2026_v32 = vor.u32 %v2025_v26, %v2022_v25  ;;  %v2398_v44 = vrot.slane %v4372_v39, 2  ;;  %v2399_v45 = vrot.slane %v5625_v11, 2  ;;  %v5399_v11 = vld [vmem:[%s5608_s27 + $0x68] sm:$0xff]   ;;  %v2403_v53 = vrot.slane %v5638_v23, 2  ;;  %v5402_v23 = vld [vmem:[%s5608_s27 + $0x78] sm:$0xff]  }
  0x24   : > { %4684 = vmatprep.mubr.msk.bf16.mxu1 %vm321_vm0, %v5384_v52  ;;  %v2018_v35 = vsel %vm1938_vm1, %v2008_v15, %v2017_v29  ;;  %v5724_v42 = vor.u32 %v2034_v37, %v2031_v36  ;;  %v5401_v52 = vld [vmem:[%s5608_s27 + $0x70] sm:$0xff]   ;;  %v4236_v54 = vcombine.low %v589_v48, %v5740_v50  ;;  %v5410_v17 = vld [vmem:[%s6636_s1 + $0x68] sm:$0xff]   ;;  %v2405_v60 = vrot.slane %v5646_v33, 2  ;;  %v5817_v37 = vld [vmem:[%s5608_s27 + $0x60] sm:$0xff]  }
  0x25   : > { %4837 = vmatmul.mubr.msk.bf16.gmra.mrb[4].mxu0 %vm321_vm0, %v1982_v62  ;;  %v2027_v38 = vsel %vm1938_vm1, %v2017_v29, %v2026_v32  ;;  %v2400_v47 = vsel %vm2397_vm2, %v2398_v44, %v2399_v45  ;;  %v2402_v55 = vsel %vm2397_vm2, %v2399_v45, %v2401_v51  ;;  %v2404_v58 = vsel %vm2397_vm2, %v2401_v51, %v2403_v53  ;;  %v5802_v29 = vld [vmem:[%s5608_s27 + $0x28] sm:$0xff]   ;;  %v5830_v45 = vld [vmem:[%s5608_s27 + $0x38] sm:$0xff]  }
  0x26   : > { %4840 = vmatprep.mubr.msk.bf16.mxu0 %vm321_vm0, %v1991_v1  ;;  %v2036_v46 = vsel %vm1938_vm1, %v2026_v32, %v5724_v42  ;;  %v728_v59 = vshll.u32 %v4236_v54, 16  ;;  %v2407_v62 = vrot.slane %v5655_v40, 2  ;;  %v733_v0 = vshll.u32 %v5754_v56, 16  ;;  %v5821_v39 = vld [vmem:[%s5608_s27 + $0x68] sm:$0xff]  }
  0x27   : > { %v726_v1 = vshrl.u32 %v4236_v54, 16  ;;  %v741_v13 = vshll.u32 %v5769_v3, 16  ;;  %v2411_v15 = vrot.slane %v5674_v57, 2  ;;  %v737_v16 = vshrl.u32 %v5754_v56, 16 }
  0x28   : > { %v730_v2 = vrot.slane %v728_v59, 1  ;;  %v2408_v33 = vsel %vm2397_vm2, %v2405_v60, %v2407_v62  ;;  %v735_v7 = vrot.slane %v733_v0, 1  ;;  %v2413_v26 = vrot.slane %v5678_v61, 2  ;;  %v1152_v59 = vld [vmem:[%s5608_s27] sm:$0xe] }
  0x29   : > { %v743_v20 = vrot.slane %v741_v13, 1  ;;  %v2415_v30 = vrot.slane %v5686_v4, 2  ;;  %v753_v34 = vshrl.u32 %v5774_v6, 16  ;;  %v765_v36 = vshll.u32 %v5802_v29, 16  ;;  %v5434_v4 = vld [vmem:[%s6636_s1 + $0x28] sm:$0xff]  }
  0x2a   : > { %v731_v40 = vor.u32 %v730_v2, %v726_v1  ;;  %v739_v25 = vor.u32 %v737_v16, %v735_v7  ;;  %v2417_v51 = vrot.slane %v5703_v21, 2  ;;  %v5419_v2 = vld [vmem:[%s5608_s27 + $0x40] sm:$0xff]   ;;  %v785_v13 = vshrl.u32 %v5830_v45, 16 }
  0x2b   : > { %4685 = vmatmul.mubr.msk.bf16.gmra.mrb[12].mxu1 %vm321_vm0, %v5386_v5  ;;  %v2406_v5 = vsel %vm2397_vm2, %v2403_v53, %v2405_v60  ;;  %v767_v48 = vrot.slane %v765_v36, 1  ;;  %v769_v53 = vshrl.u32 %v5802_v29, 16  ;;  %v4279_v60 = vcombine.low %v1152_v59, %v5740_v50  ;;  %v5935_v59 = vld [vmem:[%s5608_s27 + $0x68] sm:$0xff]  }
  0x2c   : > { %4688 = vmatprep.mubr.msk.bf16.mxu1 %vm321_vm0, %v5389_v8  ;;  %v2409_v8 = vrot.slane %v5664_v49, 2  ;;  %v736_v49 = vsel %vm724_vm3, %v731_v40, %v735_v7  ;;  %v744_v32 = vsel %vm724_vm3, %v739_v25, %v743_v20  ;;  %v1167_v50 = vrot.slane %v5774_v6, 1 }
  0x2d   : > { %4841 = vmatmul.mubr.msk.bf16.gmra.mrb[8].mxu0 %vm321_vm0, %v2000_v19  ;;  %v749_v19 = vshll.u32 %v5774_v6, 16  ;;  %v771_v40 = vor.u32 %v769_v53, %v767_v48 }
  0x2e   : > { %4844 = vmatprep.mubr.msk.bf16.mxu0 %vm321_vm0, %v2009_v22  ;;  %v5795_v22 = vld [vmem:[%s5608_s27 + $0x20] sm:$0xff]   ;;  %v2412_v57 = vsel %vm2397_vm2, %v2409_v8, %v2411_v15 }
  0x2f   : > { %v757_v31 = vshll.u32 %v5795_v22, 16  ;;  %v761_v61 = vshrl.u32 %v5795_v22, 16 }
  0x33   : > { %4689 = vmatmul.mubr.msk.bf16.gmra.mrb[16].mxu1 %vm321_vm0, %v5391_v24  ;;  %v2410_v24 = vsel %vm2397_vm2, %v2407_v62, %v2409_v8  ;;  %v2418_v62 = vsel %vm2397_vm2, %v2415_v30, %v2417_v51  ;;  %v5858_v8 = vld [vmem:[%s5608_s27 + $0x48] sm:$0xff]  }
  0x34   : > { %4692 = vmatprep.mubr.msk.bf16.mxu1 %vm321_vm0, %v5393_v28  ;;  %v751_v28 = vrot.slane %v749_v19, 1  ;;  %v789_v19 = vshll.u32 %v5419_v2, 16 }
  0x35   : > { %4845 = vmatmul.mubr.msk.bf16.gmra.mrb[12].mxu0 %vm321_vm0, %v2018_v35 }
  0x36   : > { %4848 = vmatprep.mubr.msk.bf16.mxu0 %vm321_vm0, %v2027_v38  ;;  %v759_v38 = vrot.slane %v757_v31, 1  ;;  %v755_v44 = vor.u32 %v753_v34, %v751_v28  ;;  %v1177_v31 = vrot.slane %v5419_v2, 1  ;;  %v5901_v34 = vld [vmem:[%s5608_s27 + $0x80] sm:$0xff]  }
  0x38   : > { %v760_v54 = vsel %vm724_vm3, %v755_v44, %v759_v38 }
  0x3b   : > { %4693 = vmatmul.mubr.msk.bf16.gmra.mrb[20].mxu1 %vm321_vm0, %v5395_v41  ;;  %v5824_v41 = vld [vmem:[%s5608_s27 + $0x30] sm:$0xff]  }
  0x3c   : > { %4696 = vmatprep.mubr.msk.bf16.mxu1 %vm321_vm0, %v5398_v43  ;;  %v2414_v43 = vsel %vm2397_vm2, %v2411_v15, %v2413_v26 }
  0x3d   : > { %4849 = vmatmul.mubr.msk.bf16.gmra.mrb[16].mxu0 %vm321_vm0, %v2036_v46  ;;  %v2416_v46 = vsel %vm2397_vm2, %v2413_v26, %v2415_v30  ;;  %v797_v26 = vshll.u32 %v5858_v8, 16 }
  0x3e   : > { %4872 = vmatprep.mubr.msk.bf16.mxu0 %vm321_vm0, %v2400_v47  ;;  %v763_v47 = vor.u32 %v761_v61, %v759_v38  ;;  %v5904_v61 = vld [vmem:[%s5608_s27 + $0x58] sm:$0xff]   ;;  %v5912_v38 = vld [vmem:[%s5608_s27 + $0x60] sm:$0xff]  }
  0x40   : > { %v768_v21 = vsel %vm724_vm3, %v763_v47, %v767_v48 }
  0x43   : > { %4697 = vmatmul.mubr.msk.bf16.gmra.mrb[24].mxu1 %vm321_vm0, %v5399_v11  ;;  %v5834_v11 = vld [vmem:[%s5608_s27 + $0x70] sm:$0xff]  }
  0x44   : > { %4700 = vmatprep.mubr.msk.bf16.mxu1 %vm321_vm0, %v5401_v52  ;;  %v2419_v52 = vrot.slane %v5817_v37, 2 }
  0x45   : > { %4873 = vmatmul.mubr.msk.bf16.vlgmr.msra.gmra.mrb[0].mxu0 %vm321_vm0, %v2402_v55  ;;  %v2421_v55 = vrot.slane %v5821_v39, 2 }
  0x46   : > { %4909 = vmatpush3.bf16.msra.mxu0 %v5397_v18  ;;  %4876 = vmatprep.mubr.msk.bf16.mxu0 %vm321_vm0, %v2404_v58  ;;  %v745_v18 = vshrl.u32 %v5769_v3, 16  ;;  %v781_v58 = vshll.u32 %v5830_v45, 16  ;;  %v2420_v0 = vsel %vm2397_vm2, %v2417_v51, %v2419_v52  ;;  %v1183_v51 = vrot.slane %v5904_v61, 1 }
  0x47   : > { %4910 = vmatprep.subr.bf16.mxu0 %v5410_v17  ;;  %v2422_v36 = vsel %vm2397_vm2, %v2419_v52, %v2421_v55  ;;  %v1185_v52 = vrot.slane %v5912_v38, 1 }
  0x48   : > { %v747_v27 = vor.u32 %v745_v18, %v743_v20  ;;  %v783_v7 = vrot.slane %v781_v58, 1  ;;  %v801_v58 = vshrl.u32 %v5858_v8, 16 }
  0x4a   : > { %4911 = vmatpush3.bf16.msra.mxu0 %v5410_v17  ;;  %v752_v35 = vsel %vm724_vm3, %v747_v27, %v751_v28  ;;  %v2423_v17 = vrot.slane %v5834_v11, 2  ;;  %v1175_v28 = vrot.slane %v5830_v45, 1 }
  0x4b   : > { %4701 = vmatmul.mubr.msk.bf16.gmra.mrb[28].mxu1 %vm321_vm0, %v5402_v23  ;;  %4948 = vmatprep.subr.bf16.mxu0 %v5784_v14  ;;  %v777_v23 = vshrl.u32 %v5824_v41, 16 }
  0x4c   : > { %4704 = vmatprep.mubr.msk.bf16.mxu1 %vm321_vm0, %v5403_v63  ;;  %v1163_v63 = vrot.slane %v5754_v56, 1  ;;  %v2424_v44 = vsel %vm2397_vm2, %v2421_v55, %v2423_v17 }
  0x4d   : > { %4877 = vmatmul.mubr.msk.bf16.gmra.mrb[4].mxu0 %vm321_vm0, %v2406_v5  ;;  %v1162_v5 = vrot.slane %v4279_v60, 1  ;;  %v2427_v60 = vrot.slane %v5901_v34, 2 }
  0x4e   : > { %4880 = vmatprep.mubr.msk.bf16.mxu0 %vm321_vm0, %v2408_v33  ;;  %v1165_v33 = vrot.slane %v5769_v3, 1  ;;  %v5872_v3 = vld [vmem:[%s6636_s1 + $0x30] sm:$0xff]  }
  0x4f   : > { %v5864_v15 = vsel %vm1161_vm4, %v1162_v5, %v1163_v63 }
  0x50   : > { %v5867_v16 = vsel %vm1161_vm4, %v1163_v63, %v1165_v33  ;;  %v5875_v6 = vsel %vm1161_vm4, %v1165_v33, %v1167_v50  ;;  %v5952_v33 = vld [vmem:[%s5608_s27 + $0x70] sm:$0xff]  }
  0x53   : > { %4705 = vmatmul.mubr.msk.bf16.gmra.mrb[32].mxu1 %vm321_vm0, %v5404_v12  ;;  %v1169_v12 = vrot.slane %v5795_v22, 1  ;;  %v793_v22 = vshrl.u32 %v5419_v2, 16  ;;  %v5949_v2 = vld [vmem:[%s5608_s27 + $0x88] sm:$0xff]  }
  0x54   : > { %4712 = vmatprep.mubr.msk.bf16.mxu1 %vm321_vm0, %v736_v49  ;;  %v1171_v49 = vrot.slane %v5802_v29, 1  ;;  %v5423_v29 = vld [vmem:[%s5608_s27 + $0x50] sm:$0xff]  }
  0x55   : > { %4881 = vmatmul.mubr.msk.bf16.gmra.mrb[8].mxu0 %vm321_vm0, %v2410_v24  ;;  %v5878_v18 = vsel %vm1161_vm4, %v1167_v50, %v1169_v12  ;;  %v1173_v24 = vrot.slane %v5824_v41, 1  ;;  %v1181_v47 = vrot.slane %v5423_v29, 1  ;;  %v809_v63 = vshrl.u32 %v5423_v29, 16  ;;  %v5962_v50 = vld [vmem:[%s5608_s27 + $0x78] sm:$0xff]  }
  0x56   : > { %4884 = vmatprep.mubr.msk.bf16.mxu0 %vm321_vm0, %v2412_v57  ;;  %v5888_v57 = vld [vmem:[%s5608_s27 + $0x78] sm:$0xff]   ;;  %v5892_v27 = vsel %vm1161_vm4, %v1169_v12, %v1171_v49 }
  0x57   : > { %v5897_v30 = vsel %vm1161_vm4, %v1171_v49, %v1173_v24  ;;  %v2425_v53 = vrot.slane %v5888_v57, 2  ;;  %v1189_v49 = vrot.slane %v5952_v33, 1 }
  0x5b   : > { %4713 = vmatmul.mubr.msk.bf16.vlgmr.msra.gmra.mrb[0].mxu1 %vm321_vm0, %v744_v32  ;;  %v791_v32 = vrot.slane %v789_v19, 1 }
  0x5c   : > { %4716 = vmatprep.mubr.msk.bf16.mxu1 %vm321_vm0, %v752_v35  ;;  %4749 = vmatpush3.bf16.msra.mxu1 %v5735_v9  ;;  %v773_v9 = vshll.u32 %v5824_v41, 16  ;;  %v5907_v35 = vsel %vm1161_vm4, %v1173_v24, %v1175_v28  ;;  %v5915_v41 = vsel %vm1161_vm4, %v1175_v28, %v1177_v31  ;;  %v5974_v24 = vld [vmem:[%s5608_s27 + $0x80] sm:$0xff]  }
  0x5d   : > { %4750 = vmatprep.subr.bf16.mxu1 %v5434_v4  ;;  %4885 = vmatmul.mubr.msk.bf16.gmra.mrb[12].mxu0 %vm321_vm0, %v2414_v43  ;;  %v1179_v43 = vrot.slane %v5858_v8, 1  ;;  %v795_v45 = vor.u32 %v793_v22, %v791_v32  ;;  %v5959_v8 = vld [vmem:[%s5608_s27 + $0x90] sm:$0xff]   ;;  %v821_v22 = vshll.u32 %v5912_v38, 16 }
  0x5e   : > { %4888 = vmatprep.mubr.msk.bf16.mxu0 %vm321_vm0, %v2416_v46  ;;  %v775_v1 = vrot.slane %v773_v9, 1  ;;  %v799_v46 = vrot.slane %v797_v26, 1  ;;  %v805_v9 = vshll.u32 %v5423_v29, 16  ;;  %v2431_v28 = vrot.slane %v5959_v8, 2 }
  0x5f   : > { %v5922_v48 = vsel %vm1161_vm4, %v1177_v31, %v1179_v43  ;;  %v817_v29 = vshrl.u32 %v5904_v61, 16  ;;  %v5984_v31 = vld [vmem:[%s5608_s27 + $0x88] sm:$0xff]  }
  0x60   : > { %4751 = vmatpush3.bf16.msra.mxu1 %v5434_v4  ;;  %v779_v56 = vor.u32 %v777_v23, %v775_v1  ;;  %v776_v20 = vsel %vm724_vm3, %v771_v40, %v775_v1  ;;  %v787_v4 = vor.u32 %v785_v13, %v783_v7  ;;  %v5941_v23 = vsel %vm1161_vm4, %v1183_v51, %v1185_v52 }
  0x61   : > { %4788 = vmatprep.subr.bf16.mxu1 %v5872_v3  ;;  %v1187_v1 = vrot.slane %v5935_v59, 1  ;;  %v807_v5 = vrot.slane %v805_v9, 1  ;;  %v2426_v40 = vsel %vm2397_vm2, %v2423_v17, %v2425_v53  ;;  %v2429_v17 = vrot.slane %v5949_v2, 2  ;;  %v6009_v9 = vld [vmem:[%s5608_s27 + $0x98] ss:$0 sps:$4 sm:$0x33]  }
  0x62   : > { %v784_v25 = vsel %vm724_vm3, %v779_v56, %v783_v7  ;;  %v792_v55 = vsel %vm724_vm3, %v787_v4, %v791_v32  ;;  %v803_v7 = vor.u32 %v801_v58, %v799_v46  ;;  %v2428_v56 = vsel %vm2397_vm2, %v2425_v53, %v2427_v60  ;;  %v6012_v58 = vld [vmem:[%s5608_s27 + $0x18] sm:$0xff]  }
  0x63   : > { %4717 = vmatmul.mubr.msk.bf16.gmra.mrb[4].mxu1 %vm321_vm0, %v760_v54  ;;  %v5929_v54 = vsel %vm1161_vm4, %v1179_v43, %v1181_v47  ;;  %v5965_v12 = vsel %vm1161_vm4, %v1185_v52, %v1187_v1  ;;  %v811_v13 = vor.u32 %v809_v63, %v807_v5  ;;  %v825_v4 = vshrl.u32 %v5912_v38, 16 }
  0x64   : > { %4720 = vmatprep.mubr.msk.bf16.mxu1 %vm321_vm0, %v768_v21  ;;  %v5938_v21 = vsel %vm1161_vm4, %v1181_v47, %v1183_v51  ;;  %v808_v26 = vsel %vm724_vm3, %v803_v7, %v807_v5  ;;  %v829_v43 = vshll.u32 %v5935_v59, 16  ;;  %v823_v47 = vrot.slane %v821_v22, 1  ;;  %v6000_v51 = vld [vmem:[%s5608_s27 + $0x90] ss:$0 sps:$4 sm:$0x11]  }
  0x65   : > { %4889 = vmatmul.mubr.msk.bf16.gmra.mrb[16].mxu0 %vm321_vm0, %v2418_v62  ;;  %v800_v62 = vsel %vm724_vm3, %v795_v45, %v799_v46  ;;  %v2714_v45 = vld [vmem:[%s5608_s27 + $0x10] sm:$0xc]  ;;  %v5995_v46 = vld [vmem:[%s5608_s27 + $0x14] sm:$0xf]  ;;  %v2430_v53 = vsel %vm2397_vm2, %v2427_v60, %v2429_v17  ;;  %v2432_v38 = vsel %vm2397_vm2, %v2429_v17, %v2431_v28  ;;  %v1197_v5 = vrot.slane %v6000_v51, 1 }
  0x66   : > { %4892 = vmatprep.mubr.msk.bf16.mxu0 %vm321_vm0, %v2420_v0  ;;  %v813_v0 = vshll.u32 %v5904_v61, 16  ;;  %v1195_v61 = vrot.slane %v5984_v31, 1  ;;  %v6018_v63 = vcombine.low %v2714_v45, %v5995_v46  ;;  %v837_v60 = vshll.u32 %v5952_v33, 16 }
  0x67   : > { %v2433_v7 = vrot.slane %v6009_v9, 2  ;;  %v841_v17 = vshrl.u32 %v5952_v33, 16  ;;  %v845_v22 = vshll.u32 %v5962_v50, 16  ;;  %v853_v33 = vshll.u32 %v5974_v24, 16 }
  0x68   : > { %v815_v19 = vrot.slane %v813_v0, 1  ;;  %v827_v0 = vor.u32 %v825_v4, %v823_v47 }
  0x69   : > { %v847_v45 = vrot.slane %v845_v22, 1  ;;  %v869_v22 = vshll.u32 %v6000_v51, 16 }
  0x6b   : > { %4721 = vmatmul.mubr.msk.bf16.gmra.mrb[8].mxu1 %vm321_vm0, %v776_v20  ;;  %v1191_v20 = vrot.slane %v5962_v50, 1 }
  0x6c   : > { %4724 = vmatprep.mubr.msk.bf16.mxu1 %vm321_vm0, %v784_v25  ;;  %v5977_v25 = vsel %vm1161_vm4, %v1187_v1, %v1189_v49  ;;  %v831_v1 = vrot.slane %v829_v43, 1  ;;  %v6043_v43 = vld [vmem:[%s5608_s27 + $0x28] sm:$0xff]  }
  0x6d   : > { %4893 = vmatmul.mubr.msk.bf16.gmra.mrb[20].mxu0 %vm321_vm0, %v2422_v36  ;;  %v5987_v32 = vsel %vm1161_vm4, %v1189_v49, %v1191_v20  ;;  %v816_v36 = vsel %vm724_vm3, %v811_v13, %v815_v19  ;;  %v2850_v13 = vrot.slane %v6012_v58, 2  ;;  %v2849_v49 = vrot.slane %v6018_v63, 2 }
  0x6e   : > { %4896 = vmatprep.mubr.msk.bf16.mxu0 %vm321_vm0, %v2424_v44  ;;  %v1193_v44 = vrot.slane %v5974_v24, 1 }
  0x70   : > { %v6003_v52 = vsel %vm1161_vm4, %v1191_v20, %v1193_v44  ;;  %v832_v20 = vsel %vm724_vm3, %v827_v0, %v831_v1  ;;  %v861_v0 = vshll.u32 %v5984_v31, 16 }
  0x73   : > { %4725 = vmatmul.mubr.msk.bf16.gmra.mrb[12].mxu1 %vm321_vm0, %v792_v55  ;;  %v819_v55 = vor.u32 %v817_v29, %v815_v19  ;;  %v833_v19 = vshrl.u32 %v5935_v59, 16  ;;  %v2434_v29 = vsel %vm2397_vm2, %v2431_v28, %v2433_v7  ;;  %v2851_v59 = vsel %vm2397_vm2, %v2849_v49, %v2850_v13 }
  0x74   : > { %4728 = vmatprep.mubr.msk.bf16.mxu1 %vm321_vm0, %v800_v62  ;;  %v6015_v62 = vsel %vm1161_vm4, %v1193_v44, %v1195_v61  ;;  %v863_v49 = vrot.slane %v861_v0, 1 }
  0x75   : > { %4897 = vmatmul.mubr.msk.bf16.gmra.mrb[24].mxu0 %vm321_vm0, %v2426_v40  ;;  %v6024_v40 = vsel %vm1161_vm4, %v1195_v61, %v1197_v5  ;;  %v835_v4 = vor.u32 %v833_v19, %v831_v1  ;;  %v855_v1 = vrot.slane %v853_v33, 1 }
  0x76   : > { %4900 = vmatprep.mubr.msk.bf16.mxu0 %vm321_vm0, %v2428_v56  ;;  %v824_v56 = vsel %vm724_vm3, %v819_v55, %v823_v47  ;;  %v849_v47 = vshrl.u32 %v5962_v50, 16  ;;  %v857_v55 = vshrl.u32 %v5974_v24, 16  ;;  %v5448_v24 = vld [vmem:[%s6636_s1 + $0x78] sm:$0xff]  }
  0x78   : > { %v851_v7 = vor.u32 %v849_v47, %v847_v45  ;;  %v859_v19 = vor.u32 %v857_v55, %v855_v1  ;;  %v6107_v55 = vld [vmem:[%s5608_s27 + $0x58] sm:$0xff]  }
  0x7b   : > { %4729 = vmatmul.mubr.msk.bf16.gmra.mrb[16].mxu1 %vm321_vm0, %v808_v26  ;;  %v839_v26 = vrot.slane %v837_v60, 1  ;;  %v6059_v60 = vld [vmem:[%s5608_s27 + $0x30] sm:$0xff]  }
  0x7c   : > { %4732 = vmatprep.mubr.msk.bf16.mxu1 %vm321_vm0, %v816_v36  ;;  %v6039_v36 = vld [vmem:[%s5608_s27 + $0x20] sm:$0xff]  }
  0x7d   : > { %4901 = vmatmul.mubr.msk.bf16.gmra.mrb[28].mxu0 %vm321_vm0, %v2430_v53  ;;  %v843_v44 = vor.u32 %v841_v17, %v839_v26  ;;  %v2852_v28 = vrot.slane %v6039_v36, 2  ;;  %v840_v61 = vsel %vm724_vm3, %v835_v4, %v839_v26  ;;  %v2854_v53 = vrot.slane %v6043_v43, 2 }
  0x7e   : > { %4904 = vmatprep.mubr.msk.bf16.mxu0 %vm321_vm0, %v2432_v38  ;;  %v865_v17 = vshrl.u32 %v5984_v31, 16  ;;  %v6086_v31 = vld [vmem:[%s5608_s27 + $0x40] sm:$0xff]  }
  0x7f   : > { %v848_v38 = vsel %vm724_vm3, %v843_v44, %v847_v45  ;;  %v2853_v5 = vsel %vm2397_vm2, %v2850_v13, %v2852_v28  ;;  %v2855_v50 = vsel %vm2397_vm2, %v2852_v28, %v2854_v53  ;;  %v2856_v13 = vrot.slane %v6059_v60, 2  ;;  %v6090_v45 = vld [vmem:[%s5608_s27 + $0x48] sm:$0xff]  }
  0x80   : > { %v867_v51 = vor.u32 %v865_v17, %v863_v49  ;;  %v2860_v33 = vrot.slane %v6086_v31, 2 }
  0x81   : > { %v2857_v4 = vsel %vm2397_vm2, %v2854_v53, %v2856_v13  ;;  %v6103_v53 = vld [vmem:[%s5608_s27 + $0x50] sm:$0xff]  }
  0x82   : > { %v2864_v0 = vrot.slane %v6103_v53, 2 }
  0x83   : > { %4733 = vmatmul.mubr.msk.bf16.gmra.mrb[20].mxu1 %vm321_vm0, %v824_v56  ;;  %v6063_v56 = vld [vmem:[%s5608_s27 + $0x38] sm:$0xff]  }
  0x84   : > { %4736 = vmatprep.mubr.msk.bf16.mxu1 %vm321_vm0, %v832_v20  ;;  %v856_v20 = vsel %vm724_vm3, %v851_v7, %v855_v1  ;;  %v2858_v26 = vrot.slane %v6063_v56, 2  ;;  %v2866_v1 = vrot.slane %v6107_v55, 2  ;;  %v6122_v7 = vld [vmem:[%s5608_s27 + $0x60] sm:$0xff]  }
  0x85   : > { %4905 = vmatmul.mubr.msk.bf16.gmra.mrb[32].mxu0 %vm321_vm0, %v2434_v29  ;;  %v864_v29 = vsel %vm724_vm3, %v859_v19, %v863_v49  ;;  %v6127_v19 = vld [vmem:[%s5608_s27 + $0x68] sm:$0xff]  }
  0x86   : > { %4912 = vmatprep.mubr.msk.bf16.mxu0 %vm321_vm0, %v2851_v59  ;;  %v871_v59 = vrot.slane %v869_v22, 1  ;;  %v2859_v44 = vsel %vm2397_vm2, %v2856_v13, %v2858_v26  ;;  %v2861_v47 = vsel %vm2397_vm2, %v2858_v26, %v2860_v33  ;;  %v6161_v22 = vld [vmem:[%s5608_s27 + $0x80] sm:$0xff]  }
  0x88   : > { %v872_v28 = vsel %vm724_vm3, %v867_v51, %v871_v59  ;;  %v6180_v59 = vld [vmem:[%s5608_s27 + $0x98] sm:$0xff]  }
  0x8b   : > { %4737 = vmatmul.mubr.msk.bf16.gmra.mrb[24].mxu1 %vm321_vm0, %v840_v61  ;;  %v2862_v61 = vrot.slane %v6090_v45, 2 }
  0x8c   : > { %4740 = vmatprep.mubr.msk.bf16.mxu1 %vm321_vm0, %v848_v38 }
  0x8d   : > { %4913 = vmatmul.mubr.msk.bf16.vlgmr.msra.gmra.mrb[0].mxu0 %vm321_vm0, %v2853_v5  ;;  %v2863_v38 = vsel %vm2397_vm2, %v2860_v33, %v2862_v61  ;;  %v5459_v5 = vld [vmem:[%s6636_s1 + $0x38] sm:$0xff]  }
  0x8e   : > { %4949 = vmatpush3.bf16.msra.mxu0 %v5784_v14  ;;  %4916 = vmatprep.mubr.msk.bf16.mxu0 %vm321_vm0, %v2855_v50  ;;  %v6080_v14 = vld [vmem:[%s6636_s1 + $0x80] sm:$0xff]   ;;  %v2867_v50 = vsel %vm2397_vm2, %v2864_v0, %v2866_v1 }
  0x8f   : > { %4950 = vmatprep.subr.bf16.mxu0 %v5448_v24 }
  0x92   : > { %4951 = vmatpush3.bf16.msra.mxu0 %v5448_v24  ;;  %v6145_v24 = vld [vmem:[%s5608_s27 + $0x70] sm:$0xff]  }
  0x93   : > { %4741 = vmatmul.mubr.msk.bf16.gmra.mrb[28].mxu1 %vm321_vm0, %v856_v20  ;;  %4988 = vmatprep.subr.bf16.mxu0 %v6080_v14  ;;  %v6149_v20 = vld [vmem:[%s5608_s27 + $0x78] sm:$0xff]   ;;  %v2872_v17 = vrot.slane %v6145_v24, 2 }
  0x94   : > { %4744 = vmatprep.mubr.msk.bf16.mxu1 %vm321_vm0, %v864_v29  ;;  %v6165_v29 = vld [vmem:[%s5608_s27 + $0x88] sm:$0xff]  }
  0x95   : > { %4917 = vmatmul.mubr.msk.bf16.gmra.mrb[4].mxu0 %vm321_vm0, %v2857_v4  ;;  %v2876_v4 = vrot.slane %v6161_v22, 2  ;;  %v2878_v51 = vrot.slane %v6165_v29, 2 }
  0x96   : > { %4920 = vmatprep.mubr.msk.bf16.mxu0 %vm321_vm0, %v2859_v44 }
  0x97   : > { %v2879_v44 = vsel %vm2397_vm2, %v2876_v4, %v2878_v51 }
  0x9b   : > { %4745 = vmatmul.mubr.msk.bf16.gmra.mrb[32].mxu1 %vm321_vm0, %v872_v28  ;;  %v3176_v28 = vshrl.u32 %v6018_v63, 16 }
  0x9c   : > { %4752 = vmatprep.mubr.msk.bf16.mxu1 %vm321_vm0, %v5864_v15  ;;  %v2865_v15 = vsel %vm2397_vm2, %v2862_v61, %v2864_v0  ;;  %v3179_v61 = vshll.u32 %v6018_v63, 16 }
  0x9d   : > { %4921 = vmatmul.mubr.msk.bf16.gmra.mrb[8].mxu0 %vm321_vm0, %v2861_v47  ;;  %v3187_v47 = vshll.u32 %v6012_v58, 16 }
  0x9e   : > { %4924 = vmatprep.mubr.msk.bf16.mxu0 %vm321_vm0, %v2863_v38 }
  0xa3   : > { %4753 = vmatmul.mubr.msk.bf16.vlgmr.msra.gmra.mrb[0].mxu1 %vm321_vm0, %v5867_v16  ;;  %v2868_v16 = vrot.slane %v6122_v7, 2 }
  0xa4   : > { %4756 = vmatprep.mubr.msk.bf16.mxu1 %vm321_vm0, %v5875_v6  ;;  %4789 = vmatpush3.bf16.msra.mxu1 %v5872_v3  ;;  %v2870_v6 = vrot.slane %v6127_v19, 2  ;;  %v6136_v3 = vld [vmem:[%s6636_s1 + $0x40] sm:$0xff]  }
  0xa5   : > { %4790 = vmatprep.subr.bf16.mxu1 %v5459_v5  ;;  %4925 = vmatmul.mubr.msk.bf16.gmra.mrb[12].mxu0 %vm321_vm0, %v2865_v15  ;;  %v2869_v49 = vsel %vm2397_vm2, %v2866_v1, %v2868_v16  ;;  %v5457_v1 = vld [vmem:[%s5608_s27 + $0xa0] ss:$0 sps:$4 sm:$0x33]   ;;  %v3181_v15 = vrot.slane %v3179_v61, 3 }
  0xa6   : > { %4928 = vmatprep.mubr.msk.bf16.mxu0 %vm321_vm0, %v2867_v50  ;;  %v2871_v13 = vsel %vm2397_vm2, %v2868_v16, %v2870_v6  ;;  %v3189_v16 = vrot.slane %v3187_v47, 3  ;;  %v2884_v63 = vrot.slane %v5457_v1, 2 }
  0xa8   : > { %4791 = vmatpush3.bf16.msra.mxu1 %v5459_v5  ;;  %v3178_v5 = vrot.slane %v3176_v28, 2 }
  0xa9   : > { %5028 = vmatprep.subr.bf16.mxu1 %v6136_v3 }
  0xab   : > { %4757 = vmatmul.mubr.msk.bf16.gmra.mrb[4].mxu1 %vm321_vm0, %v5878_v18  ;;  %v2874_v18 = vrot.slane %v6149_v20, 2 }
  0xac   : > { %4760 = vmatprep.mubr.msk.bf16.mxu1 %vm321_vm0, %v5892_v27  ;;  %v2873_v27 = vsel %vm2397_vm2, %v2870_v6, %v2872_v17  ;;  %v3193_v6 = vshrl.u32 %v6039_v36, 16 }
  0xad   : > { %4929 = vmatmul.mubr.msk.bf16.gmra.mrb[16].mxu0 %vm321_vm0, %v2869_v49  ;;  %v2875_v26 = vsel %vm2397_vm2, %v2872_v17, %v2874_v18  ;;  %v3182_v49 = vor.u32 %v3181_v15, %v3178_v5  ;;  %v3202_v17 = vshrl.u32 %v6043_v43, 16  ;;  %v5460_v5 = vld [vmem:[%s6636_s1 + $0x88] sm:$0xff]   ;;  %v3229_v15 = vshrl.u32 %v6086_v31, 16 }
  0xae   : > { %4932 = vmatprep.mubr.msk.bf16.mxu0 %vm321_vm0, %v2871_v13 }
  0xb3   : > { %4761 = vmatmul.mubr.msk.bf16.gmra.mrb[8].mxu1 %vm321_vm0, %v5897_v30  ;;  %v2877_v30 = vsel %vm2397_vm2, %v2874_v18, %v2876_v4 }
  0xb4   : > { %4764 = vmatprep.mubr.msk.bf16.mxu1 %vm321_vm0, %v5907_v35  ;;  %v6177_v35 = vld [vmem:[%s5608_s27 + $0x90] sm:$0xff]  }
  0xb5   : > { %4933 = vmatmul.mubr.msk.bf16.gmra.mrb[20].mxu0 %vm321_vm0, %v2873_v27  ;;  %v2880_v33 = vrot.slane %v6177_v35, 2  ;;  %v3195_v27 = vrot.slane %v3193_v6, 2 }
  0xb6   : > { %4936 = vmatprep.mubr.msk.bf16.mxu0 %vm321_vm0, %v2875_v26 }
  0xb7   : > { %v2881_v38 = vsel %vm2397_vm2, %v2878_v51, %v2880_v33  ;;  %v3204_v51 = vrot.slane %v3202_v17, 2 }
  0xbb   : > { %4765 = vmatmul.mubr.msk.bf16.gmra.mrb[12].mxu1 %vm321_vm0, %v5915_v41  ;;  %v2882_v41 = vrot.slane %v6180_v59, 2 }
  0xbc   : > { %4768 = vmatprep.mubr.msk.bf16.mxu1 %vm321_vm0, %v5922_v48  ;;  %v3184_v48 = vshrl.u32 %v6012_v58, 16 }
  0xbd   : > { %4937 = vmatmul.mubr.msk.bf16.gmra.mrb[24].mxu0 %vm321_vm0, %v2877_v30  ;;  %v2883_v0 = vsel %vm2397_vm2, %v2880_v33, %v2882_v41  ;;  %v2885_v18 = vsel %vm2397_vm2, %v2882_v41, %v2884_v63  ;;  %v3211_v33 = vshrl.u32 %v6059_v60, 16  ;;  %v3220_v41 = vshrl.u32 %v6063_v56, 16 }
  0xbe   : > { %4940 = vmatprep.mubr.msk.bf16.mxu0 %vm321_vm0, %v2879_v44  ;;  %v3186_v50 = vrot.slane %v3184_v48, 2  ;;  %v3241_v63 = vshll.u32 %v6090_v45, 16 }
  0xbf   : > { %v3213_v48 = vrot.slane %v3211_v33, 2 }
  0xc0   : > { %v3190_v13 = vor.u32 %v3189_v16, %v3186_v50  ;;  %v3238_v16 = vshrl.u32 %v6090_v45, 16 }
  0xc2   : > { %v3191_v4 = vsel %vm3174_vm5, %v3182_v49, %v3190_v13  ;;  %v1613_v49 = vrot.slane %v5622_v10, 1  ;;  %v3240_v17 = vrot.slane %v3238_v16, 2 }
  0xc3   : > { %4769 = vmatmul.mubr.msk.bf16.gmra.mrb[16].mxu1 %vm321_vm0, %v5929_v54  ;;  %v3196_v54 = vshll.u32 %v6039_v36, 16 }
  0xc4   : > { %4772 = vmatprep.mubr.msk.bf16.mxu1 %vm321_vm0, %v5938_v21  ;;  %v3205_v21 = vshll.u32 %v6043_v43, 16 }
  0xc5   : > { %4941 = vmatmul.mubr.msk.bf16.gmra.mrb[28].mxu0 %vm321_vm0, %v2881_v38  ;;  %v3198_v26 = vrot.slane %v3196_v54, 3 }
  0xc6   : > { %4944 = vmatprep.mubr.msk.bf16.mxu0 %vm321_vm0, %v2883_v0  ;;  %v3207_v30 = vrot.slane %v3205_v21, 3  ;;  %v3222_v0 = vrot.slane %v3220_v41, 2  ;;  %v3243_v21 = vrot.slane %v3241_v63, 3 }
  0xc7   : > { %v3199_v44 = vor.u32 %v3198_v26, %v3195_v27  ;;  %v3247_v26 = vshrl.u32 %v6103_v53, 16 }
  0xc8   : > { %v3208_v28 = vor.u32 %v3207_v30, %v3204_v51  ;;  %v3256_v51 = vshrl.u32 %v6107_v55, 16  ;;  %v3259_v30 = vshll.u32 %v6107_v55, 16 }
  0xc9   : > { %v3200_v61 = vsel %vm3174_vm5, %v3190_v13, %v3199_v44  ;;  %v3249_v33 = vrot.slane %v3247_v26, 2 }
  0xca   : > { %v3209_v38 = vsel %vm3174_vm5, %v3199_v44, %v3208_v28 }
  0xcb   : > { %4773 = vmatmul.mubr.msk.bf16.gmra.mrb[20].mxu1 %vm321_vm0, %v5941_v23  ;;  %v3214_v23 = vshll.u32 %v6059_v60, 16 }
  0xcc   : > { %4776 = vmatprep.mubr.msk.bf16.mxu1 %vm321_vm0, %v5965_v12  ;;  %v3223_v12 = vshll.u32 %v6063_v56, 16 }
  0xcd   : > { %4945 = vmatmul.mubr.msk.bf16.gmra.mrb[32].mxu0 %vm321_vm0, %v2885_v18  ;;  %v3216_v47 = vrot.slane %v3214_v23, 3  ;;  %v5537_v18 = vld [vmem:[%s5608_s27 + $0x10] sm:$0xff]  }
  0xce   : > { %4952 = vmatprep.mubr.msk.bf16.mxu0 %vm321_vm0, %v3191_v4  ;;  %v3225_v1 = vrot.slane %v3223_v12, 3  ;;  %v1614_v27 = vrot.slane %v5537_v18, 1  ;;  %v3244_v4 = vor.u32 %v3243_v21, %v3240_v17  ;;  %v5541_v21 = vld [vmem:[%s5608_s27 + $0x30] sm:$0xff]  }
  0xcf   : > { %v1622_v18 = vrot.slane %v5541_v21, 1  ;;  %v5546_v21 = vld [vmem:[%s5608_s27 + $0x50] sm:$0xff]  }
  0xd0   : > { %v3226_v50 = vor.u32 %v3225_v1, %v3222_v0  ;;  %v1615_v10 = vsel %vm1161_vm4, %v1613_v49, %v1614_v27  ;;  %v3265_v1 = vshrl.u32 %v6122_v7, 16 }
  0xd2   : > { %v3267_v63 = vrot.slane %v3265_v1, 2  ;;  %v3301_v1 = vshrl.u32 %v6161_v22, 16 }
  0xd3   : > { %4777 = vmatmul.mubr.msk.bf16.gmra.mrb[24].mxu1 %vm321_vm0, %v5977_v25  ;;  %v3217_v25 = vor.u32 %v3216_v47, %v3213_v48  ;;  %v3261_v48 = vrot.slane %v3259_v30, 3  ;;  %v5539_v47 = vld [vmem:[%s5608_s27 + $0x20] sm:$0xff]   ;;  %v3295_v30 = vshll.u32 %v6149_v20, 16 }
  0xd4   : > { %4780 = vmatprep.mubr.msk.bf16.mxu1 %vm321_vm0, %v5987_v32  ;;  %v3232_v32 = vshll.u32 %v6086_v31, 16 }
  0xd5   : > { %4953 = vmatmul.mubr.msk.bf16.vlgmr.msra.gmra.mrb[0].mxu0 %vm321_vm0, %v3200_v61  ;;  %v3218_v6 = vsel %vm3174_vm5, %v3208_v28, %v3217_v25  ;;  %v3227_v13 = vsel %vm3174_vm5, %v3217_v25, %v3226_v50  ;;  %v5538_v28 = vld [vmem:[%s5608_s27 + $0x18] sm:$0xff]   ;;  %v3258_v61 = vrot.slane %v3256_v51, 2  ;;  %v3292_v51 = vshrl.u32 %v6149_v20, 16 }
  0xd6   : > { %4989 = vmatpush3.bf16.msra.mxu0 %v6080_v14  ;;  %4956 = vmatprep.mubr.msk.bf16.mxu0 %vm321_vm0, %v3209_v38  ;;  %v3231_v14 = vrot.slane %v3229_v15, 2  ;;  %v3234_v54 = vrot.slane %v3232_v32, 3  ;;  %v1616_v41 = vrot.slane %v5538_v28, 1  ;;  %v1618_v38 = vrot.slane %v5539_v47, 1  ;;  %v5543_v28 = vld [vmem:[%s5608_s27 + $0x38] sm:$0xff]   ;;  %v5544_v47 = vld [vmem:[%s5608_s27 + $0x40] sm:$0xff]  }
  0xd7   : > { %4990 = vmatprep.subr.bf16.mxu0 %v5460_v5  ;;  %v3262_v25 = vor.u32 %v3261_v48, %v3258_v61  ;;  %v3274_v32 = vshrl.u32 %v6127_v19, 16  ;;  %v3294_v61 = vrot.slane %v3292_v51, 2  ;;  %v3297_v48 = vrot.slane %v3295_v30, 3 }
  0xd8   : > { %v1617_v0 = vsel %vm1161_vm4, %v1614_v27, %v1616_v41  ;;  %v1619_v15 = vsel %vm1161_vm4, %v1616_v41, %v1618_v38  ;;  %v5542_v27 = vld [vmem:[%s6636_s1 + $0x48] sm:$0xff]   ;;  %v1624_v41 = vrot.slane %v5543_v28, 1  ;;  %v3331_v51 = vshll.u32 %v6180_v59, 16 }
  0xda   : > { %4991 = vmatpush3.bf16.msra.mxu0 %v5460_v5  ;;  %v3268_v5 = vshll.u32 %v6122_v7, 16 }
  0xdb   : > { %4781 = vmatmul.mubr.msk.bf16.gmra.mrb[28].mxu1 %vm321_vm0, %v6003_v52  ;;  %v3235_v52 = vor.u32 %v3234_v54, %v3231_v14  ;;  %v5540_v14 = vld [vmem:[%s5608_s27 + $0x28] sm:$0xff]  }
  0xdc   : > { %4784 = vmatprep.mubr.msk.bf16.mxu1 %vm321_vm0, %v6015_v62  ;;  %v3250_v62 = vshll.u32 %v6103_v53, 16  ;;  %v1620_v54 = vrot.slane %v5540_v14, 1  ;;  %v5545_v14 = vld [vmem:[%s5608_s27 + $0x48] sm:$0xff]  }
  0xdd   : > { %4957 = vmatmul.mubr.msk.bf16.gmra.mrb[4].mxu0 %vm321_vm0, %v3218_v6  ;;  %v3236_v44 = vsel %vm3174_vm5, %v3226_v50, %v3235_v52  ;;  %v3245_v12 = vsel %vm3174_vm5, %v3235_v52, %v3244_v4  ;;  %v3277_v50 = vshll.u32 %v6127_v19, 16  ;;  %v3270_v6 = vrot.slane %v3268_v5, 3 }
  0xde   : > { %4960 = vmatprep.mubr.msk.bf16.mxu0 %vm321_vm0, %v3227_v13  ;;  %v3252_v23 = vrot.slane %v3250_v62, 3  ;;  %v3276_v13 = vrot.slane %v3274_v32, 2  ;;  %v1621_v26 = vsel %vm1161_vm4, %v1618_v38, %v1620_v54  ;;  %v3286_v62 = vshll.u32 %v6145_v24, 16 }
  0xdf   : > { %v3279_v17 = vrot.slane %v3277_v50, 3  ;;  %v3271_v52 = vor.u32 %v3270_v6, %v3267_v63  ;;  %v1626_v38 = vrot.slane %v5544_v47, 1  ;;  %v3304_v5 = vshll.u32 %v6161_v22, 16 }
  0xe0   : > { %v3310_v32 = vshrl.u32 %v6165_v29, 16  ;;  %v3313_v50 = vshll.u32 %v6165_v29, 16  ;;  %v3303_v63 = vrot.slane %v3301_v1, 2  ;;  %v1634_v47 = vrot.slane %v5817_v37, 1 }
  0xe1   : > { %v3306_v6 = vrot.slane %v3304_v5, 3 }
  0xe3   : > { %4785 = vmatmul.mubr.msk.bf16.gmra.mrb[32].mxu1 %vm321_vm0, %v6024_v40  ;;  %v3253_v40 = vor.u32 %v3252_v23, %v3249_v33  ;;  %v3288_v23 = vrot.slane %v3286_v62, 3 }
  0xe4   : > { %4792 = vmatprep.mubr.msk.bf16.mxu1 %vm321_vm0, %v1615_v10  ;;  %v1623_v10 = vsel %vm1161_vm4, %v1620_v54, %v1622_v18  ;;  %v1628_v54 = vrot.slane %v5545_v14, 1  ;;  %v1638_v14 = vrot.slane %v5834_v11, 1  ;;  %v1640_v11 = vrot.slane %v5888_v57, 1 }
  0xe5   : > { %4961 = vmatmul.mubr.msk.bf16.gmra.mrb[8].mxu0 %vm321_vm0, %v3236_v44  ;;  %v3254_v16 = vsel %vm3174_vm5, %v3244_v4, %v3253_v40  ;;  %v3263_v49 = vsel %vm3174_vm5, %v3253_v40, %v3262_v25  ;;  %v3280_v4 = vor.u32 %v3279_v17, %v3276_v13  ;;  %v3272_v44 = vsel %vm3174_vm5, %v3262_v25, %v3271_v52 }
  0xe6   : > { %4964 = vmatprep.mubr.msk.bf16.mxu0 %vm321_vm0, %v3245_v12  ;;  %v3298_v25 = vor.u32 %v3297_v48, %v3294_v61  ;;  %v3312_v13 = vrot.slane %v3310_v32, 2  ;;  %v3315_v17 = vrot.slane %v3313_v50, 3  ;;  %v3333_v48 = vrot.slane %v3331_v51, 3 }
  0xe7   : > { %v3281_v12 = vsel %vm3174_vm5, %v3271_v52, %v3280_v4  ;;  %v1629_v52 = vsel %vm1161_vm4, %v1626_v38, %v1628_v54 }
  0xe8   : > { %v3316_v62 = vor.u32 %v3315_v17, %v3312_v13  ;;  %v3635_v17 = vrot.slane %v6012_v58, 3  ;;  %v3637_v58 = vrot.slane %v6039_v36, 3  ;;  %v5548_v36 = vld [vmem:[%s5608_s27 + $0x60] sm:$0xff]  }
  0xe9   : > { %v2038_v51 = vshrl.u32 %v5548_v36, 16 }
  0xeb   : > { %4793 = vmatmul.mubr.msk.bf16.vlgmr.msra.gmra.mrb[0].mxu1 %vm321_vm0, %v1617_v0  ;;  %v1625_v0 = vsel %vm1161_vm4, %v1622_v18, %v1624_v41  ;;  %v1630_v18 = vrot.slane %v5546_v21, 1 }
  0xec   : > { %4796 = vmatprep.mubr.msk.bf16.mxu1 %vm321_vm0, %v1619_v15  ;;  %5030 = vmatpush3.bf16.msra.mxu1 %v6136_v3  ;;  %v3283_v3 = vshrl.u32 %v6145_v24, 16  ;;  %v1627_v15 = vsel %vm1161_vm4, %v1624_v41, %v1626_v38  ;;  %v6313_v41 = vld [vmem:[%s5608_s27 + $0xa0] ss:$0 sps:$4 sm:$0x77]  }
  0xed   : > { %5029 = vmatprep.subr.bf16.mxu1 %v5542_v27  ;;  %4965 = vmatmul.mubr.msk.bf16.gmra.mrb[12].mxu0 %vm321_vm0, %v3254_v16  ;;  %v3340_v1 = vshll.u32 %v6313_v41, 16 }
  0xee   : > { %4968 = vmatprep.mubr.msk.bf16.mxu0 %vm321_vm0, %v3263_v49  ;;  %v3285_v33 = vrot.slane %v3283_v3, 2  ;;  %v3322_v3 = vshll.u32 %v6177_v35, 16 }
  0xef   : > { %v3342_v50 = vrot.slane %v3340_v1, 3 }
  0xf0   : > { %5031 = vmatpush3.bf16.msra.mxu1 %v5542_v27  ;;  %v3289_v40 = vor.u32 %v3288_v23, %v3285_v33  ;;  %v3307_v27 = vor.u32 %v3306_v6, %v3303_v63  ;;  %v3324_v33 = vrot.slane %v3322_v3, 3  ;;  %v5547_v23 = vld [vmem:[%s5608_s27 + $0x58] sm:$0xff]   ;;  %v3638_v3 = vsel %vm3633_vm6, %v3635_v17, %v3637_v58 }
  0xf1   : > { %v1632_v28 = vrot.slane %v5547_v23, 1  ;;  %v3643_v23 = vrot.slane %v6063_v56, 3 }
  0xf2   : > { %v3290_v16 = vsel %vm3174_vm5, %v3280_v4, %v3289_v40  ;;  %v3299_v49 = vsel %vm3174_vm5, %v3289_v40, %v3298_v25  ;;  %v1631_v4 = vsel %vm1161_vm4, %v1628_v54, %v1630_v18  ;;  %v3308_v30 = vsel %vm3174_vm5, %v3298_v25, %v3307_v27 }
  0xf3   : > { %4797 = vmatmul.mubr.msk.bf16.gmra.mrb[4].mxu1 %vm321_vm0, %v1621_v26  ;;  %v3319_v26 = vshrl.u32 %v6177_v35, 16  ;;  %v1633_v40 = vsel %vm1161_vm4, %v1630_v18, %v1632_v28  ;;  %v1635_v25 = vsel %vm1161_vm4, %v1632_v28, %v1634_v47  ;;  %v1642_v18 = vrot.slane %v5901_v34, 1 }
  0xf4   : > { %4800 = vmatprep.mubr.msk.bf16.mxu1 %vm321_vm0, %v1623_v10  ;;  %v3328_v10 = vshrl.u32 %v6180_v59, 16 }
  0xf5   : > { %4969 = vmatmul.mubr.msk.bf16.gmra.mrb[16].mxu0 %vm321_vm0, %v3272_v44  ;;  %v3321_v44 = vrot.slane %v3319_v26, 2  ;;  %v1643_v26 = vsel %vm1161_vm4, %v1640_v11, %v1642_v18 }
  0xf6   : > { %4972 = vmatprep.mubr.msk.bf16.mxu0 %vm321_vm0, %v3281_v12  ;;  %v3317_v12 = vsel %vm3174_vm5, %v3307_v27, %v3316_v62  ;;  %v3330_v61 = vrot.slane %v3328_v10, 2  ;;  %v1641_v27 = vsel %vm1161_vm4, %v1638_v14, %v1640_v11  ;;  %v1646_v10 = vrot.slane %v5959_v8, 1 }
  0xf7   : > { %v3325_v38 = vor.u32 %v3324_v33, %v3321_v44  ;;  %v5463_v33 = vld [vmem:[%s5608_s27 + $0x98] ss:$0 sps:$4 sm:$0x11]  }
  0xf8   : > { %v3334_v5 = vor.u32 %v3333_v48, %v3330_v61 }
  0xf9   : > { %v3326_v32 = vsel %vm3174_vm5, %v3316_v62, %v3325_v38  ;;  %v1644_v62 = vrot.slane %v5949_v2, 1 }
  0xfa   : > { %v3335_v63 = vsel %vm3174_vm5, %v3325_v38, %v3334_v5  ;;  %v5549_v38 = vld [vmem:[%s5608_s27 + $0x68] sm:$0xff]  }
  0xfb   : > { %4801 = vmatmul.mubr.msk.bf16.gmra.mrb[8].mxu1 %vm321_vm0, %v1625_v0  ;;  %v3337_v0 = vshrl.u32 %v6313_v41, 16  ;;  %v1645_v44 = vsel %vm1161_vm4, %v1642_v18, %v1644_v62  ;;  %v1647_v28 = vsel %vm1161_vm4, %v1644_v62, %v1646_v10 }
  0xfc   : > { %4804 = vmatprep.mubr.msk.bf16.mxu1 %vm321_vm0, %v1627_v15  ;;  %v3624_v15 = vld [vmem:[%s5608_s27 + $0x10] sm:$0x8] }
  0xfd   : > { %4973 = vmatmul.mubr.msk.bf16.gmra.mrb[20].mxu0 %vm321_vm0, %v3290_v16  ;;  %v3339_v37 = vrot.slane %v3337_v0, 2  ;;  %v1636_v16 = vrot.slane %v5821_v39, 1  ;;  %v4465_v6 = vcombine.low %v3624_v15, %v5995_v46  ;;  %v3645_v15 = vrot.slane %v6086_v31, 3 }
  0xfe   : > { %4976 = vmatprep.mubr.msk.bf16.mxu0 %vm321_vm0, %v3299_v49  ;;  %v2065_v31 = vshrl.u32 %v5888_v57, 16 }
  0xff   : > { %v3343_v54 = vor.u32 %v3342_v50, %v3339_v37  ;;  %v1637_v49 = vsel %vm1161_vm4, %v1634_v47, %v1636_v16  ;;  %v3634_v13 = vrot.slane %v4465_v6, 3  ;;  %v1639_v21 = vsel %vm1161_vm4, %v1636_v16, %v1638_v14 }
 0x100   : > { %v1648_v47 = vrot.slane %v5463_v33, 1  ;;  %v3647_v16 = vrot.slane %v6090_v45, 3  ;;  %v2074_v45 = vshrl.u32 %v5901_v34, 16 }
 0x101   : > { %v3344_v39 = vsel %vm3174_vm5, %v3334_v5, %v3343_v54  ;;  %v3636_v46 = vsel %vm3633_vm6, %v3634_v13, %v3635_v17  ;;  %v5550_v5 = vld [vmem:[%s5608_s27 + $0x70] sm:$0xff]   ;;  %v3646_v54 = vsel %vm3633_vm6, %v3643_v23, %v3645_v15  ;;  %v2068_v13 = vshll.u32 %v5888_v57, 16 }
 0x102   : > { %v2059_v56 = vshll.u32 %v5550_v5, 16  ;;  %v3648_v17 = vsel %vm3633_vm6, %v3645_v15, %v3647_v16 }
 0x103   : > { %4805 = vmatmul.mubr.msk.bf16.gmra.mrb[12].mxu1 %vm321_vm0, %v1629_v52  ;;  %v3639_v52 = vrot.slane %v6043_v43, 3  ;;  %v3641_v43 = vrot.slane %v6059_v60, 3  ;;  %v2050_v60 = vshll.u32 %v5549_v38, 16  ;;  %v2070_v18 = vrot.slane %v2068_v13, 2 }
 0x104   : > { %4808 = vmatprep.mubr.msk.bf16.mxu1 %vm321_vm0, %v1631_v4  ;;  %v2061_v14 = vrot.slane %v2059_v56, 2 }
 0x105   : > { %4977 = vmatmul.mubr.msk.bf16.gmra.mrb[24].mxu0 %vm321_vm0, %v3308_v30  ;;  %v3640_v4 = vsel %vm3633_vm6, %v3637_v58, %v3639_v52  ;;  %v2041_v30 = vshll.u32 %v5548_v36, 16  ;;  %v3642_v48 = vsel %vm3633_vm6, %v3639_v52, %v3641_v43  ;;  %v3644_v0 = vsel %vm3633_vm6, %v3641_v43, %v3643_v23 }
 0x106   : > { %4980 = vmatprep.mubr.msk.bf16.mxu0 %vm321_vm0, %v3317_v12  ;;  %v2040_v12 = vrot.slane %v2038_v51, 1  ;;  %v2052_v50 = vrot.slane %v2050_v60, 2  ;;  %v3651_v58 = vrot.slane %v6107_v55, 3  ;;  %v2092_v55 = vshrl.u32 %v5959_v8, 16 }
 0x107   : > { %v2043_v61 = vrot.slane %v2041_v30, 2  ;;  %v3653_v36 = vrot.slane %v6122_v7, 3  ;;  %v2104_v7 = vshll.u32 %v6009_v9, 16  ;;  %v3659_v60 = vrot.slane %v6149_v20, 3 }
 0x108   : > { %v2094_v33 = vrot.slane %v2092_v55, 1  ;;  %v3663_v20 = vrot.slane %v6165_v29, 3  ;;  %v3669_v29 = vrot.slane %v6313_v41, 3 }
 0x109   : > { %v2044_v1 = vor.u32 %v2043_v61, %v2040_v12  ;;  %v2101_v12 = vshrl.u32 %v6009_v9, 16 }
 0x10b   : > { %4809 = vmatmul.mubr.msk.bf16.gmra.mrb[16].mxu1 %vm321_vm0, %v1633_v40  ;;  %v2047_v40 = vshrl.u32 %v5549_v38, 16  ;;  %v2103_v38 = vrot.slane %v2101_v12, 1 }
 0x10c   : > { %4812 = vmatprep.mubr.msk.bf16.mxu1 %vm321_vm0, %v1635_v25  ;;  %v2056_v25 = vshrl.u32 %v5550_v5, 16 }
 0x10d   : > { %4981 = vmatmul.mubr.msk.bf16.gmra.mrb[28].mxu0 %vm321_vm0, %v3326_v32  ;;  %v1649_v32 = vsel %vm1161_vm4, %v1646_v10, %v1648_v47  ;;  %v2049_v37 = vrot.slane %v2047_v40, 1  ;;  %v2095_v10 = vshll.u32 %v5959_v8, 16  ;;  %v3654_v8 = vsel %vm3633_vm6, %v3651_v58, %v3653_v36 }
 0x10e   : > { %4984 = vmatprep.mubr.msk.bf16.mxu0 %vm321_vm0, %v3335_v63  ;;  %v2045_v63 = vsel %vm1938_vm1, %v5724_v42, %v2044_v1  ;;  %v2058_v6 = vrot.slane %v2056_v25, 1  ;;  %v2077_v42 = vshll.u32 %v5901_v34, 16  ;;  %v2106_v40 = vrot.slane %v2104_v7, 2 }
 0x10f   : > { %v2097_v23 = vrot.slane %v2095_v10, 2 }
 0x110   : > { %v2079_v52 = vrot.slane %v2077_v42, 2 }
 0x113   : > { %4813 = vmatmul.mubr.msk.bf16.gmra.mrb[20].mxu1 %vm321_vm0, %v1637_v49  ;;  %v2053_v49 = vor.u32 %v2052_v50, %v2049_v37  ;;  %v3667_v37 = vrot.slane %v6180_v59, 3 }
 0x114   : > { %4816 = vmatprep.mubr.msk.bf16.mxu1 %vm321_vm0, %v1639_v21  ;;  %v2062_v21 = vor.u32 %v2061_v14, %v2058_v6 }
 0x115   : > { %4985 = vmatmul.mubr.msk.bf16.gmra.mrb[32].mxu0 %vm321_vm0, %v3344_v39  ;;  %v3649_v39 = vrot.slane %v6103_v53, 3  ;;  %v2054_v11 = vsel %vm1938_vm1, %v2044_v1, %v2053_v49  ;;  %v2086_v53 = vshll.u32 %v5949_v2, 16  ;;  %v2107_v1 = vor.u32 %v2106_v40, %v2103_v38 }
 0x116   : > { %4992 = vmatprep.mubr.msk.bf16.mxu0 %vm321_vm0, %v3636_v46  ;;  %v2067_v46 = vrot.slane %v2065_v31, 1  ;;  %v2063_v57 = vsel %vm1938_vm1, %v2053_v49, %v2062_v21 }
 0x117   : > { %v3650_v34 = vsel %vm3633_vm6, %v3647_v16, %v3649_v39  ;;  %v3652_v62 = vsel %vm3633_vm6, %v3649_v39, %v3651_v58  ;;  %v2088_v43 = vrot.slane %v2086_v53, 2  ;;  %v3670_v16 = vsel %vm3633_vm6, %v3667_v37, %v3669_v29 }
 0x11b   : > { %4817 = vmatmul.mubr.msk.bf16.gmra.mrb[24].mxu1 %vm321_vm0, %v1641_v27  ;;  %v2076_v27 = vrot.slane %v2074_v45, 1 }
 0x11c   : > { %4820 = vmatprep.mubr.msk.bf16.mxu1 %vm321_vm0, %v1643_v26  ;;  %v2071_v26 = vor.u32 %v2070_v18, %v2067_v46 }
 0x11d   : > { %4993 = vmatmul.mubr.msk.bf16.vlgmr.msra.gmra.mrb[0].mxu0 %vm321_vm0, %v3638_v3  ;;  %v2083_v3 = vshrl.u32 %v5949_v2, 16 }
 0x11e   : > { %4996 = vmatprep.mubr.msk.bf16.mxu0 %vm321_vm0, %v3640_v4  ;;  %v2080_v4 = vor.u32 %v2079_v52, %v2076_v27  ;;  %v2072_v51 = vsel %vm1938_vm1, %v2062_v21, %v2071_v26  ;;  %v6459_v27 = vld [vmem:[%s6637_s2] ss:$0 sm:$0xff] }
 0x11f   : > { %v2085_v30 = vrot.slane %v2083_v3, 1 }
 0x120   : > { %v2081_v2 = vsel %vm1938_vm1, %v2071_v26, %v2080_v4 }
 0x123   : > { %4821 = vmatmul.mubr.msk.bf16.gmra.mrb[28].mxu1 %vm321_vm0, %v1645_v44  ;;  %v3655_v44 = vrot.slane %v6127_v19, 3  ;;  %v3657_v19 = vrot.slane %v6145_v24, 3  ;;  %v3661_v24 = vrot.slane %v6161_v22, 3 }
 0x124   : > { %4824 = vmatprep.mubr.msk.bf16.mxu1 %vm321_vm0, %v1647_v28  ;;  %v2089_v28 = vor.u32 %v2088_v43, %v2085_v30 }
 0x125   : > { %4997 = vmatmul.mubr.msk.bf16.gmra.mrb[4].mxu0 %vm321_vm0, %v3642_v48  ;;  %v3656_v61 = vsel %vm3633_vm6, %v3653_v36, %v3655_v44  ;;  %v2098_v48 = vor.u32 %v2097_v23, %v2094_v33  ;;  %v3658_v9 = vsel %vm3633_vm6, %v3655_v44, %v3657_v19  ;;  %v3660_v5 = vsel %vm3633_vm6, %v3657_v19, %v3659_v60 }
 0x126   : > { %5000 = vmatprep.mubr.msk.bf16.mxu0 %vm321_vm0, %v3644_v0  ;;  %v2090_v47 = vsel %vm1938_vm1, %v2080_v4, %v2089_v28  ;;  %v3662_v56 = vsel %vm3633_vm6, %v3659_v60, %v3661_v24  ;;  %v3664_v15 = vsel %vm3633_vm6, %v3661_v24, %v3663_v20 }
 0x127   : > { %v2099_v0 = vsel %vm1938_vm1, %v2089_v28, %v2098_v48  ;;  %v2108_v25 = vsel %vm1938_vm1, %v2098_v48, %v2107_v1 }
 0x12b   : > { %4825 = vmatmul.mubr.msk.bf16.gmra.mrb[32].mxu1 %vm321_vm0, %v1649_v32  ;;  %v3665_v32 = vrot.slane %v6177_v35, 3 }
 0x12c   : > { %4852 = vmatprep.mubr.msk.bf16.mxu1 %vm321_vm0, %v2045_v63 }
 0x12d   : > { %5001 = vmatmul.mubr.msk.bf16.gmra.mrb[8].mxu0 %vm321_vm0, %v3646_v54  ;;  %v3666_v22 = vsel %vm3633_vm6, %v3663_v20, %v3665_v32  ;;  %v3668_v50 = vsel %vm3633_vm6, %v3665_v32, %v3667_v37 }
 0x12e   : > { %5004 = vmatprep.mubr.msk.bf16.mxu0 %vm321_vm0, %v3648_v17 }
 0x133   : > { %4853 = vmatmul.mubr.msk.bf16.vlgmr.msra.gmra.mrb[20].mxu1 %vm321_vm0, %v2054_v11 }
 0x134   : > { %4856 = vmatprep.mubr.msk.bf16.mxu1 %vm321_vm0, %v2063_v57 }
 0x135   : > { %5005 = vmatmul.mubr.msk.bf16.gmra.mrb[12].mxu0 %vm321_vm0, %v3650_v34 }
 0x136   : > { %5008 = vmatprep.mubr.msk.bf16.mxu0 %vm321_vm0, %v3652_v62 }
 0x13b   : > { %4857 = vmatmul.mubr.msk.bf16.gmra.mrb[24].mxu1 %vm321_vm0, %v2072_v51 }
 0x13c   : > { %4860 = vmatprep.mubr.msk.bf16.mxu1 %vm321_vm0, %v2081_v2 }
 0x13d   : > { %5009 = vmatmul.mubr.msk.bf16.gmra.mrb[16].mxu0 %vm321_vm0, %v3654_v8 }
 0x13e   : > { %5012 = vmatprep.mubr.msk.bf16.mxu0 %vm321_vm0, %v3656_v61 }
 0x143   : > { %4861 = vmatmul.mubr.msk.bf16.gmra.mrb[28].mxu1 %vm321_vm0, %v2090_v47 }
 0x144   : > { %4864 = vmatprep.mubr.msk.bf16.mxu1 %vm321_vm0, %v2099_v0 }
 0x145   : > { %5013 = vmatmul.mubr.msk.bf16.gmra.mrb[20].mxu0 %vm321_vm0, %v3658_v9 }
 0x146   : > { %5016 = vmatprep.mubr.msk.bf16.mxu0 %vm321_vm0, %v3660_v5 }
 0x14b   : > { %4865 = vmatmul.mubr.msk.bf16.gmra.mrb[32].mxu1 %vm321_vm0, %v2108_v25 }
 0x14d   : > { %5017 = vmatmul.mubr.msk.bf16.gmra.mrb[24].mxu0 %vm321_vm0, %v3662_v56 }
 0x14e   : > { %5020 = vmatprep.mubr.msk.bf16.mxu0 %vm321_vm0, %v3664_v15 }
 0x155   : > { %5021 = vmatmul.mubr.msk.bf16.gmra.mrb[28].mxu0 %vm321_vm0, %v3666_v22 }
 0x156   : > { %5024 = vmatprep.mubr.msk.bf16.mxu0 %vm321_vm0, %v3668_v50 }
 0x15d   : > { %5025 = vmatmul.mubr.msk.bf16.gmra.mrb[32].mxu0 %vm321_vm0, %v3670_v16 }
 0x1be   : > { %v4794_v63 = vpop.f32.mrb[0].mxu1 }
 0x1bf   : > { %v1750_v6 = vpop.f32.mrb[1].mxu1  ;;  %v5032_v52 = vadd.f32 %v4794_v63, %v6459_v27 }
 0x1c0   : > { %v4795_v14 = vpop.f32.mrb[2].mxu1  ;;  %v5034_v34 = vadd.f32 %v6459_v27, %v1750_v6 }
 0x1c1   : > { %v1753_v35 = vpop.f32.mrb[3].mxu1  ;;  %v5036_v3 = vadd.f32 %v4795_v14, %v6459_v27 }
 0x1c2   : > { %v5038_v4 = vadd.f32 %v6459_v27, %v1753_v35 }
 0x1c6   : > { %v4798_v54 = vpop.f32.mrb[4].mxu1 }
 0x1c7   : > { %v1766_v59 = vpop.f32.mrb[5].mxu1  ;;  %v5040_v23 = vadd.f32 %v4798_v54, %v6459_v27 }
 0x1c8   : > { %v4799_v49 = vpop.f32.mrb[6].mxu1  ;;  %v5042_v8 = vadd.f32 %v6459_v27, %v1766_v59 }
 0x1c9   : > { %v1769_v31 = vpop.f32.mrb[7].mxu1  ;;  %v5044_v12 = vadd.f32 %v4799_v49, %v6459_v27 }
 0x1ca   : > { %v5046_v48 = vadd.f32 %v6459_v27, %v1769_v31 }
 0x1ce   : > { %v4802_v13 = vpop.f32.mrb[8].mxu1 }
 0x1cf   : > { %v1782_v17 = vpop.f32.mrb[9].mxu1  ;;  %v5048_v25 = vadd.f32 %v4802_v13, %v6459_v27 }
 0x1d0   : > { %v4803_v21 = vpop.f32.mrb[10].mxu1  ;;  %v5050_v56 = vadd.f32 %v6459_v27, %v1782_v17 }
 0x1d1   : > { %v6438_v45 = vpop.f32.mrb[11].mxu1  ;;  %v5052_v22 = vadd.f32 %v4803_v21, %v6459_v27 }
 0x1d2   : > { %v5054_v6 = vadd.f32 %v6459_v27, %v6438_v45 }
 0x1d6   : > { %v6440_v42 = vpop.f32.mrb[12].mxu1 }
 0x1d7   : > { %v6442_v41 = vpop.f32.mrb[13].mxu1 }
 0x1d8   : > { %v6444_v39 = vpop.f32.mrb[14].mxu1 }
 0x1d9   : > { %v6446_v11 = vpop.f32.mrb[15].mxu1 }
 0x1de   : > { %v6448_v46 = vpop.f32.mrb[16].mxu1 }
 0x1df   : > { %v6450_v18 = vpop.f32.mrb[17].mxu1 }
 0x1e0   : > { %v6452_v58 = vpop.f32.mrb[18].mxu1 }
 0x1e1   : > { %v6454_v57 = vpop.f32.mrb[19].mxu1 }
 0x1f0   : > { %v4994_v26 = vpop.f32.mrb[0].mxu0 }
 0x1f1   : > { %v5033_v53 = vadd.f32 %v5032_v52, %v4994_v26  ;;  %v3771_v62 = vpop.f32.mrb[1].mxu0 }
 0x1f2   : > { %v5035_v55 = vadd.f32 %v5034_v34, %v3771_v62  ;;  %v4995_v10 = vpop.f32.mrb[2].mxu0 }
 0x1f3   : > { %v3952_v36 = vmul.f32 0.5, %v5033_v53  ;;  %v5037_v51 = vadd.f32 %v5036_v3, %v4995_v10  ;;  %v3774_v30 = vpop.f32.mrb[3].mxu0 }
 0x1f4   : > { %v3950_v43 = vmul.f32 0.5, %v5035_v55  ;;  %v5039_v44 = vadd.f32 %v5038_v4, %v3774_v30 }
 0x1f5   : > { %5464 = vtanh.f32 %v3952_v36  ;;  %v3953_v2 = vmul.f32 0.5, %v5037_v51  ;;  %v5056_v36 = vadd.f32 %v6440_v42, %v6459_v27 }
 0x1f6   : > { %5466 = vtanh.f32 %v3950_v43  ;;  %v3951_v33 = vmul.f32 0.5, %v5039_v44  ;;  %v5058_v43 = vadd.f32 %v6459_v27, %v6442_v41 }
 0x1f7   : > { %5468 = vtanh.f32 %v3953_v2 }
 0x1f8   : > { %5470 = vtanh.f32 %v3951_v33  ;;  %v4998_v28 = vpop.f32.mrb[4].mxu0 }
 0x1f9   : > { %v5041_v7 = vadd.f32 %v5040_v23, %v4998_v28  ;;  %v3787_v61 = vpop.f32.mrb[5].mxu0  ;;  %v5060_v23 = vadd.f32 %v6444_v39, %v6459_v27 }
 0x1fa   : > { %v5043_v19 = vadd.f32 %v5042_v8, %v3787_v61  ;;  %v4999_v47 = vpop.f32.mrb[6].mxu0 }
 0x1fb   : > { %v3956_v38 = vmul.f32 0.5, %v5041_v7  ;;  %v5045_v40 = vadd.f32 %v5044_v12, %v4999_v47  ;;  %v3790_v60 = vpop.f32.mrb[7].mxu0  ;;  %v5062_v7 = vadd.f32 %v6459_v27, %v6446_v11 }
 0x1fc   : > { %v3954_v0 = vmul.f32 0.5, %v5043_v19  ;;  %v5047_v9 = vadd.f32 %v5046_v48, %v3790_v60 }
 0x1fd   : > { %5472 = vtanh.f32 %v3956_v38  ;;  %v3957_v1 = vmul.f32 0.5, %v5045_v40 }
 0x1fe   : > { %5474 = vtanh.f32 %v3954_v0  ;;  %v3955_v5 = vmul.f32 0.5, %v5047_v9 }
 0x1ff   : > { %v5465_v24 = vpop.eup %5464  ;;  %5476 = vtanh.f32 %v3957_v1 }
 0x200   : > { %v5467_v20 = vpop.eup %5466  ;;  %v4024_v15 = vadd.f32 1.0, %v5465_v24  ;;  %5478 = vtanh.f32 %v3955_v5  ;;  %v5002_v32 = vpop.f32.mrb[8].mxu0 }
 0x201   : > { %v5469_v37 = vpop.eup %5468  ;;  %v4022_v50 = vadd.f32 1.0, %v5467_v20  ;;  %v5049_v29 = vadd.f32 %v5048_v25, %v5002_v32  ;;  %v3803_v16 = vpop.f32.mrb[9].mxu0  ;;  %v5064_v32 = vadd.f32 %v6448_v46, %v6459_v27 }
 0x202   : > { %v5471_v63 = vpop.eup %5470  ;;  %v4060_v14 = vmul.f32 0.5, %v4024_v15  ;;  %v4025_v35 = vadd.f32 1.0, %v5469_v37  ;;  %v5051_v54 = vadd.f32 %v5050_v56, %v3803_v16  ;;  %v5003_v59 = vpop.f32.mrb[10].mxu0 }
 0x203   : > { %v4058_v49 = vmul.f32 0.5, %v4022_v50  ;;  %v4023_v31 = vadd.f32 1.0, %v5471_v63  ;;  %v3960_v13 = vmul.f32 0.5, %v5049_v29  ;;  %v5053_v17 = vadd.f32 %v5052_v22, %v5003_v59  ;;  %v3806_v21 = vpop.f32.mrb[11].mxu0 }
 0x204   : > { %4097 = vst.msk [vmem:[%s6476_s13 + $0x10] sm:$0xff] %vm4094_vm7, %v4060_v14  ;;  %v4061_v52 = vmul.f32 0.5, %v4025_v35  ;;  %v3958_v34 = vmul.f32 0.5, %v5051_v54  ;;  %v5055_v26 = vadd.f32 %v5054_v6, %v3806_v21  ;;  %v5066_v50 = vadd.f32 %v6459_v27, %v6450_v18 }
 0x205   : > { %4095 = vst.msk [vmem:[%s6476_s13] sm:$0xff] %vm4094_vm7, %v4058_v49  ;;  %v4059_v45 = vmul.f32 0.5, %v4023_v31  ;;  %5480 = vtanh.f32 %v3960_v13  ;;  %v3961_v53 = vmul.f32 0.5, %v5053_v17  ;;  %v5068_v6 = vadd.f32 %v6452_v58, %v6459_v27 }
 0x206   : > { %v6482_v3 = vpop.f32.mrb[20].mxu1  ;;  %4098 = vst.msk [vmem:[%s6476_s13 + $0x18] sm:$0xff] %vm4094_vm7, %v4061_v52  ;;  %5482 = vtanh.f32 %v3958_v34  ;;  %v3959_v4 = vmul.f32 0.5, %v5055_v26  ;;  %v5070_v59 = vadd.f32 %v6459_v27, %v6454_v57 }
 0x207   : > { %v6486_v62 = vpop.f32.mrb[21].mxu1  ;;  %v5473_v10 = vpop.eup %5472  ;;  %4096 = vst.msk [vmem:[%s6476_s13 + $0x8] sm:$0xff] %vm4094_vm7, %v4059_v45  ;;  %5484 = vtanh.f32 %v3961_v53 }
 0x208   : > { %v6490_v55 = vpop.f32.mrb[22].mxu1  ;;  %v5475_v30 = vpop.eup %5474  ;;  %v4028_v44 = vadd.f32 1.0, %v5473_v10  ;;  %5486 = vtanh.f32 %v3959_v4 }
 0x209   : > { %v6496_v51 = vpop.f32.mrb[23].mxu1  ;;  %v5006_v2 = vpop.f32.mrb[12].mxu0  ;;  %v4026_v8 = vadd.f32 1.0, %v5475_v30 }
 0x20a   : > { %v5477_v33 = vpop.eup %5476  ;;  %v5057_v28 = vadd.f32 %v5056_v36, %v5006_v2  ;;  %v3819_v42 = vpop.f32.mrb[13].mxu0  ;;  %v4064_v61 = vmul.f32 0.5, %v4028_v44  ;;  %v5072_v2 = vadd.f32 %v6482_v3, %v6459_v27 }
 0x20b   : > { %v5479_v12 = vpop.eup %5478  ;;  %v4029_v48 = vadd.f32 1.0, %v5477_v33  ;;  %v5059_v19 = vadd.f32 %v5058_v43, %v3819_v42  ;;  %v5007_v41 = vpop.f32.mrb[14].mxu0  ;;  %v4062_v47 = vmul.f32 0.5, %v4026_v8 }
 0x20c   : > { %v4027_v38 = vadd.f32 1.0, %v5479_v12  ;;  %v3964_v40 = vmul.f32 0.5, %v5057_v28  ;;  %v5061_v60 = vadd.f32 %v5060_v23, %v5007_v41  ;;  %v3822_v0 = vpop.f32.mrb[15].mxu0  ;;  %4101 = vst.msk [vmem:[%s6476_s13 + $0x30] sm:$0xff] %vm4094_vm7, %v4064_v61  ;;  %v5074_v28 = vadd.f32 %v6459_v27, %v6486_v62 }
 0x20d   : > { %v4065_v39 = vmul.f32 0.5, %v4029_v48  ;;  %v3962_v9 = vmul.f32 0.5, %v5059_v19  ;;  %v5063_v1 = vadd.f32 %v5062_v7, %v3822_v0  ;;  %4099 = vst.msk [vmem:[%s6476_s13 + $0x20] sm:$0xff] %vm4094_vm7, %v4062_v47  ;;  %v5076_v61 = vadd.f32 %v6490_v55, %v6459_v27 }
 0x20e   : > { %v6506_v5 = vpop.f32.mrb[24].mxu1  ;;  %v4063_v11 = vmul.f32 0.5, %v4027_v38  ;;  %5488 = vtanh.f32 %v3964_v40  ;;  %v3965_v24 = vmul.f32 0.5, %v5061_v60  ;;  %v5078_v38 = vadd.f32 %v6459_v27, %v6496_v51 }
 0x20f   : > { %v6510_v25 = vpop.f32.mrb[25].mxu1  ;;  %4102 = vst.msk [vmem:[%s6476_s13 + $0x38] sm:$0xff] %vm4094_vm7, %v4065_v39  ;;  %5490 = vtanh.f32 %v3962_v9  ;;  %v3963_v20 = vmul.f32 0.5, %v5063_v1  ;;  %v5481_v15 = vpop.eup %5480 }
 0x210   : > { %v6514_v56 = vpop.f32.mrb[26].mxu1  ;;  %4100 = vst.msk [vmem:[%s6476_s13 + $0x28] sm:$0xff] %vm4094_vm7, %v4063_v11  ;;  %5492 = vtanh.f32 %v3965_v24  ;;  %v5483_v22 = vpop.eup %5482  ;;  %v4032_v29 = vadd.f32 1.0, %v5481_v15 }
 0x211   : > { %v6520_v37 = vpop.f32.mrb[27].mxu1  ;;  %5494 = vtanh.f32 %v3963_v20  ;;  %v5010_v16 = vpop.f32.mrb[16].mxu0  ;;  %v4030_v14 = vadd.f32 1.0, %v5483_v22 }
 0x212   : > { %v5485_v63 = vpop.eup %5484  ;;  %v5065_v35 = vadd.f32 %v5064_v32, %v5010_v16  ;;  %v3835_v46 = vpop.f32.mrb[17].mxu0  ;;  %v4068_v49 = vmul.f32 0.5, %v4032_v29  ;;  %v5080_v16 = vadd.f32 %v6506_v5, %v6459_v27 }
 0x213   : > { %v5487_v54 = vpop.eup %5486  ;;  %v4033_v31 = vadd.f32 1.0, %v5485_v63  ;;  %v5067_v13 = vadd.f32 %v5066_v50, %v3835_v46  ;;  %v5011_v18 = vpop.f32.mrb[18].mxu0  ;;  %v4066_v17 = vmul.f32 0.5, %v4030_v14 }
 0x214   : > { %v4031_v21 = vadd.f32 1.0, %v5487_v54  ;;  %v3968_v52 = vmul.f32 0.5, %v5065_v35  ;;  %v5069_v34 = vadd.f32 %v5068_v6, %v5011_v18  ;;  %v3838_v26 = vpop.f32.mrb[19].mxu0  ;;  %4105 = vst.msk [vmem:[%s6476_s13 + $0x50] sm:$0xff] %vm4094_vm7, %v4068_v49  ;;  %v5082_v35 = vadd.f32 %v6459_v27, %v6510_v25 }
 0x215   : > { %v4069_v58 = vmul.f32 0.5, %v4033_v31  ;;  %v3966_v45 = vmul.f32 0.5, %v5067_v13  ;;  %v5071_v53 = vadd.f32 %v5070_v59, %v3838_v26  ;;  %4103 = vst.msk [vmem:[%s6476_s13 + $0x40] sm:$0xff] %vm4094_vm7, %v4066_v17  ;;  %v5084_v49 = vadd.f32 %v6514_v56, %v6459_v27 }
 0x216   : > { %v6530_v4 = vpop.f32.mrb[28].mxu1  ;;  %v4067_v57 = vmul.f32 0.5, %v4031_v21  ;;  %5496 = vtanh.f32 %v3968_v52  ;;  %v3969_v10 = vmul.f32 0.5, %v5069_v34  ;;  %v5086_v21 = vadd.f32 %v6459_v27, %v6520_v37 }
 0x217   : > { %v6534_v36 = vpop.f32.mrb[29].mxu1  ;;  %4106 = vst.msk [vmem:[%s6476_s13 + $0x58] sm:$0xff] %vm4094_vm7, %v4069_v58  ;;  %5498 = vtanh.f32 %v3966_v45  ;;  %v3967_v30 = vmul.f32 0.5, %v5071_v53 }
 0x218   : > { %v6538_v43 = vpop.f32.mrb[30].mxu1  ;;  %v5489_v44 = vpop.eup %5488  ;;  %4104 = vst.msk [vmem:[%s6476_s13 + $0x48] sm:$0xff] %vm4094_vm7, %v4067_v57  ;;  %5500 = vtanh.f32 %v3969_v10 }
 0x219   : > { %v6544_v33 = vpop.f32.mrb[31].mxu1  ;;  %v5491_v23 = vpop.eup %5490  ;;  %v4036_v8 = vadd.f32 1.0, %v5489_v44  ;;  %5502 = vtanh.f32 %v3967_v30 }
 0x21a   : > { %v5014_v42 = vpop.f32.mrb[20].mxu0  ;;  %v5493_v12 = vpop.eup %5492  ;;  %v4034_v7 = vadd.f32 1.0, %v5491_v23  ;;  %v5088_v23 = vadd.f32 %v6530_v4, %v6459_v27 }
 0x21b   : > { %v5073_v48 = vadd.f32 %v5072_v2, %v5014_v42  ;;  %v3851_v19 = vpop.f32.mrb[21].mxu0  ;;  %v5495_v41 = vpop.eup %5494  ;;  %v4072_v3 = vmul.f32 0.5, %v4036_v8  ;;  %v4037_v47 = vadd.f32 1.0, %v5493_v12  ;;  %v5090_v42 = vadd.f32 %v6459_v27, %v6534_v36 }
 0x21c   : > { %v5075_v40 = vadd.f32 %v5074_v28, %v3851_v19  ;;  %v5015_v60 = vpop.f32.mrb[22].mxu0  ;;  %v4070_v62 = vmul.f32 0.5, %v4034_v7  ;;  %v4035_v0 = vadd.f32 1.0, %v5495_v41 }
 0x21d   : > { %v3972_v39 = vmul.f32 0.5, %v5073_v48  ;;  %v5077_v9 = vadd.f32 %v5076_v61, %v5015_v60  ;;  %v3854_v1 = vpop.f32.mrb[23].mxu0  ;;  %4109 = vst.msk [vmem:[%s6476_s13 + $0x70] sm:$0xff] %vm4094_vm7, %v4072_v3  ;;  %v4073_v55 = vmul.f32 0.5, %v4037_v47  ;;  %v5092_v48 = vadd.f32 %v6538_v43, %v6459_v27 }
 0x21e   : > { %v3970_v11 = vmul.f32 0.5, %v5075_v40  ;;  %v5079_v24 = vadd.f32 %v5078_v38, %v3854_v1  ;;  %v6554_v20 = vpop.f32.mrb[32].mxu1  ;;  %4107 = vst.msk [vmem:[%s6476_s13 + $0x60] sm:$0xff] %vm4094_vm7, %v4070_v62  ;;  %v4071_v15 = vmul.f32 0.5, %v4035_v0  ;;  %v5094_v38 = vadd.f32 %v6459_v27, %v6544_v33 }
 0x21f   : > { %5504 = vtanh.f32 %v3972_v39  ;;  %v3973_v51 = vmul.f32 0.5, %v5077_v9  ;;  %v6558_v32 = vpop.f32.mrb[33].mxu1  ;;  %4110 = vst.msk [vmem:[%s6476_s13 + $0x78] sm:$0xff] %vm4094_vm7, %v4073_v55 }
 0x220   : > { %5506 = vtanh.f32 %v3970_v11  ;;  %v3971_v22 = vmul.f32 0.5, %v5079_v24  ;;  %v6562_v50 = vpop.f32.mrb[34].mxu1  ;;  %v5497_v29 = vpop.eup %5496  ;;  %4108 = vst.msk [vmem:[%s6476_s13 + $0x68] sm:$0xff] %vm4094_vm7, %v4071_v15 }
 0x221   : > { %5508 = vtanh.f32 %v3973_v51  ;;  %v6568_v63 = vpop.f32.mrb[35].mxu1  ;;  %v5499_v6 = vpop.eup %5498  ;;  %v4040_v14 = vadd.f32 1.0, %v5497_v29  ;;  %v5096_v51 = vadd.f32 %v6554_v20, %v6459_v27 }
 0x222   : > { %5510 = vtanh.f32 %v3971_v22  ;;  %v5018_v46 = vpop.f32.mrb[24].mxu0  ;;  %v5501_v54 = vpop.eup %5500  ;;  %v4038_v59 = vadd.f32 1.0, %v5499_v6 }
 0x223   : > { %v5081_v31 = vadd.f32 %v5080_v16, %v5018_v46  ;;  %v3867_v13 = vpop.f32.mrb[25].mxu0  ;;  %v5503_v5 = vpop.eup %5502  ;;  %v4076_v18 = vmul.f32 0.5, %v4040_v14  ;;  %v4041_v17 = vadd.f32 1.0, %v5501_v54  ;;  %v5098_v16 = vadd.f32 %v6459_v27, %v6558_v32 }
 0x224   : > { %v5083_v52 = vadd.f32 %v5082_v35, %v3867_v13  ;;  %v5019_v25 = vpop.f32.mrb[26].mxu0  ;;  %v4074_v34 = vmul.f32 0.5, %v4038_v59  ;;  %v4039_v26 = vadd.f32 1.0, %v5503_v5  ;;  %v5100_v46 = vadd.f32 %v6562_v50, %v6459_v27 }
 0x225   : > { %v3976_v58 = vmul.f32 0.5, %v5081_v31  ;;  %v5085_v45 = vadd.f32 %v5084_v49, %v5019_v25  ;;  %v3870_v53 = vpop.f32.mrb[27].mxu0  ;;  %4113 = vst.msk [vmem:[%s6476_s13 + $0x90] sm:$0xff] %vm4094_vm7, %v4076_v18  ;;  %v4077_v56 = vmul.f32 0.5, %v4041_v17  ;;  %v5102_v13 = vadd.f32 %v6459_v27, %v6568_v63 }
 0x226   : > { %v3974_v57 = vmul.f32 0.5, %v5083_v52  ;;  %v5087_v10 = vadd.f32 %v5086_v21, %v3870_v53  ;;  %4111 = vst.msk [vmem:[%s6476_s13 + $0x80] sm:$0xff] %vm4094_vm7, %v4074_v34  ;;  %v4075_v30 = vmul.f32 0.5, %v4039_v26 }
 0x227   : > { %5512 = vtanh.f32 %v3976_v58  ;;  %v3977_v44 = vmul.f32 0.5, %v5085_v45  ;;  %4114 = vst.msk [vmem:[%s6476_s13 + $0x98] sm:$0xff] %vm4094_vm7, %v4077_v56 }
 0x228   : > { %5514 = vtanh.f32 %v3974_v57  ;;  %v3975_v37 = vmul.f32 0.5, %v5087_v10  ;;  %4112 = vst.msk [vmem:[%s6476_s13 + $0x88] sm:$0xff] %vm4094_vm7, %v4075_v30  ;;  %v5022_v12 = vpop.f32.mrb[28].mxu0 }
 0x229   : > { %v5505_v2 = vpop.eup %5504  ;;  %5516 = vtanh.f32 %v3977_v44  ;;  %v5089_v19 = vadd.f32 %v5088_v23, %v5022_v12  ;;  %v3883_v41 = vpop.f32.mrb[29].mxu0 }
 0x22a   : > { %v5507_v8 = vpop.eup %5506  ;;  %v4044_v28 = vadd.f32 1.0, %v5505_v2  ;;  %5518 = vtanh.f32 %v3975_v37  ;;  %v5091_v40 = vadd.f32 %v5090_v42, %v3883_v41  ;;  %v5023_v36 = vpop.f32.mrb[30].mxu0 }
 0x22b   : > { %v5509_v7 = vpop.eup %5508  ;;  %v4042_v61 = vadd.f32 1.0, %v5507_v8  ;;  %v3980_v0 = vmul.f32 0.5, %v5089_v19  ;;  %v5093_v39 = vadd.f32 %v5092_v48, %v5023_v36  ;;  %v3886_v9 = vpop.f32.mrb[31].mxu0 }
 0x22c   : > { %v5511_v3 = vpop.eup %5510  ;;  %v4080_v47 = vmul.f32 0.5, %v4044_v28  ;;  %v4045_v4 = vadd.f32 1.0, %v5509_v7  ;;  %v3978_v1 = vmul.f32 0.5, %v5091_v40  ;;  %v5095_v55 = vadd.f32 %v5094_v38, %v3886_v9 }
 0x22d   : > { %v4078_v60 = vmul.f32 0.5, %v4042_v61  ;;  %v4043_v62 = vadd.f32 1.0, %v5511_v3  ;;  %5520 = vtanh.f32 %v3980_v0  ;;  %v3981_v24 = vmul.f32 0.5, %v5093_v39 }
 0x22e   : > { %4117 = vst.msk [vmem:[%s6476_s13 + $0xb0] sm:$0xff] %vm4094_vm7, %v4080_v47  ;;  %v4081_v43 = vmul.f32 0.5, %v4045_v4  ;;  %5522 = vtanh.f32 %v3978_v1  ;;  %v3979_v33 = vmul.f32 0.5, %v5095_v55 }
 0x22f   : > { %4115 = vst.msk [vmem:[%s6476_s13 + $0xa0] sm:$0xff] %vm4094_vm7, %v4078_v60  ;;  %v4079_v11 = vmul.f32 0.5, %v4043_v62  ;;  %5524 = vtanh.f32 %v3981_v24 }
 0x230   : > { %4118 = vst.msk [vmem:[%s6476_s13 + $0xb8] sm:$0xff] %vm4094_vm7, %v4081_v43  ;;  %5526 = vtanh.f32 %v3979_v33  ;;  %v5026_v6 = vpop.f32.mrb[32].mxu0 }
 0x231   : > { %v5513_v15 = vpop.eup %5512  ;;  %4116 = vst.msk [vmem:[%s6476_s13 + $0xa8] sm:$0xff] %vm4094_vm7, %v4079_v11  ;;  %v5097_v54 = vadd.f32 %v5096_v51, %v5026_v6  ;;  %v3899_v59 = vpop.f32.mrb[33].mxu0 }
 0x232   : > { %v5515_v22 = vpop.eup %5514  ;;  %v4048_v29 = vadd.f32 1.0, %v5513_v15  ;;  %v5099_v5 = vadd.f32 %v5098_v16, %v3899_v59  ;;  %v5027_v32 = vpop.f32.mrb[34].mxu0 }
 0x233   : > { %v5517_v14 = vpop.eup %5516  ;;  %v4046_v35 = vadd.f32 1.0, %v5515_v22  ;;  %v3984_v21 = vmul.f32 0.5, %v5097_v54  ;;  %v5101_v52 = vadd.f32 %v5100_v46, %v5027_v32  ;;  %v3902_v25 = vpop.f32.mrb[35].mxu0 }
 0x234   : > { %v5519_v49 = vpop.eup %5518  ;;  %v4084_v31 = vmul.f32 0.5, %v4048_v29  ;;  %v4049_v20 = vadd.f32 1.0, %v5517_v14  ;;  %v3982_v34 = vmul.f32 0.5, %v5099_v5  ;;  %v5103_v26 = vadd.f32 %v5102_v13, %v3902_v25 }
 0x235   : > { %v4082_v18 = vmul.f32 0.5, %v4046_v35  ;;  %v4047_v17 = vadd.f32 1.0, %v5519_v49  ;;  %5528 = vtanh.f32 %v3984_v21  ;;  %v3985_v45 = vmul.f32 0.5, %v5101_v52 }
 0x236   : > { %4121 = vst.msk [vmem:[%s6476_s13 + $0xd0] sm:$0xff] %vm4094_vm7, %v4084_v31  ;;  %v4085_v50 = vmul.f32 0.5, %v4049_v20  ;;  %5530 = vtanh.f32 %v3982_v34  ;;  %v3983_v27 = vmul.f32 0.5, %v5103_v26 }
 0x237   : > { %4119 = vst.msk [vmem:[%s6476_s13 + $0xc0] sm:$0xff] %vm4094_vm7, %v4082_v18  ;;  %v4083_v58 = vmul.f32 0.5, %v4047_v17  ;;  %v5521_v63 = vpop.eup %5520  ;;  %5532 = vtanh.f32 %v3985_v45 }
 0x238   : > { %4122 = vst.msk [vmem:[%s6476_s13 + $0xd8] sm:$0xff] %vm4094_vm7, %v4085_v50  ;;  %v5523_v53 = vpop.eup %5522  ;;  %v4052_v56 = vadd.f32 1.0, %v5521_v63  ;;  %5534 = vtanh.f32 %v3983_v27 }
 0x239   : > { %4120 = vst.msk [vmem:[%s6476_s13 + $0xc8] sm:$0xff] %vm4094_vm7, %v4083_v58  ;;  %v5525_v57 = vpop.eup %5524  ;;  %v4050_v10 = vadd.f32 1.0, %v5523_v53 }
 0x23a   : > { %v5527_v30 = vpop.eup %5526  ;;  %v4088_v44 = vmul.f32 0.5, %v4052_v56  ;;  %v4053_v37 = vadd.f32 1.0, %v5525_v57 }
 0x23b   : > { %v4086_v2 = vmul.f32 0.5, %v4050_v10  ;;  %v4051_v23 = vadd.f32 1.0, %v5527_v30 }
 0x23c   : > { %4125 = vst.msk [vmem:[%s6476_s13 + $0xf0] sm:$0xff] %vm4094_vm7, %v4088_v44  ;;  %v4089_v8 = vmul.f32 0.5, %v4053_v37 }
 0x23d   : > { %4123 = vst.msk [vmem:[%s6476_s13 + $0xe0] sm:$0xff] %vm4094_vm7, %v4086_v2  ;;  %v4087_v28 = vmul.f32 0.5, %v4051_v23 }
 0x23e   : > { %4126 = vst.msk [vmem:[%s6476_s13 + $0xf8] sm:$0xff] %vm4094_vm7, %v4089_v8 }
 0x23f   : > { %v5529_v42 = vpop.eup %5528  ;;  %4124 = vst.msk [vmem:[%s6476_s13 + $0xe8] sm:$0xff] %vm4094_vm7, %v4087_v28 }
 0x240   : > { %v5531_v12 = vpop.eup %5530  ;;  %v4056_v7 = vadd.f32 1.0, %v5529_v42 }
 0x241   : > { %v5533_v61 = vpop.eup %5532  ;;  %v4054_v48 = vadd.f32 1.0, %v5531_v12 }
 0x242   : > { %v5535_v19 = vpop.eup %5534  ;;  %v4092_v41 = vmul.f32 0.5, %v4056_v7  ;;  %v4057_v3 = vadd.f32 1.0, %v5533_v61 }
 0x243   : > { %v4090_v47 = vmul.f32 0.5, %v4054_v48  ;;  %v4055_v4 = vadd.f32 1.0, %v5535_v19 }
 0x244   : > { %4129 = vst.msk [vmem:[%s6476_s13 + $0x110] sm:$0xff] %vm4094_vm7, %v4092_v41  ;;  %v4093_v38 = vmul.f32 0.5, %v4057_v3 }
 0x245   : > { %4127 = vst.msk [vmem:[%s6476_s13 + $0x100] sm:$0xff] %vm4094_vm7, %v4090_v47  ;;  %v4091_v40 = vmul.f32 0.5, %v4055_v4 }
 0x246   : > { %4130 = vst.msk [vmem:[%s6476_s13 + $0x118] sm:$0xff] %vm4094_vm7, %v4093_v38 }
 0x247   : > { %4128 = vst.msk [vmem:[%s6476_s13 + $0x108] sm:$0xff] %vm4094_vm7, %v4091_v40 }
 0x248 PF: > { %s13_s12 = sadd.s32 1, %s5557_s12  }
 0x249   : > { %p10_p4 = scmp.ge.s32.totalorder %s13_s12, 4  }
 0x24b   :  { %12 = sbr.rel (!%p10_p4) target bundleno = 1 (0x1), region = 70 }

</bundles_post_ra>
